<compile_context>
chip_gen: v6e
topology: v6e:2x2x1
jax: 0.10.0
libtpu: 0.0.40
codegen_flags: <defaults>
</compile_context>

<pallas_src>
import functools

import numpy as np
import jax
import jax.numpy as jnp
from jax import lax
from jax.experimental import pallas as pl
from jax.experimental.pallas import tpu as pltpu

EPS = 1e-5  # nn.BatchNorm2d default eps


# ---------------------------------------------------------------------------
# In-kernel building blocks
# ---------------------------------------------------------------------------
def _build_dx_cols(xp_ref, col_ref, n, W, Cin):
    """Build the dx-im2col slab for sample n in a VMEM scratch.

    col[h' * W + w, dx * Cin + c] = xp[n, h', w + dx, c]
    so the 5x5 conv becomes 5 dy-offset MXU matmuls with K = 5 * Cin.
    """
    Hp = xp_ref.shape[1]
    if W % 8 == 0:
        for dx in range(5):
            col_ref[:, dx * Cin:(dx + 1) * Cin] = (
                xp_ref[n, :, dx:dx + W, :].astype(jnp.float32)
                .reshape(Hp * W, Cin))
    else:
        # Tiny spatial dims (block 3, W=4): per-row stores avoid reshapes with
        # a sub-8 second-minor dimension.
        for dx in range(5):
            for h in range(Hp):
                col_ref[h * W:(h + 1) * W, dx * Cin:(dx + 1) * Cin] = (
                    xp_ref[n, h, dx:dx + W, :].astype(jnp.float32))


def _conv_accum(col_ref, w_ref, W, HW):
    """5 dy-tap MXU matmuls over the dx-folded K axis, single f32 accumulator."""
    Cout = w_ref.shape[-1]
    acc = jnp.zeros((HW, Cout), jnp.float32)
    for dy in range(5):
        lhs = col_ref[dy * W:dy * W + HW, :].astype(jnp.bfloat16)
        acc = acc + jnp.dot(lhs, w_ref[dy], preferred_element_type=jnp.float32)
    return acc


def _batch_bn_scale_shift(conv_ref, g_ref, b_ref):
    """Train-mode BatchNorm stats over the whole (VMEM-resident) batch."""
    N, HW, C = conv_ref.shape
    y = conv_ref[...].reshape(N * HW, C)
    inv_cnt = 1.0 / float(N * HW)
    mean = jnp.sum(y, axis=0, keepdims=True) * inv_cnt
    d = y - mean
    var = jnp.sum(d * d, axis=0, keepdims=True) * inv_cnt   # biased, centered
    inv = lax.rsqrt(var + EPS)
    scale = g_ref[...] * inv
    shift = b_ref[...] - mean * scale
    return scale, shift


def _maxpool_3x3_s2(z, poolbuf, H, W, C):
    """MaxPool2d(k=3, s=2, p=1) on post-ReLU values (>= 0, so a zero edge fill
    is equivalent to -inf padding; keep this invariant if ReLU ever moves).
    Rows are subsampled before the 3-wide maxes (~2x the minimal max work)."""
    Ho, Wo = H // 2, W // 2
    y4 = z.reshape(H, W, C).reshape(Ho, 2, W, C)
    re = y4[:, 0]                                                 # rows 2i
    ro = y4[:, 1]                                                 # rows 2i+1
    rp = jnp.concatenate(
        [jnp.zeros((1, W, C), jnp.float32), ro[:Ho - 1]], axis=0)  # rows 2i-1
    rmax = jnp.maximum(jnp.maximum(re, ro), rp)                   # (Ho, W, C)
    zc = jnp.zeros((Ho, 1, C), jnp.float32)
    left = jnp.concatenate([zc, rmax[:, :W - 1, :]], axis=1)
    right = jnp.concatenate([rmax[:, 1:, :], zc], axis=1)
    cmax = jnp.maximum(jnp.maximum(rmax, left), right)            # (Ho, W, C)
    # Stride-2 column subsample via a strided VMEM read (W even, so even
    # flattened indices are exactly the even columns, in output row-major).
    poolbuf[...] = cmax.reshape(Ho * W, C)
    return poolbuf[pl.ds(0, Ho * Wo, 2), :]


def _sa_apply(x, wq_ref, bq_ref, wk_ref, bk_ref, wv_ref, bv_ref, gamma):
    """SelfAttention on one sample; x is the (L, C) f32 residual."""
    xb = x.astype(jnp.bfloat16)
    q = jnp.dot(xb, wq_ref[...], preferred_element_type=jnp.float32) + bq_ref[...]
    k = jnp.dot(xb, wk_ref[...], preferred_element_type=jnp.float32) + bk_ref[...]
    v = jnp.dot(xb, wv_ref[...], preferred_element_type=jnp.float32) + bv_ref[...]
    # energy[i, j] = q_i . k_j   (small L here; flash-tile for big L)
    energy = lax.dot_general(q, k, (((1,), (1,)), ((), ())),
                             preferred_element_type=jnp.float32)       # (L, L)
    energy = energy - jnp.max(energy, axis=-1, keepdims=True)
    e = jnp.exp(energy)
    attn = e / jnp.sum(e, axis=-1, keepdims=True)
    out = jnp.dot(attn, v, preferred_element_type=jnp.float32)          # (L, C)
    return gamma * out + x


# ---------------------------------------------------------------------------
# Pallas kernels (one per fused stage; batch folded into a single grid step)
# ---------------------------------------------------------------------------
def _conv_bn_relu_pool_kernel(xp_ref, w_ref, g_ref, b_ref, o_ref,
                              col_ref, conv_ref, poolbuf, *, H, W, Cin):
    N = xp_ref.shape[0]
    HW = H * W
    C = conv_ref.shape[-1]
    for n in range(N):
        _build_dx_cols(xp_ref, col_ref, n, W, Cin)
        conv_ref[n] = _conv_accum(col_ref, w_ref, W, HW)
    scale, shift = _batch_bn_scale_shift(conv_ref, g_ref, b_ref)
    for n in range(N):
        z = jnp.maximum(conv_ref[n] * scale + shift, 0.0)
        o_ref[n] = _maxpool_3x3_s2(z, poolbuf, H, W, C).astype(o_ref.dtype)


def _conv_bn_relu_kernel(xp_ref, w_ref, g_ref, b_ref, o_ref,
                         col_ref, conv_ref, *, H, W, Cin):
    N = xp_ref.shape[0]
    HW = H * W
    for n in range(N):
        _build_dx_cols(xp_ref, col_ref, n, W, Cin)
        conv_ref[n] = _conv_accum(col_ref, w_ref, W, HW)
    scale, shift = _batch_bn_scale_shift(conv_ref, g_ref, b_ref)
    for n in range(N):
        o_ref[n] = jnp.maximum(conv_ref[n] * scale + shift, 0.0).astype(o_ref.dtype)


def _conv_bn_relu_sa_kernel(xp_ref, w_ref, g_ref, b_ref,
                            wq_ref, bq_ref, wk_ref, bk_ref, wv_ref, bv_ref,
                            gamma_ref, o_ref, col_ref, conv_ref, *, H, W, Cin):
    N = xp_ref.shape[0]
    HW = H * W
    for n in range(N):
        _build_dx_cols(xp_ref, col_ref, n, W, Cin)
        conv_ref[n] = _conv_accum(col_ref, w_ref, W, HW)
    scale, shift = _batch_bn_scale_shift(conv_ref, g_ref, b_ref)
    gamma = gamma_ref[0, 0]
    for n in range(N):
        x = jnp.maximum(conv_ref[n] * scale + shift, 0.0)   # (HW, C) f32 residual
        o_ref[n] = _sa_apply(x, wq_ref, bq_ref, wk_ref, bk_ref, wv_ref, bv_ref,
                             gamma)


def _sa_kernel(x_ref, wq_ref, bq_ref, wk_ref, bk_ref, wv_ref, bv_ref,
               gamma_ref, o_ref):
    N = x_ref.shape[0]
    gamma = gamma_ref[0, 0]
    for n in range(N):
        o_ref[n] = _sa_apply(x_ref[n].astype(jnp.float32),
                             wq_ref, bq_ref, wk_ref, bk_ref, wv_ref, bv_ref,
                             gamma)


# ---------------------------------------------------------------------------
# pallas_call wrappers
# ---------------------------------------------------------------------------
def _pack_conv_weight(w_oihw):
    # OIHW -> (dy, dx*Cin + cin, cout); K ordered (dx, cin) to match the slab.
    cout, cin = w_oihw.shape[0], w_oihw.shape[1]
    w5 = jnp.transpose(w_oihw, (2, 3, 1, 0)).reshape(5, 5 * cin, cout)
    return w5.astype(jnp.bfloat16)


def conv_bn_relu_block(x, p, *, pool, out_dtype=jnp.bfloat16):
    """Fused Conv2d(k=5,s=1,p=2; bias folded away by train-mode BN) +
    BatchNorm2d(batch stats) + ReLU (+ MaxPool2d(3,2,1)), one pallas_call."""
    N, H, W, Cin = x.shape
    Cout = p["w"].shape[0]
    HW = H * W
    Hp, Wp = H + 4, W + 4
    xp = jnp.pad(x.astype(jnp.bfloat16), ((0, 0), (2, 2), (2, 2), (0, 0)))
    w5 = _pack_conv_weight(p["w"])
    g = p["gamma"].reshape(1, Cout).astype(jnp.float32)
    b = p["beta"].reshape(1, Cout).astype(jnp.float32)

    in_specs = [
        pl.BlockSpec((N, Hp, Wp, Cin), lambda i: (0, 0, 0, 0)),
        pl.BlockSpec((5, 5 * Cin, Cout), lambda i: (0, 0, 0)),
        pl.BlockSpec((1, Cout), lambda i: (0, 0)),
        pl.BlockSpec((1, Cout), lambda i: (0, 0)),
    ]
    scratch = [pltpu.VMEM((Hp * W, 5 * Cin), jnp.float32),   # dx-im2col slab
               pltpu.VMEM((N, HW, Cout), jnp.float32)]       # conv out stays in VMEM
    if pool:
        Ho, Wo = H // 2, W // 2
        kern = functools.partial(_conv_bn_relu_pool_kernel, H=H, W=W, Cin=Cin)
        scratch.append(pltpu.VMEM((Ho * W, Cout), jnp.float32))
        out_rows, out_hw = Ho * Wo, (Ho, Wo)
    else:
        kern = functools.partial(_conv_bn_relu_kernel, H=H, W=W, Cin=Cin)
        out_rows, out_hw = HW, (H, W)

    out = pl.pallas_call(
        kern,
        out_shape=jax.ShapeDtypeStruct((N, out_rows, Cout), out_dtype),
        grid=(1,),
        in_specs=in_specs,
        out_specs=pl.BlockSpec((N, out_rows, Cout), lambda i: (0, 0, 0)),
        scratch_shapes=scratch,
    )(xp, w5, g, b)
    return out.reshape(N, out_hw[0], out_hw[1], Cout)


def _sa_inputs(p):
    wq = p["wq"].astype(jnp.bfloat16)
    wk = p["wk"].astype(jnp.bfloat16)
    wv = p["wv"].astype(jnp.bfloat16)
    bq = p["bq"].astype(jnp.float32)
    bk = p["bk"].astype(jnp.float32)
    bv = p["bv"].astype(jnp.float32)
    gamma = p["gamma"].reshape(1, 1).astype(jnp.float32)
    return wq, bq, wk, bk, wv, bv, gamma


def _sa_specs(C, Cq):
    return [
        pl.BlockSpec((C, Cq), lambda i: (0, 0)),
        pl.BlockSpec((1, Cq), lambda i: (0, 0)),
        pl.BlockSpec((C, Cq), lambda i: (0, 0)),
        pl.BlockSpec((1, Cq), lambda i: (0, 0)),
        pl.BlockSpec((C, C), lambda i: (0, 0)),
        pl.BlockSpec((1, C), lambda i: (0, 0)),
        pl.BlockSpec(memory_space=pltpu.MemorySpace.SMEM),   # gamma scalar
    ]


def conv_bn_relu_sa_block(x, p_conv, p_sa):
    """Block-3 Conv+BN+ReLU fused with the following SelfAttention (they share
    the same tiny (L, C) tile), one pallas_call over the whole batch."""
    N, H, W, Cin = x.shape
    Cout = p_conv["w"].shape[0]
    HW = H * W
    Hp, Wp = H + 4, W + 4
    xp = jnp.pad(x.astype(jnp.bfloat16), ((0, 0), (2, 2), (2, 2), (0, 0)))
    w5 = _pack_conv_weight(p_conv["w"])
    g = p_conv["gamma"].reshape(1, Cout).astype(jnp.float32)
    b = p_conv["beta"].reshape(1, Cout).astype(jnp.float32)
    wq, bq, wk, bk, wv, bv, gamma = _sa_inputs(p_sa)
    Cq = wq.shape[-1]

    kern = functools.partial(_conv_bn_relu_sa_kernel, H=H, W=W, Cin=Cin)
    out = pl.pallas_call(
        kern,
        out_shape=jax.ShapeDtypeStruct((N, HW, Cout), jnp.float32),
        grid=(1,),
        in_specs=[
            pl.BlockSpec((N, Hp, Wp, Cin), lambda i: (0, 0, 0, 0)),
            pl.BlockSpec((5, 5 * Cin, Cout), lambda i: (0, 0, 0)),
            pl.BlockSpec((1, Cout), lambda i: (0, 0)),
            pl.BlockSpec((1, Cout), lambda i: (0, 0)),
        ] + _sa_specs(Cout, Cq),
        out_specs=pl.BlockSpec((N, HW, Cout), lambda i: (0, 0, 0)),
        scratch_shapes=[pltpu.VMEM((Hp * W, 5 * Cin), jnp.float32),
                        pltpu.VMEM((N, HW, Cout), jnp.float32)],
    )(xp, w5, g, b, wq, bq, wk, bk, wv, bv, gamma)
    return out.reshape(N, H, W, Cout)


def self_attention(x, p):
    """Standalone SelfAttention (only used if the shifter has extra layers)."""
    N, H, W, C = x.shape
    L = H * W
    wq, bq, wk, bk, wv, bv, gamma = _sa_inputs(p)
    Cq = wq.shape[-1]
    xf = x.reshape(N, L, C).astype(jnp.float32)
    out = pl.pallas_call(
        _sa_kernel,
        out_shape=jax.ShapeDtypeStruct((N, L, C), jnp.float32),
        grid=(1,),
        in_specs=[pl.BlockSpec((N, L, C), lambda i: (0, 0, 0))] + _sa_specs(C, Cq),
        out_specs=pl.BlockSpec((N, L, C), lambda i: (0, 0, 0)),
    )(xf, wq, bq, wk, bk, wv, bv, gamma)
    return out.reshape(N, H, W, C)


# ---------------------------------------------------------------------------
# Parameter initialization (deterministic, mirrors the PyTorch constructors)
# ---------------------------------------------------------------------------
def _conv_params(key, cin, cout, ksize):
    kw, kb = jax.random.split(key)
    w = 0.1 * jax.random.normal(kw, (cout, cin, ksize, ksize), jnp.float32)  # OIHW
    b = 0.1 * jax.random.normal(kb, (cout,), jnp.float32)
    return w, b


def _bn_params(key, c):
    kg, kb = jax.random.split(key)
    gamma = 1.0 + 0.1 * jax.random.normal(kg, (c,), jnp.float32)
    beta = 0.1 * jax.random.normal(kb, (c,), jnp.float32)
    return gamma, beta


def init_feature_extractor(key, input_nc, output_nc):
    ks = jax.random.split(key, 6)
    chans = [(input_nc, output_nc // 4), (output_nc // 4, output_nc // 2),
             (output_nc // 2, output_nc)]
    params = []
    for i, (cin, cout) in enumerate(chans):
        w, b = _conv_params(ks[2 * i], cin, cout, 5)
        g, bt = _bn_params(ks[2 * i + 1], cout)
        params.append(dict(w=w, b=b, gamma=g, beta=bt, pool=(i < 2)))
    return params


def init_self_attention(key, input_nc):
    out_nc = max(input_nc // 8, 1)
    kq, kk, kv, kg = jax.random.split(key, 4)
    wq, bq = _conv_params(kq, input_nc, out_nc, 1)
    wk, bk = _conv_params(kk, input_nc, out_nc, 1)
    wv, bv = _conv_params(kv, input_nc, input_nc, 1)
    gamma = jax.random.normal(kg, (1,), jnp.float32)          # torch.randn(1)
    return dict(
        wq=jnp.transpose(wq.reshape(out_nc, input_nc)),       # (C, Cq)
        bq=bq.reshape(1, out_nc),
        wk=jnp.transpose(wk.reshape(out_nc, input_nc)),
        bk=bk.reshape(1, out_nc),
        wv=jnp.transpose(wv.reshape(input_nc, input_nc)),     # (C, C)
        bv=bv.reshape(1, input_nc),
        gamma=gamma.reshape(1, 1),
    )


def init_feature_shifter_sa(key, input_nc, output_nc=None, n_layers=1, conv_layers=0):
    if output_nc is None:
        output_nc = input_nc // 2
    layers = []
    k = key
    for _ in range(n_layers):
        k, ka, kc, kb = jax.random.split(k, 4)
        layers.append(("sa", init_self_attention(ka, input_nc)))
        if conv_layers > 0:
            w, b = _conv_params(kc, input_nc, output_nc, 5)
            g, bt = _bn_params(kb, output_nc)
            layers.append(("conv", dict(w=w, b=b, gamma=g, beta=bt, pool=False)))
            input_nc = output_nc
            conv_layers -= 1
    return layers


def init_feature_extractor_sa(key, input_nc=3, output_nc=128, n_layers=1, conv_layers=0):
    k1, k2 = jax.random.split(key)
    fe = init_feature_extractor(k1, input_nc, output_nc)
    # Faithful to PyTorch: FeatureShifter_SA(output_nc, n_layers, conv_layers)
    # binds (input_nc=output_nc, output_nc=n_layers, n_layers=conv_layers).
    fs = init_feature_shifter_sa(k2, output_nc, n_layers, conv_layers)
    return dict(fe=fe, fs=fs)


# ---------------------------------------------------------------------------
# Forward pass (Pallas) and pure-JAX reference
# ---------------------------------------------------------------------------
def feature_extractor_sa_forward(params, x_nchw):
    x = jnp.transpose(x_nchw, (0, 2, 3, 1)).astype(jnp.float32)   # NCHW -> NHWC
    fe = params["fe"]
    fs = list(params["fs"])
    for p in fe[:-1]:
        x = conv_bn_relu_block(x, p, pool=p["pool"])
    last = fe[-1]
    if (not last["pool"]) and fs and fs[0][0] == "sa":
        x = conv_bn_relu_sa_block(x, last, fs[0][1])   # block-3 fused with SA
        fs = fs[1:]
    else:
        x = conv_bn_relu_block(x, last, pool=last["pool"], out_dtype=jnp.float32)
    for kind, p in fs:
        if kind == "sa":
            x = self_attention(x, p)
        else:
            x = conv_bn_relu_block(x, p, pool=False, out_dtype=jnp.float32)
    return jnp.transpose(x, (0, 3, 1, 2))                         # NHWC -> NCHW


def _ref_conv_block(x, p):  # NHWC reference (bf16 conv operands, f32 accum)
    w_hwio = jnp.transpose(p["w"], (2, 3, 1, 0)).astype(jnp.bfloat16)
    y = lax.conv_general_dilated(x.astype(jnp.bfloat16), w_hwio, (1, 1),
                                 [(2, 2), (2, 2)],
                                 dimension_numbers=("NHWC", "HWIO", "NHWC"),
                                 preferred_element_type=jnp.float32)
    y = y + p["b"]
    mean = jnp.mean(y, axis=(0, 1, 2))
    var = jnp.mean((y - mean) ** 2, axis=(0, 1, 2))
    y = (y - mean) * lax.rsqrt(var + EPS) * p["gamma"] + p["beta"]
    y = jnp.maximum(y, 0.0)
    if p["pool"]:
        y = lax.reduce_window(y, -jnp.inf, lax.max, (1, 3, 3, 1), (1, 2, 2, 1),
                              [(0, 0), (1, 1), (1, 1), (0, 0)])
    return y


def _ref_self_attention(x, p):
    N, H, W, C = x.shape
    xf = x.reshape(N, H * W, C)
    xb = xf.astype(jnp.bfloat16)
    q = jnp.einsum("nlc,cd->nld", xb, p["wq"].astype(jnp.bfloat16),
                   preferred_element_type=jnp.float32) + p["bq"]
    k = jnp.einsum("nlc,cd->nld", xb, p["wk"].astype(jnp.bfloat16),
                   preferred_element_type=jnp.float32) + p["bk"]
    v = jnp.einsum("nlc,cd->nld", xb, p["wv"].astype(jnp.bfloat16),
                   preferred_element_type=jnp.float32) + p["bv"]
    attn = jax.nn.softmax(jnp.einsum("nic,njc->nij", q, k), axis=-1)
    out = jnp.einsum("nij,njc->nic", attn, v)
    out = p["gamma"][0, 0] * out + xf
    return out.reshape(N, H, W, C)


def reference_forward(params, x_nchw):
    x = jnp.transpose(x_nchw, (0, 2, 3, 1)).astype(jnp.float32)
    for p in params["fe"]:
        x = _ref_conv_block(x, p)
    for kind, p in params["fs"]:
        x = _ref_self_attention(x, p) if kind == "sa" else _ref_conv_block(x, p)
    return jnp.transpose(x, (0, 3, 1, 2))


# ---------------------------------------------------------------------------
if __name__ == "__main__":
    key = jax.random.PRNGKey(0)
    kp, kx = jax.random.split(key)

    # FeatureExtractorSA(input_nc=3, output_nc=128, n_layers=1, conv_layers=1)
    # -> FeatureExtractor(3, 128) followed by exactly one SelfAttention(128)
    #    (positional-argument forwarding of the PyTorch module, see above).
    params = init_feature_extractor_sa(kp, input_nc=3, output_nc=128,
                                       n_layers=1, conv_layers=1)

    x = jax.random.normal(kx, (2, 3, 16, 16), jnp.float32)   # NCHW, like PyTorch
    out = jax.block_until_ready(feature_extractor_sa_forward(params, x))
    assert out.shape == (2, 128, 4, 4), out.shape

    ref = jax.block_until_ready(reference_forward(params, x))
    np.testing.assert_allclose(np.asarray(out), np.asarray(ref),
                               rtol=5e-3, atol=5e-3)
    print("KERNEL_OK")
</pallas_src>

<mosaic_0001>
module attributes {stable_mosaic.version = 11 : i64} {
  func.func @_conv_bn_relu_pool_kernel(%arg0: i32, %arg1: memref<2x20x20x3xbf16, #tpu.memory_space<vmem>>, %arg2: memref<5x15x32xbf16, #tpu.memory_space<vmem>>, %arg3: memref<1x32xf32, #tpu.memory_space<vmem>>, %arg4: memref<1x32xf32, #tpu.memory_space<vmem>>, %arg5: memref<2x64x32xbf16, #tpu.memory_space<vmem>>, %arg6: memref<320x15xf32, #tpu.memory_space<vmem>>, %arg7: memref<2x256x32xf32, #tpu.memory_space<vmem>>, %arg8: memref<128x32xf32, #tpu.memory_space<vmem>>) attributes {dimension_semantics = [#tpu.dimension_semantics<arbitrary>], iteration_bounds = array<i64: 1>, scalar_prefetch = 0 : i64, scratch_operands = 3 : i64, tpu.core_type = #tpu.core_type<tc>, window_params = [{pipeline_mode = #tpu.pipeline_mode<synchronous>, transform_indices = @transform_0, window_bounds = array<i64: 2, 20, 20, 3>}, {pipeline_mode = #tpu.pipeline_mode<synchronous>, transform_indices = @transform_1, window_bounds = array<i64: 5, 15, 32>}, {pipeline_mode = #tpu.pipeline_mode<synchronous>, transform_indices = @transform_2, window_bounds = array<i64: 1, 32>}, {pipeline_mode = #tpu.pipeline_mode<synchronous>, transform_indices = @transform_3, window_bounds = array<i64: 1, 32>}, {pipeline_mode = #tpu.pipeline_mode<synchronous>, transform_indices = @transform_4, window_bounds = array<i64: 2, 64, 32>}]} {
    %c0 = arith.constant 0 : index
    %c0_0 = arith.constant 0 : index
    %c0_1 = arith.constant 0 : index
    %c0_2 = arith.constant 0 : index
    %0 = vector.load %arg1[%c0, %c0_0, %c0_1, %c0_2] : memref<2x20x20x3xbf16, #tpu.memory_space<vmem>>, vector<1x20x16x3xbf16>
    %1 = vector.shape_cast %0 : vector<1x20x16x3xbf16> to vector<20x16x3xbf16>
    %2 = arith.extf %1 : vector<20x16x3xbf16> to vector<20x16x3xf32>
    %3 = vector.shape_cast %2 : vector<20x16x3xf32> to vector<320x3xf32>
    %c0_3 = arith.constant 0 : index
    %c0_4 = arith.constant 0 : index
    %4 = vector.load %arg6[%c0_3, %c0_4] : memref<320x15xf32, #tpu.memory_space<vmem>>, vector<320x3xf32>
    tpu.vector_store %arg6[%c0_3, %c0_4], %3 {strides = array<i32>} : memref<320x15xf32, #tpu.memory_space<vmem>>, vector<320x3xf32>,
    %c0_5 = arith.constant 0 : index
    %c0_6 = arith.constant 0 : index
    %c1 = arith.constant 1 : index
    %c0_7 = arith.constant 0 : index
    %5 = vector.load %arg1[%c0_5, %c0_6, %c1, %c0_7] : memref<2x20x20x3xbf16, #tpu.memory_space<vmem>>, vector<1x20x16x3xbf16>
    %6 = vector.shape_cast %5 : vector<1x20x16x3xbf16> to vector<20x16x3xbf16>
    %7 = arith.extf %6 : vector<20x16x3xbf16> to vector<20x16x3xf32>
    %8 = vector.shape_cast %7 : vector<20x16x3xf32> to vector<320x3xf32>
    %c0_8 = arith.constant 0 : index
    %c3 = arith.constant 3 : index
    %9 = vector.load %arg6[%c0_8, %c3] : memref<320x15xf32, #tpu.memory_space<vmem>>, vector<320x3xf32>
    tpu.vector_store %arg6[%c0_8, %c3], %8 {strides = array<i32>} : memref<320x15xf32, #tpu.memory_space<vmem>>, vector<320x3xf32>,
    %c0_9 = arith.constant 0 : index
    %c0_10 = arith.constant 0 : index
    %c2 = arith.constant 2 : index
    %c0_11 = arith.constant 0 : index
    %10 = vector.load %arg1[%c0_9, %c0_10, %c2, %c0_11] : memref<2x20x20x3xbf16, #tpu.memory_space<vmem>>, vector<1x20x16x3xbf16>
    %11 = vector.shape_cast %10 : vector<1x20x16x3xbf16> to vector<20x16x3xbf16>
    %12 = arith.extf %11 : vector<20x16x3xbf16> to vector<20x16x3xf32>
    %13 = vector.shape_cast %12 : vector<20x16x3xf32> to vector<320x3xf32>
    %c0_12 = arith.constant 0 : index
    %c6 = arith.constant 6 : index
    %14 = vector.load %arg6[%c0_12, %c6] : memref<320x15xf32, #tpu.memory_space<vmem>>, vector<320x3xf32>
    tpu.vector_store %arg6[%c0_12, %c6], %13 {strides = array<i32>} : memref<320x15xf32, #tpu.memory_space<vmem>>, vector<320x3xf32>,
    %c0_13 = arith.constant 0 : index
    %c0_14 = arith.constant 0 : index
    %c3_15 = arith.constant 3 : index
    %c0_16 = arith.constant 0 : index
    %15 = vector.load %arg1[%c0_13, %c0_14, %c3_15, %c0_16] : memref<2x20x20x3xbf16, #tpu.memory_space<vmem>>, vector<1x20x16x3xbf16>
    %16 = vector.shape_cast %15 : vector<1x20x16x3xbf16> to vector<20x16x3xbf16>
    %17 = arith.extf %16 : vector<20x16x3xbf16> to vector<20x16x3xf32>
    %18 = vector.shape_cast %17 : vector<20x16x3xf32> to vector<320x3xf32>
    %c0_17 = arith.constant 0 : index
    %c9 = arith.constant 9 : index
    %19 = vector.load %arg6[%c0_17, %c9] : memref<320x15xf32, #tpu.memory_space<vmem>>, vector<320x3xf32>
    tpu.vector_store %arg6[%c0_17, %c9], %18 {strides = array<i32>} : memref<320x15xf32, #tpu.memory_space<vmem>>, vector<320x3xf32>,
    %c0_18 = arith.constant 0 : index
    %c0_19 = arith.constant 0 : index
    %c4 = arith.constant 4 : index
    %c0_20 = arith.constant 0 : index
    %20 = vector.load %arg1[%c0_18, %c0_19, %c4, %c0_20] : memref<2x20x20x3xbf16, #tpu.memory_space<vmem>>, vector<1x20x16x3xbf16>
    %21 = vector.shape_cast %20 : vector<1x20x16x3xbf16> to vector<20x16x3xbf16>
    %22 = arith.extf %21 : vector<20x16x3xbf16> to vector<20x16x3xf32>
    %23 = vector.shape_cast %22 : vector<20x16x3xf32> to vector<320x3xf32>
    %c0_21 = arith.constant 0 : index
    %c12 = arith.constant 12 : index
    %24 = vector.load %arg6[%c0_21, %c12] : memref<320x15xf32, #tpu.memory_space<vmem>>, vector<320x3xf32>
    tpu.vector_store %arg6[%c0_21, %c12], %23 {strides = array<i32>} : memref<320x15xf32, #tpu.memory_space<vmem>>, vector<320x3xf32>,
    %cst = arith.constant 0.000000e+00 : f32
    %25 = vector.broadcast %cst : f32 to vector<256x32xf32>
    %c0_22 = arith.constant 0 : index
    %c0_23 = arith.constant 0 : index
    %26 = vector.load %arg6[%c0_22, %c0_23] : memref<320x15xf32, #tpu.memory_space<vmem>>, vector<256x15xf32>
    %27 = arith.truncf %26 : vector<256x15xf32> to vector<256x15xbf16>
    %c0_24 = arith.constant 0 : index
    %c0_25 = arith.constant 0 : index
    %c0_26 = arith.constant 0 : index
    %28 = vector.load %arg2[%c0_24, %c0_25, %c0_26] : memref<5x15x32xbf16, #tpu.memory_space<vmem>>, vector<1x15x32xbf16>
    %29 = vector.shape_cast %28 : vector<1x15x32xbf16> to vector<15x32xbf16>
    %cst_27 = arith.constant dense<0.000000e+00> : vector<256x32xf32>
    %30 = tpu.matmul %27, %29, %cst_27 {dimension_numbers = #tpu.dot_dimension_numbers<[1], [0], [0], [1], [0, 0, 1, 1], [], []>} : vector<256x15xbf16>, vector<15x32xbf16>, vector<256x32xf32> -> vector<256x32xf32>
    %31 = arith.addf %25, %30 : vector<256x32xf32>
    %c16 = arith.constant 16 : index
    %c0_28 = arith.constant 0 : index
    %32 = vector.load %arg6[%c16, %c0_28] : memref<320x15xf32, #tpu.memory_space<vmem>>, vector<256x15xf32>
    %33 = arith.truncf %32 : vector<256x15xf32> to vector<256x15xbf16>
    %c1_29 = arith.constant 1 : index
    %c0_30 = arith.constant 0 : index
    %c0_31 = arith.constant 0 : index
    %34 = vector.load %arg2[%c1_29, %c0_30, %c0_31] : memref<5x15x32xbf16, #tpu.memory_space<vmem>>, vector<1x15x32xbf16>
    %35 = vector.shape_cast %34 : vector<1x15x32xbf16> to vector<15x32xbf16>
    %cst_32 = arith.constant dense<0.000000e+00> : vector<256x32xf32>
    %36 = tpu.matmul %33, %35, %cst_32 {dimension_numbers = #tpu.dot_dimension_numbers<[1], [0], [0], [1], [0, 0, 1, 1], [], []>} : vector<256x15xbf16>, vector<15x32xbf16>, vector<256x32xf32> -> vector<256x32xf32>
    %37 = arith.addf %31, %36 : vector<256x32xf32>
    %c32 = arith.constant 32 : index
    %c0_33 = arith.constant 0 : index
    %38 = vector.load %arg6[%c32, %c0_33] : memref<320x15xf32, #tpu.memory_space<vmem>>, vector<256x15xf32>
    %39 = arith.truncf %38 : vector<256x15xf32> to vector<256x15xbf16>
    %c2_34 = arith.constant 2 : index
    %c0_35 = arith.constant 0 : index
    %c0_36 = arith.constant 0 : index
    %40 = vector.load %arg2[%c2_34, %c0_35, %c0_36] : memref<5x15x32xbf16, #tpu.memory_space<vmem>>, vector<1x15x32xbf16>
    %41 = vector.shape_cast %40 : vector<1x15x32xbf16> to vector<15x32xbf16>
    %cst_37 = arith.constant dense<0.000000e+00> : vector<256x32xf32>
    %42 = tpu.matmul %39, %41, %cst_37 {dimension_numbers = #tpu.dot_dimension_numbers<[1], [0], [0], [1], [0, 0, 1, 1], [], []>} : vector<256x15xbf16>, vector<15x32xbf16>, vector<256x32xf32> -> vector<256x32xf32>
    %43 = arith.addf %37, %42 : vector<256x32xf32>
    %c48 = arith.constant 48 : index
    %c0_38 = arith.constant 0 : index
    %44 = vector.load %arg6[%c48, %c0_38] : memref<320x15xf32, #tpu.memory_space<vmem>>, vector<256x15xf32>
    %45 = arith.truncf %44 : vector<256x15xf32> to vector<256x15xbf16>
    %c3_39 = arith.constant 3 : index
    %c0_40 = arith.constant 0 : index
    %c0_41 = arith.constant 0 : index
    %46 = vector.load %arg2[%c3_39, %c0_40, %c0_41] : memref<5x15x32xbf16, #tpu.memory_space<vmem>>, vector<1x15x32xbf16>
    %47 = vector.shape_cast %46 : vector<1x15x32xbf16> to vector<15x32xbf16>
    %cst_42 = arith.constant dense<0.000000e+00> : vector<256x32xf32>
    %48 = tpu.matmul %45, %47, %cst_42 {dimension_numbers = #tpu.dot_dimension_numbers<[1], [0], [0], [1], [0, 0, 1, 1], [], []>} : vector<256x15xbf16>, vector<15x32xbf16>, vector<256x32xf32> -> vector<256x32xf32>
    %49 = arith.addf %43, %48 : vector<256x32xf32>
    %c64 = arith.constant 64 : index
    %c0_43 = arith.constant 0 : index
    %50 = vector.load %arg6[%c64, %c0_43] : memref<320x15xf32, #tpu.memory_space<vmem>>, vector<256x15xf32>
    %51 = arith.truncf %50 : vector<256x15xf32> to vector<256x15xbf16>
    %c4_44 = arith.constant 4 : index
    %c0_45 = arith.constant 0 : index
    %c0_46 = arith.constant 0 : index
    %52 = vector.load %arg2[%c4_44, %c0_45, %c0_46] : memref<5x15x32xbf16, #tpu.memory_space<vmem>>, vector<1x15x32xbf16>
    %53 = vector.shape_cast %52 : vector<1x15x32xbf16> to vector<15x32xbf16>
    %cst_47 = arith.constant dense<0.000000e+00> : vector<256x32xf32>
    %54 = tpu.matmul %51, %53, %cst_47 {dimension_numbers = #tpu.dot_dimension_numbers<[1], [0], [0], [1], [0, 0, 1, 1], [], []>} : vector<256x15xbf16>, vector<15x32xbf16>, vector<256x32xf32> -> vector<256x32xf32>
    %55 = arith.addf %49, %54 : vector<256x32xf32>
    %c0_48 = arith.constant 0 : index
    %c0_49 = arith.constant 0 : index
    %c0_50 = arith.constant 0 : index
    %56 = vector.load %arg7[%c0_48, %c0_49, %c0_50] : memref<2x256x32xf32, #tpu.memory_space<vmem>>, vector<1x256x32xf32>
    %57 = vector.shape_cast %56 : vector<1x256x32xf32> to vector<256x32xf32>
    %58 = vector.shape_cast %55 : vector<256x32xf32> to vector<1x256x32xf32>
    tpu.vector_store %arg7[%c0_48, %c0_49, %c0_50], %58 {strides = array<i32>} : memref<2x256x32xf32, #tpu.memory_space<vmem>>, vector<1x256x32xf32>,
    %c1_51 = arith.constant 1 : index
    %c0_52 = arith.constant 0 : index
    %c0_53 = arith.constant 0 : index
    %c0_54 = arith.constant 0 : index
    %59 = vector.load %arg1[%c1_51, %c0_52, %c0_53, %c0_54] : memref<2x20x20x3xbf16, #tpu.memory_space<vmem>>, vector<1x20x16x3xbf16>
    %60 = vector.shape_cast %59 : vector<1x20x16x3xbf16> to vector<20x16x3xbf16>
    %61 = arith.extf %60 : vector<20x16x3xbf16> to vector<20x16x3xf32>
    %62 = vector.shape_cast %61 : vector<20x16x3xf32> to vector<320x3xf32>
    %c0_55 = arith.constant 0 : index
    %c0_56 = arith.constant 0 : index
    %63 = vector.load %arg6[%c0_55, %c0_56] : memref<320x15xf32, #tpu.memory_space<vmem>>, vector<320x3xf32>
    tpu.vector_store %arg6[%c0_55, %c0_56], %62 {strides = array<i32>} : memref<320x15xf32, #tpu.memory_space<vmem>>, vector<320x3xf32>,
    %c1_57 = arith.constant 1 : index
    %c0_58 = arith.constant 0 : index
    %c1_59 = arith.constant 1 : index
    %c0_60 = arith.constant 0 : index
    %64 = vector.load %arg1[%c1_57, %c0_58, %c1_59, %c0_60] : memref<2x20x20x3xbf16, #tpu.memory_space<vmem>>, vector<1x20x16x3xbf16>
    %65 = vector.shape_cast %64 : vector<1x20x16x3xbf16> to vector<20x16x3xbf16>
    %66 = arith.extf %65 : vector<20x16x3xbf16> to vector<20x16x3xf32>
    %67 = vector.shape_cast %66 : vector<20x16x3xf32> to vector<320x3xf32>
    %c0_61 = arith.constant 0 : index
    %c3_62 = arith.constant 3 : index
    %68 = vector.load %arg6[%c0_61, %c3_62] : memref<320x15xf32, #tpu.memory_space<vmem>>, vector<320x3xf32>
    tpu.vector_store %arg6[%c0_61, %c3_62], %67 {strides = array<i32>} : memref<320x15xf32, #tpu.memory_space<vmem>>, vector<320x3xf32>,
    %c1_63 = arith.constant 1 : index
    %c0_64 = arith.constant 0 : index
    %c2_65 = arith.constant 2 : index
    %c0_66 = arith.constant 0 : index
    %69 = vector.load %arg1[%c1_63, %c0_64, %c2_65, %c0_66] : memref<2x20x20x3xbf16, #tpu.memory_space<vmem>>, vector<1x20x16x3xbf16>
    %70 = vector.shape_cast %69 : vector<1x20x16x3xbf16> to vector<20x16x3xbf16>
    %71 = arith.extf %70 : vector<20x16x3xbf16> to vector<20x16x3xf32>
    %72 = vector.shape_cast %71 : vector<20x16x3xf32> to vector<320x3xf32>
    %c0_67 = arith.constant 0 : index
    %c6_68 = arith.constant 6 : index
    %73 = vector.load %arg6[%c0_67, %c6_68] : memref<320x15xf32, #tpu.memory_space<vmem>>, vector<320x3xf32>
    tpu.vector_store %arg6[%c0_67, %c6_68], %72 {strides = array<i32>} : memref<320x15xf32, #tpu.memory_space<vmem>>, vector<320x3xf32>,
    %c1_69 = arith.constant 1 : index
    %c0_70 = arith.constant 0 : index
    %c3_71 = arith.constant 3 : index
    %c0_72 = arith.constant 0 : index
    %74 = vector.load %arg1[%c1_69, %c0_70, %c3_71, %c0_72] : memref<2x20x20x3xbf16, #tpu.memory_space<vmem>>, vector<1x20x16x3xbf16>
    %75 = vector.shape_cast %74 : vector<1x20x16x3xbf16> to vector<20x16x3xbf16>
    %76 = arith.extf %75 : vector<20x16x3xbf16> to vector<20x16x3xf32>
    %77 = vector.shape_cast %76 : vector<20x16x3xf32> to vector<320x3xf32>
    %c0_73 = arith.constant 0 : index
    %c9_74 = arith.constant 9 : index
    %78 = vector.load %arg6[%c0_73, %c9_74] : memref<320x15xf32, #tpu.memory_space<vmem>>, vector<320x3xf32>
    tpu.vector_store %arg6[%c0_73, %c9_74], %77 {strides = array<i32>} : memref<320x15xf32, #tpu.memory_space<vmem>>, vector<320x3xf32>,
    %c1_75 = arith.constant 1 : index
    %c0_76 = arith.constant 0 : index
    %c4_77 = arith.constant 4 : index
    %c0_78 = arith.constant 0 : index
    %79 = vector.load %arg1[%c1_75, %c0_76, %c4_77, %c0_78] : memref<2x20x20x3xbf16, #tpu.memory_space<vmem>>, vector<1x20x16x3xbf16>
    %80 = vector.shape_cast %79 : vector<1x20x16x3xbf16> to vector<20x16x3xbf16>
    %81 = arith.extf %80 : vector<20x16x3xbf16> to vector<20x16x3xf32>
    %82 = vector.shape_cast %81 : vector<20x16x3xf32> to vector<320x3xf32>
    %c0_79 = arith.constant 0 : index
    %c12_80 = arith.constant 12 : index
    %83 = vector.load %arg6[%c0_79, %c12_80] : memref<320x15xf32, #tpu.memory_space<vmem>>, vector<320x3xf32>
    tpu.vector_store %arg6[%c0_79, %c12_80], %82 {strides = array<i32>} : memref<320x15xf32, #tpu.memory_space<vmem>>, vector<320x3xf32>,
    %cst_81 = arith.constant 0.000000e+00 : f32
    %84 = vector.broadcast %cst_81 : f32 to vector<256x32xf32>
    %c0_82 = arith.constant 0 : index
    %c0_83 = arith.constant 0 : index
    %85 = vector.load %arg6[%c0_82, %c0_83] : memref<320x15xf32, #tpu.memory_space<vmem>>, vector<256x15xf32>
    %86 = arith.truncf %85 : vector<256x15xf32> to vector<256x15xbf16>
    %c0_84 = arith.constant 0 : index
    %c0_85 = arith.constant 0 : index
    %c0_86 = arith.constant 0 : index
    %87 = vector.load %arg2[%c0_84, %c0_85, %c0_86] : memref<5x15x32xbf16, #tpu.memory_space<vmem>>, vector<1x15x32xbf16>
    %88 = vector.shape_cast %87 : vector<1x15x32xbf16> to vector<15x32xbf16>
    %cst_87 = arith.constant dense<0.000000e+00> : vector<256x32xf32>
    %89 = tpu.matmul %86, %88, %cst_87 {dimension_numbers = #tpu.dot_dimension_numbers<[1], [0], [0], [1], [0, 0, 1, 1], [], []>} : vector<256x15xbf16>, vector<15x32xbf16>, vector<256x32xf32> -> vector<256x32xf32>
    %90 = arith.addf %84, %89 : vector<256x32xf32>
    %c16_88 = arith.constant 16 : index
    %c0_89 = arith.constant 0 : index
    %91 = vector.load %arg6[%c16_88, %c0_89] : memref<320x15xf32, #tpu.memory_space<vmem>>, vector<256x15xf32>
    %92 = arith.truncf %91 : vector<256x15xf32> to vector<256x15xbf16>
    %c1_90 = arith.constant 1 : index
    %c0_91 = arith.constant 0 : index
    %c0_92 = arith.constant 0 : index
    %93 = vector.load %arg2[%c1_90, %c0_91, %c0_92] : memref<5x15x32xbf16, #tpu.memory_space<vmem>>, vector<1x15x32xbf16>
    %94 = vector.shape_cast %93 : vector<1x15x32xbf16> to vector<15x32xbf16>
    %cst_93 = arith.constant dense<0.000000e+00> : vector<256x32xf32>
    %95 = tpu.matmul %92, %94, %cst_93 {dimension_numbers = #tpu.dot_dimension_numbers<[1], [0], [0], [1], [0, 0, 1, 1], [], []>} : vector<256x15xbf16>, vector<15x32xbf16>, vector<256x32xf32> -> vector<256x32xf32>
    %96 = arith.addf %90, %95 : vector<256x32xf32>
    %c32_94 = arith.constant 32 : index
    %c0_95 = arith.constant 0 : index
    %97 = vector.load %arg6[%c32_94, %c0_95] : memref<320x15xf32, #tpu.memory_space<vmem>>, vector<256x15xf32>
    %98 = arith.truncf %97 : vector<256x15xf32> to vector<256x15xbf16>
    %c2_96 = arith.constant 2 : index
    %c0_97 = arith.constant 0 : index
    %c0_98 = arith.constant 0 : index
    %99 = vector.load %arg2[%c2_96, %c0_97, %c0_98] : memref<5x15x32xbf16, #tpu.memory_space<vmem>>, vector<1x15x32xbf16>
    %100 = vector.shape_cast %99 : vector<1x15x32xbf16> to vector<15x32xbf16>
    %cst_99 = arith.constant dense<0.000000e+00> : vector<256x32xf32>
    %101 = tpu.matmul %98, %100, %cst_99 {dimension_numbers = #tpu.dot_dimension_numbers<[1], [0], [0], [1], [0, 0, 1, 1], [], []>} : vector<256x15xbf16>, vector<15x32xbf16>, vector<256x32xf32> -> vector<256x32xf32>
    %102 = arith.addf %96, %101 : vector<256x32xf32>
    %c48_100 = arith.constant 48 : index
    %c0_101 = arith.constant 0 : index
    %103 = vector.load %arg6[%c48_100, %c0_101] : memref<320x15xf32, #tpu.memory_space<vmem>>, vector<256x15xf32>
    %104 = arith.truncf %103 : vector<256x15xf32> to vector<256x15xbf16>
    %c3_102 = arith.constant 3 : index
    %c0_103 = arith.constant 0 : index
    %c0_104 = arith.constant 0 : index
    %105 = vector.load %arg2[%c3_102, %c0_103, %c0_104] : memref<5x15x32xbf16, #tpu.memory_space<vmem>>, vector<1x15x32xbf16>
    %106 = vector.shape_cast %105 : vector<1x15x32xbf16> to vector<15x32xbf16>
    %cst_105 = arith.constant dense<0.000000e+00> : vector<256x32xf32>
    %107 = tpu.matmul %104, %106, %cst_105 {dimension_numbers = #tpu.dot_dimension_numbers<[1], [0], [0], [1], [0, 0, 1, 1], [], []>} : vector<256x15xbf16>, vector<15x32xbf16>, vector<256x32xf32> -> vector<256x32xf32>
    %108 = arith.addf %102, %107 : vector<256x32xf32>
    %c64_106 = arith.constant 64 : index
    %c0_107 = arith.constant 0 : index
    %109 = vector.load %arg6[%c64_106, %c0_107] : memref<320x15xf32, #tpu.memory_space<vmem>>, vector<256x15xf32>
    %110 = arith.truncf %109 : vector<256x15xf32> to vector<256x15xbf16>
    %c4_108 = arith.constant 4 : index
    %c0_109 = arith.constant 0 : index
    %c0_110 = arith.constant 0 : index
    %111 = vector.load %arg2[%c4_108, %c0_109, %c0_110] : memref<5x15x32xbf16, #tpu.memory_space<vmem>>, vector<1x15x32xbf16>
    %112 = vector.shape_cast %111 : vector<1x15x32xbf16> to vector<15x32xbf16>
    %cst_111 = arith.constant dense<0.000000e+00> : vector<256x32xf32>
    %113 = tpu.matmul %110, %112, %cst_111 {dimension_numbers = #tpu.dot_dimension_numbers<[1], [0], [0], [1], [0, 0, 1, 1], [], []>} : vector<256x15xbf16>, vector<15x32xbf16>, vector<256x32xf32> -> vector<256x32xf32>
    %114 = arith.addf %108, %113 : vector<256x32xf32>
    %c1_112 = arith.constant 1 : index
    %c0_113 = arith.constant 0 : index
    %c0_114 = arith.constant 0 : index
    %115 = vector.load %arg7[%c1_112, %c0_113, %c0_114] : memref<2x256x32xf32, #tpu.memory_space<vmem>>, vector<1x256x32xf32>
    %116 = vector.shape_cast %115 : vector<1x256x32xf32> to vector<256x32xf32>
    %117 = vector.shape_cast %114 : vector<256x32xf32> to vector<1x256x32xf32>
    tpu.vector_store %arg7[%c1_112, %c0_113, %c0_114], %117 {strides = array<i32>} : memref<2x256x32xf32, #tpu.memory_space<vmem>>, vector<1x256x32xf32>,
    %c0_115 = arith.constant 0 : index
    %c0_116 = arith.constant 0 : index
    %c0_117 = arith.constant 0 : index
    %118 = vector.load %arg7[%c0_115, %c0_116, %c0_117] : memref<2x256x32xf32, #tpu.memory_space<vmem>>, vector<2x256x32xf32>
    %119 = vector.shape_cast %118 : vector<2x256x32xf32> to vector<512x32xf32>
    %cst_118 = arith.constant dense<0.000000e+00> : vector<32xf32>
    %120 = vector.multi_reduction <add>, %119, %cst_118 [0] : vector<512x32xf32> to vector<32xf32>
    %121 = vector.shape_cast %120 : vector<32xf32> to vector<1x32xf32>
    %cst_119 = arith.constant 0.001953125 : f32
    %122 = vector.broadcast %cst_119 : f32 to vector<1x32xf32>
    %123 = arith.mulf %121, %122 : vector<1x32xf32>
    %124 = vector.broadcast %123 : vector<1x32xf32> to vector<512x32xf32>
    %125 = arith.subf %119, %124 : vector<512x32xf32>
    %126 = arith.mulf %125, %125 : vector<512x32xf32>
    %cst_120 = arith.constant dense<0.000000e+00> : vector<32xf32>
    %127 = vector.multi_reduction <add>, %126, %cst_120 [0] : vector<512x32xf32> to vector<32xf32>
    %128 = vector.shape_cast %127 : vector<32xf32> to vector<1x32xf32>
    %cst_121 = arith.constant 0.001953125 : f32
    %129 = vector.broadcast %cst_121 : f32 to vector<1x32xf32>
    %130 = arith.mulf %128, %129 : vector<1x32xf32>
    %cst_122 = arith.constant 9.99999974E-6 : f32
    %131 = vector.broadcast %cst_122 : f32 to vector<1x32xf32>
    %132 = arith.addf %130, %131 : vector<1x32xf32>
    %133 = math.rsqrt %132 : vector<1x32xf32>
    %c0_123 = arith.constant 0 : index
    %c0_124 = arith.constant 0 : index
    %134 = vector.load %arg3[%c0_123, %c0_124] : memref<1x32xf32, #tpu.memory_space<vmem>>, vector<1x32xf32>
    %135 = arith.mulf %134, %133 : vector<1x32xf32>
    %c0_125 = arith.constant 0 : index
    %c0_126 = arith.constant 0 : index
    %136 = vector.load %arg4[%c0_125, %c0_126] : memref<1x32xf32, #tpu.memory_space<vmem>>, vector<1x32xf32>
    %137 = arith.mulf %123, %135 : vector<1x32xf32>
    %138 = arith.subf %136, %137 : vector<1x32xf32>
    %c0_127 = arith.constant 0 : index
    %c0_128 = arith.constant 0 : index
    %c0_129 = arith.constant 0 : index
    %139 = vector.load %arg7[%c0_127, %c0_128, %c0_129] : memref<2x256x32xf32, #tpu.memory_space<vmem>>, vector<1x256x32xf32>
    %140 = vector.shape_cast %139 : vector<1x256x32xf32> to vector<256x32xf32>
    %141 = vector.broadcast %135 : vector<1x32xf32> to vector<256x32xf32>
    %142 = arith.mulf %140, %141 : vector<256x32xf32>
    %143 = vector.broadcast %138 : vector<1x32xf32> to vector<256x32xf32>
    %144 = arith.addf %142, %143 : vector<256x32xf32>
    %cst_130 = arith.constant 0.000000e+00 : f32
    %145 = vector.broadcast %cst_130 : f32 to vector<256x32xf32>
    %146 = arith.maximumf %144, %145 : vector<256x32xf32>
    %147 = vector.shape_cast %146 : vector<256x32xf32> to vector<16x16x32xf32>
    %148 = vector.shape_cast %147 : vector<16x16x32xf32> to vector<8x2x16x32xf32>
    %149 = vector.extract_strided_slice %148 {offsets = [0, 0, 0, 0], sizes = [8, 1, 16, 32], strides = [1, 1, 1, 1]} : vector<8x2x16x32xf32> to vector<8x1x16x32xf32>
    %150 = vector.shape_cast %149 : vector<8x1x16x32xf32> to vector<8x16x32xf32>
    %151 = vector.extract_strided_slice %148 {offsets = [0, 1, 0, 0], sizes = [8, 1, 16, 32], strides = [1, 1, 1, 1]} : vector<8x2x16x32xf32> to vector<8x1x16x32xf32>
    %152 = vector.shape_cast %151 : vector<8x1x16x32xf32> to vector<8x16x32xf32>
    %cst_131 = arith.constant 0.000000e+00 : f32
    %153 = vector.broadcast %cst_131 : f32 to vector<1x16x32xf32>
    %154 = vector.extract_strided_slice %152 {offsets = [0, 0, 0], sizes = [7, 16, 32], strides = [1, 1, 1]} : vector<8x16x32xf32> to vector<7x16x32xf32>
    %155 = tpu.concatenate %153, %154 in 0 : vector<1x16x32xf32>, vector<7x16x32xf32> -> vector<8x16x32xf32>
    %156 = arith.maximumf %150, %152 : vector<8x16x32xf32>
    %157 = arith.maximumf %156, %155 : vector<8x16x32xf32>
    %cst_132 = arith.constant 0.000000e+00 : f32
    %158 = vector.broadcast %cst_132 : f32 to vector<8x1x32xf32>
    %159 = vector.extract_strided_slice %157 {offsets = [0, 0, 0], sizes = [8, 15, 32], strides = [1, 1, 1]} : vector<8x16x32xf32> to vector<8x15x32xf32>
    %160 = tpu.concatenate %158, %159 in 1 : vector<8x1x32xf32>, vector<8x15x32xf32> -> vector<8x16x32xf32>
    %161 = vector.extract_strided_slice %157 {offsets = [0, 1, 0], sizes = [8, 15, 32], strides = [1, 1, 1]} : vector<8x16x32xf32> to vector<8x15x32xf32>
    %162 = tpu.concatenate %161, %158 in 1 : vector<8x15x32xf32>, vector<8x1x32xf32> -> vector<8x16x32xf32>
    %163 = arith.maximumf %157, %160 : vector<8x16x32xf32>
    %164 = arith.maximumf %163, %162 : vector<8x16x32xf32>
    %165 = vector.shape_cast %164 : vector<8x16x32xf32> to vector<128x32xf32>
    %c0_133 = arith.constant 0 : index
    %c0_134 = arith.constant 0 : index
    %166 = vector.load %arg8[%c0_133, %c0_134] : memref<128x32xf32, #tpu.memory_space<vmem>>, vector<128x32xf32>
    tpu.vector_store %arg8[%c0_133, %c0_134], %165 {strides = array<i32>} : memref<128x32xf32, #tpu.memory_space<vmem>>, vector<128x32xf32>,
    %c0_135 = arith.constant 0 : index
    %c0_136 = arith.constant 0 : index
    %167 = tpu.strided_load %arg8[%c0_135, %c0_136] {strides = array<i32: 2, 1>} : memref<128x32xf32, #tpu.memory_space<vmem>>, vector<64x32xf32>
    %168 = arith.truncf %167 : vector<64x32xf32> to vector<64x32xbf16>
    %c0_137 = arith.constant 0 : index
    %c0_138 = arith.constant 0 : index
    %c0_139 = arith.constant 0 : index
    %169 = vector.load %arg5[%c0_137, %c0_138, %c0_139] : memref<2x64x32xbf16, #tpu.memory_space<vmem>>, vector<1x64x32xbf16>
    %170 = vector.shape_cast %169 : vector<1x64x32xbf16> to vector<64x32xbf16>
    %171 = vector.shape_cast %168 : vector<64x32xbf16> to vector<1x64x32xbf16>
    tpu.vector_store %arg5[%c0_137, %c0_138, %c0_139], %171 {strides = array<i32>} : memref<2x64x32xbf16, #tpu.memory_space<vmem>>, vector<1x64x32xbf16>,
    %c1_140 = arith.constant 1 : index
    %c0_141 = arith.constant 0 : index
    %c0_142 = arith.constant 0 : index
    %172 = vector.load %arg7[%c1_140, %c0_141, %c0_142] : memref<2x256x32xf32, #tpu.memory_space<vmem>>, vector<1x256x32xf32>
    %173 = vector.shape_cast %172 : vector<1x256x32xf32> to vector<256x32xf32>
    %174 = vector.broadcast %135 : vector<1x32xf32> to vector<256x32xf32>
    %175 = arith.mulf %173, %174 : vector<256x32xf32>
    %176 = vector.broadcast %138 : vector<1x32xf32> to vector<256x32xf32>
    %177 = arith.addf %175, %176 : vector<256x32xf32>
    %cst_143 = arith.constant 0.000000e+00 : f32
    %178 = vector.broadcast %cst_143 : f32 to vector<256x32xf32>
    %179 = arith.maximumf %177, %178 : vector<256x32xf32>
    %180 = vector.shape_cast %179 : vector<256x32xf32> to vector<16x16x32xf32>
    %181 = vector.shape_cast %180 : vector<16x16x32xf32> to vector<8x2x16x32xf32>
    %182 = vector.extract_strided_slice %181 {offsets = [0, 0, 0, 0], sizes = [8, 1, 16, 32], strides = [1, 1, 1, 1]} : vector<8x2x16x32xf32> to vector<8x1x16x32xf32>
    %183 = vector.shape_cast %182 : vector<8x1x16x32xf32> to vector<8x16x32xf32>
    %184 = vector.extract_strided_slice %181 {offsets = [0, 1, 0, 0], sizes = [8, 1, 16, 32], strides = [1, 1, 1, 1]} : vector<8x2x16x32xf32> to vector<8x1x16x32xf32>
    %185 = vector.shape_cast %184 : vector<8x1x16x32xf32> to vector<8x16x32xf32>
    %cst_144 = arith.constant 0.000000e+00 : f32
    %186 = vector.broadcast %cst_144 : f32 to vector<1x16x32xf32>
    %187 = vector.extract_strided_slice %185 {offsets = [0, 0, 0], sizes = [7, 16, 32], strides = [1, 1, 1]} : vector<8x16x32xf32> to vector<7x16x32xf32>
    %188 = tpu.concatenate %186, %187 in 0 : vector<1x16x32xf32>, vector<7x16x32xf32> -> vector<8x16x32xf32>
    %189 = arith.maximumf %183, %185 : vector<8x16x32xf32>
    %190 = arith.maximumf %189, %188 : vector<8x16x32xf32>
    %cst_145 = arith.constant 0.000000e+00 : f32
    %191 = vector.broadcast %cst_145 : f32 to vector<8x1x32xf32>
    %192 = vector.extract_strided_slice %190 {offsets = [0, 0, 0], sizes = [8, 15, 32], strides = [1, 1, 1]} : vector<8x16x32xf32> to vector<8x15x32xf32>
    %193 = tpu.concatenate %191, %192 in 1 : vector<8x1x32xf32>, vector<8x15x32xf32> -> vector<8x16x32xf32>
    %194 = vector.extract_strided_slice %190 {offsets = [0, 1, 0], sizes = [8, 15, 32], strides = [1, 1, 1]} : vector<8x16x32xf32> to vector<8x15x32xf32>
    %195 = tpu.concatenate %194, %191 in 1 : vector<8x15x32xf32>, vector<8x1x32xf32> -> vector<8x16x32xf32>
    %196 = arith.maximumf %190, %193 : vector<8x16x32xf32>
    %197 = arith.maximumf %196, %195 : vector<8x16x32xf32>
    %198 = vector.shape_cast %197 : vector<8x16x32xf32> to vector<128x32xf32>
    %c0_146 = arith.constant 0 : index
    %c0_147 = arith.constant 0 : index
    %199 = vector.load %arg8[%c0_146, %c0_147] : memref<128x32xf32, #tpu.memory_space<vmem>>, vector<128x32xf32>
    tpu.vector_store %arg8[%c0_146, %c0_147], %198 {strides = array<i32>} : memref<128x32xf32, #tpu.memory_space<vmem>>, vector<128x32xf32>,
    %c0_148 = arith.constant 0 : index
    %c0_149 = arith.constant 0 : index
    %200 = tpu.strided_load %arg8[%c0_148, %c0_149] {strides = array<i32: 2, 1>} : memref<128x32xf32, #tpu.memory_space<vmem>>, vector<64x32xf32>
    %201 = arith.truncf %200 : vector<64x32xf32> to vector<64x32xbf16>
    %c1_150 = arith.constant 1 : index
    %c0_151 = arith.constant 0 : index
    %c0_152 = arith.constant 0 : index
    %202 = vector.load %arg5[%c1_150, %c0_151, %c0_152] : memref<2x64x32xbf16, #tpu.memory_space<vmem>>, vector<1x64x32xbf16>
    %203 = vector.shape_cast %202 : vector<1x64x32xbf16> to vector<64x32xbf16>
    %204 = vector.shape_cast %201 : vector<64x32xbf16> to vector<1x64x32xbf16>
    tpu.vector_store %arg5[%c1_150, %c0_151, %c0_152], %204 {strides = array<i32>} : memref<2x64x32xbf16, #tpu.memory_space<vmem>>, vector<1x64x32xbf16>,
    return
  }
  func.func @transform_0(%arg0: i32) -> (i32, i32, i32, i32) {
    %c0_i32 = arith.constant 0 : i32
    %c0_i32_0 = arith.constant 0 : i32
    %c0_i32_1 = arith.constant 0 : i32
    %c0_i32_2 = arith.constant 0 : i32
    %c0_i32_3 = arith.constant 0 : i32
    return %c0_i32, %c0_i32_0, %c0_i32_1, %c0_i32_2 : i32, i32, i32, i32
  }
  func.func @transform_1(%arg0: i32) -> (i32, i32, i32) {
    %c0_i32 = arith.constant 0 : i32
    %c0_i32_0 = arith.constant 0 : i32
    %c0_i32_1 = arith.constant 0 : i32
    %c0_i32_2 = arith.constant 0 : i32
    return %c0_i32, %c0_i32_0, %c0_i32_1 : i32, i32, i32
  }
  func.func @transform_2(%arg0: i32) -> (i32, i32) {
    %c0_i32 = arith.constant 0 : i32
    %c0_i32_0 = arith.constant 0 : i32
    %c0_i32_1 = arith.constant 0 : i32
    return %c0_i32, %c0_i32_0 : i32, i32
  }
  func.func @transform_3(%arg0: i32) -> (i32, i32) {
    %c0_i32 = arith.constant 0 : i32
    %c0_i32_0 = arith.constant 0 : i32
    %c0_i32_1 = arith.constant 0 : i32
    return %c0_i32, %c0_i32_0 : i32, i32
  }
  func.func @transform_4(%arg0: i32) -> (i32, i32, i32) {
    %c0_i32 = arith.constant 0 : i32
    %c0_i32_0 = arith.constant 0 : i32
    %c0_i32_1 = arith.constant 0 : i32
    %c0_i32_2 = arith.constant 0 : i32
    return %c0_i32, %c0_i32_0, %c0_i32_1 : i32, i32, i32
  }
}

</mosaic_0001>

<bundles_post_ra>
// kernel: tpu_custom_call.1
= control target key start
LH: loop header
LB: loop body
LE: loop exit
PB: predicated region body
PF: predicated region fallthrough
CT: control target
= control target key end

     0   :  { %vm761_vm0 = vcmask 1045504   ;;  %vm319_vm1 = vcmask 1046528   ;;  %vm1203_vm2 = vcmask 1044480   ;;  %s9835_s15 = smov 6   ;;  %s9836_s18 = smov 3   ;;  %vm1645_vm3 = vcmask 1043456   ;;  %s14858_s0 = inlined_call_operand.vmem [shape: bf16[2,20,20,3], index: 0, kind: input, shape index: {}]   ;;  %s14859_s1 = inlined_call_operand.vmem [shape: bf16[5,15,32], index: 1, kind: input, shape index: {}]   ;;  %s14860_s2 = inlined_call_operand.vmem [shape: f32[1,32], index: 2, kind: input, shape index: {}]   ;;  %s14861_s3 = inlined_call_operand.vmem [shape: f32[1,32], index: 3, kind: input, shape index: {}]   ;;  %s14862_s4 = inlined_call_operand.vmem [shape: bf16[2,64,32], index: 4, kind: output, shape index: {}]  }
   0x1   :  { %v584_v0 = vld [vmem:[%s14858_s0 + $0xc] sm:$0xe]  ;;  %v586_v2 = vld [vmem:[%s14858_s0 + $0x14] sm:$0x1]  ;;  %v143_v6 = vld [vmem:[%s14858_s0 + $0x10] ss:$12 sps:$4 sm:$0xff]  }
   0x2   :  { %v585_v1 = vld [vmem:[%s14858_s0 + $0xc] sm:$0xff]   ;;  %v644_v3 = vunpack.c.l.bf16 %v584_v0  ;;  %v646_v5 = vunpack.c.l.bf16 %v586_v2  ;;  %v144_v7 = vld [vmem:[%s14858_s0 + $0x14] sm:$0x1]  ;;  %v8416_v9 = vld [vmem:[%s14858_s0 + $0x18] sm:$0xff]   ;;  %v203_v10 = vunpack.c.l.bf16 %v143_v6  ;;  %v648_v44 = vunpack.c.h.bf16 %v143_v6  ;;  %s9837_s13 = smov 9   ;;  %s9838_s6 = smov 12  }
   0x3   :  { %v645_v4 = vunpack.c.h.bf16 %v585_v1  ;;  %v202_v8 = vunpack.c.l.bf16 %v585_v1  ;;  %v204_v11 = vunpack.c.l.bf16 %v144_v7  ;;  %v8293_v12 = vunpack.c.l.bf16 %v8416_v9  ;;  %v147_v14 = vld [vmem:[%s14858_s0 + $0x20] sm:$0x1]  ;;  %v141_v24 = vld [vmem:[%s14858_s0 + $0x8] sm:$0x1]  ;;  %v587_v29 = vld [vmem:[%s14858_s0 + $0x18] sm:$0xe] }
   0x4   :  { %v8294_v13 = vunpack.c.h.bf16 %v8416_v9  ;;  %v8288_v15 = vld [vmem:[%s14858_s0] sm:$0xff]   ;;  %v767_v16 = vrot.slane %v644_v3, 2  ;;  %v770_v18 = vrot.slane %v646_v5, 2  ;;  %v326_v20 = vrot.slane %v203_v10, 1  ;;  %v1026_v39 = vld [vmem:[%s14858_s0 + $0xc] sm:$0xe] }
   0x5   :  { %v768_v17 = vrot.slane %v645_v4, 2  ;;  %v325_v19 = vrot.slane %v202_v8, 1  ;;  %v328_v21 = vrot.slane %v204_v11, 1  ;;  %v207_v22 = vunpack.c.l.bf16 %v147_v14  ;;  %v589_v34 = vld [vmem:[%s14858_s0 + $0x20] sm:$0x1] }
   0x6   :  { %v330_v23 = vrot.slane %v8293_v12, 1  ;;  %v331_v27 = vrot.slane %v8294_v13, 1  ;;  %v8289_v28 = vunpack.c.l.bf16 %v8288_v15  ;;  %v8290_v37 = vunpack.c.h.bf16 %v8288_v15  ;;  %v1027_v40 = vld [vmem:[%s14858_s0 + $0x4] ss:$12 sps:$4 sm:$0xff]   ;;  %v1028_v45 = vld [vmem:[%s14858_s0 + $0x14] sm:$0x3] }
   0x7   :  { %v769_v25 = vsel %vm761_vm0, %v767_v16, %v768_v17  ;;  %v771_v26 = vsel %vm761_vm0, %v768_v17, %v770_v18  ;;  %v327_v31 = vsel %vm319_vm1, %v325_v19, %v326_v20  ;;  %v329_v32 = vsel %vm319_vm1, %v326_v20, %v328_v21  ;;  %v581_v54 = vld [vmem:[%s14858_s0] sm:$0xe]  ;;  %v583_v59 = vld [vmem:[%s14858_s0 + $0x8] sm:$0x1]  ;;  %v1029_v60 = vld [vmem:[%s14858_s0 + $0x18] sm:$0xe] }
   0x8   :  { %v8970_v30 = vpack.i.bf16 %v771_v26, %v769_v25  ;;  %v333_v33 = vrot.slane %v207_v22, 1  ;;  %v8960_v35 = vpack.i.bf16 %v329_v32, %v327_v31  ;;  %v332_v36 = vsel %vm319_vm1, %v330_v23, %v331_v27  ;;  %v1030_v1 = vld [vmem:[%s14858_s0 + $0x10] ss:$12 sps:$4 sm:$0xff]   ;;  %v1031_v6 = vld [vmem:[%s14858_s0 + $0x20] sm:$0x3] }
   0x9   :  { %v201_v38 = vunpack.c.l.bf16 %v141_v24  ;;  %v320_v42 = vrot.slane %v8289_v28, 1  ;;  %v647_v43 = vunpack.c.l.bf16 %v587_v29  ;;  %v321_v47 = vrot.slane %v8290_v37, 1  ;;  %v1468_v11 = vld [vmem:[%s14858_s0 + $0xc] sm:$0xc]  ;;  %v1470_v16 = vld [vmem:[%s14858_s0 + $0x14] sm:$0x3] }
   0xa   :  { %8971 = vrot.lane.b32.xlu1 %v8970_v30, %s9835_s15  ;;  %v334_v41 = vsel %vm319_vm1, %v331_v27, %v333_v33  ;;  %8961 = vrot.lane.b32.xlu0 %v8960_v35, %s9836_s18  ;;  %v649_v49 = vunpack.c.l.bf16 %v589_v34  ;;  %v773_v51 = vrot.slane %v648_v44, 2  ;;  %v1086_v52 = vunpack.c.l.bf16 %v1026_v39  ;;  %v1023_v17 = vld [vmem:[%s14858_s0] sm:$0xe]  ;;  %v1024_v26 = vld [vmem:[%s14858_s0 + $0x4] ss:$24 sps:$4 sm:$0xff]  }
   0xb   :  { %v8965_v46 = vpack.i.bf16 %v334_v41, %v332_v36  ;;  %v323_v48 = vrot.slane %v201_v38, 1  ;;  %v772_v50 = vrot.slane %v647_v43, 2  ;;  %v1087_v53 = vunpack.c.h.bf16 %v1027_v40  ;;  %v1025_v27 = vld [vmem:[%s14858_s0 + $0x8] sm:$0x3]  ;;  %v1471_v32 = vld [vmem:[%s14858_s0 + $0x18] sm:$0xc] }
   0xc   :  { %v322_v55 = vsel %vm319_vm1, %v320_v42, %v321_v47  ;;  %v775_v57 = vrot.slane %v649_v49, 2  ;;  %v1088_v58 = vunpack.c.l.bf16 %v1028_v45  ;;  %v1209_v63 = vrot.slane %v1086_v52, 3  ;;  %v1473_v41 = vld [vmem:[%s14858_s0 + $0x20] sm:$0x3]  ;;  %v1465_v42 = vld [vmem:[%s14858_s0] sm:$0xc] }
   0xd   :  { %v324_v56 = vsel %vm319_vm1, %v321_v47, %v323_v48  ;;  %v774_v62 = vsel %vm761_vm0, %v772_v50, %v773_v51  ;;  %v1210_v0 = vrot.slane %v1087_v53, 3  ;;  %v641_v4 = vunpack.c.l.bf16 %v581_v54  ;;  %v9973_v47 = vld [vmem:[%s14858_s0 + $0x4] ss:$36 sps:$4 sm:$0xff]  }
   0xe   :  { %v8975_v61 = vpack.i.bf16 %v324_v56, %v322_v55  ;;  %8966 = vrot.lane.b32.xlu0 %v8965_v46, %s9836_s18  ;;  %v776_v2 = vsel %vm761_vm0, %v773_v51, %v775_v57  ;;  %v1212_v3 = vrot.slane %v1088_v58, 3  ;;  %v642_v5 = vunpack.c.l.bf16 %v1027_v40  ;;  %v1467_v52 = vld [vmem:[%s14858_s0 + $0x8] sm:$0x3] }
   0xf   :  { %v8980_v7 = vpack.i.bf16 %v776_v2, %v774_v62  ;;  %v1211_v8 = vsel %vm1203_vm2, %v1209_v63, %v1210_v0  ;;  %v643_v9 = vunpack.c.l.bf16 %v583_v59  ;;  %v1089_v10 = vunpack.c.l.bf16 %v1029_v60  ;;  %v148_v57 = vld [vmem:[%s14858_s0 + $0x24] sm:$0xff]   ;;  %v150_v62 = vld [vmem:[%s14858_s0 + $0x2c] sm:$0x1]  ;;  %v8417_v63 = vld [vmem:[%s14858_s0 + $0x30] sm:$0xff]  }
  0x10   :  { %8976 = vrot.lane.b32.xlu1 %v8975_v61, %s9836_s18  ;;  %v1213_v12 = vsel %vm1203_vm2, %v1210_v0, %v1212_v3  ;;  %v762_v13 = vrot.slane %v641_v4, 2  ;;  %v763_v14 = vrot.slane %v642_v5, 2  ;;  %v1090_v15 = vunpack.c.h.bf16 %v1030_v1 }
  0x11   :  { %v8985_v18 = vpack.i.bf16 %v1213_v12, %v1211_v8  ;;  %v765_v19 = vrot.slane %v643_v9, 2  ;;  %v1091_v20 = vunpack.c.l.bf16 %v1031_v6  ;;  %v1214_v21 = vrot.slane %v1089_v10, 3  ;;  %v153_v8 = vld [vmem:[%s14858_s0 + $0x38] sm:$0x1] }
  0x12   :  { %8981 = vrot.lane.b32.xlu0 %v8980_v7, %s9835_s15  ;;  %v764_v22 = vsel %vm761_vm0, %v762_v13, %v763_v14  ;;  %v1215_v23 = vrot.slane %v1090_v15, 3  ;;  %v1528_v24 = vunpack.c.l.bf16 %v1468_v11  ;;  %v1529_v25 = vunpack.c.l.bf16 %v1030_v1  ;;  %v590_v13 = vld [vmem:[%s14858_s0 + $0x24] sm:$0xe] }
  0x13   :  { %v766_v28 = vsel %vm761_vm0, %v763_v14, %v765_v19  ;;  %v1217_v29 = vrot.slane %v1091_v20, 3  ;;  %v1530_v30 = vunpack.c.l.bf16 %v1470_v16  ;;  %v1083_v31 = vunpack.c.l.bf16 %v1023_v17 }
  0x14   :  { %8986 = vrot.lane.b32.xlu1 %v8985_v18, %s9837_s13  ;;  %v8990_v33 = vpack.i.bf16 %v766_v28, %v764_v22  ;;  %v1216_v34 = vsel %vm1203_vm2, %v1214_v21, %v1215_v23  ;;  %v1651_v35 = vrot.slane %v1528_v24, 4  ;;  %v1652_v36 = vrot.slane %v1529_v25, 4  ;;  %v592_v22 = vld [vmem:[%s14858_s0 + $0x2c] sm:$0x1]  ;;  %v594_v28 = vld [vmem:[%s14858_s0 + $0x28] ss:$12 sps:$4 sm:$0xff]  }
  0x15   :  { %v1218_v37 = vsel %vm1203_vm2, %v1215_v23, %v1217_v29  ;;  %v1654_v38 = vrot.slane %v1530_v30, 4  ;;  %v1084_v39 = vunpack.c.l.bf16 %v1024_v26  ;;  %v1085_v40 = vunpack.c.l.bf16 %v1025_v27  ;;  %v593_v23 = vld [vmem:[%s14858_s0 + $0x30] sm:$0xe] }
  0x16   :  { %8991 = vrot.lane.b32.xlu0 %v8990_v33, %s9835_s15  ;;  %v8995_v43 = vpack.i.bf16 %v1218_v37, %v1216_v34  ;;  %v1653_v44 = vsel %vm1645_vm3, %v1651_v35, %v1652_v36  ;;  %v1204_v45 = vrot.slane %v1083_v31, 3  ;;  %v1531_v46 = vunpack.c.l.bf16 %v1471_v32  ;;  %v595_v33 = vld [vmem:[%s14858_s0 + $0x38] sm:$0x1] }
  0x17   :  { %v1655_v48 = vsel %vm1645_vm3, %v1652_v36, %v1654_v38  ;;  %v1205_v49 = vrot.slane %v1084_v39, 3  ;;  %v1207_v50 = vrot.slane %v1085_v40, 3  ;;  %v1532_v51 = vunpack.c.h.bf16 %v1024_v26  ;;  %v1032_v38 = vld [vmem:[%s14858_s0 + $0x24] sm:$0xe] }
  0x18   :  { %8996 = vrot.lane.b32.xlu1 %v8995_v43, %s9837_s13  ;;  %v9000_v53 = vpack.i.bf16 %v1655_v48, %v1653_v44  ;;  %v1533_v54 = vunpack.c.l.bf16 %v1473_v41  ;;  %v1656_v55 = vrot.slane %v1531_v46, 4  ;;  %v1525_v56 = vunpack.c.l.bf16 %v1465_v42  ;;  %v1034_v43 = vld [vmem:[%s14858_s0 + $0x2c] sm:$0x3]  ;;  %v1035_v44 = vld [vmem:[%s14858_s0 + $0x30] sm:$0xe] }
  0x19   :  { %v1206_v58 = vsel %vm1203_vm2, %v1204_v45, %v1205_v49  ;;  %v1208_v59 = vsel %vm1203_vm2, %v1205_v49, %v1207_v50  ;;  %v1657_v60 = vrot.slane %v1532_v51, 4  ;;  %v1526_v61 = vunpack.c.l.bf16 %v9973_v47 }
  0x1a   :  { %9001 = vrot.lane.b32.xlu0 %v9000_v53, %s9838_s6  ;;  %v9005_v0 = vpack.i.bf16 %v1208_v59, %v1206_v58  ;;  %v1659_v1 = vrot.slane %v1533_v54, 4  ;;  %v1527_v2 = vunpack.c.l.bf16 %v1467_v52  ;;  %v1646_v3 = vrot.slane %v1525_v56, 4  ;;  %v1036_v53 = vld [vmem:[%s14858_s0 + $0x28] ss:$12 sps:$4 sm:$0xff]   ;;  %v1037_v54 = vld [vmem:[%s14858_s0 + $0x38] sm:$0x3] }
  0x1b   :  { %v1658_v4 = vsel %vm1645_vm3, %v1656_v55, %v1657_v60  ;;  %v1647_v5 = vrot.slane %v1526_v61, 4  ;;  %v208_v6 = vunpack.c.l.bf16 %v148_v57  ;;  %v209_v7 = vunpack.c.h.bf16 %v148_v57  ;;  %v1474_v59 = vld [vmem:[%s14858_s0 + $0x24] sm:$0xc] }
  0x1c   :  { %9006 = vrot.lane.b32.xlu1 %v9005_v0, %s9837_s13  ;;  %v1660_v9 = vsel %vm1645_vm3, %v1657_v60, %v1659_v1  ;;  %v1649_v10 = vrot.slane %v1527_v2, 4  ;;  %v210_v11 = vunpack.c.l.bf16 %v150_v62  ;;  %v8297_v12 = vunpack.c.l.bf16 %v8417_v63 }
  0x1d   :  { %v9010_v14 = vpack.i.bf16 %v1660_v9, %v1658_v4  ;;  %v1648_v15 = vsel %vm1645_vm3, %v1646_v3, %v1647_v5  ;;  %v335_v16 = vrot.slane %v208_v6, 1  ;;  %v336_v17 = vrot.slane %v209_v7, 1  ;;  %v1476_v4 = vld [vmem:[%s14858_s0 + $0x2c] sm:$0x3] }
  0x1e   :  { %v1650_v18 = vsel %vm1645_vm3, %v1647_v5, %v1649_v10  ;;  %v338_v19 = vrot.slane %v210_v11, 1  ;;  %v8298_v20 = vunpack.c.h.bf16 %v8417_v63  ;;  %v213_v21 = vunpack.c.l.bf16 %v153_v8  ;;  %v1477_v5 = vld [vmem:[%s14858_s0 + $0x30] sm:$0xc]  ;;  %v10058_v10 = vld [vmem:[%s14858_s0 + $0x34] ss:$12 sps:$4 sm:$0xff]  }
  0x1f   :  { %9011 = vrot.lane.b32.xlu0 %v9010_v14, %s9838_s6  ;;  %v9015_v24 = vpack.i.bf16 %v1650_v18, %v1648_v15  ;;  %v337_v25 = vsel %vm319_vm1, %v335_v16, %v336_v17  ;;  %v340_v26 = vrot.slane %v8297_v12, 1  ;;  %v650_v27 = vunpack.c.l.bf16 %v590_v13  ;;  %v1479_v15 = vld [vmem:[%s14858_s0 + $0x38] sm:$0x3] }
  0x20   :  { %v339_v29 = vsel %vm319_vm1, %v336_v17, %v338_v19  ;;  %v341_v30 = vrot.slane %v8298_v20, 1  ;;  %v343_v31 = vrot.slane %v213_v21, 1  ;;  %v651_v32 = vunpack.c.h.bf16 %v9973_v47  ;;  %v154_v20 = vld [vmem:[%s14858_s0 + $0x3c] sm:$0xff]  }
  0x21   :  { %9016 = vrot.lane.b32.xlu1 %v9015_v24, %s9838_s6  ;;  %v9020_v34 = vpack.i.bf16 %v339_v29, %v337_v25  ;;  %v652_v35 = vunpack.c.l.bf16 %v592_v22  ;;  %v777_v36 = vrot.slane %v650_v27, 2  ;;  %v653_v37 = vunpack.c.l.bf16 %v593_v23  ;;  %v156_v25 = vld [vmem:[%s14858_s0 + $0x44] sm:$0x1] }
  0x22   :  { %v342_v39 = vsel %vm319_vm1, %v340_v26, %v341_v30  ;;  %v344_v40 = vsel %vm319_vm1, %v341_v30, %v343_v31  ;;  %v778_v41 = vrot.slane %v651_v32, 2  ;;  %v654_v42 = vunpack.c.h.bf16 %v594_v28  ;;  %v8418_v26 = vld [vmem:[%s14858_s0 + $0x48] sm:$0xff]  }
  0x23   :  { %9021 = vrot.lane.b32.xlu0 %v9020_v34, %s9836_s18  ;;  %v9025_v45 = vpack.i.bf16 %v344_v40, %v342_v39  ;;  %v780_v46 = vrot.slane %v652_v35, 2  ;;  %v655_v47 = vunpack.c.l.bf16 %v595_v33  ;;  %v782_v48 = vrot.slane %v653_v37, 2  ;;  %v159_v35 = vld [vmem:[%s14858_s0 + $0x50] sm:$0x1]  ;;  %v596_v40 = vld [vmem:[%s14858_s0 + $0x3c] sm:$0xe] }
  0x24   :  { %v779_v49 = vsel %vm761_vm0, %v777_v36, %v778_v41  ;;  %v783_v50 = vrot.slane %v654_v42, 2  ;;  %v1092_v51 = vunpack.c.l.bf16 %v1032_v38  ;;  %v1093_v52 = vunpack.c.l.bf16 %v594_v28 }
  0x25   :  { %9026 = vrot.lane.b32.xlu1 %v9025_v45, %s9836_s18  ;;  %v781_v55 = vsel %vm761_vm0, %v778_v41, %v780_v46  ;;  %v785_v56 = vrot.slane %v655_v47, 2  ;;  %v1094_v57 = vunpack.c.l.bf16 %v1034_v43  ;;  %v1095_v58 = vunpack.c.l.bf16 %v1035_v44 }
  0x26   :  { %v9030_v60 = vpack.i.bf16 %v781_v55, %v779_v49  ;;  %v784_v61 = vsel %vm761_vm0, %v782_v48, %v783_v50  ;;  %v1219_v62 = vrot.slane %v1092_v51, 3  ;;  %v1220_v63 = vrot.slane %v1093_v52, 3  ;;  %v598_v49 = vld [vmem:[%s14858_s0 + $0x44] sm:$0x1]  ;;  %v600_v55 = vld [vmem:[%s14858_s0 + $0x40] ss:$12 sps:$4 sm:$0xff]  }
  0x27   :  { %v786_v0 = vsel %vm761_vm0, %v783_v50, %v785_v56  ;;  %v1222_v1 = vrot.slane %v1094_v57, 3  ;;  %v1096_v2 = vunpack.c.h.bf16 %v1036_v53  ;;  %v1097_v3 = vunpack.c.l.bf16 %v1037_v54  ;;  %v599_v50 = vld [vmem:[%s14858_s0 + $0x48] sm:$0xe] }
  0x28   :  { %9031 = vrot.lane.b32.xlu0 %v9030_v60, %s9835_s15  ;;  %v9035_v6 = vpack.i.bf16 %v786_v0, %v784_v61  ;;  %v1221_v7 = vsel %vm1203_vm2, %v1219_v62, %v1220_v63  ;;  %v1224_v8 = vrot.slane %v1095_v58, 3  ;;  %v1534_v9 = vunpack.c.l.bf16 %v1474_v59  ;;  %v601_v60 = vld [vmem:[%s14858_s0 + $0x50] sm:$0x1] }
  0x29   :  { %v1223_v11 = vsel %vm1203_vm2, %v1220_v63, %v1222_v1  ;;  %v1225_v12 = vrot.slane %v1096_v2, 3  ;;  %v1227_v13 = vrot.slane %v1097_v3, 3  ;;  %v1535_v14 = vunpack.c.l.bf16 %v1036_v53  ;;  %v1038_v1 = vld [vmem:[%s14858_s0 + $0x3c] sm:$0xe] }
  0x2a   :  { %9036 = vrot.lane.b32.xlu1 %v9035_v6, %s9835_s15  ;;  %v9040_v16 = vpack.i.bf16 %v1223_v11, %v1221_v7  ;;  %v1536_v17 = vunpack.c.l.bf16 %v1476_v4  ;;  %v1661_v18 = vrot.slane %v1534_v9, 4  ;;  %v1537_v19 = vunpack.c.l.bf16 %v1477_v5  ;;  %v1040_v6 = vld [vmem:[%s14858_s0 + $0x44] sm:$0x3]  ;;  %v1041_v7 = vld [vmem:[%s14858_s0 + $0x48] sm:$0xe] }
  0x2b   :  { %v1226_v21 = vsel %vm1203_vm2, %v1224_v8, %v1225_v12  ;;  %v1228_v22 = vsel %vm1203_vm2, %v1225_v12, %v1227_v13  ;;  %v1662_v23 = vrot.slane %v1535_v14, 4  ;;  %v1538_v24 = vunpack.c.l.bf16 %v10058_v10 }
  0x2c   :  { %9041 = vrot.lane.b32.xlu0 %v9040_v16, %s9837_s13  ;;  %v9045_v27 = vpack.i.bf16 %v1228_v22, %v1226_v21  ;;  %v1664_v28 = vrot.slane %v1536_v17, 4  ;;  %v1539_v29 = vunpack.c.l.bf16 %v1479_v15  ;;  %v1666_v30 = vrot.slane %v1537_v19, 4  ;;  %v1042_v16 = vld [vmem:[%s14858_s0 + $0x40] ss:$12 sps:$4 sm:$0xff]   ;;  %v1043_v17 = vld [vmem:[%s14858_s0 + $0x50] sm:$0x3] }
  0x2d   :  { %v1663_v31 = vsel %vm1645_vm3, %v1661_v18, %v1662_v23  ;;  %v1667_v32 = vrot.slane %v1538_v24, 4  ;;  %v214_v33 = vunpack.c.l.bf16 %v154_v20  ;;  %v215_v34 = vunpack.c.h.bf16 %v154_v20  ;;  %v1480_v22 = vld [vmem:[%s14858_s0 + $0x3c] sm:$0xc] }
  0x2e   :  { %9046 = vrot.lane.b32.xlu1 %v9045_v27, %s9837_s13  ;;  %v1665_v36 = vsel %vm1645_vm3, %v1662_v23, %v1664_v28  ;;  %v1669_v37 = vrot.slane %v1539_v29, 4  ;;  %v216_v38 = vunpack.c.l.bf16 %v156_v25  ;;  %v8301_v39 = vunpack.c.l.bf16 %v8418_v26 }
  0x2f   :  { %v9050_v41 = vpack.i.bf16 %v1665_v36, %v1663_v31  ;;  %v1668_v42 = vsel %vm1645_vm3, %v1666_v30, %v1667_v32  ;;  %v345_v43 = vrot.slane %v214_v33, 1  ;;  %v346_v44 = vrot.slane %v215_v34, 1  ;;  %v1482_v31 = vld [vmem:[%s14858_s0 + $0x44] sm:$0x3] }
  0x30   :  { %v1670_v45 = vsel %vm1645_vm3, %v1667_v32, %v1669_v37  ;;  %v348_v46 = vrot.slane %v216_v38, 1  ;;  %v8302_v47 = vunpack.c.h.bf16 %v8418_v26  ;;  %v219_v48 = vunpack.c.l.bf16 %v159_v35  ;;  %v1483_v32 = vld [vmem:[%s14858_s0 + $0x48] sm:$0xc]  ;;  %v10143_v37 = vld [vmem:[%s14858_s0 + $0x4c] ss:$12 sps:$4 sm:$0xff]  }
  0x31   :  { %9051 = vrot.lane.b32.xlu0 %v9050_v41, %s9838_s6  ;;  %v9055_v51 = vpack.i.bf16 %v1670_v45, %v1668_v42  ;;  %v347_v52 = vsel %vm319_vm1, %v345_v43, %v346_v44  ;;  %v350_v53 = vrot.slane %v8301_v39, 1  ;;  %v656_v54 = vunpack.c.l.bf16 %v596_v40  ;;  %v1485_v42 = vld [vmem:[%s14858_s0 + $0x50] sm:$0x3] }
  0x32   :  { %v349_v56 = vsel %vm319_vm1, %v346_v44, %v348_v46  ;;  %v351_v57 = vrot.slane %v8302_v47, 1  ;;  %v353_v58 = vrot.slane %v219_v48, 1  ;;  %v657_v59 = vunpack.c.h.bf16 %v10058_v10  ;;  %v160_v47 = vld [vmem:[%s14858_s0 + $0x54] sm:$0xff]  }
  0x33   :  { %9056 = vrot.lane.b32.xlu1 %v9055_v51, %s9838_s6  ;;  %v9060_v61 = vpack.i.bf16 %v349_v56, %v347_v52  ;;  %v658_v62 = vunpack.c.l.bf16 %v598_v49  ;;  %v787_v63 = vrot.slane %v656_v54, 2  ;;  %v659_v0 = vunpack.c.l.bf16 %v599_v50  ;;  %v162_v52 = vld [vmem:[%s14858_s0 + $0x5c] sm:$0x1] }
  0x34   :  { %v352_v2 = vsel %vm319_vm1, %v350_v53, %v351_v57  ;;  %v354_v3 = vsel %vm319_vm1, %v351_v57, %v353_v58  ;;  %v788_v4 = vrot.slane %v657_v59, 2  ;;  %v660_v5 = vunpack.c.h.bf16 %v600_v55  ;;  %v8419_v53 = vld [vmem:[%s14858_s0 + $0x60] sm:$0xff]  }
  0x35   :  { %9061 = vrot.lane.b32.xlu0 %v9060_v61, %s9836_s18  ;;  %v9065_v8 = vpack.i.bf16 %v354_v3, %v352_v2  ;;  %v790_v9 = vrot.slane %v658_v62, 2  ;;  %v661_v10 = vunpack.c.l.bf16 %v601_v60  ;;  %v792_v11 = vrot.slane %v659_v0, 2  ;;  %v165_v62 = vld [vmem:[%s14858_s0 + $0x68] sm:$0x1]  ;;  %v602_v3 = vld [vmem:[%s14858_s0 + $0x54] sm:$0xe] }
  0x36   :  { %v789_v12 = vsel %vm761_vm0, %v787_v63, %v788_v4  ;;  %v793_v13 = vrot.slane %v660_v5, 2  ;;  %v1098_v14 = vunpack.c.l.bf16 %v1038_v1  ;;  %v1099_v15 = vunpack.c.l.bf16 %v600_v55 }
  0x37   :  { %9066 = vrot.lane.b32.xlu1 %v9065_v8, %s9836_s18  ;;  %v791_v18 = vsel %vm761_vm0, %v788_v4, %v790_v9  ;;  %v795_v19 = vrot.slane %v661_v10, 2  ;;  %v1100_v20 = vunpack.c.l.bf16 %v1040_v6  ;;  %v1101_v21 = vunpack.c.l.bf16 %v1041_v7 }
  0x38   :  { %v9070_v23 = vpack.i.bf16 %v791_v18, %v789_v12  ;;  %v794_v24 = vsel %vm761_vm0, %v792_v11, %v793_v13  ;;  %v1229_v25 = vrot.slane %v1098_v14, 3  ;;  %v1230_v26 = vrot.slane %v1099_v15, 3  ;;  %v604_v12 = vld [vmem:[%s14858_s0 + $0x5c] sm:$0x1]  ;;  %v606_v18 = vld [vmem:[%s14858_s0 + $0x58] ss:$12 sps:$4 sm:$0xff]  }
  0x39   :  { %v796_v27 = vsel %vm761_vm0, %v793_v13, %v795_v19  ;;  %v1232_v28 = vrot.slane %v1100_v20, 3  ;;  %v1102_v29 = vunpack.c.h.bf16 %v1042_v16  ;;  %v1103_v30 = vunpack.c.l.bf16 %v1043_v17  ;;  %v605_v13 = vld [vmem:[%s14858_s0 + $0x60] sm:$0xe] }
  0x3a   :  { %9071 = vrot.lane.b32.xlu0 %v9070_v23, %s9835_s15  ;;  %v9075_v33 = vpack.i.bf16 %v796_v27, %v794_v24  ;;  %v1231_v34 = vsel %vm1203_vm2, %v1229_v25, %v1230_v26  ;;  %v1234_v35 = vrot.slane %v1101_v21, 3  ;;  %v1540_v36 = vunpack.c.l.bf16 %v1480_v22  ;;  %v607_v23 = vld [vmem:[%s14858_s0 + $0x68] sm:$0x1] }
  0x3b   :  { %v1233_v38 = vsel %vm1203_vm2, %v1230_v26, %v1232_v28  ;;  %v1235_v39 = vrot.slane %v1102_v29, 3  ;;  %v1237_v40 = vrot.slane %v1103_v30, 3  ;;  %v1541_v41 = vunpack.c.l.bf16 %v1042_v16  ;;  %v1044_v28 = vld [vmem:[%s14858_s0 + $0x54] sm:$0xe] }
  0x3c   :  { %9076 = vrot.lane.b32.xlu1 %v9075_v33, %s9835_s15  ;;  %v9080_v43 = vpack.i.bf16 %v1233_v38, %v1231_v34  ;;  %v1542_v44 = vunpack.c.l.bf16 %v1482_v31  ;;  %v1671_v45 = vrot.slane %v1540_v36, 4  ;;  %v1543_v46 = vunpack.c.l.bf16 %v1483_v32  ;;  %v1046_v33 = vld [vmem:[%s14858_s0 + $0x5c] sm:$0x3]  ;;  %v1047_v34 = vld [vmem:[%s14858_s0 + $0x60] sm:$0xe] }
  0x3d   :  { %v1236_v48 = vsel %vm1203_vm2, %v1234_v35, %v1235_v39  ;;  %v1238_v49 = vsel %vm1203_vm2, %v1235_v39, %v1237_v40  ;;  %v1672_v50 = vrot.slane %v1541_v41, 4  ;;  %v1544_v51 = vunpack.c.l.bf16 %v10143_v37 }
  0x3e   :  { %9081 = vrot.lane.b32.xlu0 %v9080_v43, %s9837_s13  ;;  %v9085_v54 = vpack.i.bf16 %v1238_v49, %v1236_v48  ;;  %v1674_v55 = vrot.slane %v1542_v44, 4  ;;  %v1545_v56 = vunpack.c.l.bf16 %v1485_v42  ;;  %v1676_v57 = vrot.slane %v1543_v46, 4  ;;  %v1048_v43 = vld [vmem:[%s14858_s0 + $0x58] ss:$12 sps:$4 sm:$0xff]   ;;  %v1049_v44 = vld [vmem:[%s14858_s0 + $0x68] sm:$0x3] }
  0x3f   :  { %v1673_v58 = vsel %vm1645_vm3, %v1671_v45, %v1672_v50  ;;  %v1677_v59 = vrot.slane %v1544_v51, 4  ;;  %v220_v60 = vunpack.c.l.bf16 %v160_v47  ;;  %v221_v61 = vunpack.c.h.bf16 %v160_v47  ;;  %v1486_v49 = vld [vmem:[%s14858_s0 + $0x54] sm:$0xc] }
  0x40   :  { %9086 = vrot.lane.b32.xlu1 %v9085_v54, %s9837_s13  ;;  %v1675_v63 = vsel %vm1645_vm3, %v1672_v50, %v1674_v55  ;;  %v1679_v0 = vrot.slane %v1545_v56, 4  ;;  %v222_v1 = vunpack.c.l.bf16 %v162_v52  ;;  %v8305_v2 = vunpack.c.l.bf16 %v8419_v53 }
  0x41   :  { %v9090_v4 = vpack.i.bf16 %v1675_v63, %v1673_v58  ;;  %v1678_v5 = vsel %vm1645_vm3, %v1676_v57, %v1677_v59  ;;  %v355_v6 = vrot.slane %v220_v60, 1  ;;  %v356_v7 = vrot.slane %v221_v61, 1  ;;  %v1488_v58 = vld [vmem:[%s14858_s0 + $0x5c] sm:$0x3] }
  0x42   :  { %v1680_v8 = vsel %vm1645_vm3, %v1677_v59, %v1679_v0  ;;  %v358_v9 = vrot.slane %v222_v1, 1  ;;  %v8306_v10 = vunpack.c.h.bf16 %v8419_v53  ;;  %v225_v11 = vunpack.c.l.bf16 %v165_v62  ;;  %v1489_v59 = vld [vmem:[%s14858_s0 + $0x60] sm:$0xc]  ;;  %v10228_v0 = vld [vmem:[%s14858_s0 + $0x64] ss:$12 sps:$4 sm:$0xff]  }
  0x43   :  { %9091 = vrot.lane.b32.xlu0 %v9090_v4, %s9838_s6  ;;  %v9095_v14 = vpack.i.bf16 %v1680_v8, %v1678_v5  ;;  %v357_v15 = vsel %vm319_vm1, %v355_v6, %v356_v7  ;;  %v360_v16 = vrot.slane %v8305_v2, 1  ;;  %v662_v17 = vunpack.c.l.bf16 %v602_v3  ;;  %v1491_v1 = vld [vmem:[%s14858_s0 + $0x68] sm:$0x3] }
  0x44   :  { %v359_v19 = vsel %vm319_vm1, %v356_v7, %v358_v9  ;;  %v361_v20 = vrot.slane %v8306_v10, 1  ;;  %v363_v21 = vrot.slane %v225_v11, 1  ;;  %v663_v22 = vunpack.c.h.bf16 %v10143_v37  ;;  %v166_v10 = vld [vmem:[%s14858_s0 + $0x6c] sm:$0xff]  }
  0x45   :  { %9096 = vrot.lane.b32.xlu1 %v9095_v14, %s9838_s6  ;;  %v9100_v24 = vpack.i.bf16 %v359_v19, %v357_v15  ;;  %v664_v25 = vunpack.c.l.bf16 %v604_v12  ;;  %v797_v26 = vrot.slane %v662_v17, 2  ;;  %v665_v27 = vunpack.c.l.bf16 %v605_v13  ;;  %v168_v15 = vld [vmem:[%s14858_s0 + $0x74] sm:$0x1] }
  0x46   :  { %v362_v29 = vsel %vm319_vm1, %v360_v16, %v361_v20  ;;  %v364_v30 = vsel %vm319_vm1, %v361_v20, %v363_v21  ;;  %v798_v31 = vrot.slane %v663_v22, 2  ;;  %v666_v32 = vunpack.c.h.bf16 %v606_v18  ;;  %v8420_v16 = vld [vmem:[%s14858_s0 + $0x78] sm:$0xff]  }
  0x47   :  { %9101 = vrot.lane.b32.xlu0 %v9100_v24, %s9836_s18  ;;  %v9105_v35 = vpack.i.bf16 %v364_v30, %v362_v29  ;;  %v800_v36 = vrot.slane %v664_v25, 2  ;;  %v667_v37 = vunpack.c.l.bf16 %v607_v23  ;;  %v802_v38 = vrot.slane %v665_v27, 2  ;;  %v171_v25 = vld [vmem:[%s14858_s0 + $0x80] sm:$0x1]  ;;  %v608_v30 = vld [vmem:[%s14858_s0 + $0x6c] sm:$0xe] }
  0x48   :  { %v799_v39 = vsel %vm761_vm0, %v797_v26, %v798_v31  ;;  %v803_v40 = vrot.slane %v666_v32, 2  ;;  %v1104_v41 = vunpack.c.l.bf16 %v1044_v28  ;;  %v1105_v42 = vunpack.c.l.bf16 %v606_v18 }
  0x49   :  { %9106 = vrot.lane.b32.xlu1 %v9105_v35, %s9836_s18  ;;  %v801_v45 = vsel %vm761_vm0, %v798_v31, %v800_v36  ;;  %v805_v46 = vrot.slane %v667_v37, 2  ;;  %v1106_v47 = vunpack.c.l.bf16 %v1046_v33  ;;  %v1107_v48 = vunpack.c.l.bf16 %v1047_v34 }
  0x4a   :  { %v9110_v50 = vpack.i.bf16 %v801_v45, %v799_v39  ;;  %v804_v51 = vsel %vm761_vm0, %v802_v38, %v803_v40  ;;  %v1239_v52 = vrot.slane %v1104_v41, 3  ;;  %v1240_v53 = vrot.slane %v1105_v42, 3  ;;  %v610_v39 = vld [vmem:[%s14858_s0 + $0x74] sm:$0x1]  ;;  %v612_v45 = vld [vmem:[%s14858_s0 + $0x70] ss:$12 sps:$4 sm:$0xff]  }
  0x4b   :  { %v806_v54 = vsel %vm761_vm0, %v803_v40, %v805_v46  ;;  %v1242_v55 = vrot.slane %v1106_v47, 3  ;;  %v1108_v56 = vunpack.c.h.bf16 %v1048_v43  ;;  %v1109_v57 = vunpack.c.l.bf16 %v1049_v44  ;;  %v611_v40 = vld [vmem:[%s14858_s0 + $0x78] sm:$0xe] }
  0x4c   :  { %9111 = vrot.lane.b32.xlu0 %v9110_v50, %s9835_s15  ;;  %v9115_v60 = vpack.i.bf16 %v806_v54, %v804_v51  ;;  %v1241_v61 = vsel %vm1203_vm2, %v1239_v52, %v1240_v53  ;;  %v1244_v62 = vrot.slane %v1107_v48, 3  ;;  %v1546_v63 = vunpack.c.l.bf16 %v1486_v49  ;;  %v613_v50 = vld [vmem:[%s14858_s0 + $0x80] sm:$0x1] }
  0x4d   :  { %v1243_v2 = vsel %vm1203_vm2, %v1240_v53, %v1242_v55  ;;  %v1245_v3 = vrot.slane %v1108_v56, 3  ;;  %v1247_v4 = vrot.slane %v1109_v57, 3  ;;  %v1547_v5 = vunpack.c.l.bf16 %v1048_v43  ;;  %v1050_v55 = vld [vmem:[%s14858_s0 + $0x6c] sm:$0xe] }
  0x4e   :  { %9116 = vrot.lane.b32.xlu1 %v9115_v60, %s9835_s15  ;;  %v9120_v6 = vpack.i.bf16 %v1243_v2, %v1241_v61  ;;  %v1548_v7 = vunpack.c.l.bf16 %v1488_v58  ;;  %v1681_v8 = vrot.slane %v1546_v63, 4  ;;  %v1549_v9 = vunpack.c.l.bf16 %v1489_v59  ;;  %v1052_v60 = vld [vmem:[%s14858_s0 + $0x74] sm:$0x3]  ;;  %v1053_v61 = vld [vmem:[%s14858_s0 + $0x78] sm:$0xe] }
  0x4f   :  { %v1246_v11 = vsel %vm1203_vm2, %v1244_v62, %v1245_v3  ;;  %v1248_v12 = vsel %vm1203_vm2, %v1245_v3, %v1247_v4  ;;  %v1682_v13 = vrot.slane %v1547_v5, 4  ;;  %v1550_v14 = vunpack.c.l.bf16 %v10228_v0 }
  0x50   :  { %9121 = vrot.lane.b32.xlu0 %v9120_v6, %s9837_s13  ;;  %v9125_v17 = vpack.i.bf16 %v1248_v12, %v1246_v11  ;;  %v1684_v18 = vrot.slane %v1548_v7, 4  ;;  %v1551_v19 = vunpack.c.l.bf16 %v1491_v1  ;;  %v1686_v20 = vrot.slane %v1549_v9, 4  ;;  %v1054_v6 = vld [vmem:[%s14858_s0 + $0x70] ss:$12 sps:$4 sm:$0xff]   ;;  %v1055_v7 = vld [vmem:[%s14858_s0 + $0x80] sm:$0x3] }
  0x51   :  { %v1683_v21 = vsel %vm1645_vm3, %v1681_v8, %v1682_v13  ;;  %v1687_v22 = vrot.slane %v1550_v14, 4  ;;  %v226_v23 = vunpack.c.l.bf16 %v166_v10  ;;  %v227_v24 = vunpack.c.h.bf16 %v166_v10  ;;  %v1492_v12 = vld [vmem:[%s14858_s0 + $0x6c] sm:$0xc] }
  0x52   :  { %9126 = vrot.lane.b32.xlu1 %v9125_v17, %s9837_s13  ;;  %v1685_v26 = vsel %vm1645_vm3, %v1682_v13, %v1684_v18  ;;  %v1689_v27 = vrot.slane %v1551_v19, 4  ;;  %v228_v28 = vunpack.c.l.bf16 %v168_v15  ;;  %v8309_v29 = vunpack.c.l.bf16 %v8420_v16 }
  0x53   :  { %v9130_v31 = vpack.i.bf16 %v1685_v26, %v1683_v21  ;;  %v1688_v32 = vsel %vm1645_vm3, %v1686_v20, %v1687_v22  ;;  %v365_v33 = vrot.slane %v226_v23, 1  ;;  %v366_v34 = vrot.slane %v227_v24, 1  ;;  %v1494_v21 = vld [vmem:[%s14858_s0 + $0x74] sm:$0x3] }
  0x54   :  { %v1690_v35 = vsel %vm1645_vm3, %v1687_v22, %v1689_v27  ;;  %v368_v36 = vrot.slane %v228_v28, 1  ;;  %v8310_v37 = vunpack.c.h.bf16 %v8420_v16  ;;  %v231_v38 = vunpack.c.l.bf16 %v171_v25  ;;  %v1495_v22 = vld [vmem:[%s14858_s0 + $0x78] sm:$0xc]  ;;  %v10313_v27 = vld [vmem:[%s14858_s0 + $0x7c] ss:$12 sps:$4 sm:$0xff]  }
  0x55   :  { %9131 = vrot.lane.b32.xlu0 %v9130_v31, %s9838_s6  ;;  %v9135_v41 = vpack.i.bf16 %v1690_v35, %v1688_v32  ;;  %v367_v42 = vsel %vm319_vm1, %v365_v33, %v366_v34  ;;  %v370_v43 = vrot.slane %v8309_v29, 1  ;;  %v668_v44 = vunpack.c.l.bf16 %v608_v30  ;;  %v1497_v32 = vld [vmem:[%s14858_s0 + $0x80] sm:$0x3] }
  0x56   :  { %v369_v46 = vsel %vm319_vm1, %v366_v34, %v368_v36  ;;  %v371_v47 = vrot.slane %v8310_v37, 1  ;;  %v373_v48 = vrot.slane %v231_v38, 1  ;;  %v669_v49 = vunpack.c.h.bf16 %v10228_v0  ;;  %v172_v37 = vld [vmem:[%s14858_s0 + $0x84] sm:$0xff]  }
  0x57   :  { %9136 = vrot.lane.b32.xlu1 %v9135_v41, %s9838_s6  ;;  %v9140_v51 = vpack.i.bf16 %v369_v46, %v367_v42  ;;  %v670_v52 = vunpack.c.l.bf16 %v610_v39  ;;  %v807_v53 = vrot.slane %v668_v44, 2  ;;  %v671_v54 = vunpack.c.l.bf16 %v611_v40  ;;  %v174_v42 = vld [vmem:[%s14858_s0 + $0x8c] sm:$0x1] }
  0x58   :  { %v372_v56 = vsel %vm319_vm1, %v370_v43, %v371_v47  ;;  %v374_v57 = vsel %vm319_vm1, %v371_v47, %v373_v48  ;;  %v808_v58 = vrot.slane %v669_v49, 2  ;;  %v672_v59 = vunpack.c.h.bf16 %v612_v45  ;;  %v8421_v43 = vld [vmem:[%s14858_s0 + $0x90] sm:$0xff]   ;;  %v177_v48 = vld [vmem:[%s14858_s0 + $0x98] sm:$0x1]  ;;  %v614_v49 = vld [vmem:[%s14858_s0 + $0x84] sm:$0xe] }
  0x59   :  { %9141 = vrot.lane.b32.xlu0 %v9140_v51, %s9836_s18  ;;  %v9145_v62 = vpack.i.bf16 %v374_v57, %v372_v56  ;;  %v810_v63 = vrot.slane %v670_v52, 2  ;;  %v673_v0 = vunpack.c.l.bf16 %v613_v50  ;;  %v812_v1 = vrot.slane %v671_v54, 2 }
  0x5a   :  { %v809_v2 = vsel %vm761_vm0, %v807_v53, %v808_v58  ;;  %v813_v3 = vrot.slane %v672_v59, 2  ;;  %v1110_v4 = vunpack.c.l.bf16 %v1050_v55  ;;  %v1111_v5 = vunpack.c.l.bf16 %v612_v45 }
  0x5b   :  { %9146 = vrot.lane.b32.xlu1 %v9145_v62, %s9836_s18  ;;  %v811_v8 = vsel %vm761_vm0, %v808_v58, %v810_v63  ;;  %v815_v9 = vrot.slane %v673_v0, 2  ;;  %v1112_v10 = vunpack.c.l.bf16 %v1052_v60  ;;  %v1113_v11 = vunpack.c.l.bf16 %v1053_v61  ;;  %v616_v62 = vld [vmem:[%s14858_s0 + $0x8c] sm:$0x1]  ;;  %v617_v63 = vld [vmem:[%s14858_s0 + $0x90] sm:$0xe] }
  0x5c   :  { %v9150_v13 = vpack.i.bf16 %v811_v8, %v809_v2  ;;  %v814_v14 = vsel %vm761_vm0, %v812_v1, %v813_v3  ;;  %v1249_v15 = vrot.slane %v1110_v4, 3  ;;  %v1250_v16 = vrot.slane %v1111_v5, 3  ;;  %v618_v4 = vld [vmem:[%s14858_s0 + $0x88] ss:$12 sps:$4 sm:$0xff]  }
  0x5d   :  { %v816_v17 = vsel %vm761_vm0, %v813_v3, %v815_v9  ;;  %v1252_v18 = vrot.slane %v1112_v10, 3  ;;  %v1114_v19 = vunpack.c.h.bf16 %v1054_v6  ;;  %v1115_v20 = vunpack.c.l.bf16 %v1055_v7  ;;  %v619_v9 = vld [vmem:[%s14858_s0 + $0x98] sm:$0x1]  ;;  %v1056_v10 = vld [vmem:[%s14858_s0 + $0x84] sm:$0xe] }
  0x5e   :  { %9151 = vrot.lane.b32.xlu0 %v9150_v13, %s9835_s15  ;;  %v9155_v23 = vpack.i.bf16 %v816_v17, %v814_v14  ;;  %v1251_v24 = vsel %vm1203_vm2, %v1249_v15, %v1250_v16  ;;  %v1254_v25 = vrot.slane %v1113_v11, 3  ;;  %v1552_v26 = vunpack.c.l.bf16 %v1492_v12  ;;  %v1058_v15 = vld [vmem:[%s14858_s0 + $0x8c] sm:$0x3] }
  0x5f   :  { %v1253_v28 = vsel %vm1203_vm2, %v1250_v16, %v1252_v18  ;;  %v1255_v29 = vrot.slane %v1114_v19, 3  ;;  %v1257_v30 = vrot.slane %v1115_v20, 3  ;;  %v1553_v31 = vunpack.c.l.bf16 %v1054_v6  ;;  %v1059_v16 = vld [vmem:[%s14858_s0 + $0x90] sm:$0xe] }
  0x60   :  { %9156 = vrot.lane.b32.xlu1 %v9155_v23, %s9835_s15  ;;  %v9160_v33 = vpack.i.bf16 %v1253_v28, %v1251_v24  ;;  %v1554_v34 = vunpack.c.l.bf16 %v1494_v21  ;;  %v1691_v35 = vrot.slane %v1552_v26, 4  ;;  %v1555_v36 = vunpack.c.l.bf16 %v1495_v22 }
  0x61   :  { %v1256_v38 = vsel %vm1203_vm2, %v1254_v25, %v1255_v29  ;;  %v1258_v39 = vsel %vm1203_vm2, %v1255_v29, %v1257_v30  ;;  %v1692_v40 = vrot.slane %v1553_v31, 4  ;;  %v1556_v41 = vunpack.c.l.bf16 %v10313_v27  ;;  %v1060_v29 = vld [vmem:[%s14858_s0 + $0x88] ss:$12 sps:$4 sm:$0xff]   ;;  %v1061_v30 = vld [vmem:[%s14858_s0 + $0x98] sm:$0x3] }
  0x62   :  { %9161 = vrot.lane.b32.xlu0 %v9160_v33, %s9837_s13  ;;  %v9165_v44 = vpack.i.bf16 %v1258_v39, %v1256_v38  ;;  %v1694_v45 = vrot.slane %v1554_v34, 4  ;;  %v1557_v46 = vunpack.c.l.bf16 %v1497_v32  ;;  %v1696_v47 = vrot.slane %v1555_v36, 4  ;;  %v1498_v39 = vld [vmem:[%s14858_s0 + $0x84] sm:$0xc] }
  0x63   :  { %v1693_v50 = vsel %vm1645_vm3, %v1691_v35, %v1692_v40  ;;  %v1697_v51 = vrot.slane %v1556_v41, 4  ;;  %v232_v52 = vunpack.c.l.bf16 %v172_v37  ;;  %v233_v53 = vunpack.c.h.bf16 %v172_v37 }
  0x64   :  { %9166 = vrot.lane.b32.xlu1 %v9165_v44, %s9837_s13  ;;  %v1695_v54 = vsel %vm1645_vm3, %v1692_v40, %v1694_v45  ;;  %v1699_v55 = vrot.slane %v1557_v46, 4  ;;  %v234_v56 = vunpack.c.l.bf16 %v174_v42  ;;  %v8313_v57 = vunpack.c.l.bf16 %v8421_v43 }
  0x65   :  { %v9170_v58 = vpack.i.bf16 %v1695_v54, %v1693_v50  ;;  %v1698_v59 = vsel %vm1645_vm3, %v1696_v47, %v1697_v51  ;;  %v375_v60 = vrot.slane %v232_v52, 1  ;;  %v376_v61 = vrot.slane %v233_v53, 1  ;;  %v10398_v54 = vld [vmem:[%s14858_s0 + $0x94] ss:$12 sps:$4 sm:$0xff]  }
  0x66   :  { %v1700_v0 = vsel %vm1645_vm3, %v1697_v51, %v1699_v55  ;;  %v378_v1 = vrot.slane %v234_v56, 1  ;;  %v8314_v2 = vunpack.c.h.bf16 %v8421_v43  ;;  %v237_v3 = vunpack.c.l.bf16 %v177_v48  ;;  %v1500_v48 = vld [vmem:[%s14858_s0 + $0x8c] sm:$0x3] }
  0x67   :  { %9171 = vrot.lane.b32.xlu0 %v9170_v58, %s9838_s6  ;;  %v9175_v5 = vpack.i.bf16 %v1700_v0, %v1698_v59  ;;  %v377_v6 = vsel %vm319_vm1, %v375_v60, %v376_v61  ;;  %v380_v7 = vrot.slane %v8313_v57, 1  ;;  %v674_v8 = vunpack.c.l.bf16 %v614_v49  ;;  %v1501_v49 = vld [vmem:[%s14858_s0 + $0x90] sm:$0xc]  ;;  %v1503_v59 = vld [vmem:[%s14858_s0 + $0x98] sm:$0x3]  ;;  %v178_v0 = vld [vmem:[%s14858_s0 + $0x9c] sm:$0xff]  }
  0x68   :  { %v379_v11 = vsel %vm319_vm1, %v376_v61, %v378_v1  ;;  %v381_v12 = vrot.slane %v8314_v2, 1  ;;  %v383_v13 = vrot.slane %v237_v3, 1  ;;  %v675_v14 = vunpack.c.h.bf16 %v10313_v27 }
  0x69   :  { %9176 = vrot.lane.b32.xlu1 %v9175_v5, %s9838_s6  ;;  %v9180_v17 = vpack.i.bf16 %v379_v11, %v377_v6  ;;  %v676_v18 = vunpack.c.l.bf16 %v616_v62  ;;  %v817_v19 = vrot.slane %v674_v8, 2  ;;  %v677_v20 = vunpack.c.l.bf16 %v617_v63  ;;  %v180_v5 = vld [vmem:[%s14858_s0 + $0xa4] sm:$0x1]  ;;  %v8422_v6 = vld [vmem:[%s14858_s0 + $0xa8] sm:$0xff]  }
  0x6a   :  { %v382_v21 = vsel %vm319_vm1, %v380_v7, %v381_v12  ;;  %v384_v22 = vsel %vm319_vm1, %v381_v12, %v383_v13  ;;  %v818_v23 = vrot.slane %v675_v14, 2  ;;  %v678_v24 = vunpack.c.h.bf16 %v618_v4 }
  0x6b   :  { %9181 = vrot.lane.b32.xlu0 %v9180_v17, %s9836_s18  ;;  %v9185_v25 = vpack.i.bf16 %v384_v22, %v382_v21  ;;  %v820_v26 = vrot.slane %v676_v18, 2  ;;  %v679_v27 = vunpack.c.l.bf16 %v619_v9  ;;  %v822_v28 = vrot.slane %v677_v20, 2  ;;  %v620_v20 = vld [vmem:[%s14858_s0 + $0x9c] sm:$0xe] }
  0x6c   :  { %v819_v31 = vsel %vm761_vm0, %v817_v19, %v818_v23  ;;  %v823_v32 = vrot.slane %v678_v24, 2  ;;  %v1116_v33 = vunpack.c.l.bf16 %v1056_v10  ;;  %v1117_v34 = vunpack.c.l.bf16 %v618_v4 }
  0x6d   :  { %9186 = vrot.lane.b32.xlu1 %v9185_v25, %s9836_s18  ;;  %v821_v35 = vsel %vm761_vm0, %v818_v23, %v820_v26  ;;  %v825_v36 = vrot.slane %v679_v27, 2  ;;  %v1118_v37 = vunpack.c.l.bf16 %v1058_v15  ;;  %v1119_v38 = vunpack.c.l.bf16 %v1059_v16  ;;  %v183_v15 = vld [vmem:[%s14858_s0 + $0xb0] sm:$0x1] }
  0x6e   :  { %v9190_v40 = vpack.i.bf16 %v821_v35, %v819_v31  ;;  %v824_v41 = vsel %vm761_vm0, %v822_v28, %v823_v32  ;;  %v1259_v42 = vrot.slane %v1116_v33, 3  ;;  %v1260_v43 = vrot.slane %v1117_v34, 3  ;;  %v624_v35 = vld [vmem:[%s14858_s0 + $0xa0] ss:$12 sps:$4 sm:$0xff]  }
  0x6f   :  { %v826_v44 = vsel %vm761_vm0, %v823_v32, %v825_v36  ;;  %v1262_v45 = vrot.slane %v1118_v37, 3  ;;  %v1120_v46 = vunpack.c.h.bf16 %v1060_v29  ;;  %v1121_v47 = vunpack.c.l.bf16 %v1061_v30  ;;  %v623_v30 = vld [vmem:[%s14858_s0 + $0xa8] sm:$0xe] }
  0x70   :  { %9191 = vrot.lane.b32.xlu0 %v9190_v40, %s9835_s15  ;;  %v9195_v50 = vpack.i.bf16 %v826_v44, %v824_v41  ;;  %v1261_v51 = vsel %vm1203_vm2, %v1259_v42, %v1260_v43  ;;  %v1264_v52 = vrot.slane %v1119_v38, 3  ;;  %v1558_v53 = vunpack.c.l.bf16 %v1498_v39  ;;  %v625_v40 = vld [vmem:[%s14858_s0 + $0xb0] sm:$0x1] }
  0x71   :  { %v1263_v55 = vsel %vm1203_vm2, %v1260_v43, %v1262_v45  ;;  %v1265_v56 = vrot.slane %v1120_v46, 3  ;;  %v1267_v57 = vrot.slane %v1121_v47, 3  ;;  %v1559_v58 = vunpack.c.l.bf16 %v1060_v29  ;;  %v622_v29 = vld [vmem:[%s14858_s0 + $0xa4] sm:$0x1]  ;;  %v1062_v45 = vld [vmem:[%s14858_s0 + $0x9c] sm:$0xe] }
  0x72   :  { %9196 = vrot.lane.b32.xlu1 %v9195_v50, %s9835_s15  ;;  %v9200_v60 = vpack.i.bf16 %v1263_v55, %v1261_v51  ;;  %v1560_v61 = vunpack.c.l.bf16 %v1500_v48  ;;  %v1701_v62 = vrot.slane %v1558_v53, 4  ;;  %v1561_v63 = vunpack.c.l.bf16 %v1501_v49  ;;  %v1064_v51 = vld [vmem:[%s14858_s0 + $0xa4] sm:$0x3] }
  0x73   :  { %v1266_v1 = vsel %vm1203_vm2, %v1264_v52, %v1265_v56  ;;  %v1268_v2 = vsel %vm1203_vm2, %v1265_v56, %v1267_v57  ;;  %v1702_v3 = vrot.slane %v1559_v58, 4  ;;  %v1562_v4 = vunpack.c.l.bf16 %v10398_v54  ;;  %v1065_v52 = vld [vmem:[%s14858_s0 + $0xa8] sm:$0xe] }
  0x74   :  { %9201 = vrot.lane.b32.xlu0 %v9200_v60, %s9837_s13  ;;  %v9205_v7 = vpack.i.bf16 %v1268_v2, %v1266_v1  ;;  %v1704_v8 = vrot.slane %v1560_v61, 4  ;;  %v1563_v9 = vunpack.c.l.bf16 %v1503_v59  ;;  %v1706_v10 = vrot.slane %v1561_v63, 4  ;;  %v1067_v63 = vld [vmem:[%s14858_s0 + $0xb0] sm:$0x3] }
  0x75   :  { %v1703_v11 = vsel %vm1645_vm3, %v1701_v62, %v1702_v3  ;;  %v1707_v12 = vrot.slane %v1562_v4, 4  ;;  %v238_v13 = vunpack.c.l.bf16 %v178_v0  ;;  %v239_v14 = vunpack.c.h.bf16 %v178_v0  ;;  %v1066_v62 = vld [vmem:[%s14858_s0 + $0xa0] ss:$12 sps:$4 sm:$0xff]  }
  0x76   :  { %9206 = vrot.lane.b32.xlu1 %v9205_v7, %s9837_s13  ;;  %v1705_v16 = vsel %vm1645_vm3, %v1702_v3, %v1704_v8  ;;  %v1709_v17 = vrot.slane %v1563_v9, 4  ;;  %v240_v18 = vunpack.c.l.bf16 %v180_v5  ;;  %v8317_v19 = vunpack.c.l.bf16 %v8422_v6 }
  0x77   :  { %v9210_v21 = vpack.i.bf16 %v1705_v16, %v1703_v11  ;;  %v1708_v22 = vsel %vm1645_vm3, %v1706_v10, %v1707_v12  ;;  %v385_v23 = vrot.slane %v238_v13, 1  ;;  %v386_v24 = vrot.slane %v239_v14, 1 }
  0x78   :  { %v1710_v25 = vsel %vm1645_vm3, %v1707_v12, %v1709_v17  ;;  %v388_v26 = vrot.slane %v240_v18, 1  ;;  %v8318_v27 = vunpack.c.h.bf16 %v8422_v6  ;;  %v243_v28 = vunpack.c.l.bf16 %v183_v15  ;;  %v20_v18 = vld [vmem:[%s14858_s0 + $0xc] sm:$0xff]  }
  0x79   :  { %9211 = vrot.lane.b32.xlu0 %v9210_v21, %s9838_s6  ;;  %v9215_v31 = vpack.i.bf16 %v1710_v25, %v1708_v22  ;;  %v387_v32 = vsel %vm319_vm1, %v385_v23, %v386_v24  ;;  %v390_v33 = vrot.slane %v8317_v19, 1  ;;  %v680_v34 = vunpack.c.l.bf16 %v620_v20  ;;  %v1504_v19 = vld [vmem:[%s14858_s0 + $0x9c] sm:$0xc]  ;;  %v1507_v25 = vld [vmem:[%s14858_s0 + $0xa8] sm:$0xc] }
  0x7a   :  { %v389_v36 = vsel %vm319_vm1, %v386_v24, %v388_v26  ;;  %v391_v37 = vrot.slane %v8318_v27, 1  ;;  %v393_v38 = vrot.slane %v243_v28, 1  ;;  %v681_v39 = vunpack.c.h.bf16 %v10398_v54  ;;  %v1506_v24 = vld [vmem:[%s14858_s0 + $0xa4] sm:$0x3]  ;;  %v10499_v28 = vld [vmem:[%s14858_s0 + $0xac] ss:$12 sps:$4 sm:$0xff]  }
  0x7b   :  { %9216 = vrot.lane.b32.xlu1 %v9215_v31, %s9838_s6  ;;  %v9220_v41 = vpack.i.bf16 %v389_v36, %v387_v32  ;;  %v682_v42 = vunpack.c.l.bf16 %v622_v29  ;;  %v827_v43 = vrot.slane %v680_v34, 2  ;;  %v683_v44 = vunpack.c.l.bf16 %v623_v30  ;;  %v1509_v29 = vld [vmem:[%s14858_s0 + $0xb0] sm:$0x3] }
  0x7c   :  { %v10449_v46 = vpop.permute.xlu1 %8971  ;;  %v392_v47 = vsel %vm319_vm1, %v390_v33, %v391_v37  ;;  %v394_v48 = vsel %vm319_vm1, %v391_v37, %v393_v38  ;;  %v828_v49 = vrot.slane %v681_v39, 2  ;;  %v684_v50 = vunpack.c.h.bf16 %v624_v35  ;;  %v10459_v53 = vpop.permute.xlu0 %8961 }
  0x7d   :  { %9221 = vrot.lane.b32.xlu0 %v9220_v41, %s9836_s18  ;;  %v9225_v54 = vpack.i.bf16 %v394_v48, %v392_v47  ;;  %v830_v55 = vrot.slane %v682_v42, 2  ;;  %v685_v56 = vunpack.c.l.bf16 %v625_v40  ;;  %v832_v57 = vrot.slane %v683_v44, 2  ;;  %v8407_v44 = vld [vmem:[%s14858_s0 + $0x18] sm:$0xff]  }
  0x7e   :  { %v829_v58 = vsel %vm761_vm0, %v827_v43, %v828_v49  ;;  %v833_v59 = vrot.slane %v684_v50, 2  ;;  %v1122_v60 = vunpack.c.l.bf16 %v1062_v45  ;;  %v1123_v61 = vunpack.c.l.bf16 %v624_v35 }
  0x7f   :  { %9226 = vrot.lane.b32.xlu1 %v9225_v54, %s9836_s18  ;;  %v831_v0 = vsel %vm761_vm0, %v828_v49, %v830_v55  ;;  %v835_v1 = vrot.slane %v685_v56, 2  ;;  %v1124_v2 = vunpack.c.l.bf16 %v1064_v51  ;;  %v1125_v3 = vunpack.c.l.bf16 %v1065_v52  ;;  %v8248_v55 = vld [vmem:[%s14858_s0] sm:$0xff]  }
  0x80   :  { %v9230_v4 = vpack.i.bf16 %v831_v0, %v829_v58  ;;  %v834_v5 = vsel %vm761_vm0, %v832_v57, %v833_v59  ;;  %v1269_v6 = vrot.slane %v1122_v60, 3  ;;  %v1270_v7 = vrot.slane %v1123_v61, 3  ;;  %v10472_v8 = vpop.permute.xlu0 %8966  ;;  %v184_v60 = vld [vmem:[%s14858_s0 + $0xb4] sm:$0xff]   ;;  %v186_v61 = vld [vmem:[%s14858_s0 + $0xbc] sm:$0x1] }
  0x81   :  { %v836_v9 = vsel %vm761_vm0, %v833_v59, %v835_v1  ;;  %v1272_v10 = vrot.slane %v1124_v2, 3  ;;  %v1126_v11 = vunpack.c.h.bf16 %v1066_v62  ;;  %v1127_v12 = vunpack.c.l.bf16 %v1067_v63 }
  0x82   :  { %v10475_v13 = vpop.permute.xlu1 %8976  ;;  %9231 = vrot.lane.b32.xlu0 %v9230_v4, %s9835_s15  ;;  %v9235_v14 = vpack.i.bf16 %v836_v9, %v834_v5  ;;  %v1271_v15 = vsel %vm1203_vm2, %v1269_v6, %v1270_v7  ;;  %v1274_v16 = vrot.slane %v1125_v3, 3  ;;  %v8974_v17 = vunpack.i.h.bf16 %v10449_v46  ;;  %v189_v4 = vld [vmem:[%s14858_s0 + $0xc8] sm:$0x1] }
  0x83   :  { %v1273_v20 = vsel %vm1203_vm2, %v1270_v7, %v1272_v10  ;;  %v1275_v21 = vrot.slane %v1126_v11, 3  ;;  %v1277_v22 = vrot.slane %v1127_v12, 3  ;;  %v8973_v23 = vunpack.i.l.bf16 %v10449_v46 }
  0x84   :  { %9236 = vrot.lane.b32.xlu1 %v9235_v14, %s9835_s15  ;;  %v9240_v26 = vpack.i.bf16 %v1273_v20, %v1271_v15  ;;  %vm98_vm4 = vcmask 23552   ;;  %vm540_vm5 = vcmask 48152   ;;  %v8964_v27 = vunpack.i.h.bf16 %v10459_v53  ;;  %v10504_v30 = vpop.permute.xlu0 %8981 }
  0x85   :  { %v1276_v31 = vsel %vm1203_vm2, %v1274_v16, %v1275_v21  ;;  %v1278_v32 = vsel %vm1203_vm2, %v1275_v21, %v1277_v22  ;;  %v8963_v33 = vunpack.i.l.bf16 %v10459_v53  ;;  %v60_v34 = vunpack.c.l.bf16 %v20_v18 }
  0x86   :  { %v10509_v35 = vpop.permute.xlu1 %8986  ;;  %9241 = vrot.lane.b32.xlu0 %v9240_v26, %s9837_s13  ;;  %v9245_v36 = vpack.i.bf16 %v1278_v32, %v1276_v31  ;;  %v61_v37 = vunpack.c.h.bf16 %v20_v18  ;;  %v1564_v38 = vunpack.c.l.bf16 %v1504_v19  ;;  %v1565_v39 = vunpack.c.l.bf16 %v1066_v62  ;;  %v8423_v62 = vld [vmem:[%s14858_s0 + $0xc0] sm:$0xff]   ;;  %v626_v18 = vld [vmem:[%s14858_s0 + $0xb4] sm:$0xe] }
  0x87   :  { %101 = vst.msk [vmem:[#allocation2 + $0x10] sm:$0xff] %vm98_vm4, %v60_v34  ;;  %v1566_v40 = vunpack.c.l.bf16 %v1506_v24  ;;  %v1567_v41 = vunpack.c.l.bf16 %v1507_v25  ;;  %v1568_v42 = vunpack.c.l.bf16 %v10499_v28  ;;  %v1569_v43 = vunpack.c.l.bf16 %v1509_v29  ;;  %v628_v25 = vld [vmem:[%s14858_s0 + $0xbc] sm:$0x1]  ;;  %v629_v31 = vld [vmem:[%s14858_s0 + $0xc0] sm:$0xe] }
  0x88   :  { %9246 = vrot.lane.b32.xlu1 %v9245_v36, %s9837_s13  ;;  %102 = vst.msk [vmem:[#allocation2 + $0x18] sm:$0xff] %vm98_vm4, %v61_v37  ;;  %v1711_v45 = vrot.slane %v1564_v38, 4  ;;  %v1712_v47 = vrot.slane %v1565_v39, 4  ;;  %v8969_v48 = vunpack.i.h.bf16 %v10472_v8  ;;  %v8968_v49 = vunpack.i.l.bf16 %v10472_v8  ;;  %v10522_v50 = vpop.permute.xlu0 %8991 }
  0x89   :  { %543 = vst.msk [vmem:[#allocation2 + $0x10] sm:$0xff] %vm540_vm5, %v8963_v33  ;;  %544 = vst.msk [vmem:[#allocation2 + $0x18] sm:$0xff] %vm540_vm5, %v8964_v27  ;;  %v1714_v51 = vrot.slane %v1566_v40, 4  ;;  %v1716_v52 = vrot.slane %v1567_v41, 4  ;;  %v1717_v53 = vrot.slane %v1568_v42, 4  ;;  %v1719_v54 = vrot.slane %v1569_v43, 4 }
  0x8a   :  { %v1713_v56 = vsel %vm1645_vm3, %v1711_v45, %v1712_v47  ;;  %v8253_v57 = vunpack.c.l.bf16 %v8407_v44  ;;  %v8254_v58 = vunpack.c.h.bf16 %v8407_v44  ;;  %v8979_v59 = vunpack.i.h.bf16 %v10475_v13  ;;  %v10539_v63 = vpop.permute.xlu1 %8996  ;;  %v630_v33 = vld [vmem:[%s14858_s0 + $0xb8] ss:$12 sps:$4 sm:$0xff]  }
  0x8b   :  { %v1715_v0 = vsel %vm1645_vm3, %v1712_v47, %v1714_v51  ;;  %v1718_v1 = vsel %vm1645_vm3, %v1716_v52, %v1717_v53  ;;  %v1720_v2 = vsel %vm1645_vm3, %v1717_v53, %v1719_v54  ;;  %v8978_v3 = vunpack.i.l.bf16 %v10475_v13  ;;  %v1070_v54 = vld [vmem:[%s14858_s0 + $0xbc] sm:$0x3] }
  0x8c   :  { %v9250_v5 = vpack.i.bf16 %v1715_v0, %v1713_v56  ;;  %v9255_v6 = vpack.i.bf16 %v1720_v2, %v1718_v1  ;;  %103 = vst.msk [vmem:[#allocation2 + $0x20] sm:$0xff] %vm98_vm4, %v8253_v57  ;;  %104 = vst.msk [vmem:[#allocation2 + $0x28] sm:$0xff] %vm98_vm4, %v8254_v58  ;;  %v8249_v7 = vunpack.c.l.bf16 %v8248_v55  ;;  %v8250_v8 = vunpack.c.h.bf16 %v8248_v55  ;;  %v10550_v9 = vpop.permute.xlu0 %9001  ;;  %v1072_v1 = vld [vmem:[%s14858_s0 + $0xb8] ss:$12 sps:$4 sm:$0xff]  }
  0x8d   :  { %545 = vst.msk [vmem:[#allocation2 + $0x20] sm:$0xff] %vm540_vm5, %v8968_v49  ;;  %546 = vst.msk [vmem:[#allocation2 + $0x28] sm:$0xff] %vm540_vm5, %v8969_v48  ;;  %v244_v10 = vunpack.c.l.bf16 %v184_v60  ;;  %v245_v11 = vunpack.c.h.bf16 %v184_v60  ;;  %v246_v12 = vunpack.c.l.bf16 %v186_v61  ;;  %v8321_v13 = vunpack.c.l.bf16 %v8423_v62  ;;  %v1068_v49 = vld [vmem:[%s14858_s0 + $0xb4] sm:$0xe]  ;;  %v1071_v60 = vld [vmem:[%s14858_s0 + $0xc0] sm:$0xe] }
  0x8e   :  { %9251 = vrot.lane.b32.xlu0 %v9250_v5, %s9838_s6  ;;  %9256 = vrot.lane.b32.xlu1 %v9255_v6, %s9838_s6  ;;  %99 = vst.msk [vmem:[#allocation2] sm:$0xff] %vm98_vm4, %v8249_v7  ;;  %100 = vst.msk [vmem:[#allocation2 + $0x8] sm:$0xff] %vm98_vm4, %v8250_v8  ;;  %v8322_v14 = vunpack.c.h.bf16 %v8423_v62  ;;  %v249_v15 = vunpack.c.l.bf16 %v189_v4  ;;  %vm982_vm6 = vcmask 72752   ;;  %v8984_v16 = vunpack.i.h.bf16 %v10504_v30  ;;  %v10562_v19 = vpop.permute.xlu1 %9006 }
  0x8f   :  { %541 = vst.msk [vmem:[#allocation2] sm:$0xff] %vm540_vm5, %v8978_v3  ;;  %542 = vst.msk [vmem:[#allocation2 + $0x8] sm:$0xff] %vm540_vm5, %v8979_v59  ;;  %v395_v20 = vrot.slane %v244_v10, 1  ;;  %v396_v21 = vrot.slane %v245_v11, 1  ;;  %v398_v22 = vrot.slane %v246_v12, 1  ;;  %v400_v24 = vrot.slane %v8321_v13, 1 }
  0x90   :  { %985 = vst.msk [vmem:[#allocation2 + $0x10] sm:$0xff] %vm982_vm6, %v8973_v23  ;;  %986 = vst.msk [vmem:[#allocation2 + $0x18] sm:$0xff] %vm982_vm6, %v8974_v17  ;;  %v401_v26 = vrot.slane %v8322_v14, 1  ;;  %v403_v27 = vrot.slane %v249_v15, 1  ;;  %v8983_v29 = vunpack.i.l.bf16 %v10504_v30  ;;  %vm1424_vm7 = vcmask 97352  }
  0x91   :  { %988 = vst.msk [vmem:[#allocation2 + $0x28] sm:$0xff] %vm982_vm6, %v8984_v16  ;;  %v397_v23 = vsel %vm319_vm1, %v395_v20, %v396_v21  ;;  %v399_v46 = vsel %vm319_vm1, %v396_v21, %v398_v22  ;;  %v8989_v17 = vunpack.i.h.bf16 %v10509_v35  ;;  %v8988_v32 = vunpack.i.l.bf16 %v10509_v35  ;;  %v631_v30 = vld [vmem:[%s14858_s0 + $0xc8] sm:$0x1]  ;;  %v10590_v34 = vpop.permute.xlu0 %9011  ;;  %v1510_v15 = vld [vmem:[%s14858_s0 + $0xb4] sm:$0xc] }
  0x92   :  { %v9260_v36 = vpack.i.bf16 %v399_v46, %v397_v23  ;;  %v402_v37 = vsel %vm319_vm1, %v400_v24, %v401_v26  ;;  %v404_v38 = vsel %vm319_vm1, %v401_v26, %v403_v27  ;;  %987 = vst.msk [vmem:[#allocation2 + $0x20] sm:$0xff] %vm982_vm6, %v8983_v29  ;;  %v686_v39 = vunpack.c.l.bf16 %v626_v18  ;;  %v1512_v24 = vld [vmem:[%s14858_s0 + $0xbc] sm:$0x3]  ;;  %v1514_v23 = vld [vmem:[%s14858_s0 + $0xc4] ss:$12 sps:$4 sm:$0xff]  }
  0x93   :  { %v9265_v40 = vpack.i.bf16 %v404_v38, %v402_v37  ;;  %1427 = vst.msk [vmem:[#allocation2 + $0x10] sm:$0xff] %vm1424_vm7, %v8988_v32  ;;  %1428 = vst.msk [vmem:[#allocation2 + $0x18] sm:$0xff] %vm1424_vm7, %v8989_v17  ;;  %v687_v35 = vunpack.c.h.bf16 %v10499_v28  ;;  %v688_v41 = vunpack.c.l.bf16 %v628_v25  ;;  %v689_v42 = vunpack.c.l.bf16 %v629_v31  ;;  %v10598_v43 = vpop.permute.xlu1 %9016  ;;  %v1513_v25 = vld [vmem:[%s14858_s0 + $0xc0] sm:$0xc] }
  0x94   :  { %9261 = vrot.lane.b32.xlu0 %v9260_v36, %s9836_s18  ;;  %v837_v44 = vrot.slane %v686_v39, 2  ;;  %v690_v45 = vunpack.c.h.bf16 %v630_v33  ;;  %v691_v47 = vunpack.c.l.bf16 %v631_v30  ;;  %v8994_v48 = vunpack.i.h.bf16 %v10522_v50  ;;  %v1515_v30 = vld [vmem:[%s14858_s0 + $0xc8] sm:$0x3] }
  0x95   :  { %9266 = vrot.lane.b32.xlu1 %v9265_v40, %s9836_s18  ;;  %v838_v51 = vrot.slane %v687_v35, 2  ;;  %v840_v52 = vrot.slane %v688_v41, 2  ;;  %v842_v28 = vrot.slane %v689_v42, 2  ;;  %v8993_v53 = vunpack.i.l.bf16 %v10522_v50  ;;  %v10610_v55 = vpop.permute.xlu0 %9021 }
  0x96   :  { %v843_v56 = vrot.slane %v690_v45, 2  ;;  %v845_v57 = vrot.slane %v691_v47, 2  ;;  %984 = vst.msk [vmem:[#allocation2 + $0x8] sm:$0xff] %vm982_vm6, %v8994_v48  ;;  %v8999_v58 = vunpack.i.h.bf16 %v10539_v63  ;;  %v8998_v59 = vunpack.i.l.bf16 %v10539_v63  ;;  %v1073_v63 = vld [vmem:[%s14858_s0 + $0xc8] sm:$0x3] }
  0x97   :  { %v839_v50 = vsel %vm761_vm0, %v837_v44, %v838_v51  ;;  %v841_v61 = vsel %vm761_vm0, %v838_v51, %v840_v52  ;;  %983 = vst.msk [vmem:[#allocation2] sm:$0xff] %vm982_vm6, %v8993_v53  ;;  %v1128_v62 = vunpack.c.l.bf16 %v1068_v49  ;;  %v1129_v0 = vunpack.c.l.bf16 %v630_v33  ;;  %v10627_v2 = vpop.permute.xlu1 %9026  ;;  %v190_v44 = vld [vmem:[%s14858_s0 + $0xcc] sm:$0xff]   ;;  %v192_v51 = vld [vmem:[%s14858_s0 + $0xd4] sm:$0x1] }
  0x98   :  { %v9270_v3 = vpack.i.bf16 %v841_v61, %v839_v50  ;;  %v844_v4 = vsel %vm761_vm0, %v842_v28, %v843_v56  ;;  %v846_v5 = vsel %vm761_vm0, %v843_v56, %v845_v57  ;;  %1429 = vst.msk [vmem:[#allocation2 + $0x20] sm:$0xff] %vm1424_vm7, %v8998_v59  ;;  %1430 = vst.msk [vmem:[#allocation2 + $0x28] sm:$0xff] %vm1424_vm7, %v8999_v58  ;;  %v1130_v6 = vunpack.c.l.bf16 %v1070_v54  ;;  %v632_v57 = vld [vmem:[%s14858_s0 + $0xcc] sm:$0xe]  ;;  %v634_v61 = vld [vmem:[%s14858_s0 + $0xd4] sm:$0x1] }
  0x99   :  { %v9275_v7 = vpack.i.bf16 %v846_v5, %v844_v4  ;;  %v1279_v8 = vrot.slane %v1128_v62, 3  ;;  %v1280_v10 = vrot.slane %v1129_v0, 3  ;;  %v1131_v11 = vunpack.c.l.bf16 %v1071_v60 }
  0x9a   :  { %9271 = vrot.lane.b32.xlu0 %v9270_v3, %s9835_s15  ;;  %v1282_v12 = vrot.slane %v1130_v6, 3  ;;  %v1132_v13 = vunpack.c.h.bf16 %v1072_v1  ;;  %v1133_v14 = vunpack.c.l.bf16 %v1073_v63  ;;  %vm1866_vm8 = vcmask 121952   ;;  %v10637_v16 = vpop.permute.xlu0 %9031  ;;  %v24_v6 = vld [vmem:[%s14858_s0 + $0x24] sm:$0xff]  }
  0x9b   :  { %9276 = vrot.lane.b32.xlu1 %v9275_v7, %s9835_s15  ;;  %v1281_v18 = vsel %vm1203_vm2, %v1279_v8, %v1280_v10  ;;  %v1284_v20 = vrot.slane %v1131_v11, 3  ;;  %v9004_v21 = vunpack.i.h.bf16 %v10550_v9  ;;  %v9003_v22 = vunpack.i.l.bf16 %v10550_v9 }
  0x9c   :  { %v1283_v26 = vsel %vm1203_vm2, %v1280_v10, %v1282_v12  ;;  %v1285_v27 = vrot.slane %v1132_v13, 3  ;;  %v1287_v29 = vrot.slane %v1133_v14, 3  ;;  %v9009_v31 = vunpack.i.h.bf16 %v10562_v19  ;;  %v10654_v46 = vpop.permute.xlu1 %9036 }
  0x9d   :  { %v9280_v9 = vpack.i.bf16 %v1283_v26, %v1281_v18  ;;  %1869 = vst.msk [vmem:[#allocation2 + $0x10] sm:$0xff] %vm1866_vm8, %v9003_v22  ;;  %1870 = vst.msk [vmem:[#allocation2 + $0x18] sm:$0xff] %vm1866_vm8, %v9004_v21  ;;  %v9008_v17 = vunpack.i.l.bf16 %v10562_v19  ;;  %v1570_v32 = vunpack.c.l.bf16 %v1510_v15  ;;  %v1571_v33 = vunpack.c.l.bf16 %v1072_v1  ;;  %v8424_v26 = vld [vmem:[%s14858_s0 + $0xd8] sm:$0xff]  }
  0x9e   :  { %v1286_v36 = vsel %vm1203_vm2, %v1284_v20, %v1285_v27  ;;  %v1288_v37 = vsel %vm1203_vm2, %v1285_v27, %v1287_v29  ;;  %1426 = vst.msk [vmem:[#allocation2 + $0x8] sm:$0xff] %vm1424_vm7, %v9009_v31  ;;  %v1572_v38 = vunpack.c.l.bf16 %v1512_v24  ;;  %v1573_v39 = vunpack.c.l.bf16 %v1513_v25  ;;  %v10665_v40 = vpop.permute.xlu0 %9041  ;;  %v8408_v20 = vld [vmem:[%s14858_s0 + $0x30] sm:$0xff]  }
  0x9f   :  { %9281 = vrot.lane.b32.xlu0 %v9280_v9, %s9837_s13  ;;  %v9285_v35 = vpack.i.bf16 %v1288_v37, %v1286_v36  ;;  %1425 = vst.msk [vmem:[#allocation2] sm:$0xff] %vm1424_vm7, %v9008_v17  ;;  %v1721_v19 = vrot.slane %v1570_v32, 4  ;;  %v1722_v41 = vrot.slane %v1571_v33, 4  ;;  %v1574_v42 = vunpack.c.l.bf16 %v1514_v23  ;;  %v1074_v17 = vld [vmem:[%s14858_s0 + $0xcc] sm:$0xe] }
  0xa0   :  { %v1724_v45 = vrot.slane %v1572_v38, 4  ;;  %v1575_v47 = vunpack.c.l.bf16 %v1515_v30  ;;  %v1726_v48 = vrot.slane %v1573_v39, 4  ;;  %v9014_v49 = vunpack.i.h.bf16 %v10590_v34  ;;  %v10676_v52 = vpop.permute.xlu1 %9046  ;;  %v1075_v32 = vld [vmem:[%s14858_s0 + $0xd0] sm:$0xf]  ;;  %v1076_v33 = vld [vmem:[%s14858_s0 + $0xd4] sm:$0x3] }
  0xa1   :  { %9286 = vrot.lane.b32.xlu1 %v9285_v35, %s9837_s13  ;;  %v1723_v28 = vsel %vm1645_vm3, %v1721_v19, %v1722_v41  ;;  %v1727_v53 = vrot.slane %v1574_v42, 4  ;;  %v9013_v54 = vunpack.i.l.bf16 %v10590_v34  ;;  %v9019_v56 = vunpack.i.h.bf16 %v10598_v43 }
  0xa2   :  { %v1725_v58 = vsel %vm1645_vm3, %v1722_v41, %v1724_v45  ;;  %v1729_v59 = vrot.slane %v1575_v47, 4  ;;  %1872 = vst.msk [vmem:[#allocation2 + $0x28] sm:$0xff] %vm1866_vm8, %v9014_v49  ;;  %v9018_v60 = vunpack.i.l.bf16 %v10598_v43  ;;  %v250_v50 = vunpack.c.l.bf16 %v190_v44 }
  0xa3   :  { %v9290_v62 = vpack.i.bf16 %v1725_v58, %v1723_v28  ;;  %v1728_v34 = vsel %vm1645_vm3, %v1726_v48, %v1727_v53  ;;  %1871 = vst.msk [vmem:[#allocation2 + $0x20] sm:$0xff] %vm1866_vm8, %v9013_v54  ;;  %1868 = vst.msk [vmem:[#allocation2 + $0x8] sm:$0xff] %vm1866_vm8, %v9019_v56  ;;  %v251_v0 = vunpack.c.h.bf16 %v190_v44  ;;  %v252_v1 = vunpack.c.l.bf16 %v192_v51  ;;  %v10694_v63 = vpop.permute.xlu0 %9051 }
  0xa4   :  { %v1730_v3 = vsel %vm1645_vm3, %v1727_v53, %v1729_v59  ;;  %1867 = vst.msk [vmem:[#allocation2] sm:$0xff] %vm1866_vm8, %v9018_v60  ;;  %v405_v43 = vrot.slane %v250_v50, 1  ;;  %v692_v4 = vunpack.c.l.bf16 %v632_v57  ;;  %v693_v5 = vunpack.c.h.bf16 %v1514_v23  ;;  %v9760_v53 = vld [vmem:[%s14859_s1 + $0x8] sm:$0xff]   ;;  %v1909_v59 = vld [vmem:[#allocation2 + $0x10] sm:$0xff]  ;;  %v1910_v60 = vld [vmem:[#allocation2 + $0x18] sm:$0xff] }
  0xa5   :  { %9291 = vrot.lane.b32.xlu0 %v9290_v62, %s9838_s6  ;;  %v9295_v7 = vpack.i.bf16 %v1730_v3, %v1728_v34  ;;  %v406_v8 = vrot.slane %v251_v0, 1  ;;  %v408_v10 = vrot.slane %v252_v1, 1  ;;  %v694_v11 = vunpack.c.l.bf16 %v634_v61  ;;  %v10702_v12 = vpop.permute.xlu1 %9056  ;;  %v7836_v62 = vld [vmem:[%s14858_s0 + $0xfc] sm:$0xff]   ;;  %v635_v0 = vld [vmem:[%s14858_s0 + $0xd8] sm:$0xe] }
  0xa6   :  { %v847_v13 = vrot.slane %v692_v4, 2  ;;  %v848_v14 = vrot.slane %v693_v5, 2  ;;  %v9024_v15 = vunpack.i.h.bf16 %v10610_v55  ;;  %v9023_v18 = vunpack.i.l.bf16 %v10610_v55  ;;  %v195_v55 = vld [vmem:[%s14858_s0 + $0xe0] sm:$0x1] }
  0xa7   :  { %9296 = vrot.lane.b32.xlu1 %v9295_v7, %s9838_s6  ;;  %v407_v21 = vsel %vm319_vm1, %v405_v43, %v406_v8  ;;  %v409_v22 = vsel %vm319_vm1, %v406_v8, %v408_v10  ;;  %v850_v24 = vrot.slane %v694_v11, 2  ;;  %v64_v25 = vunpack.c.l.bf16 %v24_v6  ;;  %v10718_v27 = vpop.permute.xlu0 %9061  ;;  %v9761_v34 = vld [vmem:[%s14859_s1] sm:$0xff]   ;;  %v636_v7 = vld [vmem:[%s14858_s0 + $0xd0] ss:$12 sps:$4 sm:$0xff]  }
  0xa8   :  { %v9300_v29 = vpack.i.bf16 %v409_v22, %v407_v21  ;;  %v849_v31 = vsel %vm761_vm0, %v847_v13, %v848_v14  ;;  %v65_v23 = vunpack.c.h.bf16 %v24_v6  ;;  %v9029_v9 = vunpack.i.h.bf16 %v10627_v2  ;;  %v637_v8 = vld [vmem:[%s14858_s0 + $0xe0] sm:$0x1] }
  0xa9   :  { %v851_v30 = vsel %vm761_vm0, %v848_v14, %v850_v24  ;;  %105 = vst.msk [vmem:[#allocation2 + $0x30] sm:$0xff] %vm98_vm4, %v64_v25  ;;  %v9028_v36 = vunpack.i.l.bf16 %v10627_v2  ;;  %v8257_v37 = vunpack.c.l.bf16 %v8408_v20  ;;  %v8258_v38 = vunpack.c.h.bf16 %v8408_v20  ;;  %v10734_v39 = vpop.permute.xlu1 %9066 }
  0xaa   :  { %9301 = vrot.lane.b32.xlu0 %v9300_v29, %s9836_s18  ;;  %v9305_v35 = vpack.i.bf16 %v851_v30, %v849_v31  ;;  %106 = vst.msk [vmem:[#allocation2 + $0x38] sm:$0xff] %vm98_vm4, %v65_v23  ;;  %v8325_v19 = vunpack.c.l.bf16 %v8424_v26  ;;  %v8326_v41 = vunpack.c.h.bf16 %v8424_v26  ;;  %v255_v42 = vunpack.c.l.bf16 %v195_v55  ;;  %v1077_v30 = vld [vmem:[%s14858_s0 + $0xd8] sm:$0xe] }
  0xab   :  { %547 = vst.msk [vmem:[#allocation2 + $0x30] sm:$0xff] %vm540_vm5, %v9023_v18  ;;  %548 = vst.msk [vmem:[#allocation2 + $0x38] sm:$0xff] %vm540_vm5, %v9024_v15  ;;  %v1134_v2 = vunpack.c.l.bf16 %v1074_v17  ;;  %v1135_v44 = vunpack.c.l.bf16 %v1075_v32  ;;  %v1136_v45 = vunpack.c.l.bf16 %v1076_v33  ;;  %v9034_v47 = vunpack.i.h.bf16 %v10637_v16  ;;  %v1516_v15 = vld [vmem:[%s14858_s0 + $0xcc] sm:$0xc]  ;;  %v1518_v18 = vld [vmem:[%s14858_s0 + $0xd4] sm:$0x3] }
  0xac   :  { %107 = vst.msk [vmem:[#allocation2 + $0x40] sm:$0xff] %vm98_vm4, %v8257_v37  ;;  %108 = vst.msk [vmem:[#allocation2 + $0x48] sm:$0xff] %vm98_vm4, %v8258_v38  ;;  %9306 = vrot.lane.b32.xlu1 %v9305_v35, %s9835_s15  ;;  %v410_v48 = vrot.slane %v8325_v19, 1  ;;  %v411_v49 = vrot.slane %v8326_v41, 1  ;;  %v413_v51 = vrot.slane %v255_v42, 1  ;;  %v9033_v28 = vunpack.i.l.bf16 %v10637_v16  ;;  %v10750_v54 = vpop.permute.xlu0 %9071  ;;  %v1911_v32 = vld [vmem:[#allocation2 + $0x20] sm:$0xff] }
  0xad   :  { %549 = vst.msk [vmem:[#allocation2 + $0x40] sm:$0xff] %vm540_vm5, %v9028_v36  ;;  %550 = vst.msk [vmem:[#allocation2 + $0x48] sm:$0xff] %vm540_vm5, %v9029_v9  ;;  %v1289_v56 = vrot.slane %v1134_v2, 3  ;;  %v1290_v57 = vrot.slane %v1135_v44, 3  ;;  %v1292_v58 = vrot.slane %v1136_v45, 3  ;;  %vm2017_vm9 = vcmask 1047552  }
  0xae   :  { %990 = vst.msk [vmem:[#allocation2 + $0x38] sm:$0xff] %vm982_vm6, %v9034_v47  ;;  %v412_v50 = vsel %vm319_vm1, %v410_v48, %v411_v49  ;;  %v414_v61 = vsel %vm319_vm1, %v411_v49, %v413_v51  ;;  %989 = vst.msk [vmem:[#allocation2 + $0x30] sm:$0xff] %vm982_vm6, %v9033_v28  ;;  %v9039_v16 = vunpack.i.h.bf16 %v10654_v46  ;;  %v10766_v1 = vpop.permute.xlu1 %9076  ;;  %v9839_v5 = vmov 65535   ;;  %v1912_v33 = vld [vmem:[#allocation2 + $0x28] sm:$0xff]  ;;  %v1907_v19 = vld [vmem:[#allocation2] sm:$0xff] }
  0xaf   :  { %v9310_v3 = vpack.i.bf16 %v414_v61, %v412_v50  ;;  %v1291_v43 = vsel %vm1203_vm2, %v1289_v56, %v1290_v57  ;;  %v1293_v4 = vsel %vm1203_vm2, %v1290_v57, %v1292_v58  ;;  %v2018_v6 = vsel %vm319_vm1, 4294967295, %v9839_v5  ;;  %v1908_v41 = vld [vmem:[#allocation2 + $0x8] sm:$0xff]  ;;  %v8425_v47 = vld [vmem:[%s14858_s0 + $0xf0] sm:$0xff]   ;;  %v10816_v48 = vld [vmem:[%s14858_s0 + $0xdc] ss:$36 sps:$4 sm:$0xff]  }
  0xb0   :  { %v9315_v10 = vpack.i.bf16 %v1293_v4, %v1291_v43  ;;  %v10778_v11 = vsel %vm2017_vm9, %v2018_v6, 0  ;;  %v9038_v13 = vunpack.i.l.bf16 %v10654_v46  ;;  %992 = vst.msk [vmem:[#allocation2 + $0x48] sm:$0xff] %vm982_vm6, %v9039_v16  ;;  %v10782_v14 = vpack.c.bf16 %v1910_v60, %v1909_v59  ;;  %v10790_v20 = vpop.permute.xlu0 %9081  ;;  %v1079_v56 = vld [vmem:[%s14858_s0 + $0xe0] sm:$0x3]  ;;  %v1519_v57 = vld [vmem:[%s14858_s0 + $0xd8] sm:$0xc] }
  0xb1   :  { %9311 = vrot.lane.b32.xlu0 %v9310_v3, %s9836_s18  ;;  %v2021_v21 = vand.u32 %v9760_v53, %v10778_v11  ;;  %vm1968_vm10 = vcmask 121856   ;;  %v3332_v46 = vunpack.c.l.bf16 %v7836_v62  ;;  %v3333_v22 = vunpack.c.h.bf16 %v7836_v62  ;;  %v10833_v58 = vld [vmem:[%s14858_s0 + $0xdc] ss:$48 sps:$4 sm:$0xff]   ;;  %v1521_v61 = vld [vmem:[%s14858_s0 + $0xe0] sm:$0x3] }
  0xb2   :  { %9316 = vrot.lane.b32.xlu1 %v9315_v10, %s9837_s13  ;;  %991 = vst.msk [vmem:[#allocation2 + $0x40] sm:$0xff] %vm982_vm6, %v9038_v13  ;;  %8617 = vmatprep.mubr.msk.bf16.mxu0 %vm1968_vm10, %v10782_v14  ;;  %v2193_v24 = vand.u32 %v9761_v34, %v10778_v11  ;;  %v695_v25 = vunpack.c.l.bf16 %v635_v0  ;;  %v696_v26 = vunpack.c.h.bf16 %v636_v7  ;;  %v697_v55 = vunpack.c.l.bf16 %v637_v8  ;;  %v10799_v29 = vpop.permute.xlu1 %9086 }
  0xb3   :  { %8615 = vmatprep.subr.bf16.mxu0 %v2021_v21  ;;  %3372 = vst.msk [vmem:[#allocation2 + $0x10] sm:$0xff] %vm98_vm4, %v3332_v46  ;;  %3373 = vst.msk [vmem:[#allocation2 + $0x18] sm:$0xff] %vm98_vm4, %v3333_v22  ;;  %v1576_v31 = vunpack.c.l.bf16 %v1516_v15  ;;  %v1577_v23 = vunpack.c.l.bf16 %v636_v7  ;;  %v1578_v9 = vunpack.c.l.bf16 %v1518_v18  ;;  %v9044_v17 = vunpack.i.h.bf16 %v10665_v40  ;;  %v7877_v7 = vld [vmem:[%s14858_s0 + $0xfc] sm:$0xff]  }
  0xb4   :  { %8616 = vmatpush3.bf16.msra.mxu0 %v2021_v21  ;;  %8649 = vmatprep.subr.bf16.mxu1 %v2193_v24  ;;  %v852_v36 = vrot.slane %v695_v25, 2  ;;  %v853_v37 = vrot.slane %v696_v26, 2  ;;  %v855_v38 = vrot.slane %v697_v55, 2  ;;  %v9043_v35 = vunpack.i.l.bf16 %v10665_v40  ;;  %v7879_v25 = vld [vmem:[%s14858_s0 + $0x104] sm:$0x1] }
  0xb5   :  { %8650 = vmatpush3.bf16.msra.mxu1 %v2193_v24  ;;  %v1731_v42 = vrot.slane %v1576_v31, 4  ;;  %v1732_v2 = vrot.slane %v1577_v23, 4  ;;  %v1734_v44 = vrot.slane %v1578_v9, 4  ;;  %1432 = vst.msk [vmem:[#allocation2 + $0x38] sm:$0xff] %vm1424_vm7, %v9044_v17  ;;  %v9049_v45 = vunpack.i.h.bf16 %v10676_v52  ;;  %v10818_v40 = vpop.permute.xlu0 %9091  ;;  %v8436_v23 = vld [vmem:[%s14858_s0 + $0x108] sm:$0xff]  }
  0xb6   :  { %v854_v49 = vsel %vm761_vm0, %v852_v36, %v853_v37  ;;  %v856_v51 = vsel %vm761_vm0, %v853_v37, %v855_v38  ;;  %1431 = vst.msk [vmem:[#allocation2 + $0x30] sm:$0xff] %vm1424_vm7, %v9043_v35  ;;  %v9048_v28 = vunpack.i.l.bf16 %v10676_v52  ;;  %v1941_v53 = vpack.c.bf16 %v1912_v33, %v1911_v32  ;;  %v28_v35 = vld [vmem:[%s14858_s0 + $0x3c] sm:$0xff]  }
  0xb7   :  { %v9320_v59 = vpack.i.bf16 %v856_v51, %v854_v49  ;;  %v1733_v60 = vsel %vm1645_vm3, %v1731_v42, %v1732_v2  ;;  %v1735_v50 = vsel %vm1645_vm3, %v1732_v2, %v1734_v44  ;;  %1434 = vst.msk [vmem:[#allocation2 + $0x48] sm:$0xff] %vm1424_vm7, %v9049_v45  ;;  %v1939_v52 = vpack.c.bf16 %v1908_v41, %v1907_v19  ;;  %v10841_v16 = vpop.permute.xlu1 %9096 }
  0xb8   :  { %v9325_v62 = vpack.i.bf16 %v1735_v50, %v1733_v60  ;;  %1433 = vst.msk [vmem:[#allocation2 + $0x40] sm:$0xff] %vm1424_vm7, %v9048_v28  ;;  %8618 = vmatmul.mubr.msk.bf16.vlgmr.msra.gmra.mxu0 %vm1968_vm10, %v1941_v53  ;;  %v8329_v34 = vunpack.c.l.bf16 %v8425_v47  ;;  %v8330_v0 = vunpack.c.h.bf16 %v8425_v47  ;;  %v1137_v3 = vunpack.c.l.bf16 %v1077_v30  ;;  %v7882_v30 = vld [vmem:[%s14858_s0 + $0x110] sm:$0x1]  ;;  %v8409_v28 = vld [vmem:[%s14858_s0 + $0x48] sm:$0xff]   ;;  %v7937_v50 = vld [vmem:[%s14858_s0 + $0xfc] sm:$0xe] }
  0xb9   :  { %9321 = vrot.lane.b32.xlu0 %v9320_v59, %s9835_s15  ;;  %8651 = vmatprep.mubr.msk.bf16.mxu1 %vm1968_vm10, %v1939_v52  ;;  %v1138_v43 = vunpack.c.l.bf16 %v10816_v48  ;;  %v1139_v4 = vunpack.c.l.bf16 %v1079_v56  ;;  %v1579_v5 = vunpack.c.l.bf16 %v1519_v57  ;;  %v1580_v6 = vunpack.c.l.bf16 %v10833_v58  ;;  %v10852_v8 = vpop.permute.xlu0 %9101 }
  0xba   :  { %9326 = vrot.lane.b32.xlu1 %v9325_v62, %s9838_s6  ;;  %3370 = vst.msk [vmem:[#allocation2] sm:$0xff] %vm98_vm4, %v8329_v34  ;;  %3371 = vst.msk [vmem:[#allocation2 + $0x8] sm:$0xff] %vm98_vm4, %v8330_v0  ;;  %v1294_v10 = vrot.slane %v1137_v3, 3  ;;  %8652 = vmatmul.mubr.msk.bf16.vlgmr.msra.gmra.mxu1 %vm1968_vm10, %v10782_v14  ;;  %v1581_v13 = vunpack.c.l.bf16 %v1521_v61  ;;  %v9054_v15 = vunpack.i.h.bf16 %v10694_v63  ;;  %v9053_v18 = vunpack.i.l.bf16 %v10694_v63  ;;  %v7939_v34 = vld [vmem:[%s14858_s0 + $0x104] sm:$0x1] }
  0xbb   :  { %v1295_v21 = vrot.slane %v1138_v43, 3  ;;  %v1297_v46 = vrot.slane %v1139_v4, 3  ;;  %v1736_v22 = vrot.slane %v1579_v5, 4  ;;  %v1737_v24 = vrot.slane %v1580_v6, 4  ;;  %8655 = vmatprep.mubr.msk.bf16.mxu1 %vm1968_vm10, %v1941_v53  ;;  %v10865_v26 = vpop.permute.xlu1 %9106  ;;  %v7940_v0 = vld [vmem:[%s14858_s0 + $0x108] sm:$0xe] }
  0xbc   :  { %v1739_v55 = vrot.slane %v1581_v13, 4  ;;  %1873 = vst.msk [vmem:[#allocation2 + $0x30] sm:$0xff] %vm1866_vm8, %v9053_v18  ;;  %1874 = vst.msk [vmem:[#allocation2 + $0x38] sm:$0xff] %vm1866_vm8, %v9054_v15  ;;  %v9059_v14 = vunpack.i.h.bf16 %v10702_v12  ;;  %v9058_v63 = vunpack.i.l.bf16 %v10702_v12  ;;  %v3473_v31 = vunpack.c.l.bf16 %v7877_v7 }
  0xbd   :  { %v1296_v9 = vsel %vm1203_vm2, %v1294_v10, %v1295_v21  ;;  %v1298_v17 = vsel %vm1203_vm2, %v1295_v21, %v1297_v46  ;;  %v1738_v32 = vsel %vm1645_vm3, %v1736_v22, %v1737_v24  ;;  %v3474_v33 = vunpack.c.h.bf16 %v7877_v7  ;;  %v7942_v7 = vld [vmem:[%s14858_s0 + $0x110] sm:$0x1] }
  0xbe   :  { %v9330_v36 = vpack.i.bf16 %v1298_v17, %v1296_v9  ;;  %v1740_v37 = vsel %vm1645_vm3, %v1737_v24, %v1739_v55  ;;  %1875 = vst.msk [vmem:[#allocation2 + $0x40] sm:$0xff] %vm1866_vm8, %v9058_v63  ;;  %1876 = vst.msk [vmem:[#allocation2 + $0x48] sm:$0xff] %vm1866_vm8, %v9059_v14  ;;  %v3475_v12 = vunpack.c.l.bf16 %v7879_v25  ;;  %v3595_v38 = vrot.slane %v3473_v31, 1  ;;  %v10886_v19 = vpop.permute.xlu0 %9111  ;;  %v7997_v25 = vld [vmem:[%s14858_s0 + $0xfc] sm:$0xe] }
  0xbf   :  { %v9335_v41 = vpack.i.bf16 %v1740_v37, %v1738_v32  ;;  %v3596_v42 = vrot.slane %v3474_v33, 1  ;;  %v8373_v2 = vunpack.c.l.bf16 %v8436_v23  ;;  %v8374_v44 = vunpack.c.h.bf16 %v8436_v23  ;;  %v7998_v31 = vld [vmem:[%s14858_s0 + $0x100] ss:$12 sps:$4 sm:$0xff]   ;;  %v8000_v33 = vld [vmem:[%s14858_s0 + $0x108] sm:$0xe] }
  0xc0   :  { %9331 = vrot.lane.b32.xlu0 %v9330_v36, %s9837_s13  ;;  %v3598_v45 = vrot.slane %v3475_v12, 1  ;;  %v3478_v47 = vunpack.c.l.bf16 %v7882_v30  ;;  %v9064_v49 = vunpack.i.h.bf16 %v10718_v27  ;;  %v9063_v51 = vunpack.i.l.bf16 %v10718_v27  ;;  %v10894_v53 = vpop.permute.xlu1 %9116 }
  0xc1   :  { %9336 = vrot.lane.b32.xlu1 %v9335_v41, %s9838_s6  ;;  %v3597_v56 = vsel %vm319_vm1, %v3595_v38, %v3596_v42  ;;  %v3600_v57 = vrot.slane %v8373_v2, 1  ;;  %v3601_v59 = vrot.slane %v8374_v44, 1  ;;  %v68_v60 = vunpack.c.l.bf16 %v28_v35  ;;  %v8002_v2 = vld [vmem:[%s14858_s0 + $0x110] sm:$0x3] }
  0xc2   :  { %v3599_v52 = vsel %vm319_vm1, %v3596_v42, %v3598_v45  ;;  %v3603_v27 = vrot.slane %v3478_v47, 1  ;;  %v69_v61 = vunpack.c.h.bf16 %v28_v35  ;;  %v9069_v62 = vunpack.i.h.bf16 %v10734_v39  ;;  %v10909_v3 = vpop.permute.xlu0 %9121 }
  0xc3   :  { %v9340_v43 = vpack.i.bf16 %v3599_v52, %v3597_v56  ;;  %v3602_v4 = vsel %vm319_vm1, %v3600_v57, %v3601_v59  ;;  %109 = vst.msk [vmem:[#allocation2 + $0x50] sm:$0xff] %vm98_vm4, %v68_v60  ;;  %v9068_v5 = vunpack.i.l.bf16 %v10734_v39  ;;  %v8261_v6 = vunpack.c.l.bf16 %v8409_v28  ;;  %v1914_v60 = vld [vmem:[#allocation2 + $0x38] sm:$0xff] }
  0xc4   :  { %v3604_v10 = vsel %vm319_vm1, %v3601_v59, %v3603_v27  ;;  %110 = vst.msk [vmem:[#allocation2 + $0x58] sm:$0xff] %vm98_vm4, %v69_v61  ;;  %v8262_v13 = vunpack.c.h.bf16 %v8409_v28  ;;  %v3913_v15 = vunpack.c.l.bf16 %v7937_v50  ;;  %v3914_v18 = vunpack.c.h.bf16 %v10816_v48  ;;  %v10921_v21 = vpop.permute.xlu1 %9126  ;;  %v1913_v59 = vld [vmem:[#allocation2 + $0x30] sm:$0xff]  ;;  %v8057_v50 = vld [vmem:[%s14858_s0 + $0xfc] sm:$0xc] }
  0xc5   :  { %551 = vst.msk [vmem:[#allocation2 + $0x50] sm:$0xff] %vm540_vm5, %v9063_v51  ;;  %9341 = vrot.lane.b32.xlu0 %v9340_v43, %s9836_s18  ;;  %v9345_v39 = vpack.i.bf16 %v3604_v10, %v3602_v4  ;;  %552 = vst.msk [vmem:[#allocation2 + $0x58] sm:$0xff] %vm540_vm5, %v9064_v49  ;;  %v3915_v46 = vunpack.c.l.bf16 %v7939_v34  ;;  %v3916_v22 = vunpack.c.l.bf16 %v7940_v0  ;;  %v3917_v24 = vunpack.c.h.bf16 %v10833_v58  ;;  %v7999_v58 = vld [vmem:[%s14858_s0 + $0x104] sm:$0x3]  ;;  %v8058_v0 = vld [vmem:[%s14858_s0 + $0x100] ss:$12 sps:$4 sm:$0xff]  }
  0xc6   :  { %111 = vst.msk [vmem:[#allocation2 + $0x60] sm:$0xff] %vm98_vm4, %v8261_v6  ;;  %112 = vst.msk [vmem:[#allocation2 + $0x68] sm:$0xff] %vm98_vm4, %v8262_v13  ;;  %v4035_v48 = vrot.slane %v3913_v15, 2  ;;  %v4036_v55 = vrot.slane %v3914_v18, 2  ;;  %v3918_v14 = vunpack.c.l.bf16 %v7942_v7  ;;  %v9074_v63 = vunpack.i.h.bf16 %v10750_v54  ;;  %v8059_v43 = vld [vmem:[%s14858_s0 + $0x104] sm:$0x3] }
  0xc7   :  { %553 = vst.msk [vmem:[#allocation2 + $0x60] sm:$0xff] %vm540_vm5, %v9068_v5  ;;  %9346 = vrot.lane.b32.xlu1 %v9345_v39, %s9836_s18  ;;  %554 = vst.msk [vmem:[#allocation2 + $0x68] sm:$0xff] %vm540_vm5, %v9069_v62  ;;  %v4038_v23 = vrot.slane %v3915_v46, 2  ;;  %v4040_v9 = vrot.slane %v3916_v22, 2  ;;  %v4041_v17 = vrot.slane %v3917_v24, 2  ;;  %v9073_v32 = vunpack.i.l.bf16 %v10750_v54  ;;  %v10945_v30 = vpop.permute.xlu0 %9131  ;;  %v1915_v10 = vld [vmem:[#allocation2 + $0x40] sm:$0xff] }
  0xc8   :  { %v4037_v36 = vsel %vm761_vm0, %v4035_v48, %v4036_v55  ;;  %v4043_v37 = vrot.slane %v3918_v14, 2  ;;  %994 = vst.msk [vmem:[#allocation2 + $0x58] sm:$0xff] %vm982_vm6, %v9074_v63  ;;  %v9079_v12 = vunpack.i.h.bf16 %v10766_v1  ;;  %v9078_v38 = vunpack.i.l.bf16 %v10766_v1  ;;  %v1916_v13 = vld [vmem:[#allocation2 + $0x48] sm:$0xff]  ;;  %v8062_v14 = vld [vmem:[%s14858_s0 + $0x110] sm:$0x3] }
  0xc9   :  { %v4039_v35 = vsel %vm761_vm0, %v4036_v55, %v4038_v23  ;;  %v4042_v41 = vsel %vm761_vm0, %v4040_v9, %v4041_v17  ;;  %993 = vst.msk [vmem:[#allocation2 + $0x50] sm:$0xff] %vm982_vm6, %v9073_v32  ;;  %v4353_v54 = vunpack.c.l.bf16 %v7997_v25  ;;  %v4354_v42 = vunpack.c.l.bf16 %v7998_v31  ;;  %v10957_v44 = vpop.permute.xlu1 %9136  ;;  %v8060_v15 = vld [vmem:[%s14858_s0 + $0x108] sm:$0xc] }
  0xca   :  { %v9350_v45 = vpack.i.bf16 %v4039_v35, %v4037_v36  ;;  %v4044_v47 = vsel %vm761_vm0, %v4041_v17, %v4043_v37  ;;  %995 = vst.msk [vmem:[#allocation2 + $0x60] sm:$0xff] %vm982_vm6, %v9078_v38  ;;  %996 = vst.msk [vmem:[#allocation2 + $0x68] sm:$0xff] %vm982_vm6, %v9079_v12  ;;  %v4355_v1 = vunpack.c.l.bf16 %v7999_v58  ;;  %v4356_v49 = vunpack.c.l.bf16 %v8000_v33  ;;  %v7883_v36 = vld [vmem:[%s14858_s0 + $0x114] sm:$0xff]  }
  0xcb   :  { %v9355_v51 = vpack.i.bf16 %v4044_v47, %v4042_v41  ;;  %v4475_v28 = vrot.slane %v4353_v54, 3  ;;  %v4476_v56 = vrot.slane %v4354_v42, 3  ;;  %v4357_v57 = vunpack.c.h.bf16 %v7998_v31  ;;  %v10965_v52 = vpop.permute.xlu0 %9141  ;;  %v7885_v41 = vld [vmem:[%s14858_s0 + $0x11c] sm:$0x1] }
  0xcc   :  { %9351 = vrot.lane.b32.xlu0 %v9350_v45, %s9835_s15  ;;  %v4478_v27 = vrot.slane %v4355_v1, 3  ;;  %v4358_v61 = vunpack.c.l.bf16 %v8002_v2  ;;  %v4480_v62 = vrot.slane %v4356_v49, 3  ;;  %v9084_v34 = vunpack.i.h.bf16 %v10790_v20  ;;  %v8437_v1 = vld [vmem:[%s14858_s0 + $0x120] sm:$0xff]  }
  0xcd   :  { %9356 = vrot.lane.b32.xlu1 %v9355_v51, %s9835_s15  ;;  %v4477_v4 = vsel %vm1203_vm2, %v4475_v28, %v4476_v56  ;;  %v4481_v5 = vrot.slane %v4357_v57, 3  ;;  %v9083_v6 = vunpack.i.l.bf16 %v10790_v20  ;;  %v9089_v7 = vunpack.i.h.bf16 %v10799_v29  ;;  %v10982_v18 = vpop.permute.xlu1 %9146  ;;  %v7888_v57 = vld [vmem:[%s14858_s0 + $0x128] sm:$0x1] }
  0xce   :  { %v4479_v39 = vsel %vm1203_vm2, %v4476_v56, %v4478_v27  ;;  %v4483_v46 = vrot.slane %v4358_v61, 3  ;;  %1436 = vst.msk [vmem:[#allocation2 + $0x58] sm:$0xff] %vm1424_vm7, %v9084_v34  ;;  %v9088_v22 = vunpack.i.l.bf16 %v10799_v29  ;;  %v1942_v24 = vpack.c.bf16 %v1914_v60, %v1913_v59 }
  0xcf   :  { %v9360_v25 = vpack.i.bf16 %v4479_v39, %v4477_v4  ;;  %v4482_v20 = vsel %vm1203_vm2, %v4480_v62, %v4481_v5  ;;  %1435 = vst.msk [vmem:[#allocation2 + $0x50] sm:$0xff] %vm1424_vm7, %v9083_v6  ;;  %1438 = vst.msk [vmem:[#allocation2 + $0x68] sm:$0xff] %vm1424_vm7, %v9089_v7  ;;  %v4793_v48 = vunpack.c.l.bf16 %v8057_v50  ;;  %v4794_v55 = vunpack.c.l.bf16 %v8058_v0 }
  0xd0   :  { %v4484_v63 = vsel %vm1203_vm2, %v4481_v5, %v4483_v46  ;;  %1437 = vst.msk [vmem:[#allocation2 + $0x60] sm:$0xff] %vm1424_vm7, %v9088_v22  ;;  %8621 = vmatprep.mubr.msk.bf16.mxu0 %vm1968_vm10, %v1942_v24  ;;  %8656 = vmatmul.mubr.msk.bf16.gmra.mxu1 %vm1968_vm10, %v1942_v24  ;;  %v4795_v29 = vunpack.c.l.bf16 %v8059_v43  ;;  %v1943_v31 = vpack.c.bf16 %v1916_v13, %v1915_v10  ;;  %v4796_v58 = vunpack.c.l.bf16 %v8060_v15  ;;  %v10997_v23 = vpop.permute.xlu0 %9151  ;;  %v8410_v46 = vld [vmem:[%s14858_s0 + $0x60] sm:$0xff]   ;;  %v7943_v22 = vld [vmem:[%s14858_s0 + $0x114] sm:$0xe] }
  0xd1   :  { %9361 = vrot.lane.b32.xlu0 %v9360_v25, %s9837_s13  ;;  %v9365_v9 = vpack.i.bf16 %v4484_v63, %v4482_v20  ;;  %v4915_v17 = vrot.slane %v4793_v48, 4  ;;  %v4916_v32 = vrot.slane %v4794_v55, 4  ;;  %v4797_v33 = vunpack.c.h.bf16 %v8058_v0  ;;  %v32_v0 = vld [vmem:[%s14858_s0 + $0x54] sm:$0xff]   ;;  %v7945_v55 = vld [vmem:[%s14858_s0 + $0x11c] sm:$0x1] }
  0xd2   :  { %v4918_v37 = vrot.slane %v4795_v29, 4  ;;  %8622 = vmatmul.mubr.msk.bf16.gmra.mxu0 %vm1968_vm10, %v1943_v31  ;;  %8659 = vmatprep.mubr.msk.bf16.mxu1 %vm1968_vm10, %v1943_v31  ;;  %v4798_v12 = vunpack.c.l.bf16 %v8062_v14  ;;  %v4920_v38 = vrot.slane %v4796_v58, 4  ;;  %v9094_v35 = vunpack.i.h.bf16 %v10818_v40  ;;  %v11009_v54 = vpop.permute.xlu1 %9156 }
  0xd3   :  { %9366 = vrot.lane.b32.xlu1 %v9365_v9, %s9837_s13  ;;  %v4917_v42 = vsel %vm1645_vm3, %v4915_v17, %v4916_v32  ;;  %v4921_v2 = vrot.slane %v4797_v33, 4  ;;  %v9093_v45 = vunpack.i.l.bf16 %v10818_v40  ;;  %v9099_v47 = vunpack.i.h.bf16 %v10841_v16  ;;  %v7946_v9 = vld [vmem:[%s14858_s0 + $0x120] sm:$0xe]  ;;  %v7948_v17 = vld [vmem:[%s14858_s0 + $0x128] sm:$0x1] }
  0xd4   :  { %v4919_v49 = vsel %vm1645_vm3, %v4916_v32, %v4918_v37  ;;  %v4923_v51 = vrot.slane %v4798_v12, 4  ;;  %1878 = vst.msk [vmem:[#allocation2 + $0x58] sm:$0xff] %vm1866_vm8, %v9094_v35  ;;  %v9098_v28 = vunpack.i.l.bf16 %v10841_v16  ;;  %v3479_v56 = vunpack.c.l.bf16 %v7883_v36  ;;  %v11024_v59 = vpop.permute.xlu0 %9161 }
  0xd5   :  { %v9370_v40 = vpack.i.bf16 %v4919_v49, %v4917_v42  ;;  %v4922_v60 = vsel %vm1645_vm3, %v4920_v38, %v4921_v2  ;;  %1877 = vst.msk [vmem:[#allocation2 + $0x50] sm:$0xff] %vm1866_vm8, %v9093_v45  ;;  %1880 = vst.msk [vmem:[#allocation2 + $0x68] sm:$0xff] %vm1866_vm8, %v9099_v47  ;;  %v3480_v50 = vunpack.c.h.bf16 %v7883_v36  ;;  %v3481_v27 = vunpack.c.l.bf16 %v7885_v41  ;;  %v8004_v49 = vld [vmem:[%s14858_s0 + $0x118] ss:$12 sps:$4 sm:$0xff]  }
  0xd6   :  { %v4924_v61 = vsel %vm1645_vm3, %v4921_v2, %v4923_v51  ;;  %1879 = vst.msk [vmem:[#allocation2 + $0x60] sm:$0xff] %vm1866_vm8, %v9098_v28  ;;  %v3605_v16 = vrot.slane %v3479_v56, 1  ;;  %v8377_v62 = vunpack.c.l.bf16 %v8437_v1  ;;  %v8378_v34 = vunpack.c.h.bf16 %v8437_v1  ;;  %v11034_v43 = vpop.permute.xlu1 %9166  ;;  %v8003_v1 = vld [vmem:[%s14858_s0 + $0x114] sm:$0xe] }
  0xd7   :  { %9371 = vrot.lane.b32.xlu0 %v9370_v40, %s9838_s6  ;;  %v9375_v4 = vpack.i.bf16 %v4924_v61, %v4922_v60  ;;  %v3606_v5 = vrot.slane %v3480_v50, 1  ;;  %v3608_v6 = vrot.slane %v3481_v27, 1  ;;  %v3484_v7 = vunpack.c.l.bf16 %v7888_v57  ;;  %v8005_v60 = vld [vmem:[%s14858_s0 + $0x11c] sm:$0x3] }
  0xd8   :  { %v3610_v10 = vrot.slane %v8377_v62, 1  ;;  %v3611_v13 = vrot.slane %v8378_v34, 1  ;;  %v9104_v15 = vunpack.i.h.bf16 %v10852_v8  ;;  %v9103_v39 = vunpack.i.l.bf16 %v10852_v8  ;;  %v7944_v8 = vld [vmem:[%s14858_s0 + $0x118] ss:$12 sps:$4 sm:$0xff]   ;;  %v8006_v62 = vld [vmem:[%s14858_s0 + $0x120] sm:$0xe] }
  0xd9   :  { %9376 = vrot.lane.b32.xlu1 %v9375_v4, %s9838_s6  ;;  %v3607_v24 = vsel %vm319_vm1, %v3605_v16, %v3606_v5  ;;  %v3609_v25 = vsel %vm319_vm1, %v3606_v5, %v3608_v6  ;;  %v3613_v20 = vrot.slane %v3484_v7, 1  ;;  %v72_v48 = vunpack.c.l.bf16 %v32_v0  ;;  %v11054_v14 = vpop.permute.xlu0 %9171  ;;  %v8008_v6 = vld [vmem:[%s14858_s0 + $0x128] sm:$0x3] }
  0xda   :  { %v9380_v63 = vpack.i.bf16 %v3609_v25, %v3607_v24  ;;  %v3612_v29 = vsel %vm319_vm1, %v3610_v10, %v3611_v13  ;;  %v73_v31 = vunpack.c.h.bf16 %v32_v0  ;;  %v9109_v58 = vunpack.i.h.bf16 %v10865_v26 }
  0xdb   :  { %v3614_v32 = vsel %vm319_vm1, %v3611_v13, %v3613_v20  ;;  %113 = vst.msk [vmem:[#allocation2 + $0x70] sm:$0xff] %vm98_vm4, %v72_v48  ;;  %v9108_v33 = vunpack.i.l.bf16 %v10865_v26  ;;  %v8265_v36 = vunpack.c.l.bf16 %v8410_v46  ;;  %v8266_v37 = vunpack.c.h.bf16 %v8410_v46  ;;  %v11067_v12 = vpop.permute.xlu1 %9176 }
  0xdc   :  { %9381 = vrot.lane.b32.xlu0 %v9380_v63, %s9836_s18  ;;  %v9385_v38 = vpack.i.bf16 %v3614_v32, %v3612_v29  ;;  %114 = vst.msk [vmem:[#allocation2 + $0x78] sm:$0xff] %vm98_vm4, %v73_v31  ;;  %v3919_v35 = vunpack.c.l.bf16 %v7943_v22  ;;  %v3920_v41 = vunpack.c.l.bf16 %v7944_v8  ;;  %v3921_v42 = vunpack.c.l.bf16 %v7945_v55  ;;  %v1917_v63 = vld [vmem:[#allocation2 + $0x50] sm:$0xff]  ;;  %v1918_v29 = vld [vmem:[#allocation2 + $0x58] sm:$0xff] }
  0xdd   :  { %555 = vst.msk [vmem:[#allocation2 + $0x70] sm:$0xff] %vm540_vm5, %v9103_v39  ;;  %556 = vst.msk [vmem:[#allocation2 + $0x78] sm:$0xff] %vm540_vm5, %v9104_v15  ;;  %v3922_v26 = vunpack.c.l.bf16 %v7946_v9  ;;  %v3923_v2 = vunpack.c.h.bf16 %v7944_v8  ;;  %v3924_v45 = vunpack.c.l.bf16 %v7948_v17  ;;  %v9114_v47 = vunpack.i.h.bf16 %v10886_v19  ;;  %v11082_v51 = vpop.permute.xlu0 %9181  ;;  %v8064_v31 = vld [vmem:[%s14858_s0 + $0x118] ss:$12 sps:$4 sm:$0xff]  }
  0xde   :  { %115 = vst.msk [vmem:[#allocation2 + $0x80] sm:$0xff] %vm98_vm4, %v8265_v36  ;;  %116 = vst.msk [vmem:[#allocation2 + $0x88] sm:$0xff] %vm98_vm4, %v8266_v37  ;;  %9386 = vrot.lane.b32.xlu1 %v9385_v38, %s9836_s18  ;;  %v4045_v28 = vrot.slane %v3919_v35, 2  ;;  %v4046_v56 = vrot.slane %v3920_v41, 2  ;;  %v4048_v57 = vrot.slane %v3921_v42, 2  ;;  %v9113_v40 = vunpack.i.l.bf16 %v10886_v19  ;;  %v1919_v42 = vld [vmem:[#allocation2 + $0x60] sm:$0xff] }
  0xdf   :  { %557 = vst.msk [vmem:[#allocation2 + $0x80] sm:$0xff] %vm540_vm5, %v9108_v33  ;;  %558 = vst.msk [vmem:[#allocation2 + $0x88] sm:$0xff] %vm540_vm5, %v9109_v58  ;;  %v4050_v50 = vrot.slane %v3922_v26, 2  ;;  %v4051_v27 = vrot.slane %v3923_v2, 2  ;;  %v4053_v61 = vrot.slane %v3924_v45, 2  ;;  %v9119_v16 = vunpack.i.h.bf16 %v10894_v53  ;;  %v11096_v34 = vpop.permute.xlu1 %9186  ;;  %v1920_v26 = vld [vmem:[#allocation2 + $0x68] sm:$0xff] }
  0xe0   :  { %998 = vst.msk [vmem:[#allocation2 + $0x78] sm:$0xff] %vm982_vm6, %v9114_v47  ;;  %v4047_v0 = vsel %vm761_vm0, %v4045_v28, %v4046_v56  ;;  %v4049_v19 = vsel %vm761_vm0, %v4046_v56, %v4048_v57  ;;  %997 = vst.msk [vmem:[#allocation2 + $0x70] sm:$0xff] %vm982_vm6, %v9113_v40  ;;  %v9118_v4 = vunpack.i.l.bf16 %v10894_v53  ;;  %v4359_v5 = vunpack.c.l.bf16 %v8003_v1  ;;  %v8063_v53 = vld [vmem:[%s14858_s0 + $0x114] sm:$0xc]  ;;  %v8065_v33 = vld [vmem:[%s14858_s0 + $0x11c] sm:$0x3] }
  0xe1   :  { %v9390_v7 = vpack.i.bf16 %v4049_v19, %v4047_v0  ;;  %v4052_v10 = vsel %vm761_vm0, %v4050_v50, %v4051_v27  ;;  %v4054_v13 = vsel %vm761_vm0, %v4051_v27, %v4053_v61  ;;  %1000 = vst.msk [vmem:[#allocation2 + $0x88] sm:$0xff] %vm982_vm6, %v9119_v16  ;;  %v4360_v15 = vunpack.c.l.bf16 %v8004_v49  ;;  %v8066_v1 = vld [vmem:[%s14858_s0 + $0x120] sm:$0xc] }
  0xe2   :  { %v9395_v39 = vpack.i.bf16 %v4054_v13, %v4052_v10  ;;  %999 = vst.msk [vmem:[#allocation2 + $0x80] sm:$0xff] %vm982_vm6, %v9118_v4  ;;  %v4361_v46 = vunpack.c.l.bf16 %v8005_v60  ;;  %v4485_v22 = vrot.slane %v4359_v5, 3  ;;  %v4362_v24 = vunpack.c.l.bf16 %v8006_v62  ;;  %v11112_v25 = vpop.permute.xlu0 %9191  ;;  %v7889_v5 = vld [vmem:[%s14858_s0 + $0x12c] sm:$0xff]  }
  0xe3   :  { %9391 = vrot.lane.b32.xlu0 %v9390_v7, %s9835_s15  ;;  %v4486_v20 = vrot.slane %v4360_v15, 3  ;;  %v4363_v48 = vunpack.c.h.bf16 %v8004_v49  ;;  %v4364_v8 = vunpack.c.l.bf16 %v8008_v6  ;;  %v9124_v55 = vunpack.i.h.bf16 %v10909_v3  ;;  %v8068_v49 = vld [vmem:[%s14858_s0 + $0x128] sm:$0x3]  ;;  %v7891_v15 = vld [vmem:[%s14858_s0 + $0x134] sm:$0x1] }
  0xe4   :  { %9396 = vrot.lane.b32.xlu1 %v9395_v39, %s9835_s15  ;;  %v4488_v58 = vrot.slane %v4361_v46, 3  ;;  %v4490_v9 = vrot.slane %v4362_v24, 3  ;;  %v9123_v17 = vunpack.i.l.bf16 %v10909_v3  ;;  %v9129_v32 = vunpack.i.h.bf16 %v10921_v21  ;;  %v11125_v36 = vpop.permute.xlu1 %9196  ;;  %v8438_v39 = vld [vmem:[%s14858_s0 + $0x138] sm:$0xff]  }
  0xe5   :  { %v4487_v37 = vsel %vm1203_vm2, %v4485_v22, %v4486_v20  ;;  %v4491_v38 = vrot.slane %v4363_v48, 3  ;;  %v4493_v35 = vrot.slane %v4364_v8, 3  ;;  %1440 = vst.msk [vmem:[#allocation2 + $0x78] sm:$0xff] %vm1424_vm7, %v9124_v55  ;;  %v9128_v41 = vunpack.i.l.bf16 %v10921_v21 }
  0xe6   :  { %v4489_v3 = vsel %vm1203_vm2, %v4486_v20, %v4488_v58  ;;  %1439 = vst.msk [vmem:[#allocation2 + $0x70] sm:$0xff] %vm1424_vm7, %v9123_v17  ;;  %1442 = vst.msk [vmem:[#allocation2 + $0x88] sm:$0xff] %vm1424_vm7, %v9129_v32  ;;  %v1944_v2 = vpack.c.bf16 %v1918_v29, %v1917_v63  ;;  %v4799_v45 = vunpack.c.l.bf16 %v8063_v53  ;;  %v4800_v47 = vunpack.c.l.bf16 %v8064_v31  ;;  %v11139_v21 = vpop.permute.xlu0 %9201  ;;  %v7894_v63 = vld [vmem:[%s14858_s0 + $0x140] sm:$0x1]  ;;  %v36_v17 = vld [vmem:[%s14858_s0 + $0x6c] sm:$0xff]  }
  0xe7   :  { %v9400_v28 = vpack.i.bf16 %v4489_v3, %v4487_v37  ;;  %v4492_v56 = vsel %vm1203_vm2, %v4490_v9, %v4491_v38  ;;  %v4494_v57 = vsel %vm1203_vm2, %v4491_v38, %v4493_v35  ;;  %1441 = vst.msk [vmem:[#allocation2 + $0x80] sm:$0xff] %vm1424_vm7, %v9128_v41  ;;  %v4801_v40 = vunpack.c.l.bf16 %v8065_v33  ;;  %v8411_v3 = vld [vmem:[%s14858_s0 + $0x78] sm:$0xff]  }
  0xe8   :  { %v9405_v60 = vpack.i.bf16 %v4494_v57, %v4492_v56  ;;  %8625 = vmatprep.mubr.msk.bf16.mxu0 %vm1968_vm10, %v1944_v2  ;;  %8660 = vmatmul.mubr.msk.bf16.gmra.mxu1 %vm1968_vm10, %v1944_v2  ;;  %v4925_v50 = vrot.slane %v4799_v45, 4  ;;  %v4926_v27 = vrot.slane %v4800_v47, 4  ;;  %v1945_v61 = vpack.c.bf16 %v1920_v26, %v1919_v42  ;;  %v11146_v16 = vpop.permute.xlu1 %9206 }
  0xe9   :  { %9401 = vrot.lane.b32.xlu0 %v9400_v28, %s9837_s13  ;;  %v4928_v62 = vrot.slane %v4801_v40, 4  ;;  %v4802_v0 = vunpack.c.l.bf16 %v8066_v1  ;;  %v4803_v19 = vunpack.c.h.bf16 %v8064_v31  ;;  %v4804_v4 = vunpack.c.l.bf16 %v8068_v49  ;;  %v7949_v49 = vld [vmem:[%s14858_s0 + $0x12c] sm:$0xe]  ;;  %v7950_v28 = vld [vmem:[%s14858_s0 + $0x130] ss:$12 sps:$4 sm:$0xff]  }
  0xea   :  { %9406 = vrot.lane.b32.xlu1 %v9405_v60, %s9837_s13  ;;  %v4927_v6 = vsel %vm1645_vm3, %v4925_v50, %v4926_v27  ;;  %8626 = vmatmul.mubr.msk.bf16.gmra.mxu0 %vm1968_vm10, %v1945_v61  ;;  %v9134_v7 = vunpack.i.h.bf16 %v10945_v30  ;;  %v9133_v10 = vunpack.i.l.bf16 %v10945_v30  ;;  %v9139_v13 = vunpack.i.h.bf16 %v10957_v44 }
  0xeb   :  { %v4929_v46 = vsel %vm1645_vm3, %v4926_v27, %v4928_v62  ;;  %8663 = vmatprep.mubr.msk.bf16.mxu1 %vm1968_vm10, %v1945_v61  ;;  %v4930_v22 = vrot.slane %v4802_v0, 4  ;;  %v4931_v24 = vrot.slane %v4803_v19, 4  ;;  %v4933_v53 = vrot.slane %v4804_v4, 4  ;;  %v11166_v20 = vpop.permute.xlu0 %9211  ;;  %v7952_v27 = vld [vmem:[%s14858_s0 + $0x138] sm:$0xe] }
  0xec   :  { %v9410_v30 = vpack.i.bf16 %v4929_v46, %v4927_v6  ;;  %1881 = vst.msk [vmem:[#allocation2 + $0x70] sm:$0xff] %vm1866_vm8, %v9133_v10  ;;  %1882 = vst.msk [vmem:[#allocation2 + $0x78] sm:$0xff] %vm1866_vm8, %v9134_v7  ;;  %v9138_v48 = vunpack.i.l.bf16 %v10957_v44  ;;  %v3485_v8 = vunpack.c.l.bf16 %v7889_v5  ;;  %v3486_v55 = vunpack.c.h.bf16 %v7889_v5  ;;  %v7954_v5 = vld [vmem:[%s14858_s0 + $0x140] sm:$0x1] }
  0xed   :  { %1884 = vst.msk [vmem:[#allocation2 + $0x88] sm:$0xff] %vm1866_vm8, %v9139_v13  ;;  %v4932_v29 = vsel %vm1645_vm3, %v4930_v22, %v4931_v24  ;;  %v4934_v31 = vsel %vm1645_vm3, %v4931_v24, %v4933_v53  ;;  %v3487_v58 = vunpack.c.l.bf16 %v7891_v15  ;;  %v8381_v9 = vunpack.c.l.bf16 %v8438_v39  ;;  %v11180_v32 = vpop.permute.xlu1 %9216  ;;  %v8009_v22 = vld [vmem:[%s14858_s0 + $0x12c] sm:$0xe] }
  0xee   :  { %9411 = vrot.lane.b32.xlu0 %v9410_v30, %s9838_s6  ;;  %v9415_v44 = vpack.i.bf16 %v4934_v31, %v4932_v29  ;;  %1883 = vst.msk [vmem:[#allocation2 + $0x80] sm:$0xff] %vm1866_vm8, %v9138_v48  ;;  %v3615_v33 = vrot.slane %v3485_v8, 1  ;;  %v3616_v37 = vrot.slane %v3486_v55, 1  ;;  %v8382_v38 = vunpack.c.h.bf16 %v8438_v39  ;;  %v8010_v8 = vld [vmem:[%s14858_s0 + $0x130] ss:$12 sps:$4 sm:$0xff]  }
  0xef   :  { %v3618_v35 = vrot.slane %v3487_v58, 1  ;;  %v3490_v41 = vunpack.c.l.bf16 %v7894_v63  ;;  %v3620_v42 = vrot.slane %v8381_v9, 1  ;;  %v9144_v26 = vunpack.i.h.bf16 %v10965_v52  ;;  %v11197_v56 = vpop.permute.xlu0 %9221  ;;  %v8011_v55 = vld [vmem:[%s14858_s0 + $0x134] sm:$0x3]  ;;  %v8012_v9 = vld [vmem:[%s14858_s0 + $0x138] sm:$0xe] }
  0xf0   :  { %9416 = vrot.lane.b32.xlu1 %v9415_v44, %s9838_s6  ;;  %v3617_v2 = vsel %vm319_vm1, %v3615_v33, %v3616_v37  ;;  %v3621_v45 = vrot.slane %v8382_v38, 1  ;;  %v9143_v47 = vunpack.i.l.bf16 %v10965_v52  ;;  %v76_v1 = vunpack.c.l.bf16 %v36_v17  ;;  %v7951_v52 = vld [vmem:[%s14858_s0 + $0x134] sm:$0x1] }
  0xf1   :  { %v3619_v57 = vsel %vm319_vm1, %v3616_v37, %v3618_v35  ;;  %v3623_v40 = vrot.slane %v3490_v41, 1  ;;  %v77_v60 = vunpack.c.h.bf16 %v36_v17  ;;  %v9149_v50 = vunpack.i.h.bf16 %v10982_v18  ;;  %v11207_v61 = vpop.permute.xlu1 %9226 }
  0xf2   :  { %v9420_v62 = vpack.i.bf16 %v3619_v57, %v3617_v2  ;;  %v3622_v0 = vsel %vm319_vm1, %v3620_v42, %v3621_v45  ;;  %117 = vst.msk [vmem:[#allocation2 + $0x90] sm:$0xff] %vm98_vm4, %v76_v1  ;;  %v9148_v19 = vunpack.i.l.bf16 %v10982_v18  ;;  %v8269_v4 = vunpack.c.l.bf16 %v8411_v3 }
  0xf3   :  { %v3624_v6 = vsel %vm319_vm1, %v3621_v45, %v3623_v40  ;;  %118 = vst.msk [vmem:[#allocation2 + $0x98] sm:$0xff] %vm98_vm4, %v77_v60  ;;  %v8270_v7 = vunpack.c.h.bf16 %v8411_v3  ;;  %v3925_v10 = vunpack.c.l.bf16 %v7949_v49  ;;  %v3926_v13 = vunpack.c.l.bf16 %v7950_v28  ;;  %v8014_v3 = vld [vmem:[%s14858_s0 + $0x140] sm:$0x3]  ;;  %v1921_v40 = vld [vmem:[#allocation2 + $0x70] sm:$0xff]  ;;  %v1922_v60 = vld [vmem:[#allocation2 + $0x78] sm:$0xff] }
  0xf4   :  { %559 = vst.msk [vmem:[#allocation2 + $0x90] sm:$0xff] %vm540_vm5, %v9143_v47  ;;  %9421 = vrot.lane.b32.xlu0 %v9420_v62, %s9836_s18  ;;  %v9425_v15 = vpack.i.bf16 %v3624_v6, %v3622_v0  ;;  %560 = vst.msk [vmem:[#allocation2 + $0x98] sm:$0xff] %vm540_vm5, %v9144_v26  ;;  %v3927_v18 = vunpack.c.l.bf16 %v7951_v52  ;;  %v3928_v39 = vunpack.c.l.bf16 %v7952_v27  ;;  %v3929_v46 = vunpack.c.h.bf16 %v7950_v28  ;;  %v11239_v17 = vpop.permute.xlu0 %9231 }
  0xf5   :  { %119 = vst.msk [vmem:[#allocation2 + $0xa0] sm:$0xff] %vm98_vm4, %v8269_v4  ;;  %120 = vst.msk [vmem:[#allocation2 + $0xa8] sm:$0xff] %vm98_vm4, %v8270_v7  ;;  %v4055_v24 = vrot.slane %v3925_v10, 2  ;;  %v4056_v53 = vrot.slane %v3926_v13, 2  ;;  %v3930_v30 = vunpack.c.l.bf16 %v7954_v5  ;;  %v9154_v48 = vunpack.i.h.bf16 %v10997_v23  ;;  %v8071_v4 = vld [vmem:[%s14858_s0 + $0x134] sm:$0x3] }
  0xf6   :  { %561 = vst.msk [vmem:[#allocation2 + $0xa0] sm:$0xff] %vm540_vm5, %v9148_v19  ;;  %9426 = vrot.lane.b32.xlu1 %v9425_v15, %s9836_s18  ;;  %562 = vst.msk [vmem:[#allocation2 + $0xa8] sm:$0xff] %vm540_vm5, %v9149_v50  ;;  %v4058_v63 = vrot.slane %v3927_v18, 2  ;;  %v4060_v29 = vrot.slane %v3928_v39, 2  ;;  %v4061_v31 = vrot.slane %v3929_v46, 2  ;;  %v9153_v58 = vunpack.i.l.bf16 %v10997_v23  ;;  %v11245_v35 = vpop.permute.xlu1 %9236  ;;  %v1923_v13 = vld [vmem:[#allocation2 + $0x80] sm:$0xff] }
  0xf7   :  { %v4057_v44 = vsel %vm761_vm0, %v4055_v24, %v4056_v53  ;;  %v4063_v33 = vrot.slane %v3930_v30, 2  ;;  %1002 = vst.msk [vmem:[#allocation2 + $0x98] sm:$0xff] %vm982_vm6, %v9154_v48  ;;  %v9159_v37 = vunpack.i.h.bf16 %v11009_v54  ;;  %v9158_v38 = vunpack.i.l.bf16 %v11009_v54  ;;  %v8069_v50 = vld [vmem:[%s14858_s0 + $0x12c] sm:$0xc]  ;;  %v8070_v19 = vld [vmem:[%s14858_s0 + $0x130] ss:$12 sps:$4 sm:$0xff]  }
  0xf8   :  { %v4059_v41 = vsel %vm761_vm0, %v4056_v53, %v4058_v63  ;;  %v4062_v23 = vsel %vm761_vm0, %v4060_v29, %v4061_v31  ;;  %1001 = vst.msk [vmem:[#allocation2 + $0x90] sm:$0xff] %vm982_vm6, %v9153_v58  ;;  %v4365_v42 = vunpack.c.l.bf16 %v8009_v22  ;;  %v4366_v26 = vunpack.c.l.bf16 %v8010_v8  ;;  %v1924_v15 = vld [vmem:[#allocation2 + $0x88] sm:$0xff]  ;;  %v8072_v18 = vld [vmem:[%s14858_s0 + $0x138] sm:$0xc]  ;;  %v11274_v39 = vpop.permute.xlu0 %9241  ;;  %v8074_v63 = vld [vmem:[%s14858_s0 + $0x140] sm:$0x3] }
  0xf9   :  { %v9430_v2 = vpack.i.bf16 %v4059_v41, %v4057_v44  ;;  %v4064_v45 = vsel %vm761_vm0, %v4061_v31, %v4063_v33  ;;  %1003 = vst.msk [vmem:[#allocation2 + $0xa0] sm:$0xff] %vm982_vm6, %v9158_v38  ;;  %1004 = vst.msk [vmem:[#allocation2 + $0xa8] sm:$0xff] %vm982_vm6, %v9159_v37  ;;  %v4367_v54 = vunpack.c.l.bf16 %v8011_v55  ;;  %v4368_v47 = vunpack.c.l.bf16 %v8012_v9  ;;  %v7895_v38 = vld [vmem:[%s14858_s0 + $0x144] sm:$0xff]  }
  0xfa   :  { %v9435_v1 = vpack.i.bf16 %v4064_v45, %v4062_v23  ;;  %v4495_v49 = vrot.slane %v4365_v42, 3  ;;  %v4496_v28 = vrot.slane %v4366_v26, 3  ;;  %v4369_v57 = vunpack.c.h.bf16 %v8010_v8  ;;  %v11279_v30 = vpop.permute.xlu1 %9246 }
  0xfb   :  { %9431 = vrot.lane.b32.xlu0 %v9430_v2, %s9835_s15  ;;  %v4498_v52 = vrot.slane %v4367_v54, 3  ;;  %v4370_v27 = vunpack.c.l.bf16 %v8014_v3  ;;  %v4500_v62 = vrot.slane %v4368_v47, 3  ;;  %v9164_v0 = vunpack.i.h.bf16 %v11024_v59  ;;  %v7897_v3 = vld [vmem:[%s14858_s0 + $0x14c] sm:$0x1] }
  0xfc   :  { %9436 = vrot.lane.b32.xlu1 %v9435_v1, %s9835_s15  ;;  %v4497_v5 = vsel %vm1203_vm2, %v4495_v49, %v4496_v28  ;;  %v4501_v6 = vrot.slane %v4369_v57, 3  ;;  %v9163_v7 = vunpack.i.l.bf16 %v11024_v59  ;;  %v9169_v10 = vunpack.i.h.bf16 %v11034_v43  ;;  %v8439_v1 = vld [vmem:[%s14858_s0 + $0x150] sm:$0xff]  }
  0xfd   :  { %v4499_v46 = vsel %vm1203_vm2, %v4496_v28, %v4498_v52  ;;  %v4503_v22 = vrot.slane %v4370_v27, 3  ;;  %1444 = vst.msk [vmem:[#allocation2 + $0x98] sm:$0xff] %vm1424_vm7, %v9164_v0  ;;  %v9168_v24 = vunpack.i.l.bf16 %v11034_v43  ;;  %v1946_v53 = vpack.c.bf16 %v1922_v60, %v1921_v40 }
  0xfe   :  { %v9440_v59 = vpack.i.bf16 %v4499_v46, %v4497_v5  ;;  %v4502_v48 = vsel %vm1203_vm2, %v4500_v62, %v4501_v6  ;;  %1443 = vst.msk [vmem:[#allocation2 + $0x90] sm:$0xff] %vm1424_vm7, %v9163_v7  ;;  %1446 = vst.msk [vmem:[#allocation2 + $0xa8] sm:$0xff] %vm1424_vm7, %v9169_v10  ;;  %v4805_v8 = vunpack.c.l.bf16 %v8069_v50  ;;  %v4806_v55 = vunpack.c.l.bf16 %v8070_v19 }
  0xff   :  { %v4504_v29 = vsel %vm1203_vm2, %v4501_v6, %v4503_v22  ;;  %1445 = vst.msk [vmem:[#allocation2 + $0xa0] sm:$0xff] %vm1424_vm7, %v9168_v24  ;;  %8629 = vmatprep.mubr.msk.bf16.mxu0 %vm1968_vm10, %v1946_v53  ;;  %8664 = vmatmul.mubr.msk.bf16.gmra.mxu1 %vm1968_vm10, %v1946_v53  ;;  %v4807_v43 = vunpack.c.l.bf16 %v8071_v4  ;;  %v1947_v31 = vpack.c.bf16 %v1924_v15, %v1923_v13  ;;  %v4808_v58 = vunpack.c.l.bf16 %v8072_v18  ;;  %v40_v6 = vld [vmem:[%s14858_s0 + $0x84] sm:$0xff]   ;;  %v8412_v53 = vld [vmem:[%s14858_s0 + $0x90] sm:$0xff]  }
 0x100   :  { %9441 = vrot.lane.b32.xlu0 %v9440_v59, %s9837_s13  ;;  %v9445_v9 = vpack.i.bf16 %v4504_v29, %v4502_v48  ;;  %v4935_v44 = vrot.slane %v4805_v8, 4  ;;  %v4936_v33 = vrot.slane %v4806_v55, 4  ;;  %v4809_v37 = vunpack.c.h.bf16 %v8070_v19  ;;  %v11308_v49 = vpop.permute.xlu0 %9251  ;;  %v11316_v50 = vpop.permute.xlu1 %9256  ;;  %v7955_v59 = vld [vmem:[%s14858_s0 + $0x144] sm:$0xe]  ;;  %v7957_v29 = vld [vmem:[%s14858_s0 + $0x14c] sm:$0x1] }
 0x101   :  { %v4938_v41 = vrot.slane %v4807_v43, 4  ;;  %8630 = vmatmul.mubr.msk.bf16.gmra.mxu0 %vm1968_vm10, %v1947_v31  ;;  %8667 = vmatprep.mubr.msk.bf16.mxu1 %vm1968_vm10, %v1947_v31  ;;  %v4810_v23 = vunpack.c.l.bf16 %v8074_v63  ;;  %v4940_v42 = vrot.slane %v4808_v58, 4  ;;  %v9174_v26 = vunpack.i.h.bf16 %v11054_v14 }
 0x102   :  { %9446 = vrot.lane.b32.xlu1 %v9445_v9, %s9837_s13  ;;  %v4937_v2 = vsel %vm1645_vm3, %v4935_v44, %v4936_v33  ;;  %v4941_v45 = vrot.slane %v4809_v37, 4  ;;  %v9173_v54 = vunpack.i.l.bf16 %v11054_v14  ;;  %v9179_v47 = vunpack.i.h.bf16 %v11067_v12  ;;  %v7900_v14 = vld [vmem:[%s14858_s0 + $0x158] sm:$0x1] }
 0x103   :  { %v4939_v28 = vsel %vm1645_vm3, %v4936_v33, %v4938_v41  ;;  %v4943_v57 = vrot.slane %v4810_v23, 4  ;;  %1886 = vst.msk [vmem:[#allocation2 + $0x98] sm:$0xff] %vm1866_vm8, %v9174_v26  ;;  %v9178_v40 = vunpack.i.l.bf16 %v11067_v12  ;;  %v3491_v60 = vunpack.c.l.bf16 %v7895_v38  ;;  %v7958_v33 = vld [vmem:[%s14858_s0 + $0x150] sm:$0xe]  ;;  %v7960_v37 = vld [vmem:[%s14858_s0 + $0x158] sm:$0x1] }
 0x104   :  { %v9450_v52 = vpack.i.bf16 %v4939_v28, %v4937_v2  ;;  %v4942_v27 = vsel %vm1645_vm3, %v4940_v42, %v4941_v45  ;;  %1885 = vst.msk [vmem:[#allocation2 + $0x90] sm:$0xff] %vm1866_vm8, %v9173_v54  ;;  %1888 = vst.msk [vmem:[#allocation2 + $0xa8] sm:$0xff] %vm1866_vm8, %v9179_v47  ;;  %v3492_v62 = vunpack.c.h.bf16 %v7895_v38  ;;  %v3493_v0 = vunpack.c.l.bf16 %v7897_v3 }
 0x105   :  { %v4944_v19 = vsel %vm1645_vm3, %v4941_v45, %v4943_v57  ;;  %1887 = vst.msk [vmem:[#allocation2 + $0xa0] sm:$0xff] %vm1866_vm8, %v9178_v40  ;;  %v3625_v12 = vrot.slane %v3491_v60, 1  ;;  %v8385_v4 = vunpack.c.l.bf16 %v8439_v1  ;;  %v8386_v5 = vunpack.c.h.bf16 %v8439_v1  ;;  %v8015_v57 = vld [vmem:[%s14858_s0 + $0x144] sm:$0xe]  ;;  %v8016_v40 = vld [vmem:[%s14858_s0 + $0x148] ss:$12 sps:$4 sm:$0xff]  }
 0x106   :  { %9451 = vrot.lane.b32.xlu0 %v9450_v52, %s9838_s6  ;;  %v9455_v7 = vpack.i.bf16 %v4944_v19, %v4942_v27  ;;  %v3626_v10 = vrot.slane %v3492_v62, 1  ;;  %v3628_v13 = vrot.slane %v3493_v0, 1  ;;  %v3496_v15 = vunpack.c.l.bf16 %v7900_v14  ;;  %v11344_v43 = vpop.permute.xlu0 %9261  ;;  %v8017_v62 = vld [vmem:[%s14858_s0 + $0x14c] sm:$0x3] }
 0x107   :  { %v3630_v18 = vrot.slane %v8385_v4, 1  ;;  %v3631_v46 = vrot.slane %v8386_v5, 1  ;;  %v9184_v22 = vunpack.i.h.bf16 %v11082_v51  ;;  %v9183_v24 = vunpack.i.l.bf16 %v11082_v51  ;;  %v7956_v51 = vld [vmem:[%s14858_s0 + $0x148] ss:$12 sps:$4 sm:$0xff]   ;;  %v11354_v38 = vpop.permute.xlu1 %9266  ;;  %v8018_v5 = vld [vmem:[%s14858_s0 + $0x150] sm:$0xe] }
 0x108   :  { %9456 = vrot.lane.b32.xlu1 %v9455_v7, %s9838_s6  ;;  %v3627_v48 = vsel %vm319_vm1, %v3625_v12, %v3626_v10  ;;  %v3629_v8 = vsel %vm319_vm1, %v3626_v10, %v3628_v13  ;;  %v3633_v55 = vrot.slane %v3496_v15, 1  ;;  %v80_v63 = vunpack.c.l.bf16 %v40_v6  ;;  %v8020_v15 = vld [vmem:[%s14858_s0 + $0x158] sm:$0x3] }
 0x109   :  { %v9460_v31 = vpack.i.bf16 %v3629_v8, %v3627_v48  ;;  %v3632_v58 = vsel %vm319_vm1, %v3630_v18, %v3631_v46  ;;  %v81_v9 = vunpack.c.h.bf16 %v40_v6  ;;  %v9189_v44 = vunpack.i.h.bf16 %v11096_v34 }
 0x10a   :  { %v3634_v41 = vsel %vm319_vm1, %v3631_v46, %v3633_v55  ;;  %121 = vst.msk [vmem:[#allocation2 + $0xb0] sm:$0xff] %vm98_vm4, %v80_v63  ;;  %v9188_v23 = vunpack.i.l.bf16 %v11096_v34  ;;  %v8273_v42 = vunpack.c.l.bf16 %v8412_v53  ;;  %v8274_v26 = vunpack.c.h.bf16 %v8412_v53  ;;  %v8075_v55 = vld [vmem:[%s14858_s0 + $0x144] sm:$0xc] }
 0x10b   :  { %9461 = vrot.lane.b32.xlu0 %v9460_v31, %s9836_s18  ;;  %v9465_v3 = vpack.i.bf16 %v3634_v41, %v3632_v58  ;;  %122 = vst.msk [vmem:[#allocation2 + $0xb8] sm:$0xff] %vm98_vm4, %v81_v9  ;;  %v3931_v2 = vunpack.c.l.bf16 %v7955_v59  ;;  %v3932_v45 = vunpack.c.l.bf16 %v7956_v51  ;;  %v3933_v54 = vunpack.c.l.bf16 %v7957_v29  ;;  %v1925_v58 = vld [vmem:[#allocation2 + $0x90] sm:$0xff]  ;;  %v1926_v9 = vld [vmem:[#allocation2 + $0x98] sm:$0xff] }
 0x10c   :  { %563 = vst.msk [vmem:[#allocation2 + $0xb0] sm:$0xff] %vm540_vm5, %v9183_v24  ;;  %564 = vst.msk [vmem:[#allocation2 + $0xb8] sm:$0xff] %vm540_vm5, %v9184_v22  ;;  %v3934_v47 = vunpack.c.l.bf16 %v7958_v33  ;;  %v3935_v34 = vunpack.c.h.bf16 %v7956_v51  ;;  %v3936_v1 = vunpack.c.l.bf16 %v7960_v37  ;;  %v9194_v28 = vunpack.i.h.bf16 %v11112_v25  ;;  %v11384_v6 = vpop.permute.xlu0 %9271 }
 0x10d   :  { %123 = vst.msk [vmem:[#allocation2 + $0xc0] sm:$0xff] %vm98_vm4, %v8273_v42  ;;  %124 = vst.msk [vmem:[#allocation2 + $0xc8] sm:$0xff] %vm98_vm4, %v8274_v26  ;;  %9466 = vrot.lane.b32.xlu1 %v9465_v3, %s9836_s18  ;;  %v4065_v60 = vrot.slane %v3931_v2, 2  ;;  %v4066_v14 = vrot.slane %v3932_v45, 2  ;;  %v4068_v52 = vrot.slane %v3933_v54, 2  ;;  %v9193_v27 = vunpack.i.l.bf16 %v11112_v25  ;;  %v11393_v18 = vpop.permute.xlu1 %9276  ;;  %v1927_v54 = vld [vmem:[#allocation2 + $0xa0] sm:$0xff] }
 0x10e   :  { %565 = vst.msk [vmem:[#allocation2 + $0xc0] sm:$0xff] %vm540_vm5, %v9188_v23  ;;  %566 = vst.msk [vmem:[#allocation2 + $0xc8] sm:$0xff] %vm540_vm5, %v9189_v44  ;;  %v4070_v0 = vrot.slane %v3934_v47, 2  ;;  %v4071_v19 = vrot.slane %v3935_v34, 2  ;;  %v4073_v12 = vrot.slane %v3936_v1, 2  ;;  %v9199_v4 = vunpack.i.h.bf16 %v11125_v36  ;;  %v1928_v47 = vld [vmem:[#allocation2 + $0xa8] sm:$0xff] }
 0x10f   :  { %1006 = vst.msk [vmem:[#allocation2 + $0xb8] sm:$0xff] %vm982_vm6, %v9194_v28  ;;  %v4067_v7 = vsel %vm761_vm0, %v4065_v60, %v4066_v14  ;;  %v4069_v25 = vsel %vm761_vm0, %v4066_v14, %v4068_v52  ;;  %1005 = vst.msk [vmem:[#allocation2 + $0xb0] sm:$0xff] %vm982_vm6, %v9193_v27  ;;  %v9198_v10 = vunpack.i.l.bf16 %v11125_v36  ;;  %v4371_v13 = vunpack.c.l.bf16 %v8015_v57  ;;  %v8076_v44 = vld [vmem:[%s14858_s0 + $0x148] ss:$12 sps:$4 sm:$0xff]   ;;  %v8077_v42 = vld [vmem:[%s14858_s0 + $0x14c] sm:$0x3] }
 0x110   :  { %v9470_v46 = vpack.i.bf16 %v4069_v25, %v4067_v7  ;;  %v4072_v22 = vsel %vm761_vm0, %v4070_v0, %v4071_v19  ;;  %v4074_v24 = vsel %vm761_vm0, %v4071_v19, %v4073_v12  ;;  %1008 = vst.msk [vmem:[#allocation2 + $0xc8] sm:$0xff] %vm982_vm6, %v9199_v4  ;;  %v4372_v53 = vunpack.c.l.bf16 %v8016_v40 }
 0x111   :  { %v9475_v59 = vpack.i.bf16 %v4074_v24, %v4072_v22  ;;  %1007 = vst.msk [vmem:[#allocation2 + $0xc0] sm:$0xff] %vm982_vm6, %v9198_v10  ;;  %v4373_v48 = vunpack.c.l.bf16 %v8017_v62  ;;  %v4505_v36 = vrot.slane %v4371_v13, 3  ;;  %v4374_v8 = vunpack.c.l.bf16 %v8018_v5  ;;  %v11416_v34 = vpop.permute.xlu0 %9281  ;;  %v7901_v13 = vld [vmem:[%s14858_s0 + $0x15c] sm:$0xff]  }
 0x112   :  { %9471 = vrot.lane.b32.xlu0 %v9470_v46, %s9835_s15  ;;  %v4506_v63 = vrot.slane %v4372_v53, 3  ;;  %v4375_v51 = vunpack.c.h.bf16 %v8016_v40  ;;  %v4376_v29 = vunpack.c.l.bf16 %v8020_v15  ;;  %v9204_v31 = vunpack.i.h.bf16 %v11139_v21  ;;  %v8078_v40 = vld [vmem:[%s14858_s0 + $0x150] sm:$0xc]  ;;  %v7903_v53 = vld [vmem:[%s14858_s0 + $0x164] sm:$0x1] }
 0x113   :  { %9476 = vrot.lane.b32.xlu1 %v9475_v59, %s9835_s15  ;;  %v4508_v33 = vrot.slane %v4373_v48, 3  ;;  %v4510_v37 = vrot.slane %v4374_v8, 3  ;;  %v9203_v41 = vunpack.i.l.bf16 %v11139_v21  ;;  %v9209_v23 = vunpack.i.h.bf16 %v11146_v16  ;;  %v11427_v60 = vpop.permute.xlu1 %9286  ;;  %v8440_v59 = vld [vmem:[%s14858_s0 + $0x168] sm:$0xff]  }
 0x114   :  { %v4507_v26 = vsel %vm1203_vm2, %v4505_v36, %v4506_v63  ;;  %v4511_v3 = vrot.slane %v4375_v51, 3  ;;  %v4513_v2 = vrot.slane %v4376_v29, 3  ;;  %1448 = vst.msk [vmem:[#allocation2 + $0xb8] sm:$0xff] %vm1424_vm7, %v9204_v31  ;;  %v9208_v45 = vunpack.i.l.bf16 %v11146_v16  ;;  %v8080_v16 = vld [vmem:[%s14858_s0 + $0x158] sm:$0x3] }
 0x115   :  { %v4509_v21 = vsel %vm1203_vm2, %v4506_v63, %v4508_v33  ;;  %1447 = vst.msk [vmem:[#allocation2 + $0xb0] sm:$0xff] %vm1424_vm7, %v9203_v41  ;;  %1450 = vst.msk [vmem:[#allocation2 + $0xc8] sm:$0xff] %vm1424_vm7, %v9209_v23  ;;  %v1948_v1 = vpack.c.bf16 %v1926_v9, %v1925_v58  ;;  %v4811_v28 = vunpack.c.l.bf16 %v8075_v55  ;;  %v4812_v57 = vunpack.c.l.bf16 %v8076_v44  ;;  %v7906_v58 = vld [vmem:[%s14858_s0 + $0x170] sm:$0x1] }
 0x116   :  { %v9480_v14 = vpack.i.bf16 %v4509_v21, %v4507_v26  ;;  %v4512_v52 = vsel %vm1203_vm2, %v4510_v37, %v4511_v3  ;;  %v4514_v27 = vsel %vm1203_vm2, %v4511_v3, %v4513_v2  ;;  %1449 = vst.msk [vmem:[#allocation2 + $0xc0] sm:$0xff] %vm1424_vm7, %v9208_v45  ;;  %v4813_v62 = vunpack.c.l.bf16 %v8077_v42  ;;  %v8413_v21 = vld [vmem:[%s14858_s0 + $0xa8] sm:$0xff]  }
 0x117   :  { %v9485_v0 = vpack.i.bf16 %v4514_v27, %v4512_v52  ;;  %8633 = vmatprep.mubr.msk.bf16.mxu0 %vm1968_vm10, %v1948_v1  ;;  %8668 = vmatmul.mubr.msk.bf16.gmra.mxu1 %vm1968_vm10, %v1948_v1  ;;  %v4945_v19 = vrot.slane %v4811_v28, 4  ;;  %v4946_v12 = vrot.slane %v4812_v57, 4  ;;  %v1949_v4 = vpack.c.bf16 %v1928_v47, %v1927_v54  ;;  %v11452_v63 = vpop.permute.xlu0 %9291 }
 0x118   :  { %9481 = vrot.lane.b32.xlu0 %v9480_v14, %s9837_s13  ;;  %v4948_v5 = vrot.slane %v4813_v62, 4  ;;  %v4814_v7 = vunpack.c.l.bf16 %v8078_v40  ;;  %v4815_v25 = vunpack.c.h.bf16 %v8076_v44  ;;  %v4816_v10 = vunpack.c.l.bf16 %v8080_v16  ;;  %v7961_v16 = vld [vmem:[%s14858_s0 + $0x15c] sm:$0xe]  ;;  %v7962_v14 = vld [vmem:[%s14858_s0 + $0x160] ss:$12 sps:$4 sm:$0xff]  }
 0x119   :  { %9486 = vrot.lane.b32.xlu1 %v9485_v0, %s9837_s13  ;;  %v4947_v15 = vsel %vm1645_vm3, %v4945_v19, %v4946_v12  ;;  %8634 = vmatmul.mubr.msk.bf16.gmra.mxu0 %vm1968_vm10, %v1949_v4  ;;  %v9214_v46 = vunpack.i.h.bf16 %v11166_v20  ;;  %v9213_v22 = vunpack.i.l.bf16 %v11166_v20  ;;  %v9219_v24 = vunpack.i.h.bf16 %v11180_v32  ;;  %v11461_v9 = vpop.permute.xlu1 %9296  ;;  %v7963_v19 = vld [vmem:[%s14858_s0 + $0x164] sm:$0x1] }
 0x11a   :  { %v4949_v48 = vsel %vm1645_vm3, %v4946_v12, %v4948_v5  ;;  %8671 = vmatprep.mubr.msk.bf16.mxu1 %vm1968_vm10, %v1949_v4  ;;  %v4950_v36 = vrot.slane %v4814_v7, 4  ;;  %v4951_v8 = vrot.slane %v4815_v25, 4  ;;  %v4953_v55 = vrot.slane %v4816_v10, 4  ;;  %v7966_v10 = vld [vmem:[%s14858_s0 + $0x170] sm:$0x1] }
 0x11b   :  { %v9490_v20 = vpack.i.bf16 %v4949_v48, %v4947_v15  ;;  %1889 = vst.msk [vmem:[#allocation2 + $0xb0] sm:$0xff] %vm1866_vm8, %v9213_v22  ;;  %1890 = vst.msk [vmem:[#allocation2 + $0xb8] sm:$0xff] %vm1866_vm8, %v9214_v46  ;;  %v9218_v51 = vunpack.i.l.bf16 %v11180_v32  ;;  %v3497_v29 = vunpack.c.l.bf16 %v7901_v13  ;;  %v3498_v31 = vunpack.c.h.bf16 %v7901_v13  ;;  %v44_v32 = vld [vmem:[%s14858_s0 + $0x9c] sm:$0xff]  }
 0x11c   :  { %1892 = vst.msk [vmem:[#allocation2 + $0xc8] sm:$0xff] %vm1866_vm8, %v9219_v24  ;;  %v4952_v44 = vsel %vm1645_vm3, %v4950_v36, %v4951_v8  ;;  %v4954_v33 = vsel %vm1645_vm3, %v4951_v8, %v4953_v55  ;;  %v3499_v37 = vunpack.c.l.bf16 %v7903_v53  ;;  %v8389_v41 = vunpack.c.l.bf16 %v8440_v59  ;;  %v11491_v12 = vpop.permute.xlu0 %9301  ;;  %v8021_v36 = vld [vmem:[%s14858_s0 + $0x15c] sm:$0xe] }
 0x11d   :  { %9491 = vrot.lane.b32.xlu0 %v9490_v20, %s9838_s6  ;;  %v9495_v23 = vpack.i.bf16 %v4954_v33, %v4952_v44  ;;  %1891 = vst.msk [vmem:[#allocation2 + $0xc0] sm:$0xff] %vm1866_vm8, %v9218_v51  ;;  %v3635_v42 = vrot.slane %v3497_v29, 1  ;;  %v3636_v26 = vrot.slane %v3498_v31, 1  ;;  %v8390_v3 = vunpack.c.h.bf16 %v8440_v59  ;;  %v8022_v29 = vld [vmem:[%s14858_s0 + $0x160] ss:$12 sps:$4 sm:$0xff]  }
 0x11e   :  { %v3638_v2 = vrot.slane %v3499_v37, 1  ;;  %v3502_v45 = vunpack.c.l.bf16 %v7906_v58  ;;  %v3640_v54 = vrot.slane %v8389_v41, 1  ;;  %v9224_v47 = vunpack.i.h.bf16 %v11197_v56  ;;  %v11499_v13 = vpop.permute.xlu1 %9306  ;;  %v8023_v31 = vld [vmem:[%s14858_s0 + $0x164] sm:$0x3]  ;;  %v8024_v41 = vld [vmem:[%s14858_s0 + $0x168] sm:$0xe] }
 0x11f   :  { %9496 = vrot.lane.b32.xlu1 %v9495_v23, %s9838_s6  ;;  %v3637_v1 = vsel %vm319_vm1, %v3635_v42, %v3636_v26  ;;  %v3641_v28 = vrot.slane %v8390_v3, 1  ;;  %v9223_v57 = vunpack.i.l.bf16 %v11197_v56  ;;  %v84_v40 = vunpack.c.l.bf16 %v44_v32  ;;  %v7964_v56 = vld [vmem:[%s14858_s0 + $0x168] sm:$0xe] }
 0x120   :  { %v3639_v52 = vsel %vm319_vm1, %v3636_v26, %v3638_v2  ;;  %v3643_v27 = vrot.slane %v3502_v45, 1  ;;  %v85_v62 = vunpack.c.h.bf16 %v44_v32  ;;  %v9229_v0 = vunpack.i.h.bf16 %v11207_v61 }
 0x121   :  { %v9500_v4 = vpack.i.bf16 %v3639_v52, %v3637_v1  ;;  %v3642_v5 = vsel %vm319_vm1, %v3640_v54, %v3641_v28  ;;  %125 = vst.msk [vmem:[#allocation2 + $0xd0] sm:$0xff] %vm98_vm4, %v84_v40  ;;  %v9228_v7 = vunpack.i.l.bf16 %v11207_v61  ;;  %v8277_v25 = vunpack.c.l.bf16 %v8413_v21 }
 0x122   :  { %v3644_v15 = vsel %vm319_vm1, %v3641_v28, %v3643_v27  ;;  %126 = vst.msk [vmem:[#allocation2 + $0xd8] sm:$0xff] %vm98_vm4, %v85_v62  ;;  %v8278_v46 = vunpack.c.h.bf16 %v8413_v21  ;;  %v3937_v22 = vunpack.c.l.bf16 %v7961_v16  ;;  %v3938_v24 = vunpack.c.l.bf16 %v7962_v14  ;;  %v1929_v27 = vld [vmem:[#allocation2 + $0xb0] sm:$0xff]  ;;  %v1930_v62 = vld [vmem:[#allocation2 + $0xb8] sm:$0xff] }
 0x123   :  { %567 = vst.msk [vmem:[#allocation2 + $0xd0] sm:$0xff] %vm540_vm5, %v9223_v57  ;;  %9501 = vrot.lane.b32.xlu0 %v9500_v4, %s9836_s18  ;;  %v9505_v53 = vpack.i.bf16 %v3644_v15, %v3642_v5  ;;  %568 = vst.msk [vmem:[#allocation2 + $0xd8] sm:$0xff] %vm540_vm5, %v9224_v47  ;;  %v3939_v61 = vunpack.c.l.bf16 %v7963_v19  ;;  %v3940_v59 = vunpack.c.l.bf16 %v7964_v56  ;;  %v3941_v48 = vunpack.c.h.bf16 %v7962_v14  ;;  %v11529_v3 = vpop.permute.xlu0 %9311  ;;  %v8026_v47 = vld [vmem:[%s14858_s0 + $0x170] sm:$0x3] }
 0x124   :  { %127 = vst.msk [vmem:[#allocation2 + $0xe0] sm:$0xff] %vm98_vm4, %v8277_v25  ;;  %128 = vst.msk [vmem:[#allocation2 + $0xe8] sm:$0xff] %vm98_vm4, %v8278_v46  ;;  %v4075_v8 = vrot.slane %v3937_v22, 2  ;;  %v4076_v55 = vrot.slane %v3938_v24, 2  ;;  %v3942_v20 = vunpack.c.l.bf16 %v7966_v10  ;;  %v9234_v51 = vunpack.i.h.bf16 %v11239_v17  ;;  %v11537_v21 = vpop.permute.xlu1 %9316  ;;  %v8082_v25 = vld [vmem:[%s14858_s0 + $0x160] ss:$12 sps:$4 sm:$0xff]  }
 0x125   :  { %569 = vst.msk [vmem:[#allocation2 + $0xe0] sm:$0xff] %vm540_vm5, %v9228_v7  ;;  %9506 = vrot.lane.b32.xlu1 %v9505_v53, %s9836_s18  ;;  %570 = vst.msk [vmem:[#allocation2 + $0xe8] sm:$0xff] %vm540_vm5, %v9229_v0  ;;  %v4078_v58 = vrot.slane %v3939_v61, 2  ;;  %v4080_v44 = vrot.slane %v3940_v59, 2  ;;  %v4081_v33 = vrot.slane %v3941_v48, 2  ;;  %v9233_v37 = vunpack.i.l.bf16 %v11239_v17  ;;  %v9762_v0 = vld [vmem:[%s14859_s1 + $0x10] sm:$0xff]  }
 0x126   :  { %v4077_v32 = vsel %vm761_vm0, %v4075_v8, %v4076_v55  ;;  %v4083_v23 = vrot.slane %v3942_v20, 2  ;;  %1010 = vst.msk [vmem:[#allocation2 + $0xd8] sm:$0xff] %vm982_vm6, %v9234_v51  ;;  %v9239_v42 = vunpack.i.h.bf16 %v11245_v35  ;;  %v9238_v26 = vunpack.i.l.bf16 %v11245_v35  ;;  %v8081_v7 = vld [vmem:[%s14858_s0 + $0x15c] sm:$0xc]  ;;  %v8083_v24 = vld [vmem:[%s14858_s0 + $0x164] sm:$0x3] }
 0x127   :  { %v4079_v2 = vsel %vm761_vm0, %v4076_v55, %v4078_v58  ;;  %v4082_v45 = vsel %vm761_vm0, %v4080_v44, %v4081_v33  ;;  %1009 = vst.msk [vmem:[#allocation2 + $0xd0] sm:$0xff] %vm982_vm6, %v9233_v37  ;;  %v4377_v17 = vunpack.c.l.bf16 %v8021_v36  ;;  %v4378_v54 = vunpack.c.l.bf16 %v8022_v29  ;;  %v1931_v53 = vld [vmem:[#allocation2 + $0xc0] sm:$0xff]  ;;  %v1932_v61 = vld [vmem:[#allocation2 + $0xc8] sm:$0xff]  ;;  %v9763_v55 = vld [vmem:[%s14859_s1 + $0x18] sm:$0xff]  }
 0x128   :  { %v9510_v1 = vpack.i.bf16 %v4079_v2, %v4077_v32  ;;  %v4084_v28 = vsel %vm761_vm0, %v4081_v33, %v4083_v23  ;;  %1011 = vst.msk [vmem:[#allocation2 + $0xe0] sm:$0xff] %vm982_vm6, %v9238_v26  ;;  %1012 = vst.msk [vmem:[#allocation2 + $0xe8] sm:$0xff] %vm982_vm6, %v9239_v42  ;;  %v4379_v35 = vunpack.c.l.bf16 %v8023_v31  ;;  %v4380_v57 = vunpack.c.l.bf16 %v8024_v41  ;;  %v8086_v58 = vld [vmem:[%s14858_s0 + $0x170] sm:$0x3] }
 0x129   :  { %v9515_v40 = vpack.i.bf16 %v4084_v28, %v4082_v45  ;;  %v4515_v16 = vrot.slane %v4377_v17, 3  ;;  %v4516_v14 = vrot.slane %v4378_v54, 3  ;;  %v4381_v52 = vunpack.c.h.bf16 %v8022_v29 }
 0x12a   :  { %9511 = vrot.lane.b32.xlu0 %v9510_v1, %s9835_s15  ;;  %v4518_v19 = vrot.slane %v4379_v35, 3  ;;  %v4382_v56 = vunpack.c.l.bf16 %v8026_v47  ;;  %v4520_v4 = vrot.slane %v4380_v57, 3  ;;  %v9244_v5 = vunpack.i.h.bf16 %v11274_v39  ;;  %v7907_v1 = vld [vmem:[%s14858_s0 + $0x174] sm:$0xff]  }
 0x12b   :  { %9516 = vrot.lane.b32.xlu1 %v9515_v40, %s9835_s15  ;;  %v4517_v10 = vsel %vm1203_vm2, %v4515_v16, %v4516_v14  ;;  %v4521_v15 = vrot.slane %v4381_v52, 3  ;;  %v9243_v46 = vunpack.i.l.bf16 %v11274_v39  ;;  %v9249_v22 = vunpack.i.h.bf16 %v11279_v30  ;;  %v8084_v39 = vld [vmem:[%s14858_s0 + $0x168] sm:$0xc]  ;;  %v11569_v20 = vpop.permute.xlu0 %9321  ;;  %v7909_v16 = vld [vmem:[%s14858_s0 + $0x17c] sm:$0x1] }
 0x12c   :  { %v4519_v59 = vsel %vm1203_vm2, %v4516_v14, %v4518_v19  ;;  %v4523_v48 = vrot.slane %v4382_v56, 3  ;;  %1452 = vst.msk [vmem:[#allocation2 + $0xd8] sm:$0xff] %vm1424_vm7, %v9244_v5  ;;  %v9248_v36 = vunpack.i.l.bf16 %v11279_v30  ;;  %v1950_v8 = vpack.c.bf16 %v1930_v62, %v1929_v27  ;;  %v11578_v44 = vpop.permute.xlu1 %9326  ;;  %v8441_v14 = vld [vmem:[%s14858_s0 + $0x180] sm:$0xff]  }
 0x12d   :  { %v9520_v51 = vpack.i.bf16 %v4519_v59, %v4517_v10  ;;  %v4522_v29 = vsel %vm1203_vm2, %v4520_v4, %v4521_v15  ;;  %1451 = vst.msk [vmem:[#allocation2 + $0xd0] sm:$0xff] %vm1424_vm7, %v9243_v46  ;;  %1454 = vst.msk [vmem:[#allocation2 + $0xe8] sm:$0xff] %vm1424_vm7, %v9249_v22  ;;  %v2461_v30 = vand.u32 %v9762_v0, %v10778_v11  ;;  %v4817_v31 = vunpack.c.l.bf16 %v8081_v7 }
 0x12e   :  { %v4524_v33 = vsel %vm1203_vm2, %v4521_v15, %v4523_v48  ;;  %1453 = vst.msk [vmem:[#allocation2 + $0xe0] sm:$0xff] %vm1424_vm7, %v9248_v36  ;;  %8637 = vmatprep.mubr.msk.bf16.mxu0 %vm1968_vm10, %v1950_v8  ;;  %8672 = vmatmul.mubr.msk.bf16.gmra.mxu1 %vm1968_vm10, %v1950_v8  ;;  %v4818_v37 = vunpack.c.l.bf16 %v8082_v25  ;;  %v4819_v41 = vunpack.c.l.bf16 %v8083_v24  ;;  %v1951_v32 = vpack.c.bf16 %v1932_v61, %v1931_v53  ;;  %v48_v24 = vld [vmem:[%s14858_s0 + $0xb4] sm:$0xff]  }
 0x12f   :  { %9521 = vrot.lane.b32.xlu0 %v9520_v51, %s9837_s13  ;;  %v9525_v23 = vpack.i.bf16 %v4524_v33, %v4522_v29  ;;  %8683 = vmatprep.subr.bf16.mxu0 %v2461_v30  ;;  %v4955_v42 = vrot.slane %v4817_v31, 4  ;;  %v4820_v26 = vunpack.c.l.bf16 %v8084_v39  ;;  %v4821_v2 = vunpack.c.h.bf16 %v8082_v25  ;;  %v8414_v31 = vld [vmem:[%s14858_s0 + $0xc0] sm:$0xff]  }
 0x130   :  { %v4956_v45 = vrot.slane %v4818_v37, 4  ;;  %v4958_v17 = vrot.slane %v4819_v41, 4  ;;  %8638 = vmatmul.mubr.msk.bf16.gmra.mxu0 %vm1968_vm10, %v1951_v32  ;;  %8675 = vmatprep.mubr.msk.bf16.mxu1 %vm1968_vm10, %v1951_v32  ;;  %v4822_v54 = vunpack.c.l.bf16 %v8086_v58  ;;  %v2761_v47 = vand.u32 %v9763_v55, %v10778_v11  ;;  %v7967_v58 = vld [vmem:[%s14858_s0 + $0x174] sm:$0xe] }
 0x131   :  { %9526 = vrot.lane.b32.xlu1 %v9525_v23, %s9837_s13  ;;  %v4960_v28 = vrot.slane %v4820_v26, 4  ;;  %v4961_v35 = vrot.slane %v4821_v2, 4  ;;  %8684 = vmatpush3.bf16.msra.mxu0 %v2461_v30  ;;  %v9254_v57 = vunpack.i.h.bf16 %v11308_v49  ;;  %v9253_v40 = vunpack.i.l.bf16 %v11308_v49  ;;  %v7912_v49 = vld [vmem:[%s14858_s0 + $0x188] sm:$0x1]  ;;  %v7969_v23 = vld [vmem:[%s14858_s0 + $0x17c] sm:$0x1] }
 0x132   :  { %v4957_v52 = vsel %vm1645_vm3, %v4955_v42, %v4956_v45  ;;  %v4959_v27 = vsel %vm1645_vm3, %v4956_v45, %v4958_v17  ;;  %v4963_v62 = vrot.slane %v4822_v54, 4  ;;  %8717 = vmatprep.subr.bf16.mxu1 %v2761_v47  ;;  %v9259_v0 = vunpack.i.h.bf16 %v11316_v50  ;;  %v11606_v19 = vpop.permute.xlu0 %9331  ;;  %v7970_v42 = vld [vmem:[%s14858_s0 + $0x180] sm:$0xe] }
 0x133   :  { %v9530_v56 = vpack.i.bf16 %v4959_v27, %v4957_v52  ;;  %v4962_v4 = vsel %vm1645_vm3, %v4960_v28, %v4961_v35  ;;  %1893 = vst.msk [vmem:[#allocation2 + $0xd0] sm:$0xff] %vm1866_vm8, %v9253_v40  ;;  %1894 = vst.msk [vmem:[#allocation2 + $0xd8] sm:$0xff] %vm1866_vm8, %v9254_v57  ;;  %v9258_v5 = vunpack.i.l.bf16 %v11316_v50  ;;  %8718 = vmatpush3.bf16.msra.mxu1 %v2761_v47  ;;  %v3503_v7 = vunpack.c.l.bf16 %v7907_v1  ;;  %v11612_v25 = vpop.permute.xlu1 %9336  ;;  %v7972_v47 = vld [vmem:[%s14858_s0 + $0x188] sm:$0x1]  ;;  %v8027_v27 = vld [vmem:[%s14858_s0 + $0x174] sm:$0xe] }
 0x134   :  { %v4964_v10 = vsel %vm1645_vm3, %v4961_v35, %v4963_v62  ;;  %1896 = vst.msk [vmem:[#allocation2 + $0xe8] sm:$0xff] %vm1866_vm8, %v9259_v0  ;;  %v3504_v15 = vunpack.c.h.bf16 %v7907_v1  ;;  %v3505_v46 = vunpack.c.l.bf16 %v7909_v16  ;;  %v8393_v22 = vunpack.c.l.bf16 %v8441_v14 }
 0x135   :  { %9531 = vrot.lane.b32.xlu0 %v9530_v56, %s9838_s6  ;;  %v9535_v53 = vpack.i.bf16 %v4964_v10, %v4962_v4  ;;  %1895 = vst.msk [vmem:[#allocation2 + $0xe0] sm:$0xff] %vm1866_vm8, %v9258_v5  ;;  %v3645_v50 = vrot.slane %v3503_v7, 1  ;;  %v8394_v61 = vunpack.c.h.bf16 %v8441_v14  ;;  %v3508_v59 = vunpack.c.l.bf16 %v7912_v49  ;;  %v8028_v4 = vld [vmem:[%s14858_s0 + $0x178] ss:$12 sps:$4 sm:$0xff]  }
 0x136   :  { %v3646_v48 = vrot.slane %v3504_v15, 1  ;;  %v3648_v36 = vrot.slane %v3505_v46, 1  ;;  %v3650_v8 = vrot.slane %v8393_v22, 1  ;;  %v9264_v39 = vunpack.i.h.bf16 %v11344_v43  ;;  %v8029_v46 = vld [vmem:[%s14858_s0 + $0x17c] sm:$0x3] }
 0x137   :  { %9536 = vrot.lane.b32.xlu1 %v9535_v53, %s9838_s6  ;;  %v3651_v55 = vrot.slane %v8394_v61, 1  ;;  %v3653_v51 = vrot.slane %v3508_v59, 1  ;;  %v9263_v29 = vunpack.i.l.bf16 %v11344_v43  ;;  %v88_v30 = vunpack.c.l.bf16 %v48_v24  ;;  %v7968_v43 = vld [vmem:[%s14858_s0 + $0x178] ss:$12 sps:$4 sm:$0xff]   ;;  %v11642_v26 = vpop.permute.xlu0 %9341 }
 0x138   :  { %v3647_v33 = vsel %vm319_vm1, %v3645_v50, %v3646_v48  ;;  %v3649_v37 = vsel %vm319_vm1, %v3646_v48, %v3648_v36  ;;  %v89_v41 = vunpack.c.h.bf16 %v48_v24  ;;  %v9269_v32 = vunpack.i.h.bf16 %v11354_v38  ;;  %v8030_v50 = vld [vmem:[%s14858_s0 + $0x180] sm:$0xe] }
 0x139   :  { %v9540_v2 = vpack.i.bf16 %v3649_v37, %v3647_v33  ;;  %v3652_v45 = vsel %vm319_vm1, %v3650_v8, %v3651_v55  ;;  %v3654_v17 = vsel %vm319_vm1, %v3651_v55, %v3653_v51  ;;  %129 = vst.msk [vmem:[#allocation2 + $0xf0] sm:$0xff] %vm98_vm4, %v88_v30  ;;  %v9268_v54 = vunpack.i.l.bf16 %v11354_v38  ;;  %v11651_v1 = vpop.permute.xlu1 %9346 }
 0x13a   :  { %v9545_v28 = vpack.i.bf16 %v3654_v17, %v3652_v45  ;;  %130 = vst.msk [vmem:[#allocation2 + $0xf8] sm:$0xff] %vm98_vm4, %v89_v41  ;;  %v8281_v35 = vunpack.c.l.bf16 %v8414_v31  ;;  %v8282_v57 = vunpack.c.h.bf16 %v8414_v31  ;;  %v3943_v40 = vunpack.c.l.bf16 %v7967_v58  ;;  %v1933_v41 = vld [vmem:[#allocation2 + $0xd0] sm:$0xff]  ;;  %v8088_v17 = vld [vmem:[%s14858_s0 + $0x178] ss:$12 sps:$4 sm:$0xff]  }
 0x13b   :  { %571 = vst.msk [vmem:[#allocation2 + $0xf0] sm:$0xff] %vm540_vm5, %v9263_v29  ;;  %9541 = vrot.lane.b32.xlu0 %v9540_v2, %s9836_s18  ;;  %572 = vst.msk [vmem:[#allocation2 + $0xf8] sm:$0xff] %vm540_vm5, %v9264_v39  ;;  %v3944_v16 = vunpack.c.l.bf16 %v7968_v43  ;;  %v3945_v38 = vunpack.c.l.bf16 %v7969_v23  ;;  %v3946_v14 = vunpack.c.l.bf16 %v7970_v42  ;;  %v3947_v52 = vunpack.c.h.bf16 %v7968_v43  ;;  %v8032_v39 = vld [vmem:[%s14858_s0 + $0x188] sm:$0x3]  ;;  %v8087_v43 = vld [vmem:[%s14858_s0 + $0x174] sm:$0xc] }
 0x13c   :  { %9546 = vrot.lane.b32.xlu1 %v9545_v28, %s9836_s18  ;;  %131 = vst.msk [vmem:[#allocation2 + $0x100] sm:$0xff] %vm98_vm4, %v8281_v35  ;;  %132 = vst.msk [vmem:[#allocation2 + $0x108] sm:$0xff] %vm98_vm4, %v8282_v57  ;;  %v4085_v62 = vrot.slane %v3943_v40, 2  ;;  %v3948_v0 = vunpack.c.l.bf16 %v7972_v47  ;;  %v9274_v49 = vunpack.i.h.bf16 %v11384_v6  ;;  %v9273_v56 = vunpack.i.l.bf16 %v11384_v6  ;;  %v1935_v40 = vld [vmem:[#allocation2 + $0xe0] sm:$0xff] }
 0x13d   :  { %573 = vst.msk [vmem:[#allocation2 + $0x100] sm:$0xff] %vm540_vm5, %v9268_v54  ;;  %574 = vst.msk [vmem:[#allocation2 + $0x108] sm:$0xff] %vm540_vm5, %v9269_v32  ;;  %v4086_v5 = vrot.slane %v3944_v16, 2  ;;  %v4088_v7 = vrot.slane %v3945_v38, 2  ;;  %v4090_v10 = vrot.slane %v3946_v14, 2  ;;  %v4091_v15 = vrot.slane %v3947_v52, 2 }
 0x13e   :  { %v4093_v22 = vrot.slane %v3948_v0, 2  ;;  %1013 = vst.msk [vmem:[#allocation2 + $0xf0] sm:$0xff] %vm982_vm6, %v9273_v56  ;;  %1014 = vst.msk [vmem:[#allocation2 + $0xf8] sm:$0xff] %vm982_vm6, %v9274_v49  ;;  %v9279_v6 = vunpack.i.h.bf16 %v11393_v18  ;;  %v9278_v24 = vunpack.i.l.bf16 %v11393_v18  ;;  %v4383_v53 = vunpack.c.l.bf16 %v8027_v27  ;;  %v11680_v61 = vpop.permute.xlu0 %9351  ;;  %v1934_v32 = vld [vmem:[#allocation2 + $0xd8] sm:$0xff]  ;;  %v1936_v16 = vld [vmem:[#allocation2 + $0xe8] sm:$0xff] }
 0x13f   :  { %v4087_v59 = vsel %vm761_vm0, %v4085_v62, %v4086_v5  ;;  %v4089_v48 = vsel %vm761_vm0, %v4086_v5, %v4088_v7  ;;  %v4092_v36 = vsel %vm761_vm0, %v4090_v10, %v4091_v15  ;;  %v4384_v8 = vunpack.c.l.bf16 %v8028_v4  ;;  %v11688_v55 = vpop.permute.xlu1 %9356  ;;  %v8089_v54 = vld [vmem:[%s14858_s0 + $0x17c] sm:$0x3]  ;;  %v8092_v5 = vld [vmem:[%s14858_s0 + $0x188] sm:$0x3] }
 0x140   :  { %v9550_v18 = vpack.i.bf16 %v4089_v48, %v4087_v59  ;;  %v4094_v51 = vsel %vm761_vm0, %v4091_v15, %v4093_v22  ;;  %1015 = vst.msk [vmem:[#allocation2 + $0x100] sm:$0xff] %vm982_vm6, %v9278_v24  ;;  %1016 = vst.msk [vmem:[#allocation2 + $0x108] sm:$0xff] %vm982_vm6, %v9279_v6  ;;  %v4385_v29 = vunpack.c.l.bf16 %v8029_v46  ;;  %v4525_v30 = vrot.slane %v4383_v53, 3 }
 0x141   :  { %v9555_v31 = vpack.i.bf16 %v4094_v51, %v4092_v36  ;;  %v4526_v58 = vrot.slane %v4384_v8, 3  ;;  %v4386_v33 = vunpack.c.l.bf16 %v8030_v50  ;;  %v4387_v37 = vunpack.c.h.bf16 %v8028_v4  ;;  %v7913_v50 = vld [vmem:[%s14858_s0 + $0x18c] sm:$0xff]  }
 0x142   :  { %9551 = vrot.lane.b32.xlu0 %v9550_v18, %s9835_s15  ;;  %v4528_v23 = vrot.slane %v4385_v29, 3  ;;  %v4388_v42 = vunpack.c.l.bf16 %v8032_v39  ;;  %v9284_v2 = vunpack.i.h.bf16 %v11416_v34  ;;  %v9283_v45 = vunpack.i.l.bf16 %v11416_v34  ;;  %v8090_v34 = vld [vmem:[%s14858_s0 + $0x180] sm:$0xc]  ;;  %v7915_v39 = vld [vmem:[%s14858_s0 + $0x194] sm:$0x1] }
 0x143   :  { %9556 = vrot.lane.b32.xlu1 %v9555_v31, %s9835_s15  ;;  %v4527_v47 = vsel %vm1203_vm2, %v4525_v30, %v4526_v58  ;;  %v4530_v28 = vrot.slane %v4386_v33, 3  ;;  %v4531_v35 = vrot.slane %v4387_v37, 3  ;;  %v9289_v57 = vunpack.i.h.bf16 %v11427_v60  ;;  %v11711_v38 = vpop.permute.xlu0 %9361  ;;  %v8442_v31 = vld [vmem:[%s14858_s0 + $0x198] sm:$0xff]  }
 0x144   :  { %v4529_v14 = vsel %vm1203_vm2, %v4526_v58, %v4528_v23  ;;  %v4533_v52 = vrot.slane %v4388_v42, 3  ;;  %1455 = vst.msk [vmem:[#allocation2 + $0xf0] sm:$0xff] %vm1424_vm7, %v9283_v45  ;;  %1456 = vst.msk [vmem:[#allocation2 + $0xf8] sm:$0xff] %vm1424_vm7, %v9284_v2  ;;  %v9288_v27 = vunpack.i.l.bf16 %v11427_v60  ;;  %v1952_v62 = vpack.c.bf16 %v1934_v32, %v1933_v41 }
 0x145   :  { %v9560_v0 = vpack.i.bf16 %v4529_v14, %v4527_v47  ;;  %v4532_v49 = vsel %vm1203_vm2, %v4530_v28, %v4531_v35  ;;  %1458 = vst.msk [vmem:[#allocation2 + $0x108] sm:$0xff] %vm1424_vm7, %v9289_v57  ;;  %v4823_v56 = vunpack.c.l.bf16 %v8087_v43  ;;  %v4824_v4 = vunpack.c.l.bf16 %v8088_v17  ;;  %v11722_v7 = vpop.permute.xlu1 %9366  ;;  %v52_v28 = vld [vmem:[%s14858_s0 + $0xcc] sm:$0xff]  }
 0x146   :  { %v4534_v10 = vsel %vm1203_vm2, %v4531_v35, %v4533_v52  ;;  %1457 = vst.msk [vmem:[#allocation2 + $0x100] sm:$0xff] %vm1424_vm7, %v9288_v27  ;;  %8641 = vmatprep.mubr.msk.bf16.mxu0 %vm1968_vm10, %v1952_v62  ;;  %8676 = vmatmul.mubr.msk.bf16.gmra.mxu1 %vm1968_vm10, %v1952_v62  ;;  %v4825_v60 = vunpack.c.l.bf16 %v8089_v54  ;;  %v1953_v15 = vpack.c.bf16 %v1936_v16, %v1935_v40  ;;  %v4826_v46 = vunpack.c.l.bf16 %v8090_v34  ;;  %v7973_v62 = vld [vmem:[%s14858_s0 + $0x18c] sm:$0xe] }
 0x147   :  { %9561 = vrot.lane.b32.xlu0 %v9560_v0, %s9837_s13  ;;  %v9565_v22 = vpack.i.bf16 %v4534_v10, %v4532_v49  ;;  %v4965_v6 = vrot.slane %v4823_v56, 4  ;;  %v4966_v24 = vrot.slane %v4824_v4, 4  ;;  %v4827_v53 = vunpack.c.h.bf16 %v8088_v17  ;;  %v7974_v0 = vld [vmem:[%s14858_s0 + $0x190] ss:$12 sps:$4 sm:$0xff]   ;;  %v7976_v10 = vld [vmem:[%s14858_s0 + $0x198] sm:$0xe] }
 0x148   :  { %v4968_v59 = vrot.slane %v4825_v60, 4  ;;  %8642 = vmatmul.mubr.msk.bf16.gmra.mxu0 %vm1968_vm10, %v1953_v15  ;;  %8679 = vmatprep.mubr.msk.bf16.mxu1 %vm1968_vm10, %v1953_v15  ;;  %v4828_v48 = vunpack.c.l.bf16 %v8092_v5  ;;  %v4970_v36 = vrot.slane %v4826_v46, 4  ;;  %v9294_v8 = vunpack.i.h.bf16 %v11452_v63 }
 0x149   :  { %9566 = vrot.lane.b32.xlu1 %v9565_v22, %s9837_s13  ;;  %v4967_v18 = vsel %vm1645_vm3, %v4965_v6, %v4966_v24  ;;  %v4971_v51 = vrot.slane %v4827_v53, 4  ;;  %v9293_v29 = vunpack.i.l.bf16 %v11452_v63  ;;  %v9299_v30 = vunpack.i.h.bf16 %v11461_v9  ;;  %v11745_v58 = vpop.permute.xlu0 %9371  ;;  %v7918_v63 = vld [vmem:[%s14858_s0 + $0x1a0] sm:$0x1] }
 0x14a   :  { %v4969_v33 = vsel %vm1645_vm3, %v4966_v24, %v4968_v59  ;;  %v4973_v37 = vrot.slane %v4828_v48, 4  ;;  %1898 = vst.msk [vmem:[#allocation2 + $0xf8] sm:$0xff] %vm1866_vm8, %v9294_v8  ;;  %v9298_v41 = vunpack.i.l.bf16 %v11461_v9  ;;  %v3509_v32 = vunpack.c.l.bf16 %v7913_v50  ;;  %v7978_v24 = vld [vmem:[%s14858_s0 + $0x1a0] sm:$0x1] }
 0x14b   :  { %v9570_v43 = vpack.i.bf16 %v4969_v33, %v4967_v18  ;;  %v4972_v23 = vsel %vm1645_vm3, %v4970_v36, %v4971_v51  ;;  %1897 = vst.msk [vmem:[#allocation2 + $0xf0] sm:$0xff] %vm1866_vm8, %v9293_v29  ;;  %1900 = vst.msk [vmem:[#allocation2 + $0x108] sm:$0xff] %vm1866_vm8, %v9299_v30  ;;  %v3510_v42 = vunpack.c.h.bf16 %v7913_v50  ;;  %v3511_v2 = vunpack.c.l.bf16 %v7915_v39  ;;  %v11756_v45 = vpop.permute.xlu1 %9376  ;;  %v8415_v29 = vld [vmem:[%s14858_s0 + $0xd8] sm:$0xff]  }
 0x14c   :  { %v4974_v17 = vsel %vm1645_vm3, %v4971_v51, %v4973_v37  ;;  %1899 = vst.msk [vmem:[#allocation2 + $0x100] sm:$0xff] %vm1866_vm8, %v9298_v41  ;;  %v3655_v9 = vrot.slane %v3509_v32, 1  ;;  %v8397_v54 = vunpack.c.l.bf16 %v8442_v31  ;;  %v8398_v47 = vunpack.c.h.bf16 %v8442_v31  ;;  %v8033_v37 = vld [vmem:[%s14858_s0 + $0x18c] sm:$0xe] }
 0x14d   :  { %9571 = vrot.lane.b32.xlu0 %v9570_v43, %s9838_s6  ;;  %v9575_v35 = vpack.i.bf16 %v4974_v17, %v4972_v23  ;;  %v3656_v57 = vrot.slane %v3510_v42, 1  ;;  %v3658_v40 = vrot.slane %v3511_v2, 1  ;;  %v3514_v16 = vunpack.c.l.bf16 %v7918_v63  ;;  %v8034_v23 = vld [vmem:[%s14858_s0 + $0x190] ss:$12 sps:$4 sm:$0xff]  }
 0x14e   :  { %v3660_v34 = vrot.slane %v8397_v54, 1  ;;  %v3661_v14 = vrot.slane %v8398_v47, 1  ;;  %v9304_v52 = vunpack.i.h.bf16 %v11491_v12  ;;  %v9303_v27 = vunpack.i.l.bf16 %v11491_v12  ;;  %v7975_v12 = vld [vmem:[%s14858_s0 + $0x194] sm:$0x1]  ;;  %v11781_v60 = vpop.permute.xlu0 %9381  ;;  %v8036_v47 = vld [vmem:[%s14858_s0 + $0x198] sm:$0xe] }
 0x14f   :  { %9576 = vrot.lane.b32.xlu1 %v9575_v35, %s9838_s6  ;;  %v3657_v49 = vsel %vm319_vm1, %v3655_v9, %v3656_v57  ;;  %v3659_v56 = vsel %vm319_vm1, %v3656_v57, %v3658_v40  ;;  %v3663_v4 = vrot.slane %v3514_v16, 1  ;;  %v92_v5 = vunpack.c.l.bf16 %v52_v28  ;;  %v8035_v54 = vld [vmem:[%s14858_s0 + $0x194] sm:$0x3]  ;;  %v8038_v16 = vld [vmem:[%s14858_s0 + $0x1a0] sm:$0x3] }
 0x150   :  { %v9580_v15 = vpack.i.bf16 %v3659_v56, %v3657_v49  ;;  %v3662_v46 = vsel %vm319_vm1, %v3660_v34, %v3661_v14  ;;  %v93_v22 = vunpack.c.h.bf16 %v52_v28  ;;  %v9309_v6 = vunpack.i.h.bf16 %v11499_v13  ;;  %v11788_v53 = vpop.permute.xlu1 %9386 }
 0x151   :  { %v3664_v50 = vsel %vm319_vm1, %v3661_v14, %v3663_v4  ;;  %133 = vst.msk [vmem:[#allocation2 + $0x110] sm:$0xff] %vm98_vm4, %v92_v5  ;;  %v9308_v59 = vunpack.i.l.bf16 %v11499_v13  ;;  %v3949_v48 = vunpack.c.l.bf16 %v7973_v62  ;;  %v3950_v36 = vunpack.c.l.bf16 %v7974_v0  ;;  %v8093_v4 = vld [vmem:[%s14858_s0 + $0x18c] sm:$0xc] }
 0x152   :  { %9581 = vrot.lane.b32.xlu0 %v9580_v15, %s9836_s18  ;;  %v9585_v8 = vpack.i.bf16 %v3664_v50, %v3662_v46  ;;  %134 = vst.msk [vmem:[#allocation2 + $0x118] sm:$0xff] %vm98_vm4, %v93_v22  ;;  %v3951_v39 = vunpack.c.l.bf16 %v7975_v12  ;;  %v3952_v18 = vunpack.c.l.bf16 %v7976_v10  ;;  %v3953_v51 = vunpack.c.h.bf16 %v7974_v0  ;;  %v1937_v46 = vld [vmem:[#allocation2 + $0xf0] sm:$0xff]  ;;  %v1938_v22 = vld [vmem:[#allocation2 + $0xf8] sm:$0xff] }
 0x153   :  { %575 = vst.msk [vmem:[#allocation2 + $0x110] sm:$0xff] %vm540_vm5, %v9303_v27  ;;  %576 = vst.msk [vmem:[#allocation2 + $0x118] sm:$0xff] %vm540_vm5, %v9304_v52  ;;  %v4095_v13 = vrot.slane %v3949_v48, 2  ;;  %v4096_v30 = vrot.slane %v3950_v36, 2  ;;  %v3954_v31 = vunpack.c.l.bf16 %v7978_v24  ;;  %v9314_v33 = vunpack.i.h.bf16 %v11529_v3  ;;  %v8095_v36 = vld [vmem:[%s14858_s0 + $0x194] sm:$0x3] }
 0x154   :  { %1017 = vst.msk [vmem:[#allocation2 + $0x110] sm:$0xff] %vm982_vm6, %v9308_v59  ;;  %9586 = vrot.lane.b32.xlu1 %v9585_v8, %s9836_s18  ;;  %1018 = vst.msk [vmem:[#allocation2 + $0x118] sm:$0xff] %vm982_vm6, %v9309_v6  ;;  %v4098_v41 = vrot.slane %v3951_v39, 2  ;;  %v4100_v32 = vrot.slane %v3952_v18, 2  ;;  %v4101_v63 = vrot.slane %v3953_v51, 2  ;;  %v9313_v43 = vunpack.i.l.bf16 %v11529_v3  ;;  %v2656_v8 = vld [vmem:[#allocation2 + $0x30] sm:$0xff] }
 0x155   :  { %v4097_v42 = vsel %vm761_vm0, %v4095_v13, %v4096_v30  ;;  %v4103_v2 = vrot.slane %v3954_v31, 2  ;;  %v8285_v17 = vunpack.c.l.bf16 %v8415_v29  ;;  %v8286_v9 = vunpack.c.h.bf16 %v8415_v29  ;;  %v11818_v28 = vpop.permute.xlu0 %9391  ;;  %v8094_v6 = vld [vmem:[%s14858_s0 + $0x190] ss:$12 sps:$4 sm:$0xff]   ;;  %v1957_v13 = vld [vmem:[#allocation2 + $0x100] sm:$0xff] }
 0x156   :  { %v4099_v3 = vsel %vm761_vm0, %v4096_v30, %v4098_v41  ;;  %v4102_v35 = vsel %vm761_vm0, %v4100_v32, %v4101_v63  ;;  %v9319_v57 = vunpack.i.h.bf16 %v11537_v21  ;;  %v9318_v40 = vunpack.i.l.bf16 %v11537_v21  ;;  %v11827_v34 = vpop.permute.xlu1 %9396  ;;  %v1958_v30 = vld [vmem:[#allocation2 + $0x108] sm:$0xff]  ;;  %v2657_v31 = vld [vmem:[#allocation2 + $0x38] sm:$0xff] }
 0x157   :  { %v9590_v14 = vpack.i.bf16 %v4099_v3, %v4097_v42  ;;  %v4104_v52 = vsel %vm761_vm0, %v4101_v63, %v4103_v2  ;;  %135 = vst.msk [vmem:[#allocation2 + $0x120] sm:$0xff] %vm98_vm4, %v8285_v17  ;;  %136 = vst.msk [vmem:[#allocation2 + $0x128] sm:$0xff] %vm98_vm4, %v8286_v9  ;;  %v4389_v27 = vunpack.c.l.bf16 %v8033_v37  ;;  %v4390_v62 = vunpack.c.l.bf16 %v8034_v23  ;;  %v8096_v63 = vld [vmem:[%s14858_s0 + $0x198] sm:$0xc]  ;;  %v8098_v17 = vld [vmem:[%s14858_s0 + $0x1a0] sm:$0x3] }
 0x158   :  { %v9595_v0 = vpack.i.bf16 %v4104_v52, %v4102_v35  ;;  %577 = vst.msk [vmem:[#allocation2 + $0x120] sm:$0xff] %vm540_vm5, %v9313_v43  ;;  %578 = vst.msk [vmem:[#allocation2 + $0x128] sm:$0xff] %vm540_vm5, %v9314_v33  ;;  %v4391_v21 = vunpack.c.l.bf16 %v8035_v54  ;;  %v4392_v49 = vunpack.c.l.bf16 %v8036_v47  ;;  %v4393_v56 = vunpack.c.h.bf16 %v8034_v23  ;;  %v2356_v9 = vld [vmem:[#allocation2 + $0x20] sm:$0xff]  ;;  %v2357_v54 = vld [vmem:[#allocation2 + $0x28] sm:$0xff] }
 0x159   :  { %1459 = vst.msk [vmem:[#allocation2 + $0x110] sm:$0xff] %vm1424_vm7, %v9318_v40  ;;  %1460 = vst.msk [vmem:[#allocation2 + $0x118] sm:$0xff] %vm1424_vm7, %v9319_v57  ;;  %9591 = vrot.lane.b32.xlu0 %v9590_v14, %s9835_s15  ;;  %v4535_v5 = vrot.slane %v4389_v27, 3  ;;  %v4536_v12 = vrot.slane %v4390_v62, 3  ;;  %v4394_v10 = vunpack.c.l.bf16 %v8038_v16  ;;  %v9324_v15 = vunpack.i.h.bf16 %v11569_v20 }
 0x15a   :  { %9596 = vrot.lane.b32.xlu1 %v9595_v0, %s9835_s15  ;;  %v4538_v24 = vrot.slane %v4391_v21, 3  ;;  %v4540_v50 = vrot.slane %v4392_v49, 3  ;;  %v4541_v59 = vrot.slane %v4393_v56, 3  ;;  %v9323_v48 = vunpack.i.l.bf16 %v11569_v20  ;;  %v196_v49 = vld [vmem:[%s14858_s0 + $0xe4] sm:$0xff]   ;;  %v198_v56 = vld [vmem:[%s14858_s0 + $0xec] sm:$0x1] }
 0x15b   :  { %v4537_v39 = vsel %vm1203_vm2, %v4535_v5, %v4536_v12  ;;  %v4543_v18 = vrot.slane %v4394_v10, 3  ;;  %1020 = vst.msk [vmem:[#allocation2 + $0x128] sm:$0xff] %vm982_vm6, %v9324_v15  ;;  %v9329_v51 = vunpack.i.h.bf16 %v11578_v44  ;;  %v9328_v29 = vunpack.i.l.bf16 %v11578_v44  ;;  %v11853_v33 = vpop.permute.xlu0 %9401  ;;  %v11898_v15 = vld [vmem:[%s14858_s0 + $0xe8] ss:$204 sps:$4 sm:$0xff]  }
 0x15c   :  { %v4539_v20 = vsel %vm1203_vm2, %v4536_v12, %v4538_v24  ;;  %v4542_v37 = vsel %vm1203_vm2, %v4540_v50, %v4541_v59  ;;  %1019 = vst.msk [vmem:[#allocation2 + $0x120] sm:$0xff] %vm982_vm6, %v9323_v48  ;;  %v11858_v41 = vpack.c.bf16 %v1938_v22, %v1937_v46  ;;  %v4829_v32 = vunpack.c.l.bf16 %v8093_v4  ;;  %v11863_v43 = vpop.permute.xlu1 %9406  ;;  %v638_v4 = vld [vmem:[%s14858_s0 + $0xe4] sm:$0xe]  ;;  %v640_v46 = vld [vmem:[%s14858_s0 + $0xec] sm:$0x1] }
 0x15d   :  { %v9600_v44 = vpack.i.bf16 %v4539_v20, %v4537_v39  ;;  %v4544_v23 = vsel %vm1203_vm2, %v4541_v59, %v4543_v18  ;;  %1901 = vst.msk [vmem:[#allocation2 + $0x110] sm:$0xff] %vm1866_vm8, %v9328_v29  ;;  %1902 = vst.msk [vmem:[#allocation2 + $0x118] sm:$0xff] %vm1866_vm8, %v9329_v51  ;;  %v4830_v42 = vunpack.c.l.bf16 %v8094_v6  ;;  %v4831_v2 = vunpack.c.l.bf16 %v8095_v36 }
 0x15e   :  { %v9605_v47 = vpack.i.bf16 %v4544_v23, %v4542_v37  ;;  %8645 = vmatprep.mubr.msk.bf16.mxu0 %vm1968_vm10, %v11858_v41  ;;  %8680 = vmatmul.mubr.msk.bf16.gmra.mxu1 %vm1968_vm10, %v11858_v41  ;;  %v4975_v3 = vrot.slane %v4829_v32, 4  ;;  %v1959_v35 = vpack.c.bf16 %v1958_v30, %v1957_v13  ;;  %v11875_v57 = vpack.c.bf16 %v2657_v31, %v2656_v8 }
 0x15f   :  { %9601 = vrot.lane.b32.xlu0 %v9600_v44, %s9837_s13  ;;  %v4976_v40 = vrot.slane %v4830_v42, 4  ;;  %v4978_v16 = vrot.slane %v4831_v2, 4  ;;  %v4832_v14 = vunpack.c.l.bf16 %v8096_v63  ;;  %v4833_v52 = vunpack.c.h.bf16 %v8094_v6  ;;  %v2658_v2 = vld [vmem:[#allocation2 + $0x40] sm:$0xff] }
 0x160   :  { %9606 = vrot.lane.b32.xlu1 %v9605_v47, %s9837_s13  ;;  %8646 = vmatmul.mubr.msk.bf16.gmra.mxu0 %vm1968_vm10, %v1959_v35  ;;  %v4834_v27 = vunpack.c.l.bf16 %v8098_v17  ;;  %v2388_v62 = vpack.c.bf16 %v2357_v54, %v2356_v9  ;;  %v9334_v0 = vunpack.i.h.bf16 %v11606_v19  ;;  %v9333_v21 = vunpack.i.l.bf16 %v11606_v19  ;;  %v11903_v22 = vpop.permute.xlu0 %9411  ;;  %v2659_v17 = vld [vmem:[#allocation2 + $0x48] sm:$0xff] }
 0x161   :  { %v4977_v5 = vsel %vm1645_vm3, %v4975_v3, %v4976_v40  ;;  %v4979_v12 = vsel %vm1645_vm3, %v4976_v40, %v4978_v16  ;;  %8719 = vmatprep.mubr.msk.bf16.mxu1 %vm1968_vm10, %v11875_v57  ;;  %v4980_v19 = vrot.slane %v4832_v14, 4  ;;  %v4981_v10 = vrot.slane %v4833_v52, 4  ;;  %v7919_v9 = vld [vmem:[%s14858_s0 + $0x1a4] sm:$0xff]   ;;  %v7921_v40 = vld [vmem:[%s14858_s0 + $0x1ac] sm:$0x1]  ;;  %v2660_v16 = vld [vmem:[#allocation2 + $0x50] sm:$0xff] }
 0x162   :  { %v9610_v6 = vpack.i.bf16 %v4979_v12, %v4977_v5  ;;  %v4983_v24 = vrot.slane %v4834_v27, 4  ;;  %8685 = vmatprep.mubr.msk.bf16.mxu0 %vm1968_vm10, %v2388_v62  ;;  %1461 = vst.msk [vmem:[#allocation2 + $0x120] sm:$0xff] %vm1424_vm7, %v9333_v21  ;;  %1462 = vst.msk [vmem:[#allocation2 + $0x128] sm:$0xff] %vm1424_vm7, %v9334_v0  ;;  %v9339_v50 = vunpack.i.h.bf16 %v11612_v25  ;;  %v9338_v59 = vunpack.i.l.bf16 %v11612_v25  ;;  %v11910_v48 = vpop.permute.xlu1 %9416  ;;  %v8426_v25 = vld [vmem:[%s14858_s0 + $0x108] sm:$0xff]   ;;  %v2661_v14 = vld [vmem:[#allocation2 + $0x58] sm:$0xff] }
 0x163   :  { %v4982_v36 = vsel %vm1645_vm3, %v4980_v19, %v4981_v10  ;;  %v256_v8 = vunpack.c.l.bf16 %v196_v49  ;;  %v257_v39 = vunpack.c.h.bf16 %v196_v49  ;;  %v258_v18 = vunpack.c.l.bf16 %v198_v56  ;;  %v11945_v49 = vld [vmem:[%s14858_s0 + $0xe8] ss:$204 sps:$4 sm:$0xff]   ;;  %v1082_v56 = vld [vmem:[%s14858_s0 + $0xec] sm:$0x3] }
 0x164   :  { %9611 = vrot.lane.b32.xlu0 %v9610_v6, %s9838_s6  ;;  %v4984_v51 = vsel %vm1645_vm3, %v4981_v10, %v4983_v24  ;;  %1903 = vst.msk [vmem:[#allocation2 + $0x120] sm:$0xff] %vm1866_vm8, %v9338_v59  ;;  %1904 = vst.msk [vmem:[#allocation2 + $0x128] sm:$0xff] %vm1866_vm8, %v9339_v50  ;;  %v698_v29 = vunpack.c.l.bf16 %v638_v4  ;;  %v699_v13 = vunpack.c.l.bf16 %v11898_v15  ;;  %v700_v30 = vunpack.c.l.bf16 %v640_v46 }
 0x165   :  { %v9615_v31 = vpack.i.bf16 %v4984_v51, %v4982_v36  ;;  %v415_v20 = vrot.slane %v256_v8, 1  ;;  %v416_v37 = vrot.slane %v257_v39, 1  ;;  %v418_v32 = vrot.slane %v258_v18, 1  ;;  %v8443_v8 = vld [vmem:[%s14858_s0 + $0x1b0] sm:$0xff]  }
 0x166   :  { %v857_v63 = vrot.slane %v698_v29, 2  ;;  %v858_v44 = vrot.slane %v699_v13, 2  ;;  %v860_v23 = vrot.slane %v700_v30, 2  ;;  %v9344_v42 = vunpack.i.h.bf16 %v11642_v26  ;;  %v11932_v52 = vpop.permute.xlu0 %9421  ;;  %v7924_v13 = vld [vmem:[%s14858_s0 + $0x1b8] sm:$0x1] }
 0x167   :  { %9616 = vrot.lane.b32.xlu1 %v9615_v31, %s9838_s6  ;;  %v417_v54 = vsel %vm319_vm1, %v415_v20, %v416_v37  ;;  %v419_v47 = vsel %vm319_vm1, %v416_v37, %v418_v32  ;;  %v9343_v3 = vunpack.i.l.bf16 %v11642_v26  ;;  %v8333_v35 = vunpack.c.l.bf16 %v8426_v25  ;;  %v1080_v26 = vld [vmem:[%s14858_s0 + $0xe4] sm:$0xe] }
 0x168   :  { %v9620_v27 = vpack.i.bf16 %v419_v47, %v417_v54  ;;  %v859_v62 = vsel %vm761_vm0, %v857_v63, %v858_v44  ;;  %v861_v0 = vsel %vm761_vm0, %v858_v44, %v860_v23  ;;  %3813 = vst.msk [vmem:[#allocation2 + $0x18] sm:$0xff] %vm540_vm5, %v9344_v42  ;;  %v8334_v21 = vunpack.c.h.bf16 %v8426_v25  ;;  %8686 = vmatmul.mubr.msk.bf16.vlgmr.msra.gmra.mxu0 %vm1968_vm10, %v11875_v57  ;;  %v11950_v4 = vpop.permute.xlu1 %9426  ;;  %v7979_v37 = vld [vmem:[%s14858_s0 + $0x1a4] sm:$0xe]  ;;  %v11994_v42 = vld [vmem:[%s14858_s0 + $0x1a8] ss:$12 sps:$4 sm:$0xff]  }
 0x169   :  { %v9625_v5 = vpack.i.bf16 %v861_v0, %v859_v62  ;;  %3812 = vst.msk [vmem:[#allocation2 + $0x10] sm:$0xff] %vm540_vm5, %v9343_v3  ;;  %v9349_v57 = vunpack.i.h.bf16 %v11651_v1  ;;  %v9348_v12 = vunpack.i.l.bf16 %v11651_v1  ;;  %v11956_v19 = vpack.c.bf16 %v2659_v17, %v2658_v2  ;;  %v7981_v2 = vld [vmem:[%s14858_s0 + $0x1ac] sm:$0x1] }
 0x16a   :  { %3374 = vst.msk [vmem:[#allocation2 + $0x20] sm:$0xff] %vm98_vm4, %v8333_v35  ;;  %9621 = vrot.lane.b32.xlu0 %v9620_v27, %s9836_s18  ;;  %3375 = vst.msk [vmem:[#allocation2 + $0x28] sm:$0xff] %vm98_vm4, %v8334_v21  ;;  %v3515_v10 = vunpack.c.l.bf16 %v7919_v9  ;;  %v3516_v46 = vunpack.c.h.bf16 %v7919_v9  ;;  %v3517_v6 = vunpack.c.l.bf16 %v7921_v40  ;;  %v11960_v24 = vpack.c.bf16 %v2661_v14, %v2660_v16  ;;  %v2662_v14 = vld [vmem:[#allocation2 + $0x60] sm:$0xff] }
 0x16b   :  { %9626 = vrot.lane.b32.xlu1 %v9625_v5, %s9835_s15  ;;  %3814 = vst.msk [vmem:[#allocation2 + $0x20] sm:$0xff] %vm540_vm5, %v9348_v12  ;;  %3815 = vst.msk [vmem:[#allocation2 + $0x28] sm:$0xff] %vm540_vm5, %v9349_v57  ;;  %8720 = vmatmul.mubr.msk.bf16.vlgmr.msra.gmra.mxu1 %vm1968_vm10, %v11956_v19  ;;  %v1140_v1 = vunpack.c.l.bf16 %v1080_v26  ;;  %v1141_v50 = vunpack.c.l.bf16 %v11945_v49  ;;  %v1142_v59 = vunpack.c.l.bf16 %v1082_v56  ;;  %v9354_v36 = vunpack.i.h.bf16 %v11680_v61  ;;  %v2663_v26 = vld [vmem:[#allocation2 + $0x68] sm:$0xff]  ;;  %v1522_v56 = vld [vmem:[%s14858_s0 + $0xe4] sm:$0xc] }
 0x16c   :  { %v3665_v39 = vrot.slane %v3515_v10, 1  ;;  %v3666_v18 = vrot.slane %v3516_v46, 1  ;;  %v3668_v51 = vrot.slane %v3517_v6, 1  ;;  %8723 = vmatprep.mubr.msk.bf16.mxu1 %vm1968_vm10, %v11960_v24  ;;  %8689 = vmatprep.mubr.msk.bf16.mxu0 %vm1968_vm10, %v11956_v19  ;;  %v9353_v29 = vunpack.i.l.bf16 %v11680_v61  ;;  %v12016_v5 = vld [vmem:[%s14858_s0 + $0xe8] ss:$12 sps:$4 sm:$0xff]  }
 0x16d   :  { %v1299_v30 = vrot.slane %v1140_v1, 3  ;;  %v1300_v25 = vrot.slane %v1141_v50, 3  ;;  %v1302_v31 = vrot.slane %v1142_v59, 3  ;;  %4253 = vst.msk [vmem:[#allocation2 + $0x18] sm:$0xff] %vm982_vm6, %v9354_v36  ;;  %v9359_v20 = vunpack.i.h.bf16 %v11688_v55  ;;  %v11985_v32 = vpop.permute.xlu0 %9431  ;;  %v1524_v6 = vld [vmem:[%s14858_s0 + $0xec] sm:$0x3] }
 0x16e   :  { %v3667_v63 = vsel %vm319_vm1, %v3665_v39, %v3666_v18  ;;  %v3669_v61 = vsel %vm319_vm1, %v3666_v18, %v3668_v51  ;;  %4252 = vst.msk [vmem:[#allocation2 + $0x10] sm:$0xff] %vm982_vm6, %v9353_v29  ;;  %v9358_v44 = vunpack.i.l.bf16 %v11688_v55  ;;  %v8401_v23 = vunpack.c.l.bf16 %v8443_v8  ;;  %v11999_v17 = vpop.permute.xlu1 %9436  ;;  %v2664_v39 = vld [vmem:[#allocation2 + $0x70] sm:$0xff]  ;;  %v2665_v18 = vld [vmem:[#allocation2 + $0x78] sm:$0xff] }
 0x16f   :  { %v9630_v9 = vpack.i.bf16 %v3669_v61, %v3667_v63  ;;  %v1301_v54 = vsel %vm1203_vm2, %v1299_v30, %v1300_v25  ;;  %v1303_v47 = vsel %vm1203_vm2, %v1300_v25, %v1302_v31  ;;  %4255 = vst.msk [vmem:[#allocation2 + $0x28] sm:$0xff] %vm982_vm6, %v9359_v20  ;;  %v8402_v55 = vunpack.c.h.bf16 %v8443_v8  ;;  %v7982_v30 = vld [vmem:[%s14858_s0 + $0x1b0] sm:$0xe] }
 0x170   :  { %v9635_v3 = vpack.i.bf16 %v1303_v47, %v1301_v54  ;;  %4254 = vst.msk [vmem:[#allocation2 + $0x20] sm:$0xff] %vm982_vm6, %v9358_v44  ;;  %v3520_v35 = vunpack.c.l.bf16 %v7924_v13  ;;  %v3670_v40 = vrot.slane %v8401_v23, 1  ;;  %v3955_v16 = vunpack.c.l.bf16 %v7979_v37  ;;  %8690 = vmatmul.mubr.msk.bf16.gmra.mxu0 %vm1968_vm10, %v11960_v24 }
 0x171   :  { %9631 = vrot.lane.b32.xlu0 %v9630_v9, %s9836_s18  ;;  %v3671_v27 = vrot.slane %v8402_v55, 1  ;;  %v3956_v62 = vunpack.c.l.bf16 %v11994_v42  ;;  %v3957_v0 = vunpack.c.l.bf16 %v7981_v2  ;;  %v9364_v21 = vunpack.i.h.bf16 %v11711_v38 }
 0x172   :  { %9636 = vrot.lane.b32.xlu1 %v9635_v3, %s9837_s13  ;;  %v3673_v57 = vrot.slane %v3520_v35, 1  ;;  %v4105_v12 = vrot.slane %v3955_v16, 2  ;;  %v9363_v10 = vunpack.i.l.bf16 %v11711_v38  ;;  %v9369_v46 = vunpack.i.h.bf16 %v11722_v7  ;;  %v12024_v1 = vpop.permute.xlu0 %9441  ;;  %v8039_v3 = vld [vmem:[%s14858_s0 + $0x1a4] sm:$0xe]  ;;  %v12060_v35 = vld [vmem:[%s14858_s0 + $0xf4] ss:$180 sps:$4 sm:$0xff]  }
 0x173   :  { %v3672_v50 = vsel %vm319_vm1, %v3670_v40, %v3671_v27  ;;  %v4106_v59 = vrot.slane %v3956_v62, 2  ;;  %v4108_v36 = vrot.slane %v3957_v0, 2  ;;  %4693 = vst.msk [vmem:[#allocation2 + $0x18] sm:$0xff] %vm1424_vm7, %v9364_v21  ;;  %v9368_v8 = vunpack.i.l.bf16 %v11722_v7  ;;  %v7984_v7 = vld [vmem:[%s14858_s0 + $0x1b8] sm:$0x1] }
 0x174   :  { %v3674_v38 = vsel %vm319_vm1, %v3671_v27, %v3673_v57  ;;  %4692 = vst.msk [vmem:[#allocation2 + $0x10] sm:$0xff] %vm1424_vm7, %v9363_v10  ;;  %4695 = vst.msk [vmem:[#allocation2 + $0x28] sm:$0xff] %vm1424_vm7, %v9369_v46  ;;  %v12032_v51 = vpack.c.bf16 %v2663_v26, %v2662_v14  ;;  %v1582_v29 = vunpack.c.l.bf16 %v1522_v56  ;;  %v1583_v13 = vunpack.c.l.bf16 %v12016_v5  ;;  %v12041_v25 = vpop.permute.xlu1 %9446  ;;  %v8041_v27 = vld [vmem:[%s14858_s0 + $0x1ac] sm:$0x3]  ;;  %v8042_v62 = vld [vmem:[%s14858_s0 + $0x1b0] sm:$0xe] }
 0x175   :  { %v9640_v31 = vpack.i.bf16 %v3674_v38, %v3672_v50  ;;  %v4107_v20 = vsel %vm761_vm0, %v4105_v12, %v4106_v59  ;;  %v4109_v37 = vsel %vm761_vm0, %v4106_v59, %v4108_v36  ;;  %4694 = vst.msk [vmem:[#allocation2 + $0x20] sm:$0xff] %vm1424_vm7, %v9368_v8  ;;  %v1584_v63 = vunpack.c.l.bf16 %v1524_v6  ;;  %v8044_v6 = vld [vmem:[%s14858_s0 + $0x1b8] sm:$0x3] }
 0x176   :  { %v9645_v61 = vpack.i.bf16 %v4109_v37, %v4107_v20  ;;  %8724 = vmatmul.mubr.msk.bf16.gmra.mxu1 %vm1968_vm10, %v12032_v51  ;;  %v1741_v44 = vrot.slane %v1582_v29, 4  ;;  %v1742_v23 = vrot.slane %v1583_v13, 4  ;;  %v12048_v2 = vpack.c.bf16 %v2665_v18, %v2664_v39  ;;  %8693 = vmatprep.mubr.msk.bf16.mxu0 %vm1968_vm10, %v12032_v51  ;;  %v7840_v50 = vld [vmem:[%s14858_s0 + $0x114] sm:$0xff]  }
 0x177   :  { %9641 = vrot.lane.b32.xlu0 %v9640_v31, %s9836_s18  ;;  %v1744_v9 = vrot.slane %v1584_v63, 4  ;;  %v3958_v54 = vunpack.c.l.bf16 %v7982_v30  ;;  %v3959_v47 = vunpack.c.h.bf16 %v11898_v15  ;;  %v3960_v55 = vunpack.c.l.bf16 %v7984_v7  ;;  %v8427_v30 = vld [vmem:[%s14858_s0 + $0x120] sm:$0xff]  }
 0x178   :  { %9646 = vrot.lane.b32.xlu1 %v9645_v61, %s9835_s15  ;;  %v1743_v40 = vsel %vm1645_vm3, %v1741_v44, %v1742_v23  ;;  %8727 = vmatprep.mubr.msk.bf16.mxu1 %vm1968_vm10, %v12048_v2  ;;  %v9374_v16 = vunpack.i.h.bf16 %v11745_v58  ;;  %v9373_v15 = vunpack.i.l.bf16 %v11745_v58  ;;  %v9379_v14 = vunpack.i.h.bf16 %v11756_v45  ;;  %v12075_v0 = vpop.permute.xlu0 %9451  ;;  %v2666_v63 = vld [vmem:[#allocation2 + $0x80] sm:$0xff] }
 0x179   :  { %v1745_v21 = vsel %vm1645_vm3, %v1742_v23, %v1744_v9  ;;  %v4110_v26 = vrot.slane %v3958_v54, 2  ;;  %v4111_v56 = vrot.slane %v3959_v47, 2  ;;  %v4113_v57 = vrot.slane %v3960_v55, 2  ;;  %8694 = vmatmul.mubr.msk.bf16.gmra.mxu0 %vm1968_vm10, %v12048_v2  ;;  %v2667_v54 = vld [vmem:[#allocation2 + $0x88] sm:$0xff] }
 0x17a   :  { %v9650_v58 = vpack.i.bf16 %v1745_v21, %v1743_v40  ;;  %5132 = vst.msk [vmem:[#allocation2 + $0x10] sm:$0xff] %vm1866_vm8, %v9373_v15  ;;  %5133 = vst.msk [vmem:[#allocation2 + $0x18] sm:$0xff] %vm1866_vm8, %v9374_v16  ;;  %v9378_v12 = vunpack.i.l.bf16 %v11756_v45  ;;  %v4395_v10 = vunpack.c.l.bf16 %v8039_v3  ;;  %v4396_v46 = vunpack.c.h.bf16 %v12060_v35  ;;  %v12091_v59 = vpop.permute.xlu1 %9456  ;;  %v12110_v47 = vld [vmem:[%s14858_s0 + $0xf4] ss:$180 sps:$4 sm:$0xff]  }
 0x17b   :  { %5135 = vst.msk [vmem:[#allocation2 + $0x28] sm:$0xff] %vm1866_vm8, %v9379_v14  ;;  %v4112_v36 = vsel %vm761_vm0, %v4110_v26, %v4111_v56  ;;  %v4114_v8 = vsel %vm761_vm0, %v4111_v56, %v4113_v57  ;;  %v4397_v45 = vunpack.c.l.bf16 %v8041_v27  ;;  %v4398_v39 = vunpack.c.l.bf16 %v8042_v62  ;;  %v8101_v14 = vld [vmem:[%s14858_s0 + $0x1ac] sm:$0x3]  ;;  %v2668_v27 = vld [vmem:[#allocation2 + $0x90] sm:$0xff]  ;;  %v2669_v62 = vld [vmem:[#allocation2 + $0x98] sm:$0xff] }
 0x17c   :  { %9651 = vrot.lane.b32.xlu0 %v9650_v58, %s9838_s6  ;;  %v9655_v18 = vpack.i.bf16 %v4114_v8, %v4112_v36  ;;  %5134 = vst.msk [vmem:[#allocation2 + $0x20] sm:$0xff] %vm1866_vm8, %v9378_v12  ;;  %v4545_v38 = vrot.slane %v4395_v10, 3  ;;  %v4546_v29 = vrot.slane %v4396_v46, 3  ;;  %v4399_v13 = vunpack.c.h.bf16 %v11945_v49  ;;  %v8099_v49 = vld [vmem:[%s14858_s0 + $0x1a4] sm:$0xc] }
 0x17d   :  { %v4548_v7 = vrot.slane %v4397_v45, 3  ;;  %v4400_v31 = vunpack.c.l.bf16 %v8044_v6  ;;  %v4550_v20 = vrot.slane %v4398_v39, 3  ;;  %v3336_v37 = vunpack.c.l.bf16 %v7840_v50  ;;  %v12112_v55 = vpop.permute.xlu0 %9461  ;;  %v8104_v12 = vld [vmem:[%s14858_s0 + $0x1b8] sm:$0x3] }
 0x17e   :  { %9656 = vrot.lane.b32.xlu1 %v9655_v18, %s9835_s15  ;;  %v4547_v61 = vsel %vm1203_vm2, %v4545_v38, %v4546_v29  ;;  %v4551_v44 = vrot.slane %v4399_v13, 3  ;;  %v3337_v23 = vunpack.c.h.bf16 %v7840_v50  ;;  %v9384_v9 = vunpack.i.h.bf16 %v11781_v60  ;;  %v8435_v13 = vld [vmem:[%s14858_s0 + $0xf0] sm:$0xff]  }
 0x17f   :  { %v4549_v3 = vsel %vm1203_vm2, %v4546_v29, %v4548_v7  ;;  %v4553_v40 = vrot.slane %v4400_v31, 3  ;;  %v9383_v16 = vunpack.i.l.bf16 %v11781_v60  ;;  %3376 = vst.msk [vmem:[#allocation2 + $0x30] sm:$0xff] %vm98_vm4, %v3336_v37  ;;  %v8337_v15 = vunpack.c.l.bf16 %v8427_v30  ;;  %v12120_v21 = vpop.permute.xlu1 %9466  ;;  %v8102_v60 = vld [vmem:[%s14858_s0 + $0x1b0] sm:$0xc] }
 0x180   :  { %v9660_v26 = vpack.i.bf16 %v4549_v3, %v4547_v61  ;;  %v4552_v56 = vsel %vm1203_vm2, %v4550_v20, %v4551_v44  ;;  %3377 = vst.msk [vmem:[#allocation2 + $0x38] sm:$0xff] %vm98_vm4, %v3337_v23  ;;  %v8338_v57 = vunpack.c.h.bf16 %v8427_v30  ;;  %v9389_v58 = vunpack.i.h.bf16 %v11788_v53 }
 0x181   :  { %v4554_v10 = vsel %vm1203_vm2, %v4551_v44, %v4553_v40  ;;  %3816 = vst.msk [vmem:[#allocation2 + $0x30] sm:$0xff] %vm540_vm5, %v9383_v16  ;;  %3817 = vst.msk [vmem:[#allocation2 + $0x38] sm:$0xff] %vm540_vm5, %v9384_v9  ;;  %v9388_v46 = vunpack.i.l.bf16 %v11788_v53  ;;  %v12136_v6 = vpack.c.bf16 %v2667_v54, %v2666_v63  ;;  %v4835_v50 = vunpack.c.l.bf16 %v8099_v49  ;;  %v7934_v9 = vld [vmem:[%s14858_s0 + $0xf0] sm:$0xe]  ;;  %v7936_v16 = vld [vmem:[%s14858_s0 + $0xf8] sm:$0x1] }
 0x182   :  { %3378 = vst.msk [vmem:[#allocation2 + $0x40] sm:$0xff] %vm98_vm4, %v8337_v15  ;;  %9661 = vrot.lane.b32.xlu0 %v9660_v26, %s9837_s13  ;;  %v9665_v36 = vpack.i.bf16 %v4554_v10, %v4552_v56  ;;  %3379 = vst.msk [vmem:[#allocation2 + $0x48] sm:$0xff] %vm98_vm4, %v8338_v57  ;;  %v4836_v8 = vunpack.c.h.bf16 %v12110_v47  ;;  %v4837_v45 = vunpack.c.l.bf16 %v8101_v14  ;;  %v12141_v39 = vpack.c.bf16 %v2669_v62, %v2668_v27 }
 0x183   :  { %3818 = vst.msk [vmem:[#allocation2 + $0x40] sm:$0xff] %vm540_vm5, %v9388_v46  ;;  %3819 = vst.msk [vmem:[#allocation2 + $0x48] sm:$0xff] %vm540_vm5, %v9389_v58  ;;  %8728 = vmatmul.mubr.msk.bf16.gmra.mxu1 %vm1968_vm10, %v12136_v6  ;;  %v4985_v53 = vrot.slane %v4835_v50, 4  ;;  %v4838_v18 = vunpack.c.l.bf16 %v8102_v60  ;;  %v4839_v38 = vunpack.c.h.bf16 %v11994_v42  ;;  %v4840_v29 = vunpack.c.l.bf16 %v8104_v12  ;;  %8697 = vmatprep.mubr.msk.bf16.mxu0 %vm1968_vm10, %v12136_v6  ;;  %v7876_v42 = vld [vmem:[%s14858_s0 + $0xf8] sm:$0x1]  ;;  %v2670_v46 = vld [vmem:[#allocation2 + $0xa0] sm:$0xff] }
 0x184   :  { %9666 = vrot.lane.b32.xlu1 %v9665_v36, %s9837_s13  ;;  %v4986_v30 = vrot.slane %v4836_v8, 4  ;;  %v4988_v7 = vrot.slane %v4837_v45, 4  ;;  %8731 = vmatprep.mubr.msk.bf16.mxu1 %vm1968_vm10, %v12141_v39  ;;  %v9394_v31 = vunpack.i.h.bf16 %v11818_v28  ;;  %v9393_v20 = vunpack.i.l.bf16 %v11818_v28  ;;  %v12161_v37 = vpop.permute.xlu0 %9471  ;;  %v2671_v50 = vld [vmem:[#allocation2 + $0xa8] sm:$0xff]  ;;  %v7994_v36 = vld [vmem:[%s14858_s0 + $0xf0] sm:$0xe] }
 0x185   :  { %v4990_v63 = vrot.slane %v4838_v18, 4  ;;  %v4991_v61 = vrot.slane %v4839_v38, 4  ;;  %v4993_v44 = vrot.slane %v4840_v29, 4  ;;  %v9399_v23 = vunpack.i.h.bf16 %v11827_v34  ;;  %8698 = vmatmul.mubr.msk.bf16.gmra.mxu0 %vm1968_vm10, %v12141_v39  ;;  %v12169_v54 = vpop.permute.xlu1 %9476 }
 0x186   :  { %v4987_v28 = vsel %vm1645_vm3, %v4985_v53, %v4986_v30  ;;  %v4989_v49 = vsel %vm1645_vm3, %v4986_v30, %v4988_v7  ;;  %4256 = vst.msk [vmem:[#allocation2 + $0x30] sm:$0xff] %vm982_vm6, %v9393_v20  ;;  %4257 = vst.msk [vmem:[#allocation2 + $0x38] sm:$0xff] %vm982_vm6, %v9394_v31  ;;  %v9398_v3 = vunpack.i.l.bf16 %v11827_v34  ;;  %v8369_v40 = vunpack.c.l.bf16 %v8435_v13  ;;  %v2672_v31 = vld [vmem:[#allocation2 + $0xb0] sm:$0xff]  ;;  %v2673_v20 = vld [vmem:[#allocation2 + $0xb8] sm:$0xff] }
 0x187   :  { %v9670_v15 = vpack.i.bf16 %v4989_v49, %v4987_v28  ;;  %v4992_v14 = vsel %vm1645_vm3, %v4990_v63, %v4991_v61  ;;  %v4994_v27 = vsel %vm1645_vm3, %v4991_v61, %v4993_v44  ;;  %4259 = vst.msk [vmem:[#allocation2 + $0x48] sm:$0xff] %vm982_vm6, %v9399_v23  ;;  %v8370_v62 = vunpack.c.h.bf16 %v8435_v13 }
 0x188   :  { %v9675_v26 = vpack.i.bf16 %v4994_v27, %v4992_v14  ;;  %4258 = vst.msk [vmem:[#allocation2 + $0x40] sm:$0xff] %vm982_vm6, %v9398_v3  ;;  %v3472_v56 = vunpack.c.l.bf16 %v7876_v42  ;;  %v3590_v57 = vrot.slane %v8369_v40, 1  ;;  %v3910_v58 = vunpack.c.l.bf16 %v7934_v9  ;;  %v8056_v40 = vld [vmem:[%s14858_s0 + $0xf8] sm:$0x3] }
 0x189   :  { %9671 = vrot.lane.b32.xlu0 %v9670_v15, %s9838_s6  ;;  %v3591_v34 = vrot.slane %v8370_v62, 1  ;;  %v3911_v60 = vunpack.c.h.bf16 %v12016_v5  ;;  %v3912_v12 = vunpack.c.l.bf16 %v7936_v16  ;;  %v9404_v10 = vunpack.i.h.bf16 %v11853_v33  ;;  %v7996_v5 = vld [vmem:[%s14858_s0 + $0xf8] sm:$0x3] }
 0x18a   :  { %9676 = vrot.lane.b32.xlu1 %v9675_v26, %s9838_s6  ;;  %v3593_v8 = vrot.slane %v3472_v56, 1  ;;  %v4030_v45 = vrot.slane %v3910_v58, 2  ;;  %v9403_v53 = vunpack.i.l.bf16 %v11853_v33  ;;  %v9409_v18 = vunpack.i.h.bf16 %v11863_v43  ;;  %v12195_v38 = vpop.permute.xlu0 %9481  ;;  %v9764_v33 = vld [vmem:[%s14859_s1 + $0x20] sm:$0xff]   ;;  %v12232_v58 = vpop.f32.mrf.mxu1 }
 0x18b   :  { %v3592_v29 = vsel %vm319_vm1, %v3590_v57, %v3591_v34  ;;  %v4031_v13 = vrot.slane %v3911_v60, 2  ;;  %v4033_v30 = vrot.slane %v3912_v12, 2  ;;  %4697 = vst.msk [vmem:[#allocation2 + $0x38] sm:$0xff] %vm1424_vm7, %v9404_v10  ;;  %v9408_v7 = vunpack.i.l.bf16 %v11863_v43  ;;  %v12203_v42 = vpop.permute.xlu1 %9486  ;;  %v8054_v43 = vld [vmem:[%s14858_s0 + $0xf0] sm:$0xc] }
 0x18c   :  { %v3594_v63 = vsel %vm319_vm1, %v3591_v34, %v3593_v8  ;;  %4696 = vst.msk [vmem:[#allocation2 + $0x30] sm:$0xff] %vm1424_vm7, %v9403_v53  ;;  %4699 = vst.msk [vmem:[#allocation2 + $0x48] sm:$0xff] %vm1424_vm7, %v9409_v18  ;;  %v12208_v61 = vpack.c.bf16 %v2671_v50, %v2670_v46  ;;  %v4350_v44 = vunpack.c.l.bf16 %v7994_v36  ;;  %v4351_v23 = vunpack.c.l.bf16 %v12060_v35  ;;  %v9765_v35 = vld [vmem:[%s14859_s1 + $0x8] sm:$0xff]   ;;  %v8428_v18 = vld [vmem:[%s14858_s0 + $0x138] sm:$0xff]  }
 0x18d   :  { %v9680_v9 = vpack.i.bf16 %v3594_v63, %v3592_v29  ;;  %v4032_v28 = vsel %vm761_vm0, %v4030_v45, %v4031_v13  ;;  %v4034_v49 = vsel %vm761_vm0, %v4031_v13, %v4033_v30  ;;  %4698 = vst.msk [vmem:[#allocation2 + $0x40] sm:$0xff] %vm1424_vm7, %v9408_v7  ;;  %v4352_v3 = vunpack.c.l.bf16 %v7996_v5  ;;  %v7844_v46 = vld [vmem:[%s14858_s0 + $0x12c] sm:$0xff]   ;;  %v2674_v7 = vld [vmem:[#allocation2 + $0xc0] sm:$0xff] }
 0x18e   :  { %v9685_v16 = vpack.i.bf16 %v4034_v49, %v4032_v28  ;;  %8732 = vmatmul.mubr.msk.bf16.gmra.mxu1 %vm1968_vm10, %v12208_v61  ;;  %v4470_v15 = vrot.slane %v4350_v44, 3  ;;  %v4471_v14 = vrot.slane %v4351_v23, 3  ;;  %v12225_v27 = vpack.c.bf16 %v2673_v20, %v2672_v31  ;;  %8701 = vmatprep.mubr.msk.bf16.mxu0 %vm1968_vm10, %v12208_v61  ;;  %v2675_v31 = vld [vmem:[#allocation2 + $0xc8] sm:$0xff]  ;;  %v2676_v23 = vld [vmem:[#allocation2 + $0xd0] sm:$0xff] }
 0x18f   :  { %9681 = vrot.lane.b32.xlu0 %v9680_v9, %s9836_s18  ;;  %v4473_v62 = vrot.slane %v4352_v3, 3  ;;  %v3061_v26 = vand.u32 %v9764_v33, %v10778_v11  ;;  %v4790_v56 = vunpack.c.l.bf16 %v8054_v43  ;;  %v4791_v57 = vunpack.c.l.bf16 %v12110_v47  ;;  %v12243_v50 = vpop.permute.xlu0 %9491  ;;  %v12245_v47 = vpop.f32.mrf.mxu0  ;;  %v2677_v43 = vld [vmem:[#allocation2 + $0xd8] sm:$0xff] }
 0x190   :  { %9686 = vrot.lane.b32.xlu1 %v9685_v16, %s9835_s15  ;;  %v4472_v34 = vsel %vm1203_vm2, %v4470_v15, %v4471_v14  ;;  %8735 = vmatprep.mubr.msk.bf16.mxu1 %vm1968_vm10, %v12225_v27  ;;  %v4792_v60 = vunpack.c.l.bf16 %v8056_v40  ;;  %v9414_v12 = vunpack.i.h.bf16 %v11903_v22  ;;  %v9413_v10 = vunpack.i.l.bf16 %v11903_v22  ;;  %v12262_v9 = vpop.f32.mrf.mxu1 }
 0x191   :  { %v4474_v36 = vsel %vm1203_vm2, %v4471_v14, %v4473_v62  ;;  %8751 = vmatprep.subr.bf16.mxu0 %v3061_v26  ;;  %v4910_v8 = vrot.slane %v4790_v56, 4  ;;  %v4911_v45 = vrot.slane %v4791_v57, 4  ;;  %v5279_v53 = vand.u32 %v9765_v35, %v10778_v11  ;;  %8702 = vmatmul.mubr.msk.bf16.gmra.mxu0 %vm1968_vm10, %v12225_v27  ;;  %v12254_v22 = vpop.permute.xlu1 %9496  ;;  %v12269_v40 = vpop.f32.mrf.mxu0  ;;  %v2678_v62 = vld [vmem:[#allocation2 + $0xe0] sm:$0xff] }
 0x192   :  { %v9690_v5 = vpack.i.bf16 %v4474_v36, %v4472_v34  ;;  %v4913_v29 = vrot.slane %v4792_v60, 4  ;;  %8752 = vmatpush3.bf16.msra.mxu0 %v3061_v26  ;;  %5136 = vst.msk [vmem:[#allocation2 + $0x30] sm:$0xff] %vm1866_vm8, %v9413_v10  ;;  %5137 = vst.msk [vmem:[#allocation2 + $0x38] sm:$0xff] %vm1866_vm8, %v9414_v12  ;;  %v9419_v13 = vunpack.i.h.bf16 %v11910_v48  ;;  %v9418_v30 = vunpack.i.l.bf16 %v11910_v48  ;;  %v2679_v26 = vld [vmem:[#allocation2 + $0xe8] sm:$0xff]  ;;  %v8429_v36 = vld [vmem:[%s14858_s0 + $0x150] sm:$0xff]  }
 0x193   :  { %v4912_v20 = vsel %vm1645_vm3, %v4910_v8, %v4911_v45  ;;  %8785 = vmatprep.subr.bf16.mxu1 %v5279_v53  ;;  %v3340_v33 = vunpack.c.l.bf16 %v7844_v46  ;;  %v3341_v63 = vunpack.c.h.bf16 %v7844_v46  ;;  %v9424_v44 = vunpack.i.h.bf16 %v11932_v52  ;;  %v7848_v34 = vld [vmem:[%s14858_s0 + $0x144] sm:$0xff]  }
 0x194   :  { %9691 = vrot.lane.b32.xlu0 %v9690_v5, %s9837_s13  ;;  %v4914_v28 = vsel %vm1645_vm3, %v4911_v45, %v4913_v29  ;;  %5138 = vst.msk [vmem:[#allocation2 + $0x40] sm:$0xff] %vm1866_vm8, %v9418_v30  ;;  %5139 = vst.msk [vmem:[#allocation2 + $0x48] sm:$0xff] %vm1866_vm8, %v9419_v13  ;;  %8786 = vmatpush3.bf16.msra.mxu1 %v5279_v53  ;;  %v9423_v48 = vunpack.i.l.bf16 %v11932_v52  ;;  %v8341_v49 = vunpack.c.l.bf16 %v8428_v18  ;;  %v8342_v3 = vunpack.c.h.bf16 %v8428_v18  ;;  %v12305_v45 = vpop.f32.mrf.mxu1  ;;  %v12319_v5 = vpop.f32.mrf.mxu0 }
 0x195   :  { %v9695_v35 = vpack.i.bf16 %v4914_v28, %v4912_v20  ;;  %3380 = vst.msk [vmem:[#allocation2 + $0x50] sm:$0xff] %vm98_vm4, %v3340_v33  ;;  %3381 = vst.msk [vmem:[#allocation2 + $0x58] sm:$0xff] %vm98_vm4, %v3341_v63  ;;  %v9429_v16 = vunpack.i.h.bf16 %v11950_v4  ;;  %v9428_v15 = vunpack.i.l.bf16 %v11950_v4  ;;  %v12275_v14 = vpack.c.bf16 %v2675_v31, %v2674_v7  ;;  %v12289_v60 = vpop.permute.xlu0 %9501  ;;  %v2383_v33 = vld [vmem:[#allocation2 + $0xf8] sm:$0xff] }
 0x196   :  { %3820 = vst.msk [vmem:[#allocation2 + $0x50] sm:$0xff] %vm540_vm5, %v9423_v48  ;;  %3821 = vst.msk [vmem:[#allocation2 + $0x58] sm:$0xff] %vm540_vm5, %v9424_v44  ;;  %v12281_v52 = vpack.c.bf16 %v2677_v43, %v2676_v23  ;;  %v9434_v56 = vunpack.i.h.bf16 %v11985_v32  ;;  %v9433_v57 = vunpack.i.l.bf16 %v11985_v32  ;;  %v9439_v4 = vunpack.i.h.bf16 %v11999_v17  ;;  %v2682_v44 = vld [vmem:[#allocation2 + $0x100] sm:$0xff]  ;;  %v2683_v23 = vld [vmem:[#allocation2 + $0x108] sm:$0xff]  ;;  %v12342_v28 = vpop.f32.mrf.mxu1 }
 0x197   :  { %3382 = vst.msk [vmem:[#allocation2 + $0x60] sm:$0xff] %vm98_vm4, %v8341_v49  ;;  %3383 = vst.msk [vmem:[#allocation2 + $0x68] sm:$0xff] %vm98_vm4, %v8342_v3  ;;  %9696 = vrot.lane.b32.xlu1 %v9695_v35, %s9838_s6  ;;  %8736 = vmatmul.mubr.msk.bf16.gmra.mxu1 %vm1968_vm10, %v12275_v14  ;;  %v9438_v12 = vunpack.i.l.bf16 %v11999_v17  ;;  %v9444_v32 = vunpack.i.h.bf16 %v12024_v1  ;;  %v9443_v10 = vunpack.i.l.bf16 %v12024_v1  ;;  %v9449_v46 = vunpack.i.h.bf16 %v12041_v25  ;;  %v12303_v8 = vpop.permute.xlu1 %9506  ;;  %v2382_v43 = vld [vmem:[#allocation2 + $0xf0] sm:$0xff]  ;;  %v12356_v35 = vpop.f32.mrf.mxu0 }
 0x198   :  { %3822 = vst.msk [vmem:[#allocation2 + $0x60] sm:$0xff] %vm540_vm5, %v9428_v15  ;;  %3823 = vst.msk [vmem:[#allocation2 + $0x68] sm:$0xff] %vm540_vm5, %v9429_v16  ;;  %8739 = vmatprep.mubr.msk.bf16.mxu1 %vm1968_vm10, %v12281_v52  ;;  %8705 = vmatprep.mubr.msk.bf16.mxu0 %vm1968_vm10, %v12275_v14  ;;  %v9448_v17 = vunpack.i.l.bf16 %v12041_v25  ;;  %v12315_v1 = vpack.c.bf16 %v2679_v26, %v2678_v62  ;;  %v9454_v53 = vunpack.i.h.bf16 %v12075_v0  ;;  %v9453_v18 = vunpack.i.l.bf16 %v12075_v0  ;;  %v8430_v26 = vld [vmem:[%s14858_s0 + $0x168] sm:$0xff]  }
 0x199   :  { %4260 = vst.msk [vmem:[#allocation2 + $0x50] sm:$0xff] %vm982_vm6, %v9433_v57  ;;  %4261 = vst.msk [vmem:[#allocation2 + $0x58] sm:$0xff] %vm982_vm6, %v9434_v56  ;;  %8706 = vmatmul.mubr.msk.bf16.gmra.mxu0 %vm1968_vm10, %v12281_v52  ;;  %v9459_v25 = vunpack.i.h.bf16 %v12091_v59  ;;  %v9458_v29 = vunpack.i.l.bf16 %v12091_v59  ;;  %v3344_v13 = vunpack.c.l.bf16 %v7848_v34  ;;  %v3345_v30 = vunpack.c.h.bf16 %v7848_v34  ;;  %v12369_v57 = vpop.f32.mrf.mxu1 }
 0x19a   :  { %4263 = vst.msk [vmem:[#allocation2 + $0x68] sm:$0xff] %vm982_vm6, %v9439_v4  ;;  %4262 = vst.msk [vmem:[#allocation2 + $0x60] sm:$0xff] %vm982_vm6, %v9438_v12  ;;  %8709 = vmatprep.mubr.msk.bf16.mxu0 %vm1968_vm10, %v12315_v1  ;;  %v9464_v0 = vunpack.i.h.bf16 %v12112_v55  ;;  %v9463_v7 = vunpack.i.l.bf16 %v12112_v55  ;;  %v8345_v31 = vunpack.c.l.bf16 %v8429_v36  ;;  %v8346_v20 = vunpack.c.h.bf16 %v8429_v36  ;;  %v12380_v12 = vpop.f32.mrf.mxu0 }
 0x19b   :  { %4700 = vst.msk [vmem:[#allocation2 + $0x50] sm:$0xff] %vm1424_vm7, %v9443_v10  ;;  %4701 = vst.msk [vmem:[#allocation2 + $0x58] sm:$0xff] %vm1424_vm7, %v9444_v32  ;;  %v9469_v59 = vunpack.i.h.bf16 %v12120_v21  ;;  %v9468_v63 = vunpack.i.l.bf16 %v12120_v21  ;;  %v9474_v55 = vunpack.i.h.bf16 %v12161_v37  ;;  %v9473_v48 = vunpack.i.l.bf16 %v12161_v37  ;;  %v7852_v21 = vld [vmem:[%s14858_s0 + $0x15c] sm:$0xff]  }
 0x19c   :  { %4703 = vst.msk [vmem:[#allocation2 + $0x68] sm:$0xff] %vm1424_vm7, %v9449_v46  ;;  %4702 = vst.msk [vmem:[#allocation2 + $0x60] sm:$0xff] %vm1424_vm7, %v9448_v17  ;;  %v9479_v49 = vunpack.i.h.bf16 %v12169_v54  ;;  %v12354_v3 = vpop.permute.xlu0 %9511  ;;  %v9478_v16 = vunpack.i.l.bf16 %v12169_v54  ;;  %v9484_v15 = vunpack.i.h.bf16 %v12195_v38  ;;  %v9483_v37 = vunpack.i.l.bf16 %v12195_v38 }
 0x19d   :  { %5140 = vst.msk [vmem:[#allocation2 + $0x50] sm:$0xff] %vm1866_vm8, %v9453_v18  ;;  %5141 = vst.msk [vmem:[#allocation2 + $0x58] sm:$0xff] %vm1866_vm8, %v9454_v53  ;;  %v9489_v62 = vunpack.i.h.bf16 %v12203_v42  ;;  %v12367_v56 = vpop.permute.xlu1 %9516  ;;  %v12371_v4 = vpack.c.bf16 %v2683_v23, %v2682_v44  ;;  %v12373_v34 = vpack.c.bf16 %v2383_v33, %v2382_v43  ;;  %v9488_v54 = vunpack.i.l.bf16 %v12203_v42  ;;  %v7927_v44 = vld [vmem:[%s14858_s0 + $0x1c4] sm:$0x1]  ;;  %v7985_v23 = vld [vmem:[%s14858_s0 + $0x1bc] sm:$0xe] }
 0x19e   :  { %5142 = vst.msk [vmem:[#allocation2 + $0x60] sm:$0xff] %vm1866_vm8, %v9458_v29  ;;  %5143 = vst.msk [vmem:[#allocation2 + $0x68] sm:$0xff] %vm1866_vm8, %v9459_v25  ;;  %v9494_v38 = vunpack.i.h.bf16 %v12243_v50  ;;  %v9493_v32 = vunpack.i.l.bf16 %v12243_v50  ;;  %v9499_v10 = vunpack.i.h.bf16 %v12254_v22  ;;  %v9498_v42 = vunpack.i.l.bf16 %v12254_v22  ;;  %v12405_v29 = vpop.f32.mrf.mxu1  ;;  %v7986_v43 = vld [vmem:[%s14858_s0 + $0x1c0] sm:$0xf] }
 0x19f   :  { %3384 = vst.msk [vmem:[#allocation2 + $0x70] sm:$0xff] %vm98_vm4, %v3344_v13  ;;  %3385 = vst.msk [vmem:[#allocation2 + $0x78] sm:$0xff] %vm98_vm4, %v3345_v30  ;;  %8740 = vmatmul.mubr.msk.bf16.gmra.mxu1 %vm1968_vm10, %v12315_v1  ;;  %v3348_v46 = vunpack.c.l.bf16 %v7852_v21  ;;  %v3349_v36 = vunpack.c.h.bf16 %v7852_v21  ;;  %v9504_v17 = vunpack.i.h.bf16 %v12289_v60  ;;  %v9503_v53 = vunpack.i.l.bf16 %v12289_v60  ;;  %v2684_v60 = vld [vmem:[#allocation2 + $0x110] sm:$0xff]  ;;  %v2685_v13 = vld [vmem:[#allocation2 + $0x118] sm:$0xff] }
 0x1a0   :  { %3824 = vst.msk [vmem:[#allocation2 + $0x70] sm:$0xff] %vm540_vm5, %v9463_v7  ;;  %3825 = vst.msk [vmem:[#allocation2 + $0x78] sm:$0xff] %vm540_vm5, %v9464_v0  ;;  %8743 = vmatprep.mubr.msk.bf16.mxu1 %vm1968_vm10, %v11858_v41  ;;  %v8349_v18 = vunpack.c.l.bf16 %v8430_v26  ;;  %v8350_v41 = vunpack.c.h.bf16 %v8430_v26  ;;  %v9509_v50 = vunpack.i.h.bf16 %v12303_v8  ;;  %v9508_v22 = vunpack.i.l.bf16 %v12303_v8  ;;  %v7925_v8 = vld [vmem:[%s14858_s0 + $0x1bc] sm:$0xff]   ;;  %v12417_v7 = vpop.f32.mrf.mxu0  ;;  %v7987_v21 = vld [vmem:[%s14858_s0 + $0x1c4] sm:$0x1] }
 0x1a1   :  { %3386 = vst.msk [vmem:[#allocation2 + $0x80] sm:$0xff] %vm98_vm4, %v8345_v31  ;;  %3387 = vst.msk [vmem:[#allocation2 + $0x88] sm:$0xff] %vm98_vm4, %v8346_v20  ;;  %8710 = vmatmul.mubr.msk.bf16.gmra.mxu0 %vm1968_vm10, %v12373_v34  ;;  %v9522_v25 = vpop.permute.xlu0 %9521  ;;  %v9514_v30 = vunpack.i.h.bf16 %v12354_v3  ;;  %v9513_v0 = vunpack.i.l.bf16 %v12354_v3  ;;  %v9519_v31 = vunpack.i.h.bf16 %v12367_v56  ;;  %v9518_v20 = vunpack.i.l.bf16 %v12367_v56  ;;  %v7856_v3 = vld [vmem:[%s14858_s0 + $0x174] sm:$0xff]  }
 0x1a2   :  { %3826 = vst.msk [vmem:[#allocation2 + $0x80] sm:$0xff] %vm540_vm5, %v9468_v63  ;;  %3827 = vst.msk [vmem:[#allocation2 + $0x88] sm:$0xff] %vm540_vm5, %v9469_v59  ;;  %8713 = vmatprep.mubr.msk.bf16.mxu0 %vm1968_vm10, %v12371_v4  ;;  %v9524_v33 = vunpack.i.h.bf16 %v9522_v25  ;;  %v9523_v59 = vunpack.i.l.bf16 %v9522_v25  ;;  %v12462_v26 = vadd.f32 %v12305_v45, %v12319_v5  ;;  %v3961_v56 = vunpack.c.l.bf16 %v7985_v23  ;;  %v5173_v25 = vld [vmem:[#allocation2 + $0x18] sm:$0xff] }
 0x1a3   :  { %4264 = vst.msk [vmem:[#allocation2 + $0x70] sm:$0xff] %vm982_vm6, %v9473_v48  ;;  %4265 = vst.msk [vmem:[#allocation2 + $0x78] sm:$0xff] %vm982_vm6, %v9474_v55  ;;  %v9527_v63 = vpop.permute.xlu1 %9526  ;;  %vm3256_vm11 = vcmask 261120   ;;  %vm7167_vm12 = vcmask 1040384   ;;  %vm7359_vm13 = vcmask 257024  }
 0x1a4   :  { %4267 = vst.msk [vmem:[#allocation2 + $0x88] sm:$0xff] %vm982_vm6, %v9479_v49  ;;  %4266 = vst.msk [vmem:[#allocation2 + $0x80] sm:$0xff] %vm982_vm6, %v9478_v16  ;;  %v9529_v55 = vunpack.i.h.bf16 %v9527_v63  ;;  %v9528_v48 = vunpack.i.l.bf16 %v9527_v63  ;;  %v12438_v49 = vadd.f32 %v12232_v58, %v12245_v47  ;;  %v12446_v16 = vpack.c.bf16 %v2685_v13, %v2684_v60  ;;  %v5175_v63 = vld [vmem:[#allocation2 + $0x28] sm:$0xff] }
 0x1a5   :  { %4704 = vst.msk [vmem:[#allocation2 + $0x70] sm:$0xff] %vm1424_vm7, %v9483_v37  ;;  %4705 = vst.msk [vmem:[#allocation2 + $0x78] sm:$0xff] %vm1424_vm7, %v9484_v15  ;;  %v12454_v58 = vadd.f32 %v12262_v9, %v12269_v40  ;;  %v3521_v47 = vunpack.c.l.bf16 %v7925_v8  ;;  %v3522_v15 = vunpack.c.h.bf16 %v7925_v8  ;;  %v12456_v37 = vpop.f32.mrf.mxu1  ;;  %v2686_v9 = vld [vmem:[#allocation2 + $0x120] sm:$0xff]  ;;  %v2687_v40 = vld [vmem:[#allocation2 + $0x128] sm:$0xff]  ;;  %v3353_v8 = vunpack.c.h.bf16 %v7856_v3 }
 0x1a6   :  { %4707 = vst.msk [vmem:[#allocation2 + $0x88] sm:$0xff] %vm1424_vm7, %v9489_v62  ;;  %4706 = vst.msk [vmem:[#allocation2 + $0x80] sm:$0xff] %vm1424_vm7, %v9488_v54  ;;  %v3523_v62 = vunpack.c.l.bf16 %v7927_v44  ;;  %v3962_v54 = vunpack.c.l.bf16 %v7986_v43 }
 0x1a7   :  { %5145 = vst.msk [vmem:[#allocation2 + $0x78] sm:$0xff] %vm1866_vm8, %v9494_v38  ;;  %5144 = vst.msk [vmem:[#allocation2 + $0x70] sm:$0xff] %vm1866_vm8, %v9493_v32  ;;  %v12464_v38 = vpop.f32.mrf.mxu0  ;;  %8744 = vmatmul.mubr.msk.bf16.gmra.mxu1 %vm1968_vm10, %v12371_v4  ;;  %v9532_v32 = vpop.permute.xlu0 %9531 }
 0x1a8   :  { %5146 = vst.msk [vmem:[#allocation2 + $0x80] sm:$0xff] %vm1866_vm8, %v9498_v42  ;;  %5147 = vst.msk [vmem:[#allocation2 + $0x88] sm:$0xff] %vm1866_vm8, %v9499_v10  ;;  %v3675_v10 = vrot.slane %v3521_v47, 1  ;;  %v3676_v42 = vrot.slane %v3522_v15, 1  ;;  %8747 = vmatprep.mubr.msk.bf16.mxu1 %vm1968_vm10, %v12446_v16  ;;  %v9534_v45 = vunpack.i.h.bf16 %v9532_v32  ;;  %v9533_v5 = vunpack.i.l.bf16 %v9532_v32  ;;  %v8106_v15 = vld [vmem:[%s14858_s0 + $0x1c0] sm:$0xf] }
 0x1a9   :  { %3388 = vst.msk [vmem:[#allocation2 + $0x90] sm:$0xff] %vm98_vm4, %v3348_v46  ;;  %3389 = vst.msk [vmem:[#allocation2 + $0x98] sm:$0xff] %vm98_vm4, %v3349_v36  ;;  %v3963_v46 = vunpack.c.l.bf16 %v7987_v21  ;;  %v3352_v36 = vunpack.c.l.bf16 %v7856_v3  ;;  %8714 = vmatmul.mubr.msk.bf16.gmra.mxu0 %vm1968_vm10, %v12446_v16  ;;  %v9537_v60 = vpop.permute.xlu1 %9536  ;;  %v8107_v32 = vld [vmem:[%s14858_s0 + $0x1c4] sm:$0x3] }
 0x1aa   :  { %3828 = vst.msk [vmem:[#allocation2 + $0x90] sm:$0xff] %vm540_vm5, %v9503_v53  ;;  %3829 = vst.msk [vmem:[#allocation2 + $0x98] sm:$0xff] %vm540_vm5, %v9504_v17  ;;  %v8431_v17 = vld [vmem:[%s14858_s0 + $0x180] sm:$0xff]   ;;  %v3678_v53 = vrot.slane %v3523_v62, 1  ;;  %v3677_v13 = vsel %vm319_vm1, %v3675_v10, %v3676_v42  ;;  %8753 = vmatprep.mubr.msk.bf16.mxu0 %vm1968_vm10, %v11956_v19  ;;  %v9539_v44 = vunpack.i.h.bf16 %v9537_v60  ;;  %v9538_v23 = vunpack.i.l.bf16 %v9537_v60 }
 0x1ab   :  { %3390 = vst.msk [vmem:[#allocation2 + $0xa0] sm:$0xff] %vm98_vm4, %v8349_v18  ;;  %3391 = vst.msk [vmem:[#allocation2 + $0xa8] sm:$0xff] %vm98_vm4, %v8350_v41  ;;  %v4115_v18 = vrot.slane %v3961_v56, 2  ;;  %v8045_v41 = vld [vmem:[%s14858_s0 + $0x1bc] sm:$0xe]  ;;  %v8353_v47 = vunpack.c.l.bf16 %v8431_v17 }
 0x1ac   :  { %3830 = vst.msk [vmem:[#allocation2 + $0xa0] sm:$0xff] %vm540_vm5, %v9508_v22  ;;  %3831 = vst.msk [vmem:[#allocation2 + $0xa8] sm:$0xff] %vm540_vm5, %v9509_v50  ;;  %v8046_v50 = vld [vmem:[%s14858_s0 + $0x1c0] sm:$0xf]  ;;  %v5172_v22 = vld [vmem:[#allocation2 + $0x10] sm:$0xff]  ;;  %v3679_v43 = vsel %vm319_vm1, %v3676_v42, %v3678_v53 }
 0x1ad   :  { %4268 = vst.msk [vmem:[#allocation2 + $0x90] sm:$0xff] %vm982_vm6, %v9513_v0  ;;  %4269 = vst.msk [vmem:[#allocation2 + $0x98] sm:$0xff] %vm982_vm6, %v9514_v30  ;;  %v4116_v30 = vrot.slane %v3962_v54, 2  ;;  %v4118_v0 = vrot.slane %v3963_v46, 2  ;;  %v9700_v21 = vpack.i.bf16 %v3679_v43, %v3677_v13  ;;  %v12508_v56 = vpack.c.bf16 %v5173_v25, %v5172_v22  ;;  %v5176_v46 = vld [vmem:[#allocation2 + $0x30] sm:$0xff] }
 0x1ae   :  { %4270 = vst.msk [vmem:[#allocation2 + $0xa0] sm:$0xff] %vm982_vm6, %v9518_v20  ;;  %4271 = vst.msk [vmem:[#allocation2 + $0xa8] sm:$0xff] %vm982_vm6, %v9519_v31  ;;  %v8047_v31 = vld [vmem:[%s14858_s0 + $0x1c4] sm:$0x3]  ;;  %v12486_v20 = vpop.f32.mrf.mxu1  ;;  %v9547_v25 = vpop.permute.xlu1 %9546  ;;  %v4842_v13 = vunpack.c.l.bf16 %v8106_v15  ;;  %v4843_v43 = vunpack.c.l.bf16 %v8107_v32  ;;  %v5181_v15 = vld [vmem:[#allocation2 + $0x58] sm:$0xff] }
 0x1af   :  { %4708 = vst.msk [vmem:[#allocation2 + $0x90] sm:$0xff] %vm1424_vm7, %v9523_v59  ;;  %4709 = vst.msk [vmem:[#allocation2 + $0x98] sm:$0xff] %vm1424_vm7, %v9524_v33  ;;  %v12488_v33 = vpack.c.bf16 %v2687_v40, %v2686_v9  ;;  %v5174_v59 = vld [vmem:[#allocation2 + $0x20] sm:$0xff]  ;;  %v4117_v3 = vsel %vm761_vm0, %v4115_v18, %v4116_v30  ;;  %v4119_v19 = vsel %vm761_vm0, %v4116_v30, %v4118_v0  ;;  %v8354_v9 = vunpack.c.h.bf16 %v8431_v17 }
 0x1b0   :  { %4710 = vst.msk [vmem:[#allocation2 + $0xa0] sm:$0xff] %vm1424_vm7, %v9528_v48  ;;  %4711 = vst.msk [vmem:[#allocation2 + $0xa8] sm:$0xff] %vm1424_vm7, %v9529_v55  ;;  %v8105_v55 = vld [vmem:[%s14858_s0 + $0x1bc] sm:$0xc]  ;;  %v12498_v48 = vpop.f32.mrf.mxu0  ;;  %v12506_v62 = vpop.f32.mrf.mxu1  ;;  %v9705_v54 = vpack.i.bf16 %v4119_v19, %v4117_v3  ;;  %v4401_v40 = vunpack.c.l.bf16 %v8045_v41  ;;  %v12517_v42 = vpack.c.bf16 %v5175_v63, %v5174_v59  ;;  %9701 = vrot.lane.b32.xlu0 %v9700_v21, %s9836_s18  ;;  %v4403_v53 = vunpack.c.l.bf16 %v8047_v31  ;;  %v9766_v17 = vld [vmem:[%s14859_s1] sm:$0xff]  }
 0x1b1   :  { %3392 = vst.msk [vmem:[#allocation2 + $0xb0] sm:$0xff] %vm98_vm4, %v3352_v36  ;;  %3393 = vst.msk [vmem:[#allocation2 + $0xb8] sm:$0xff] %vm98_vm4, %v3353_v8  ;;  %v5177_v36 = vld [vmem:[#allocation2 + $0x38] sm:$0xff]  ;;  %v4841_v18 = vunpack.c.l.bf16 %v8105_v55  ;;  %8748 = vmatmul.mubr.msk.bf16.gmra.mxu1 %vm1968_vm10, %v12488_v33  ;;  %v5178_v30 = vld [vmem:[#allocation2 + $0x40] sm:$0xff]  ;;  %v9549_v0 = vunpack.i.h.bf16 %v9547_v25  ;;  %v9548_v8 = vunpack.i.l.bf16 %v9547_v25  ;;  %v4996_v21 = vrot.slane %v4842_v13, 4  ;;  %8754 = vmatmul.mubr.msk.bf16.vlgmr.msra.gmra.mxu0 %vm1968_vm10, %v11960_v24 }
 0x1b2   :  { %5148 = vst.msk [vmem:[#allocation2 + $0x90] sm:$0xff] %vm1866_vm8, %v9533_v5  ;;  %5149 = vst.msk [vmem:[#allocation2 + $0x98] sm:$0xff] %vm1866_vm8, %v9534_v45  ;;  %v12515_v10 = vpop.f32.mrf.mxu0  ;;  %v9542_v45 = vpop.permute.xlu0 %9541  ;;  %v4402_v5 = vunpack.c.l.bf16 %v8046_v50  ;;  %9706 = vrot.lane.b32.xlu1 %v9705_v54, %s9835_s15  ;;  %v4555_v60 = vrot.slane %v4401_v40, 3  ;;  %v5179_v50 = vld [vmem:[#allocation2 + $0x48] sm:$0xff]  ;;  %v4558_v59 = vrot.slane %v4403_v53, 3  ;;  %v9767_v63 = vld [vmem:[%s14859_s1 + $0x10] sm:$0xff]   ;;  %8787 = vmatprep.mubr.msk.bf16.mxu1 %vm1968_vm10, %v12508_v56  ;;  %v12550_v40 = vadd.f32 %v12369_v57, %v12380_v12 }
 0x1b3   :  { %5150 = vst.msk [vmem:[#allocation2 + $0xa0] sm:$0xff] %vm1866_vm8, %v9538_v23  ;;  %5151 = vst.msk [vmem:[#allocation2 + $0xa8] sm:$0xff] %vm1866_vm8, %v9539_v44  ;;  %v9544_v41 = vunpack.i.h.bf16 %v9542_v45  ;;  %v9543_v22 = vunpack.i.l.bf16 %v9542_v45  ;;  %v12531_v44 = vpop.f32.mrf.mxu1  ;;  %v12535_v23 = vpack.c.bf16 %v5177_v36, %v5176_v46  ;;  %v4995_v55 = vrot.slane %v4841_v18, 4  ;;  %v7860_v3 = vld [vmem:[%s14858_s0 + $0x18c] sm:$0xff]   ;;  %v8432_v24 = vld [vmem:[%s14858_s0 + $0x198] sm:$0xff]   ;;  %8757 = vmatprep.mubr.msk.bf16.mxu0 %vm1968_vm10, %v12032_v51 }
 0x1b4   :  { %3394 = vst.msk [vmem:[#allocation2 + $0xc0] sm:$0xff] %vm98_vm4, %v8353_v47  ;;  %3395 = vst.msk [vmem:[#allocation2 + $0xc8] sm:$0xff] %vm98_vm4, %v8354_v9  ;;  %v4556_v31 = vrot.slane %v4402_v5, 3  ;;  %v2089_v19 = vpop.f32.mrf.mxu0  ;;  %v5180_v47 = vld [vmem:[#allocation2 + $0x50] sm:$0xff]  ;;  %v5451_v32 = vand.u32 %v9766_v17, %v10778_v11  ;;  %v12558_v46 = vpack.c.bf16 %v5179_v50, %v5178_v30  ;;  %v4998_v5 = vrot.slane %v4843_v43, 4  ;;  %v5182_v53 = vld [vmem:[#allocation2 + $0x60] sm:$0xff] }
 0x1b5   :  { %3832 = vst.msk [vmem:[#allocation2 + $0xb0] sm:$0xff] %vm540_vm5, %v9543_v22  ;;  %3833 = vst.msk [vmem:[#allocation2 + $0xb8] sm:$0xff] %vm540_vm5, %v9544_v41  ;;  %v4997_v45 = vsel %vm1645_vm3, %v4995_v55, %v4996_v21  ;;  %v5183_v18 = vld [vmem:[#allocation2 + $0x68] sm:$0xff]  ;;  %v12563_v57 = vadd.f32 %v12405_v29, %v12417_v7  ;;  %v5718_v12 = vand.u32 %v9767_v63, %v10778_v11  ;;  %v3356_v51 = vunpack.c.l.bf16 %v7860_v3  ;;  %v8662_v41 = vpop.f32.mrf.mxu1  ;;  %v5185_v50 = vld [vmem:[#allocation2 + $0x78] sm:$0xff] }
 0x1b6   :  { %3834 = vst.msk [vmem:[#allocation2 + $0xc0] sm:$0xff] %vm540_vm5, %v9548_v8  ;;  %3835 = vst.msk [vmem:[#allocation2 + $0xc8] sm:$0xff] %vm540_vm5, %v9549_v0  ;;  %v4557_v54 = vsel %vm1203_vm2, %v4555_v60, %v4556_v31  ;;  %v4559_v9 = vsel %vm1203_vm2, %v4556_v31, %v4558_v59  ;;  %8819 = vmatprep.subr.bf16.mxu0 %v5451_v32  ;;  %v12568_v17 = vadd.f32 %v12456_v37, %v12464_v38  ;;  %v9552_v60 = vpop.permute.xlu0 %9551  ;;  %v8628_v29 = vpop.f32.mrf.mxu0  ;;  %v56_v7 = vld [vmem:[%s14858_s0 + $0xe4] sm:$0xff]   ;;  %v5184_v38 = vld [vmem:[#allocation2 + $0x70] sm:$0xff] }
 0x1b7   :  { %v9710_v36 = vpack.i.bf16 %v4559_v9, %v4557_v54  ;;  %v12570_v22 = vpack.c.bf16 %v5181_v15, %v5180_v47  ;;  %v4999_v25 = vsel %vm1645_vm3, %v4996_v21, %v4998_v5  ;;  %8820 = vmatpush3.bf16.msra.mxu0 %v5451_v32  ;;  %v3357_v13 = vunpack.c.h.bf16 %v7860_v3  ;;  %v7864_v37 = vld [vmem:[%s14858_s0 + $0x1a4] sm:$0xff]   ;;  %v9557_v59 = vpop.permute.xlu1 %9556  ;;  %8853 = vmatprep.subr.bf16.mxu1 %v5718_v12  ;;  %v8433_v43 = vld [vmem:[%s14858_s0 + $0x1b0] sm:$0xff]  }
 0x1b8   :  { %v8357_v30 = vunpack.c.l.bf16 %v8432_v24  ;;  %v9715_v0 = vpack.i.bf16 %v4999_v25, %v4997_v45  ;;  %v9554_v8 = vunpack.i.h.bf16 %v9552_v60  ;;  %v9553_v31 = vunpack.i.l.bf16 %v9552_v60  ;;  %3396 = vst.msk [vmem:[#allocation2 + $0xd0] sm:$0xff] %vm98_vm4, %v3356_v51  ;;  %v8444_v15 = vld [vmem:[%s14858_s0 + $0x1c8] sm:$0xff]   ;;  %v7930_v54 = vld [vmem:[%s14858_s0 + $0x1d0] sm:$0x1] }
 0x1b9   :  { %9711 = vrot.lane.b32.xlu0 %v9710_v36, %s9837_s13  ;;  %v8358_v63 = vunpack.c.h.bf16 %v8432_v24  ;;  %v12584_v55 = vpack.c.bf16 %v5183_v18, %v5182_v53  ;;  %v9559_v21 = vunpack.i.h.bf16 %v9557_v59  ;;  %v9558_v3 = vunpack.i.l.bf16 %v9557_v59  ;;  %3397 = vst.msk [vmem:[#allocation2 + $0xd8] sm:$0xff] %vm98_vm4, %v3357_v13  ;;  %8788 = vmatmul.mubr.msk.bf16.vlgmr.msra.gmra.mxu1 %vm1968_vm10, %v12517_v42  ;;  %v7988_v24 = vld [vmem:[%s14858_s0 + $0x1c8] sm:$0xe]  ;;  %v12615_v36 = vld [vmem:[%s14858_s0 + $0x1cc] ss:$12 sps:$4 sm:$0xff]  }
 0x1ba   :  { %3398 = vst.msk [vmem:[#allocation2 + $0xe0] sm:$0xff] %vm98_vm4, %v8357_v30  ;;  %v12590_v47 = vadd.f32 %v12506_v62, %v12515_v10  ;;  %9716 = vrot.lane.b32.xlu1 %v9715_v0, %s9838_s6  ;;  %v12605_v62 = vadd.f32 %v12531_v44, %v2089_v19  ;;  %v12607_v10 = vadd.f32 %v8662_v41, %v8628_v29  ;;  %v96_v9 = vunpack.c.l.bf16 %v56_v7  ;;  %v7990_v53 = vld [vmem:[%s14858_s0 + $0x1d0] sm:$0x1]  ;;  %v9562_v18 = vpop.permute.xlu0 %9561  ;;  %v7931_v29 = vld [vmem:[%s14858_s0 + $0x1d4] sm:$0xff]   ;;  %v7933_v0 = vld [vmem:[%s14858_s0 + $0x1dc] sm:$0x1] }
 0x1bb   :  { %4272 = vst.msk [vmem:[#allocation2 + $0xb0] sm:$0xff] %vm982_vm6, %v9553_v31  ;;  %4273 = vst.msk [vmem:[#allocation2 + $0xb8] sm:$0xff] %vm982_vm6, %v9554_v8  ;;  %v97_v32 = vunpack.c.h.bf16 %v56_v7  ;;  %8791 = vmatprep.mubr.msk.bf16.mxu1 %vm1968_vm10, %v12535_v23  ;;  %v12619_v45 = vpack.c.bf16 %v5185_v50, %v5184_v38  ;;  %8854 = vmatpush3.bf16.msra.mxu1 %v5718_v12  ;;  %v3360_v44 = vunpack.c.l.bf16 %v7864_v37  ;;  %v3361_v19 = vunpack.c.h.bf16 %v7864_v37  ;;  %v9567_v7 = vpop.permute.xlu1 %9566 }
 0x1bc   :  { %3399 = vst.msk [vmem:[#allocation2 + $0xe8] sm:$0xff] %vm98_vm4, %v8358_v63  ;;  %v8361_v5 = vunpack.c.l.bf16 %v8433_v43  ;;  %8758 = vmatmul.mubr.msk.bf16.gmra.mxu0 %vm1968_vm10, %v12048_v2  ;;  %137 = vst.msk [vmem:[#allocation2 + $0x130] sm:$0xff] %vm98_vm4, %v96_v9  ;;  %v8362_v51 = vunpack.c.h.bf16 %v8433_v43  ;;  %v8405_v41 = vunpack.c.l.bf16 %v8444_v15  ;;  %v8406_v25 = vunpack.c.h.bf16 %v8444_v15  ;;  %v8048_v43 = vld [vmem:[%s14858_s0 + $0x1c8] sm:$0xe] }
 0x1bd   :  { %4274 = vst.msk [vmem:[#allocation2 + $0xc0] sm:$0xff] %vm982_vm6, %v9558_v3  ;;  %4275 = vst.msk [vmem:[#allocation2 + $0xc8] sm:$0xff] %vm982_vm6, %v9559_v21  ;;  %v3526_v60 = vunpack.c.l.bf16 %v7930_v54  ;;  %8761 = vmatprep.mubr.msk.bf16.mxu0 %vm1968_vm10, %v12136_v6  ;;  %v9564_v12 = vunpack.i.h.bf16 %v9562_v18  ;;  %v9563_v13 = vunpack.i.l.bf16 %v9562_v18  ;;  %v3964_v2 = vunpack.c.l.bf16 %v7988_v24  ;;  %v12653_v21 = vld [vmem:[%s14858_s0 + $0x1cc] ss:$12 sps:$4 sm:$0xff]   ;;  %v12655_v3 = vpop.f32.mrf.mxu1  ;;  %v12661_v24 = vpop.f32.mrf.mxu0  ;;  %v8050_v18 = vld [vmem:[%s14858_s0 + $0x1d0] sm:$0x3] }
 0x1be   :  { %138 = vst.msk [vmem:[#allocation2 + $0x138] sm:$0xff] %vm98_vm4, %v97_v32  ;;  %3400 = vst.msk [vmem:[#allocation2 + $0xf0] sm:$0xff] %vm98_vm4, %v3360_v44  ;;  %v3965_v30 = vunpack.c.l.bf16 %v12615_v36  ;;  %v3680_v37 = vrot.slane %v8405_v41, 1  ;;  %v3681_v6 = vrot.slane %v8406_v25, 1  ;;  %v3966_v50 = vunpack.c.l.bf16 %v7990_v53 }
 0x1bf   :  { %3401 = vst.msk [vmem:[#allocation2 + $0xf8] sm:$0xff] %vm98_vm4, %v3361_v19  ;;  %3402 = vst.msk [vmem:[#allocation2 + $0x100] sm:$0xff] %vm98_vm4, %v8361_v5  ;;  %v3683_v38 = vrot.slane %v3526_v60, 1  ;;  %v9569_v8 = vunpack.i.h.bf16 %v9567_v7  ;;  %v9568_v31 = vunpack.i.l.bf16 %v9567_v7  ;;  %v4120_v59 = vrot.slane %v3964_v2, 2 }
 0x1c0   :  { %3403 = vst.msk [vmem:[#allocation2 + $0x108] sm:$0xff] %vm98_vm4, %v8362_v51  ;;  %3406 = vst.msk [vmem:[#allocation2 + $0x120] sm:$0xff] %vm98_vm4, %v8405_v41  ;;  %v4121_v63 = vrot.slane %v3965_v30, 2  ;;  %v3682_v15 = vsel %vm319_vm1, %v3680_v37, %v3681_v6  ;;  %v4123_v9 = vrot.slane %v3966_v50, 2  ;;  %v3527_v32 = vunpack.c.l.bf16 %v7931_v29  ;;  %v9572_v51 = vpop.permute.xlu0 %9571  ;;  %v8665_v41 = vpop.f32.mrf.mxu1  ;;  %v7991_v37 = vld [vmem:[%s14858_s0 + $0x1d4] sm:$0xe] }
 0x1c1   :  { %3407 = vst.msk [vmem:[#allocation2 + $0x128] sm:$0xff] %vm98_vm4, %v8406_v25  ;;  %v3684_v54 = vsel %vm319_vm1, %v3681_v6, %v3683_v38  ;;  %v3528_v5 = vunpack.c.h.bf16 %v7931_v29  ;;  %v3529_v53 = vunpack.c.l.bf16 %v7933_v0  ;;  %8792 = vmatmul.mubr.msk.bf16.gmra.mxu1 %vm1968_vm10, %v12558_v46  ;;  %v9574_v2 = vunpack.i.h.bf16 %v9572_v51  ;;  %v9577_v6 = vpop.permute.xlu1 %9576  ;;  %v8631_v38 = vpop.f32.mrf.mxu0 }
 0x1c2   :  { %4712 = vst.msk [vmem:[#allocation2 + $0xb0] sm:$0xff] %vm1424_vm7, %v9563_v13  ;;  %4713 = vst.msk [vmem:[#allocation2 + $0xb8] sm:$0xff] %vm1424_vm7, %v9564_v12  ;;  %v9720_v44 = vpack.i.bf16 %v3684_v54, %v3682_v15  ;;  %v4122_v19 = vsel %vm761_vm0, %v4120_v59, %v4121_v63  ;;  %v4124_v25 = vsel %vm761_vm0, %v4121_v63, %v4123_v9  ;;  %v3685_v60 = vrot.slane %v3527_v32, 1  ;;  %v7993_v59 = vld [vmem:[%s14858_s0 + $0x1dc] sm:$0x1]  ;;  %v2277_v15 = vpop.f32.mrf.mxu1 }
 0x1c3   :  { %4714 = vst.msk [vmem:[#allocation2 + $0xc0] sm:$0xff] %vm1424_vm7, %v9568_v31  ;;  %4715 = vst.msk [vmem:[#allocation2 + $0xc8] sm:$0xff] %vm1424_vm7, %v9569_v8  ;;  %v4404_v12 = vunpack.c.l.bf16 %v8048_v43  ;;  %v4405_v13 = vunpack.c.l.bf16 %v12653_v21  ;;  %8795 = vmatprep.mubr.msk.bf16.mxu1 %vm1968_vm10, %v12570_v22  ;;  %v9573_v30 = vunpack.i.l.bf16 %v9572_v51  ;;  %v9725_v29 = vpack.i.bf16 %v4124_v25, %v4122_v19  ;;  %v2105_v9 = vpop.f32.mrf.mxu0 }
 0x1c4   :  { %9721 = vrot.lane.b32.xlu0 %v9720_v44, %s9836_s18  ;;  %v3686_v7 = vrot.slane %v3528_v5, 1  ;;  %8762 = vmatmul.mubr.msk.bf16.gmra.mxu0 %vm1968_vm10, %v12141_v39  ;;  %v3688_v50 = vrot.slane %v3529_v53, 1  ;;  %v4406_v0 = vunpack.c.l.bf16 %v8050_v18  ;;  %5153 = vst.msk [vmem:[#allocation2 + $0xb8] sm:$0xff] %vm1866_vm8, %v9574_v2  ;;  %v9579_v63 = vunpack.i.h.bf16 %v9577_v6  ;;  %v9582_v5 = vpop.permute.xlu0 %9581  ;;  %v8666_v18 = vpop.f32.mrf.mxu1 }
 0x1c5   :  { %v4560_v8 = vrot.slane %v4404_v12, 3  ;;  %v4561_v31 = vrot.slane %v4405_v13, 3  ;;  %8765 = vmatprep.mubr.msk.bf16.mxu0 %vm1968_vm10, %v12208_v61  ;;  %5152 = vst.msk [vmem:[#allocation2 + $0xb0] sm:$0xff] %vm1866_vm8, %v9573_v30  ;;  %v9578_v43 = vunpack.i.l.bf16 %v9577_v6  ;;  %v12686_v39 = vadd.f32 %v8665_v41, %v8631_v38  ;;  %9726 = vrot.lane.b32.xlu1 %v9725_v29, %s9835_s15  ;;  %v12703_v12 = vld [vmem:[%s14858_s0 + $0x1cc] ss:$12 sps:$4 sm:$0xff]   ;;  %v8632_v30 = vpop.f32.mrf.mxu0 }
 0x1c6   :  { %v3687_v54 = vsel %vm319_vm1, %v3685_v60, %v3686_v7  ;;  %v3689_v32 = vsel %vm319_vm1, %v3686_v7, %v3688_v50  ;;  %v4563_v19 = vrot.slane %v4406_v0, 3  ;;  %v3967_v61 = vunpack.c.l.bf16 %v7991_v37  ;;  %5155 = vst.msk [vmem:[#allocation2 + $0xc8] sm:$0xff] %vm1866_vm8, %v9579_v63  ;;  %v8108_v60 = vld [vmem:[%s14858_s0 + $0x1c8] sm:$0xc]  ;;  %v9587_v37 = vpop.permute.xlu1 %9586 }
 0x1c7   :  { %v4562_v44 = vsel %vm1203_vm2, %v4560_v8, %v4561_v31  ;;  %5154 = vst.msk [vmem:[#allocation2 + $0xc0] sm:$0xff] %vm1866_vm8, %v9578_v43  ;;  %v12694_v53 = vadd.f32 %v2277_v15, %v2105_v9  ;;  %v9730_v51 = vpack.i.bf16 %v3689_v32, %v3687_v54  ;;  %v3968_v41 = vunpack.c.h.bf16 %v12615_v36  ;;  %v8110_v36 = vld [vmem:[%s14858_s0 + $0x1d0] sm:$0x3]  ;;  %v8051_v8 = vld [vmem:[%s14858_s0 + $0x1d4] sm:$0xe] }
 0x1c8   :  { %v3969_v25 = vunpack.c.l.bf16 %v7993_v59  ;;  %v9584_v13 = vunpack.i.h.bf16 %v9582_v5  ;;  %v9583_v2 = vunpack.i.l.bf16 %v9582_v5  ;;  %v4564_v29 = vsel %vm1203_vm2, %v4561_v31, %v4563_v19  ;;  %v5186_v31 = vld [vmem:[#allocation2 + $0x80] sm:$0xff]  ;;  %v5187_v59 = vld [vmem:[#allocation2 + $0x88] sm:$0xff]  ;;  %v8053_v9 = vld [vmem:[%s14858_s0 + $0x1dc] sm:$0x3] }
 0x1c9   :  { %v4125_v7 = vrot.slane %v3967_v61, 2  ;;  %v12709_v6 = vadd.f32 %v8666_v18, %v8632_v30  ;;  %9731 = vrot.lane.b32.xlu0 %v9730_v51, %s9836_s18  ;;  %v9735_v38 = vpack.i.bf16 %v4564_v29, %v4562_v44  ;;  %v4126_v50 = vrot.slane %v3968_v41, 2  ;;  %8796 = vmatmul.mubr.msk.bf16.gmra.mxu1 %vm1968_vm10, %v12584_v55  ;;  %v8111_v61 = vld [vmem:[%s14858_s0 + $0x1d4] sm:$0xc]  ;;  %v5189_v18 = vld [vmem:[#allocation2 + $0x98] sm:$0xff] }
 0x1ca   :  { %v4128_v0 = vrot.slane %v3969_v25, 2  ;;  %3836 = vst.msk [vmem:[#allocation2 + $0xd0] sm:$0xff] %vm540_vm5, %v9583_v2  ;;  %3837 = vst.msk [vmem:[#allocation2 + $0xd8] sm:$0xff] %vm540_vm5, %v9584_v13  ;;  %v9589_v63 = vunpack.i.h.bf16 %v9587_v37  ;;  %v9588_v43 = vunpack.i.l.bf16 %v9587_v37  ;;  %v4844_v15 = vunpack.c.l.bf16 %v8108_v60  ;;  %8799 = vmatprep.mubr.msk.bf16.mxu1 %vm1968_vm10, %v12619_v45  ;;  %v5188_v5 = vld [vmem:[#allocation2 + $0x90] sm:$0xff]  ;;  %v8113_v37 = vld [vmem:[%s14858_s0 + $0x1dc] sm:$0x3] }
 0x1cb   :  { %14888 = vst [vmem:[#allocation5_spill] sm:$0xff] %v12709_v6  ;;  %v4845_v54 = vunpack.c.l.bf16 %v12703_v12  ;;  %9736 = vrot.lane.b32.xlu1 %v9735_v38, %s9837_s13  ;;  %v4127_v32 = vsel %vm761_vm0, %v4125_v7, %v4126_v50  ;;  %v4846_v19 = vunpack.c.l.bf16 %v8110_v36  ;;  %v4407_v60 = vunpack.c.l.bf16 %v8051_v8  ;;  %v6219_v6 = vld [vmem:[#allocation2 + $0x78] sm:$0xff] }
 0x1cc   :  { %v4129_v44 = vsel %vm761_vm0, %v4126_v50, %v4128_v0  ;;  %8766 = vmatmul.mubr.msk.bf16.gmra.mxu0 %vm1968_vm10, %v12225_v27  ;;  %3838 = vst.msk [vmem:[#allocation2 + $0xe0] sm:$0xff] %vm540_vm5, %v9588_v43  ;;  %3839 = vst.msk [vmem:[#allocation2 + $0xe8] sm:$0xff] %vm540_vm5, %v9589_v63  ;;  %v5000_v41 = vrot.slane %v4844_v15, 4  ;;  %v12735_v13 = vpack.c.bf16 %v5187_v59, %v5186_v31  ;;  %v4408_v30 = vunpack.c.h.bf16 %v12653_v21  ;;  %v9592_v27 = vpop.permute.xlu0 %9591  ;;  %v9597_v31 = vpop.permute.xlu1 %9596  ;;  %v9768_v59 = vld [vmem:[%s14859_s1 + $0x18] sm:$0xff]  }
 0x1cd   :  { %v9740_v51 = vpack.i.bf16 %v4129_v44, %v4127_v32  ;;  %v5001_v25 = vrot.slane %v4845_v54, 4  ;;  %8769 = vmatprep.mubr.msk.bf16.mxu0 %vm1968_vm10, %v12275_v14  ;;  %v5003_v2 = vrot.slane %v4846_v19, 4  ;;  %v4409_v29 = vunpack.c.l.bf16 %v8053_v9  ;;  %v7868_v63 = vld [vmem:[%s14858_s0 + $0x1bc] sm:$0xff]  }
 0x1ce   :  { %v4565_v36 = vrot.slane %v4407_v60, 3  ;;  %v4847_v38 = vunpack.c.l.bf16 %v8111_v61  ;;  %v4848_v50 = vunpack.c.h.bf16 %v12703_v12  ;;  %v12746_v0 = vpack.c.bf16 %v5189_v18, %v5188_v5  ;;  %v9769_v12 = vld [vmem:[%s14859_s1 + $0x20] sm:$0xff]  }
 0x1cf   :  { %9741 = vrot.lane.b32.xlu0 %v9740_v51, %s9835_s15  ;;  %v5002_v7 = vsel %vm1645_vm3, %v5000_v41, %v5001_v25  ;;  %v9594_v14 = vunpack.i.h.bf16 %v9592_v27  ;;  %v9593_v8 = vunpack.i.l.bf16 %v9592_v27  ;;  %v5004_v21 = vsel %vm1645_vm3, %v5001_v25, %v5003_v2 }
 0x1d0   :  { %v9599_v43 = vunpack.i.h.bf16 %v9597_v31  ;;  %v9598_v15 = vunpack.i.l.bf16 %v9597_v31  ;;  %v9745_v54 = vpack.i.bf16 %v5004_v21, %v5002_v7  ;;  %v4566_v9 = vrot.slane %v4408_v30, 3  ;;  %v5192_v30 = vld [vmem:[#allocation2 + $0xb0] sm:$0xff] }
 0x1d1   :  { %4276 = vst.msk [vmem:[#allocation2 + $0xd0] sm:$0xff] %vm982_vm6, %v9593_v8  ;;  %4277 = vst.msk [vmem:[#allocation2 + $0xd8] sm:$0xff] %vm982_vm6, %v9594_v14  ;;  %v4568_v32 = vrot.slane %v4409_v29, 3  ;;  %v4849_v44 = vunpack.c.l.bf16 %v8113_v37  ;;  %v5005_v19 = vrot.slane %v4847_v38, 4  ;;  %v5006_v61 = vrot.slane %v4848_v50, 4  ;;  %8800 = vmatmul.mubr.msk.bf16.gmra.mxu1 %vm1968_vm10, %v12735_v13  ;;  %v9602_v2 = vpop.permute.xlu0 %9601  ;;  %v5193_v29 = vld [vmem:[#allocation2 + $0xb8] sm:$0xff] }
 0x1d2   :  { %4278 = vst.msk [vmem:[#allocation2 + $0xe0] sm:$0xff] %vm982_vm6, %v9598_v15  ;;  %4279 = vst.msk [vmem:[#allocation2 + $0xe8] sm:$0xff] %vm982_vm6, %v9599_v43  ;;  %9746 = vrot.lane.b32.xlu1 %v9745_v54, %s9838_s6  ;;  %v4567_v5 = vsel %vm1203_vm2, %v4565_v36, %v4566_v9  ;;  %v3364_v18 = vunpack.c.l.bf16 %v7868_v63  ;;  %8803 = vmatprep.mubr.msk.bf16.mxu1 %vm1968_vm10, %v12746_v0  ;;  %v12771_v60 = vand.u32 %v9768_v59, %v10778_v11  ;;  %v5190_v36 = vld [vmem:[#allocation2 + $0xa0] sm:$0xff]  ;;  %v5191_v37 = vld [vmem:[#allocation2 + $0xa8] sm:$0xff]  ;;  %v9607_v14 = vpop.permute.xlu1 %9606 }
 0x1d3   :  { %v4569_v51 = vsel %vm1203_vm2, %v4566_v9, %v4568_v32  ;;  %v5007_v41 = vsel %vm1645_vm3, %v5005_v19, %v5006_v61  ;;  %v5008_v25 = vrot.slane %v4849_v44, 4  ;;  %v12776_v7 = vand.u32 %v9769_v12, %v10778_v11  ;;  %v12799_v9 = vpop.f32.mrf.mxu0  ;;  %v5194_v32 = vld [vmem:[#allocation2 + $0xc0] sm:$0xff]  ;;  %v5195_v44 = vld [vmem:[#allocation2 + $0xc8] sm:$0xff] }
 0x1d4   :  { %8770 = vmatmul.mubr.msk.bf16.gmra.mxu0 %vm1968_vm10, %v12281_v52  ;;  %v9750_v27 = vpack.i.bf16 %v4569_v51, %v4567_v5  ;;  %3404 = vst.msk [vmem:[#allocation2 + $0x110] sm:$0xff] %vm98_vm4, %v3364_v18  ;;  %v9604_v38 = vunpack.i.h.bf16 %v9602_v2  ;;  %v9603_v50 = vunpack.i.l.bf16 %v9602_v2  ;;  %8887 = vmatprep.subr.bf16.mxu0 %v12771_v60  ;;  %v3365_v52 = vunpack.c.h.bf16 %v7868_v63  ;;  %v12794_v63 = vpop.f32.mrf.mxu1  ;;  %14890 = vst [vmem:[#allocation7_spill] sm:$0xff] %v12799_v9 }
 0x1d5   :  { %8773 = vmatprep.mubr.msk.bf16.mxu0 %vm1968_vm10, %v12315_v1  ;;  %v5009_v8 = vsel %vm1645_vm3, %v5006_v61, %v5008_v25  ;;  %v9609_v31 = vunpack.i.h.bf16 %v9607_v14  ;;  %v9608_v21 = vunpack.i.l.bf16 %v9607_v14  ;;  %8921 = vmatprep.subr.bf16.mxu1 %v12776_v7  ;;  %v12787_v1 = vpack.c.bf16 %v5193_v29, %v5192_v30  ;;  %14889 = vst [vmem:[#allocation6_spill] sm:$0xff] %v12794_v63  ;;  %v6220_v63 = vld [vmem:[#allocation2 + $0x80] sm:$0xff] }
 0x1d6   :  { %9751 = vrot.lane.b32.xlu0 %v9750_v27, %s9837_s13  ;;  %v9755_v11 = vpack.i.bf16 %v5009_v8, %v5007_v41  ;;  %4716 = vst.msk [vmem:[#allocation2 + $0xd0] sm:$0xff] %vm1424_vm7, %v9603_v50  ;;  %4717 = vst.msk [vmem:[#allocation2 + $0xd8] sm:$0xff] %vm1424_vm7, %v9604_v38  ;;  %v12790_v59 = vpack.c.bf16 %v5191_v37, %v5190_v36  ;;  %v9612_v43 = vpop.permute.xlu0 %9611  ;;  %v12811_v25 = vpack.c.bf16 %v5195_v44, %v5194_v32 }
 0x1d7   :  { %3405 = vst.msk [vmem:[#allocation2 + $0x118] sm:$0xff] %vm98_vm4, %v3365_v52  ;;  %v9614_v15 = vunpack.i.h.bf16 %v9612_v43  ;;  %v9613_v54 = vunpack.i.l.bf16 %v9612_v43  ;;  %v8669_v12 = vpop.f32.mrf.mxu1 }
 0x1d8   :  { %4718 = vst.msk [vmem:[#allocation2 + $0xe0] sm:$0xff] %vm1424_vm7, %v9608_v21  ;;  %4719 = vst.msk [vmem:[#allocation2 + $0xe8] sm:$0xff] %vm1424_vm7, %v9609_v31  ;;  %9756 = vrot.lane.b32.xlu1 %v9755_v11, %s9838_s6 }
 0x1d9   :  { %8804 = vmatmul.mubr.msk.bf16.gmra.mxu1 %vm1968_vm10, %v12790_v59  ;;  %5156 = vst.msk [vmem:[#allocation2 + $0xd0] sm:$0xff] %vm1866_vm8, %v9613_v54  ;;  %5157 = vst.msk [vmem:[#allocation2 + $0xd8] sm:$0xff] %vm1866_vm8, %v9614_v15  ;;  %v9617_v19 = vpop.permute.xlu1 %9616  ;;  %v8635_v61 = vpop.f32.mrf.mxu0 }
 0x1da   :  { %8807 = vmatprep.mubr.msk.bf16.mxu1 %vm1968_vm10, %v12787_v1  ;;  %v9619_v5 = vunpack.i.h.bf16 %v9617_v19  ;;  %v9618_v18 = vunpack.i.l.bf16 %v9617_v19  ;;  %v12809_v51 = vadd.f32 %v8669_v12, %v8635_v61  ;;  %v2293_v41 = vpop.f32.mrf.mxu1 }
 0x1db   :  { %v2121_v2 = vpop.f32.mrf.mxu0 }
 0x1dc   :  { %8774 = vmatmul.mubr.msk.bf16.gmra.mxu0 %vm1968_vm10, %v12373_v34  ;;  %14891 = vst [vmem:[#allocation8_spill] sm:$0xff] %v12809_v51  ;;  %5158 = vst.msk [vmem:[#allocation2 + $0xe0] sm:$0xff] %vm1866_vm8, %v9618_v18  ;;  %v9622_v34 = vpop.permute.xlu0 %9621  ;;  %v12815_v30 = vadd.f32 %v2293_v41, %v2121_v2  ;;  %v8670_v29 = vpop.f32.mrf.mxu1 }
 0x1dd   :  { %8777 = vmatprep.mubr.msk.bf16.mxu0 %vm1968_vm10, %v12371_v4  ;;  %5159 = vst.msk [vmem:[#allocation2 + $0xe8] sm:$0xff] %vm1866_vm8, %v9619_v5  ;;  %v9624_v27 = vunpack.i.h.bf16 %v9622_v34  ;;  %v9623_v36 = vunpack.i.l.bf16 %v9622_v34  ;;  %v9627_v37 = vpop.permute.xlu1 %9626  ;;  %v8636_v4 = vpop.f32.mrf.mxu0 }
 0x1de   :  { %14892 = vst [vmem:[#allocation9_spill] sm:$0xff] %v12815_v30  ;;  %v9629_v38 = vunpack.i.h.bf16 %v9627_v37  ;;  %v9628_v50 = vunpack.i.l.bf16 %v9627_v37  ;;  %v12817_v14 = vadd.f32 %v8670_v29, %v8636_v4  ;;  %v12843_v2 = vpop.f32.mrf.mxu1 }
 0x1df   :  { %579 = vst.msk [vmem:[#allocation2 + $0x130] sm:$0xff] %vm540_vm5, %v9623_v36  ;;  %580 = vst.msk [vmem:[#allocation2 + $0x138] sm:$0xff] %vm540_vm5, %v9624_v27  ;;  %v12847_v34 = vpop.f32.mrf.mxu0 }
 0x1e0   :  { %14893 = vst [vmem:[#allocation10_spill] sm:$0xff] %v12817_v14  ;;  %1021 = vst.msk [vmem:[#allocation2 + $0x130] sm:$0xff] %vm982_vm6, %v9628_v50  ;;  %v5196_v8 = vld [vmem:[#allocation2 + $0xd0] sm:$0xff]  ;;  %v5197_v52 = vld [vmem:[#allocation2 + $0xd8] sm:$0xff] }
 0x1e1   :  { %8808 = vmatmul.mubr.msk.bf16.gmra.mxu1 %vm1968_vm10, %v12811_v25  ;;  %1022 = vst.msk [vmem:[#allocation2 + $0x138] sm:$0xff] %vm982_vm6, %v9629_v38  ;;  %v12827_v31 = vpack.c.bf16 %v5197_v52, %v5196_v8  ;;  %14894 = vst [vmem:[#allocation11_spill] sm:$0xff] %v12843_v2 }
 0x1e2   :  { %14895 = vst [vmem:[#allocation12_spill] sm:$0xff] %v12847_v34 }
 0x1e3   :  { %v9632_v21 = vpop.permute.xlu0 %9631  ;;  %8811 = vmatprep.mubr.msk.bf16.mxu1 %vm1968_vm10, %v12827_v31  ;;  %v5198_v11 = vld [vmem:[#allocation2 + $0xe0] sm:$0xff] }
 0x1e4   :  { %8778 = vmatmul.mubr.msk.bf16.gmra.mxu0 %vm1968_vm10, %v12446_v16  ;;  %v5199_v43 = vld [vmem:[#allocation2 + $0xe8] sm:$0xff]  ;;  %v9634_v15 = vunpack.i.h.bf16 %v9632_v21  ;;  %v9633_v54 = vunpack.i.l.bf16 %v9632_v21  ;;  %v9637_v12 = vpop.permute.xlu1 %9636 }
 0x1e5   :  { %8781 = vmatprep.mubr.msk.bf16.mxu0 %vm1968_vm10, %v12488_v33  ;;  %v12833_v32 = vpack.c.bf16 %v5199_v43, %v5198_v11  ;;  %v9639_v44 = vunpack.i.h.bf16 %v9637_v12  ;;  %v9638_v19 = vunpack.i.l.bf16 %v9637_v12 }
 0x1e6   :  { %3840 = vst.msk [vmem:[#allocation2 + $0xf0] sm:$0xff] %vm540_vm5, %v9633_v54  ;;  %3841 = vst.msk [vmem:[#allocation2 + $0xf8] sm:$0xff] %vm540_vm5, %v9634_v15 }
 0x1e7   :  { %1463 = vst.msk [vmem:[#allocation2 + $0x130] sm:$0xff] %vm1424_vm7, %v9638_v19  ;;  %1464 = vst.msk [vmem:[#allocation2 + $0x138] sm:$0xff] %vm1424_vm7, %v9639_v44 }
 0x1e9   :  { %8812 = vmatmul.mubr.msk.bf16.gmra.mxu1 %vm1968_vm10, %v12833_v32  ;;  %v9642_v16 = vpop.permute.xlu0 %9641 }
 0x1ea   :  { %v9644_v33 = vunpack.i.h.bf16 %v9642_v16  ;;  %v9643_v61 = vunpack.i.l.bf16 %v9642_v16  ;;  %v9647_v5 = vpop.permute.xlu1 %9646 }
 0x1eb   :  { %v9649_v18 = vunpack.i.h.bf16 %v9647_v5  ;;  %v9648_v41 = vunpack.i.l.bf16 %v9647_v5 }
 0x1ec   :  { %3842 = vst.msk [vmem:[#allocation2 + $0x100] sm:$0xff] %vm540_vm5, %v9643_v61  ;;  %3843 = vst.msk [vmem:[#allocation2 + $0x108] sm:$0xff] %vm540_vm5, %v9644_v33 }
 0x1ed   :  { %4280 = vst.msk [vmem:[#allocation2 + $0xf0] sm:$0xff] %vm982_vm6, %v9648_v41  ;;  %4281 = vst.msk [vmem:[#allocation2 + $0xf8] sm:$0xff] %vm982_vm6, %v9649_v18  ;;  %v7872_v18 = vld [vmem:[%s14858_s0 + $0x1d4] sm:$0xff]  }
 0x1ee   :  { %v9652_v29 = vpop.permute.xlu0 %9651  ;;  %v8673_v27 = vpop.f32.mrf.mxu1 }
 0x1ef   :  { %v9654_v36 = vunpack.i.h.bf16 %v9652_v29  ;;  %v9653_v37 = vunpack.i.l.bf16 %v9652_v29 }
 0x1f0   :  { %v9657_v4 = vpop.permute.xlu1 %9656  ;;  %v8639_v38 = vpop.f32.mrf.mxu0 }
 0x1f1   :  { %1905 = vst.msk [vmem:[#allocation2 + $0x130] sm:$0xff] %vm1866_vm8, %v9653_v37  ;;  %1906 = vst.msk [vmem:[#allocation2 + $0x138] sm:$0xff] %vm1866_vm8, %v9654_v36  ;;  %v9659_v50 = vunpack.i.h.bf16 %v9657_v4  ;;  %v9658_v8 = vunpack.i.l.bf16 %v9657_v4  ;;  %v12851_v52 = vadd.f32 %v8673_v27, %v8639_v38  ;;  %v2309_v21 = vpop.f32.mrf.mxu1  ;;  %v3368_v27 = vunpack.c.l.bf16 %v7872_v18 }
 0x1f2   :  { %v2137_v11 = vpop.f32.mrf.mxu0  ;;  %v3369_v36 = vunpack.c.h.bf16 %v7872_v18 }
 0x1f3   :  { %14896 = vst [vmem:[#allocation13_spill] sm:$0xff] %v12851_v52  ;;  %4282 = vst.msk [vmem:[#allocation2 + $0x100] sm:$0xff] %vm982_vm6, %v9658_v8  ;;  %v12855_v43 = vadd.f32 %v2309_v21, %v2137_v11  ;;  %v8674_v15 = vpop.f32.mrf.mxu1 }
 0x1f4   :  { %4283 = vst.msk [vmem:[#allocation2 + $0x108] sm:$0xff] %vm982_vm6, %v9659_v50  ;;  %v9662_v54 = vpop.permute.xlu0 %9661  ;;  %v8640_v12 = vpop.f32.mrf.mxu0 }
 0x1f5   :  { %14897 = vst [vmem:[#allocation14_spill] sm:$0xff] %v12855_v43  ;;  %v9664_v44 = vunpack.i.h.bf16 %v9662_v54  ;;  %v9663_v19 = vunpack.i.l.bf16 %v9662_v54  ;;  %v12857_v16 = vadd.f32 %v8674_v15, %v8640_v12 }
 0x1f6   :  { %v9667_v33 = vpop.permute.xlu1 %9666 }
 0x1f7   :  { %14898 = vst [vmem:[#allocation15_spill] sm:$0xff] %v12857_v16  ;;  %4720 = vst.msk [vmem:[#allocation2 + $0xf0] sm:$0xff] %vm1424_vm7, %v9663_v19  ;;  %v9669_v61 = vunpack.i.h.bf16 %v9667_v33  ;;  %v9668_v5 = vunpack.i.l.bf16 %v9667_v33 }
 0x1f8   :  { %4721 = vst.msk [vmem:[#allocation2 + $0xf8] sm:$0xff] %vm1424_vm7, %v9664_v44  ;;  %v2986_v41 = vld [vmem:[#allocation2 + $0x130] sm:$0xff]  ;;  %v2987_v29 = vld [vmem:[#allocation2 + $0x138] sm:$0xff] }
 0x1f9   :  { %4722 = vst.msk [vmem:[#allocation2 + $0x100] sm:$0xff] %vm1424_vm7, %v9668_v5  ;;  %4723 = vst.msk [vmem:[#allocation2 + $0x108] sm:$0xff] %vm1424_vm7, %v9669_v61  ;;  %v3003_v37 = vpack.c.bf16 %v2987_v29, %v2986_v41  ;;  %v5614_v61 = vld [vmem:[#allocation2 + $0x20] sm:$0xff]  ;;  %v12875_v5 = vpop.f32.mrf.mxu1  ;;  %v5615_v29 = vld [vmem:[#allocation2 + $0x28] sm:$0xff] }
 0x1fa   :  { %3408 = vst.msk [vmem:[#allocation2 + $0x130] sm:$0xff] %vm98_vm4, %v3368_v27  ;;  %3409 = vst.msk [vmem:[#allocation2 + $0x138] sm:$0xff] %vm98_vm4, %v3369_v36  ;;  %v12879_v27 = vpop.f32.mrf.mxu0 }
 0x1fb   :  { %v9672_v4 = vpop.permute.xlu0 %9671  ;;  %8782 = vmatmul.mubr.msk.bf16.gmra.mxu0 %vm1968_vm10, %v3003_v37  ;;  %14899 = vst [vmem:[#allocation16_spill] sm:$0xff] %v12875_v5  ;;  %14900 = vst [vmem:[#allocation17_spill] sm:$0xff] %v12879_v27 }
 0x1fc   :  { %v9674_v38 = vunpack.i.h.bf16 %v9672_v4  ;;  %v9673_v50 = vunpack.i.l.bf16 %v9672_v4  ;;  %v9677_v8 = vpop.permute.xlu1 %9676 }
 0x1fd   :  { %v9679_v21 = vunpack.i.h.bf16 %v9677_v8  ;;  %v9678_v11 = vunpack.i.l.bf16 %v9677_v8 }
 0x1fe   :  { %5160 = vst.msk [vmem:[#allocation2 + $0xf0] sm:$0xff] %vm1866_vm8, %v9673_v50  ;;  %5161 = vst.msk [vmem:[#allocation2 + $0xf8] sm:$0xff] %vm1866_vm8, %v9674_v38 }
 0x1ff   :  { %5162 = vst.msk [vmem:[#allocation2 + $0x100] sm:$0xff] %vm1866_vm8, %v9678_v11  ;;  %5163 = vst.msk [vmem:[#allocation2 + $0x108] sm:$0xff] %vm1866_vm8, %v9679_v21 }
 0x201   :  { %v9682_v15 = vpop.permute.xlu0 %9681 }
 0x202   :  { %v9684_v54 = vunpack.i.h.bf16 %v9682_v15  ;;  %v9683_v12 = vunpack.i.l.bf16 %v9682_v15  ;;  %v9687_v44 = vpop.permute.xlu1 %9686  ;;  %v5646_v15 = vpack.c.bf16 %v5615_v29, %v5614_v61  ;;  %v5616_v61 = vld [vmem:[#allocation2 + $0x30] sm:$0xff]  ;;  %v5617_v29 = vld [vmem:[#allocation2 + $0x38] sm:$0xff] }
 0x203   :  { %v9689_v19 = vunpack.i.h.bf16 %v9687_v44  ;;  %v9688_v33 = vunpack.i.l.bf16 %v9687_v44 }
 0x204   :  { %3810 = vst.msk [vmem:[#allocation2] sm:$0xff] %vm540_vm5, %v9683_v12  ;;  %3811 = vst.msk [vmem:[#allocation2 + $0x8] sm:$0xff] %vm540_vm5, %v9684_v54 }
 0x205   :  { %4250 = vst.msk [vmem:[#allocation2] sm:$0xff] %vm982_vm6, %v9688_v33  ;;  %4251 = vst.msk [vmem:[#allocation2 + $0x8] sm:$0xff] %vm982_vm6, %v9689_v19  ;;  %v5200_v18 = vld [vmem:[#allocation2 + $0xf0] sm:$0xff]  ;;  %v5201_v41 = vld [vmem:[#allocation2 + $0xf8] sm:$0xff] }
 0x206   :  { %v9692_v36 = vpop.permute.xlu0 %9691  ;;  %v12881_v37 = vpack.c.bf16 %v5201_v41, %v5200_v18  ;;  %v5220_v4 = vld [vmem:[#allocation2 + $0x100] sm:$0xff]  ;;  %v5221_v38 = vld [vmem:[#allocation2 + $0x108] sm:$0xff]  ;;  %v8677_v50 = vpop.f32.mrf.mxu1 }
 0x207   :  { %v9694_v8 = vunpack.i.h.bf16 %v9692_v36  ;;  %v9693_v21 = vunpack.i.l.bf16 %v9692_v36  ;;  %v12883_v11 = vpack.c.bf16 %v5221_v38, %v5220_v4 }
 0x208   :  { %8815 = vmatprep.mubr.msk.bf16.mxu1 %vm1968_vm10, %v12881_v37  ;;  %v8643_v54 = vpop.f32.mrf.mxu0  ;;  %v2325_v12 = vpop.f32.mrf.mxu1 }
 0x209   :  { %4690 = vst.msk [vmem:[#allocation2] sm:$0xff] %vm1424_vm7, %v9693_v21  ;;  %4691 = vst.msk [vmem:[#allocation2 + $0x8] sm:$0xff] %vm1424_vm7, %v9694_v8  ;;  %v9697_v44 = vpop.permute.xlu1 %9696  ;;  %8816 = vmatmul.mubr.msk.bf16.gmra.mxu1 %vm1968_vm10, %v12883_v11  ;;  %v12891_v19 = vadd.f32 %v8677_v50, %v8643_v54  ;;  %v5618_v8 = vld [vmem:[#allocation2 + $0x40] sm:$0xff]  ;;  %v5619_v21 = vld [vmem:[#allocation2 + $0x48] sm:$0xff]  ;;  %v12900_v50 = vpack.c.bf16 %v5617_v29, %v5616_v61 }
 0x20a   :  { %v9699_v33 = vunpack.i.h.bf16 %v9697_v44  ;;  %v9698_v18 = vunpack.i.l.bf16 %v9697_v44  ;;  %8855 = vmatprep.mubr.msk.bf16.mxu1 %vm1968_vm10, %v5646_v15  ;;  %v2153_v41 = vpop.f32.mrf.mxu0  ;;  %v8678_v36 = vpop.f32.mrf.mxu1  ;;  %v12902_v54 = vpack.c.bf16 %v5619_v21, %v5618_v8 }
 0x20b   :  { %14901 = vst [vmem:[#allocation18_spill] sm:$0xff] %v12891_v19  ;;  %v12894_v4 = vadd.f32 %v2325_v12, %v2153_v41 }
 0x20c   :  { %5130 = vst.msk [vmem:[#allocation2] sm:$0xff] %vm1866_vm8, %v9698_v18  ;;  %5131 = vst.msk [vmem:[#allocation2 + $0x8] sm:$0xff] %vm1866_vm8, %v9699_v33  ;;  %v8644_v38 = vpop.f32.mrf.mxu0  ;;  %v5620_v33 = vld [vmem:[#allocation2 + $0x50] sm:$0xff]  ;;  %v5621_v18 = vld [vmem:[#allocation2 + $0x58] sm:$0xff] }
 0x20d   :  { %14902 = vst [vmem:[#allocation19_spill] sm:$0xff] %v12894_v4  ;;  %v12898_v16 = vadd.f32 %v8678_v36, %v8644_v38  ;;  %v12912_v41 = vpack.c.bf16 %v5621_v18, %v5620_v33 }
 0x20e   :  { %v12923_v36 = vpop.f32.mrf.mxu0 }
 0x20f   :  { %14903 = vst [vmem:[#allocation20_spill] sm:$0xff] %v12898_v16  ;;  %14905 = vst [vmem:[#allocation22_spill] sm:$0xff] %v12923_v36 }
 0x211   :  { %8856 = vmatmul.mubr.msk.bf16.vlgmr.msra.gmra.mxu1 %vm1968_vm10, %v12900_v50 }
 0x212   :  { %8859 = vmatprep.mubr.msk.bf16.mxu1 %vm1968_vm10, %v12902_v54  ;;  %8922 = vmatpush3.bf16.msra.mxu1 %v12776_v7  ;;  %v12921_v7 = vpop.f32.mrf.mxu1 }
 0x213   :  { %v5170_v15 = vld [vmem:[#allocation2] sm:$0xff]  ;;  %v5171_v12 = vld [vmem:[#allocation2 + $0x8] sm:$0xff]  ;;  %14904 = vst [vmem:[#allocation21_spill] sm:$0xff] %v12921_v7 }
 0x214   :  { %v5202_v44 = vpack.c.bf16 %v5171_v12, %v5170_v15 }
 0x216   :  { %8821 = vmatprep.mubr.msk.bf16.mxu0 %vm1968_vm10, %v5202_v44 }
 0x217   :  { %8822 = vmatmul.mubr.msk.bf16.vlgmr.msra.gmra.mxu0 %vm1968_vm10, %v12508_v56 }
 0x218   :  { %8888 = vmatpush3.bf16.msra.mxu0 %v12771_v60  ;;  %8825 = vmatprep.mubr.msk.bf16.mxu0 %vm1968_vm10, %v12517_v42 }
 0x219   :  { %8860 = vmatmul.mubr.msk.bf16.gmra.mxu1 %vm1968_vm10, %v12912_v41 }
 0x21a   :  { %8863 = vmatprep.mubr.msk.bf16.mxu1 %vm1968_vm10, %v12584_v55 }
 0x21e   :  { %v8681_v61 = vpop.f32.mrf.mxu1 }
 0x21f   :  { %8826 = vmatmul.mubr.msk.bf16.gmra.mxu0 %vm1968_vm10, %v12535_v23 }
 0x220   :  { %8829 = vmatprep.mubr.msk.bf16.mxu0 %vm1968_vm10, %v12558_v46  ;;  %v8647_v60 = vpop.f32.mrf.mxu0  ;;  %v2341_v42 = vpop.f32.mrf.mxu1 }
 0x221   :  { %8864 = vmatmul.mubr.msk.bf16.gmra.mxu1 %vm1968_vm10, %v12619_v45  ;;  %v12931_v8 = vadd.f32 %v8681_v61, %v8647_v60 }
 0x222   :  { %v9702_v56 = vpop.permute.xlu0 %9701  ;;  %8867 = vmatprep.mubr.msk.bf16.mxu1 %vm1968_vm10, %v12735_v13  ;;  %v2169_v15 = vpop.f32.mrf.mxu0 }
 0x223   :  { %v9704_v29 = vunpack.i.h.bf16 %v9702_v56  ;;  %v9703_v38 = vunpack.i.l.bf16 %v9702_v56  ;;  %v8682_v12 = vpop.f32.mrf.mxu1  ;;  %v12937_v44 = vadd.f32 %v2341_v42, %v2169_v15 }
 0x224   :  { %v9707_v21 = vpop.permute.xlu1 %9706  ;;  %v8648_v33 = vpop.f32.mrf.mxu0 }
 0x225   :  { %3844 = vst.msk [vmem:[#allocation2 + $0x110] sm:$0xff] %vm540_vm5, %v9703_v38  ;;  %3845 = vst.msk [vmem:[#allocation2 + $0x118] sm:$0xff] %vm540_vm5, %v9704_v29  ;;  %v9709_v23 = vunpack.i.h.bf16 %v9707_v21  ;;  %v9708_v46 = vunpack.i.l.bf16 %v9707_v21  ;;  %v12941_v18 = vadd.f32 %v8682_v12, %v8648_v33  ;;  %v12947_v60 = vpop.f32.mrf.mxu1 }
 0x226   :  { %v12943_v61 = vpop.f32.mrf.mxu0  ;;  %14907 = vst [vmem:[#allocation24_spill] sm:$0xff] %v12947_v60 }
 0x227   :  { %4284 = vst.msk [vmem:[#allocation2 + $0x110] sm:$0xff] %vm982_vm6, %v9708_v46  ;;  %4285 = vst.msk [vmem:[#allocation2 + $0x118] sm:$0xff] %vm982_vm6, %v9709_v23  ;;  %8830 = vmatmul.mubr.msk.bf16.gmra.mxu0 %vm1968_vm10, %v12570_v22 }
 0x228   :  { %14906 = vst [vmem:[#allocation23_spill] sm:$0xff] %v12943_v61  ;;  %8833 = vmatprep.mubr.msk.bf16.mxu0 %vm1968_vm10, %v12584_v55  ;;  %v12951_v42 = vpop.f32.mrf.mxu0 }
 0x229   :  { %8868 = vmatmul.mubr.msk.bf16.gmra.mxu1 %vm1968_vm10, %v12746_v0 }
 0x22a   :  { %8871 = vmatprep.mubr.msk.bf16.mxu1 %vm1968_vm10, %v12790_v59  ;;  %v12959_v22 = vpop.f32.mrf.mxu0 }
 0x22b   :  { %v9712_v56 = vpop.permute.xlu0 %9711  ;;  %v12961_v23 = vpop.f32.mrf.mxu1 }
 0x22c   :  { %v9714_v29 = vunpack.i.h.bf16 %v9712_v56  ;;  %v9713_v38 = vunpack.i.l.bf16 %v9712_v56  ;;  %v9717_v21 = vpop.permute.xlu1 %9716  ;;  %v12965_v55 = vpop.f32.mrf.mxu0 }
 0x22d   :  { %v9719_v15 = vunpack.i.h.bf16 %v9717_v21  ;;  %v9718_v12 = vunpack.i.l.bf16 %v9717_v21  ;;  %v12967_v46 = vpop.f32.mrf.mxu1 }
 0x22e   :  { %4724 = vst.msk [vmem:[#allocation2 + $0x110] sm:$0xff] %vm1424_vm7, %v9713_v38  ;;  %4725 = vst.msk [vmem:[#allocation2 + $0x118] sm:$0xff] %vm1424_vm7, %v9714_v29  ;;  %v12969_v33 = vpop.f32.mrf.mxu0 }
 0x22f   :  { %5164 = vst.msk [vmem:[#allocation2 + $0x110] sm:$0xff] %vm1866_vm8, %v9718_v12  ;;  %5165 = vst.msk [vmem:[#allocation2 + $0x118] sm:$0xff] %vm1866_vm8, %v9719_v15  ;;  %8834 = vmatmul.mubr.msk.bf16.gmra.mxu0 %vm1968_vm10, %v12619_v45  ;;  %v12973_v56 = vpop.f32.mrf.mxu1 }
 0x230   :  { %8837 = vmatprep.mubr.msk.bf16.mxu0 %vm1968_vm10, %v12735_v13  ;;  %v12977_v29 = vpop.f32.mrf.mxu0 }
 0x231   :  { %8872 = vmatmul.mubr.msk.bf16.gmra.mxu1 %vm1968_vm10, %v12787_v1  ;;  %v12981_v38 = vpop.f32.mrf.mxu1 }
 0x232   :  { %8875 = vmatprep.mubr.msk.bf16.mxu1 %vm1968_vm10, %v12811_v25  ;;  %v12985_v21 = vpop.f32.mrf.mxu0 }
 0x234   :  { %v12987_v60 = vpop.f32.mrf.mxu0 }
 0x236   :  { %v9722_v15 = vpop.permute.xlu0 %9721  ;;  %v12991_v7 = vpop.f32.mrf.mxu1 }
 0x237   :  { %v9724_v12 = vunpack.i.h.bf16 %v9722_v15  ;;  %v9723_v45 = vunpack.i.l.bf16 %v9722_v15  ;;  %v9727_v61 = vpop.permute.xlu1 %9726  ;;  %v12993_v36 = vpop.f32.mrf.mxu0  ;;  %8838 = vmatmul.mubr.msk.bf16.gmra.mxu0 %vm1968_vm10, %v12746_v0 }
 0x238   :  { %v9729_v13 = vunpack.i.h.bf16 %v9727_v61  ;;  %v9728_v16 = vunpack.i.l.bf16 %v9727_v61  ;;  %8841 = vmatprep.mubr.msk.bf16.mxu0 %vm1968_vm10, %v12790_v59  ;;  %v13001_v15 = vpop.f32.mrf.mxu1 }
 0x239   :  { %3846 = vst.msk [vmem:[#allocation2 + $0x120] sm:$0xff] %vm540_vm5, %v9723_v45  ;;  %3847 = vst.msk [vmem:[#allocation2 + $0x128] sm:$0xff] %vm540_vm5, %v9724_v12  ;;  %8876 = vmatmul.mubr.msk.bf16.gmra.mxu1 %vm1968_vm10, %v12827_v31  ;;  %v13005_v61 = vpop.f32.mrf.mxu0 }
 0x23a   :  { %4286 = vst.msk [vmem:[#allocation2 + $0x120] sm:$0xff] %vm982_vm6, %v9728_v16  ;;  %4287 = vst.msk [vmem:[#allocation2 + $0x128] sm:$0xff] %vm982_vm6, %v9729_v13  ;;  %8879 = vmatprep.mubr.msk.bf16.mxu1 %vm1968_vm10, %v12833_v32  ;;  %v13009_v16 = vpop.f32.mrf.mxu1 }
 0x23b   :  { %v9732_v45 = vpop.permute.xlu0 %9731  ;;  %v13011_v13 = vpop.f32.mrf.mxu0 }
 0x23c   :  { %v9734_v12 = vunpack.i.h.bf16 %v9732_v45  ;;  %v9733_v4 = vunpack.i.l.bf16 %v9732_v45  ;;  %v13021_v52 = vpop.f32.mrf.mxu1 }
 0x23d   :  { %v9737_v0 = vpop.permute.xlu1 %9736  ;;  %v13015_v5 = vpop.f32.mrf.mxu0 }
 0x23e   :  { %3848 = vst.msk [vmem:[#allocation2 + $0x130] sm:$0xff] %vm540_vm5, %v9733_v4  ;;  %3849 = vst.msk [vmem:[#allocation2 + $0x138] sm:$0xff] %vm540_vm5, %v9734_v12  ;;  %v9739_v59 = vunpack.i.h.bf16 %v9737_v0  ;;  %v9738_v19 = vunpack.i.l.bf16 %v9737_v0  ;;  %v5644_v12 = vld [vmem:[#allocation2 + $0x110] sm:$0xff] }
 0x23f   :  { %8842 = vmatmul.mubr.msk.bf16.gmra.mxu0 %vm1968_vm10, %v12787_v1  ;;  %v5645_v1 = vld [vmem:[#allocation2 + $0x118] sm:$0xff] }
 0x240   :  { %4726 = vst.msk [vmem:[#allocation2 + $0x120] sm:$0xff] %vm1424_vm7, %v9738_v19  ;;  %4727 = vst.msk [vmem:[#allocation2 + $0x128] sm:$0xff] %vm1424_vm7, %v9739_v59  ;;  %8845 = vmatprep.mubr.msk.bf16.mxu0 %vm1968_vm10, %v12811_v25  ;;  %v13029_v19 = vpop.f32.mrf.mxu0  ;;  %v13037_v25 = vpack.c.bf16 %v5645_v1, %v5644_v12 }
 0x241   :  { %v9742_v45 = vpop.permute.xlu0 %9741  ;;  %8880 = vmatmul.mubr.msk.bf16.gmra.mxu1 %vm1968_vm10, %v12881_v37 }
 0x242   :  { %v9744_v27 = vunpack.i.h.bf16 %v9742_v45  ;;  %v9743_v43 = vunpack.i.l.bf16 %v9742_v45  ;;  %8883 = vmatprep.mubr.msk.bf16.mxu1 %vm1968_vm10, %v12883_v11 }
 0x243   :  { %v13033_v45 = vpop.f32.mrf.mxu1 }
 0x244   :  { %4288 = vst.msk [vmem:[#allocation2 + $0x130] sm:$0xff] %vm982_vm6, %v9743_v43  ;;  %4289 = vst.msk [vmem:[#allocation2 + $0x138] sm:$0xff] %vm982_vm6, %v9744_v27  ;;  %v9747_v4 = vpop.permute.xlu1 %9746 }
 0x245   :  { %v9749_v0 = vunpack.i.h.bf16 %v9747_v4  ;;  %v9748_v59 = vunpack.i.l.bf16 %v9747_v4  ;;  %v13039_v43 = vpop.f32.mrf.mxu1  ;;  %v13041_v27 = vpop.f32.mrf.mxu0 }
 0x247   :  { %5166 = vst.msk [vmem:[#allocation2 + $0x120] sm:$0xff] %vm1866_vm8, %v9748_v59  ;;  %5167 = vst.msk [vmem:[#allocation2 + $0x128] sm:$0xff] %vm1866_vm8, %v9749_v0  ;;  %8846 = vmatmul.mubr.msk.bf16.gmra.mxu0 %vm1968_vm10, %v12827_v31  ;;  %v13045_v2 = vpop.f32.mrf.mxu1  ;;  %v13047_v34 = vpop.f32.mrf.mxu0 }
 0x248   :  { %v9752_v14 = vpop.permute.xlu0 %9751  ;;  %8849 = vmatprep.mubr.msk.bf16.mxu0 %vm1968_vm10, %v12833_v32  ;;  %v6217_v32 = vld [vmem:[#allocation2 + $0x68] sm:$0xff] }
 0x249   :  { %v9754_v4 = vunpack.i.h.bf16 %v9752_v14  ;;  %v9753_v30 = vunpack.i.l.bf16 %v9752_v14  ;;  %8884 = vmatmul.mubr.msk.bf16.gmra.mxu1 %vm1968_vm10, %v13037_v25  ;;  %v13053_v12 = vpop.f32.mrf.mxu0  ;;  %v13059_v59 = vpop.f32.mrf.mxu1  ;;  %v6216_v14 = vld [vmem:[#allocation2 + $0x60] sm:$0xff] }
 0x24a   :  { %v9757_v0 = vpop.permute.xlu1 %9756  ;;  %14908 = vst [vmem:[#allocation25_spill] sm:$0xff] %v13053_v12  ;;  %8923 = vmatprep.mubr.msk.bf16.mxu1 %vm1968_vm10, %v12902_v54 }
 0x24b   :  { %4728 = vst.msk [vmem:[#allocation2 + $0x130] sm:$0xff] %vm1424_vm7, %v9753_v30  ;;  %4729 = vst.msk [vmem:[#allocation2 + $0x138] sm:$0xff] %vm1424_vm7, %v9754_v4  ;;  %v9759_v31 = vunpack.i.h.bf16 %v9757_v0  ;;  %v9758_v1 = vunpack.i.l.bf16 %v9757_v0  ;;  %v13063_v51 = vpop.f32.mrf.mxu0  ;;  %v6246_v4 = vpack.c.bf16 %v6217_v32, %v6216_v14 }
 0x24c   :  { %14909 = vst [vmem:[#allocation26_spill] sm:$0xff] %v13063_v51 }
 0x24d   :  { %5168 = vst.msk [vmem:[#allocation2 + $0x130] sm:$0xff] %vm1866_vm8, %v9758_v1  ;;  %5169 = vst.msk [vmem:[#allocation2 + $0x138] sm:$0xff] %vm1866_vm8, %v9759_v31 }
 0x24e   :  { %v13065_v12 = vpop.f32.mrf.mxu1 }
 0x24f   :  { %14910 = vst [vmem:[#allocation27_spill] sm:$0xff] %v13065_v12  ;;  %8850 = vmatmul.mubr.msk.bf16.gmra.mxu0 %vm1968_vm10, %v12881_v37  ;;  %v6218_v12 = vld [vmem:[#allocation2 + $0x70] sm:$0xff] }
 0x250   :  { %8889 = vmatprep.mubr.msk.bf16.mxu0 %vm1968_vm10, %v12900_v50  ;;  %v13071_v30 = vpop.f32.mrf.mxu1  ;;  %v6221_v50 = vld [vmem:[#allocation2 + $0x88] sm:$0xff]  ;;  %v6247_v32 = vpack.c.bf16 %v6219_v6, %v6218_v12  ;;  %v6223_v6 = vld [vmem:[#allocation2 + $0x98] sm:$0xff] }
 0x251   :  { %14911 = vst [vmem:[#allocation28_spill] sm:$0xff] %v13071_v30  ;;  %8924 = vmatmul.mubr.msk.bf16.vlgmr.msra.gmra.mxu1 %vm1968_vm10, %v12912_v41  ;;  %v13075_v0 = vpop.f32.mrf.mxu0  ;;  %v6225_v30 = vld [vmem:[#allocation2 + $0xa8] sm:$0xff] }
 0x252   :  { %14912 = vst [vmem:[#allocation29_spill] sm:$0xff] %v13075_v0  ;;  %8927 = vmatprep.mubr.msk.bf16.mxu1 %vm1968_vm10, %v6246_v4  ;;  %v13078_v31 = vpop.f32.mrf.mxu1 }
 0x253   :  { %14913 = vst [vmem:[#allocation30_spill] sm:$0xff] %v13078_v31  ;;  %v13080_v1 = vpop.f32.mrf.mxu0 }
 0x254   :  { %14914 = vst [vmem:[#allocation31_spill] sm:$0xff] %v13080_v1  ;;  %v13082_v51 = vpop.f32.mrf.mxu1  ;;  %v6248_v1 = vpack.c.bf16 %v6221_v50, %v6220_v63 }
 0x255   :  { %14915 = vst [vmem:[#allocation32_spill] sm:$0xff] %v13082_v51  ;;  %v13084_v9 = vpop.f32.mrf.mxu0 }
 0x256   :  { %14916 = vst [vmem:[#allocation33_spill] sm:$0xff] %v13084_v9 }
 0x257   :  { %8890 = vmatmul.mubr.msk.bf16.vlgmr.msra.gmra.mxu0 %vm1968_vm10, %v12902_v54  ;;  %v13088_v14 = vpop.f32.mrf.mxu1  ;;  %v13090_v0 = vpop.f32.mrf.mxu0 }
 0x258   :  { %14917 = vst [vmem:[#allocation34_spill] sm:$0xff] %v13088_v14  ;;  %14918 = vst [vmem:[#allocation35_spill] sm:$0xff] %v13090_v0  ;;  %8893 = vmatprep.mubr.msk.bf16.mxu0 %vm1968_vm10, %v12912_v41  ;;  %v6222_v14 = vld [vmem:[#allocation2 + $0x90] sm:$0xff]  ;;  %v6224_v0 = vld [vmem:[#allocation2 + $0xa0] sm:$0xff] }
 0x259   :  { %8928 = vmatmul.mubr.msk.bf16.gmra.mxu1 %vm1968_vm10, %v6247_v32  ;;  %v13095_v51 = vpop.f32.mrf.mxu1  ;;  %v13097_v31 = vpop.f32.mrf.mxu0  ;;  %v6249_v50 = vpack.c.bf16 %v6223_v6, %v6222_v14  ;;  %v6228_v6 = vld [vmem:[#allocation2 + $0xc0] sm:$0xff] }
 0x25a   :  { %14919 = vst [vmem:[#allocation36_spill] sm:$0xff] %v13095_v51  ;;  %14920 = vst [vmem:[#allocation37_spill] sm:$0xff] %v13097_v31  ;;  %8931 = vmatprep.mubr.msk.bf16.mxu1 %vm1968_vm10, %v6248_v1 }
 0x25b   :  { %v13100_v9 = vpop.f32.mrf.mxu1  ;;  %v13102_v54 = vpop.f32.mrf.mxu0 }
 0x25c   :  { %14921 = vst [vmem:[#allocation38_spill] sm:$0xff] %v13100_v9  ;;  %14922 = vst [vmem:[#allocation39_spill] sm:$0xff] %v13102_v54  ;;  %v6250_v9 = vpack.c.bf16 %v6225_v30, %v6224_v0 }
 0x25d   :  { %v13104_v12 = vpop.f32.mrf.mxu1  ;;  %v13106_v41 = vpop.f32.mrf.mxu0 }
 0x25e   :  { %14923 = vst [vmem:[#allocation40_spill] sm:$0xff] %v13104_v12  ;;  %14924 = vst [vmem:[#allocation41_spill] sm:$0xff] %v13106_v41 }
 0x25f   :  { %8894 = vmatmul.mubr.msk.bf16.gmra.mxu0 %vm1968_vm10, %v6246_v4  ;;  %v13109_v63 = vpop.f32.mrf.mxu1  ;;  %v13111_v31 = vpop.f32.mrf.mxu0  ;;  %v6226_v4 = vld [vmem:[#allocation2 + $0xb0] sm:$0xff] }
 0x260   :  { %14925 = vst [vmem:[#allocation42_spill] sm:$0xff] %v13109_v63  ;;  %14926 = vst [vmem:[#allocation43_spill] sm:$0xff] %v13111_v31  ;;  %8897 = vmatprep.mubr.msk.bf16.mxu0 %vm1968_vm10, %v6247_v32  ;;  %v6227_v63 = vld [vmem:[#allocation2 + $0xb8] sm:$0xff]  ;;  %v6229_v31 = vld [vmem:[#allocation2 + $0xc8] sm:$0xff] }
 0x261   :  { %8932 = vmatmul.mubr.msk.bf16.gmra.mxu1 %vm1968_vm10, %v6249_v50  ;;  %v13115_v54 = vpop.f32.mrf.mxu1  ;;  %v13117_v51 = vpop.f32.mrf.mxu0  ;;  %v6251_v0 = vpack.c.bf16 %v6227_v63, %v6226_v4  ;;  %v2626_v63 = vadd.f32 %v12951_v42, %v12438_v49  ;;  %v6230_v4 = vld [vmem:[#allocation2 + $0xd0] sm:$0xff] }
 0x262   :  { %14927 = vst [vmem:[#allocation44_spill] sm:$0xff] %v13115_v54  ;;  %14928 = vst [vmem:[#allocation45_spill] sm:$0xff] %v13117_v51  ;;  %8935 = vmatprep.mubr.msk.bf16.mxu1 %vm1968_vm10, %v6250_v9 }
 0x263   :  { %v13120_v12 = vpop.f32.mrf.mxu1  ;;  %v13122_v41 = vpop.f32.mrf.mxu0 }
 0x264   :  { %14929 = vst [vmem:[#allocation46_spill] sm:$0xff] %v13120_v12  ;;  %14930 = vst [vmem:[#allocation47_spill] sm:$0xff] %v13122_v41  ;;  %v6252_v12 = vpack.c.bf16 %v6229_v31, %v6228_v6  ;;  %v6232_v6 = vld [vmem:[#allocation2 + $0xe0] sm:$0xff] }
 0x265   :  { %v13124_v14 = vpop.f32.mrf.mxu1  ;;  %v13126_v32 = vpop.f32.mrf.mxu0 }
 0x266   :  { %14931 = vst [vmem:[#allocation48_spill] sm:$0xff] %v13124_v14  ;;  %14932 = vst [vmem:[#allocation49_spill] sm:$0xff] %v13126_v32 }
 0x267   :  { %8898 = vmatmul.mubr.msk.bf16.gmra.mxu0 %vm1968_vm10, %v6248_v1  ;;  %v13129_v30 = vpop.f32.mrf.mxu1  ;;  %v13131_v51 = vpop.f32.mrf.mxu0 }
 0x268   :  { %14933 = vst [vmem:[#allocation50_spill] sm:$0xff] %v13129_v30  ;;  %14934 = vst [vmem:[#allocation51_spill] sm:$0xff] %v13131_v51  ;;  %8901 = vmatprep.mubr.msk.bf16.mxu0 %vm1968_vm10, %v6249_v50  ;;  %v6231_v51 = vld [vmem:[#allocation2 + $0xd8] sm:$0xff] }
 0x269   :  { %8936 = vmatmul.mubr.msk.bf16.gmra.mxu1 %vm1968_vm10, %v6251_v0  ;;  %v13135_v41 = vpop.f32.mrf.mxu1  ;;  %v8715_v54 = vpop.f32.mrf.mxu0  ;;  %v6253_v49 = vpack.c.bf16 %v6231_v51, %v6230_v4 }
 0x26a   :  { %14935 = vst [vmem:[#allocation52_spill] sm:$0xff] %v13135_v41  ;;  %8939 = vmatprep.mubr.msk.bf16.mxu1 %vm1968_vm10, %v6252_v12  ;;  %v13139_v14 = vadd.f32 %v8715_v54, %v12931_v8  ;;  %v6233_v41 = vld [vmem:[#allocation2 + $0xe8] sm:$0xff]  ;;  %v2624_v8 = vadd.f32 %v12959_v22, %v12454_v58  ;;  %v2926_v58 = vadd.f32 %v12961_v23, %v2626_v63 }
 0x26b   :  { %v13141_v32 = vpop.f32.mrf.mxu1  ;;  %v2609_v1 = vpop.f32.mrf.mxu0 }
 0x26c   :  { %14936 = vst [vmem:[#allocation53_spill] sm:$0xff] %v13139_v14  ;;  %v13146_v31 = vadd.f32 %v2609_v1, %v12937_v44  ;;  %v2233_v44 = vadd.f32 %v12342_v28, %v12356_v35  ;;  %v2627_v1 = vadd.f32 %v12965_v55, %v12462_v26  ;;  %v2924_v28 = vadd.f32 %v12967_v46, %v2624_v8  ;;  %v6241_v8 = vld [vmem:[#allocation2 + $0x128] sm:$0xff] }
 0x26d   :  { %v13148_v50 = vpop.f32.mrf.mxu1  ;;  %v8716_v30 = vpop.f32.mrf.mxu0  ;;  %v2630_v55 = vadd.f32 %v12977_v29, %v12550_v40  ;;  %v2249_v29 = vadd.f32 %v12486_v20, %v12498_v48 }
 0x26e   :  { %14937 = vst [vmem:[#allocation54_spill] sm:$0xff] %v13146_v31  ;;  %v13153_v54 = vadd.f32 %v8716_v30, %v12941_v18  ;;  %v6254_v31 = vpack.c.bf16 %v6233_v41, %v6232_v6  ;;  %v2625_v51 = vadd.f32 %v12969_v33, %v2233_v44  ;;  %v2927_v41 = vadd.f32 %v12973_v56, %v2627_v1 }
 0x26f   :  { %8902 = vmatmul.mubr.msk.bf16.gmra.mxu0 %vm1968_vm10, %v6250_v9  ;;  %v13158_v42 = vpop.f32.mrf.mxu0  ;;  %v2628_v33 = vadd.f32 %v12985_v21, %v12563_v57  ;;  %v2631_v56 = vadd.f32 %v12987_v60, %v12568_v17  ;;  %v2930_v21 = vadd.f32 %v12991_v7, %v2630_v55  ;;  %v2629_v6 = vadd.f32 %v12993_v36, %v2249_v29  ;;  %v6240_v7 = vld [vmem:[#allocation2 + $0x120] sm:$0xff] }
 0x270   :  { %8905 = vmatprep.mubr.msk.bf16.mxu0 %vm1968_vm10, %v6251_v0  ;;  %v2925_v63 = vadd.f32 %v12981_v38, %v2625_v51  ;;  %v2638_v55 = vadd.f32 %v13041_v27, %v12686_v39 }
 0x271   :  { %v13156_v14 = vpop.f32.mrf.mxu1  ;;  %8940 = vmatmul.mubr.msk.bf16.gmra.mxu1 %vm1968_vm10, %v6253_v49  ;;  %v8755_v9 = vpop.f32.mrf.mxu0  ;;  %v2928_v48 = vadd.f32 %v13001_v15, %v2628_v33  ;;  %v2931_v36 = vadd.f32 %v13009_v16, %v2631_v56  ;;  %v2929_v51 = vadd.f32 %v13021_v52, %v2629_v6  ;;  %v2265_v16 = vadd.f32 %v12655_v3, %v12661_v24  ;;  %v6242_v3 = vld [vmem:[#allocation2 + $0x130] sm:$0xff]  ;;  %v6243_v24 = vld [vmem:[#allocation2 + $0x138] sm:$0xff]  ;;  %v14940_v56 = vld [vmem:[#allocation5_spill] sm:$0xff] }
 0x272   :  { %8943 = vmatprep.mubr.msk.bf16.mxu1 %vm1968_vm10, %v6254_v31  ;;  %v3226_v22 = vadd.f32 %v8755_v9, %v2926_v58  ;;  %v2632_v9 = vadd.f32 %v13011_v13, %v12605_v62  ;;  %v14943_v6 = vld [vmem:[#allocation26_spill] sm:$0xff] }
 0x273   :  { %v13167_v18 = vpop.f32.mrf.mxu1  ;;  %v3097_v26 = vpop.f32.mrf.mxu0 }
 0x274   :  { %3259 = vst.msk [vmem:[#allocation3 + $0x10] sm:$0xff] %vm3256_vm11, %v3226_v22  ;;  %v3224_v23 = vadd.f32 %v3097_v26, %v2924_v28  ;;  %v6258_v22 = vpack.c.bf16 %v6241_v8, %v6240_v7  ;;  %v2635_v28 = vadd.f32 %v13015_v5, %v12607_v10  ;;  %v2633_v26 = vadd.f32 %v13029_v19, %v2265_v16  ;;  %v14948_v16 = vld [vmem:[#allocation9_spill] sm:$0xff] }
 0x275   :  { %v13172_v35 = vpop.f32.mrf.mxu1  ;;  %v8756_v0 = vpop.f32.mrf.mxu0  ;;  %v2932_v5 = vadd.f32 %v13039_v43, %v2632_v9  ;;  %v14947_v9 = vld [vmem:[#allocation30_spill] sm:$0xff] }
 0x276   :  { %3257 = vst.msk [vmem:[#allocation3] sm:$0xff] %vm3256_vm11, %v3224_v23  ;;  %v3227_v46 = vadd.f32 %v8756_v0, %v2927_v41  ;;  %v2935_v19 = vadd.f32 %v13045_v2, %v2635_v28  ;;  %v6259_v0 = vpack.c.bf16 %v6243_v24, %v6242_v3  ;;  %v14939_v2 = vld [vmem:[#allocation6_spill] sm:$0xff]  ;;  %v14949_v28 = vld [vmem:[#allocation31_spill] sm:$0xff]  ;;  %v14951_v24 = vld [vmem:[#allocation12_spill] sm:$0xff] }
 0x277   :  { %v13178_v30 = vpop.f32.mrf.mxu1  ;;  %8906 = vmatmul.mubr.msk.bf16.gmra.mxu0 %vm1968_vm10, %v6252_v12  ;;  %v3100_v40 = vpop.f32.mrf.mxu0 }
 0x278   :  { %8909 = vmatprep.mubr.msk.bf16.mxu0 %vm1968_vm10, %v6253_v49  ;;  %3260 = vst.msk [vmem:[#allocation3 + $0x18] sm:$0xff] %vm3256_vm11, %v3227_v46  ;;  %v3225_v57 = vadd.f32 %v3100_v40, %v2925_v63  ;;  %v2634_v49 = vadd.f32 %v13005_v61, %v12590_v47  ;;  %v2636_v46 = vadd.f32 %v13047_v34, %v12694_v53  ;;  %v14938_v40 = vld [vmem:[#allocation7_spill] sm:$0xff] }
 0x279   :  { %v13185_v4 = vpop.f32.mrf.mxu1  ;;  %8944 = vmatmul.mubr.msk.bf16.gmra.mxu1 %vm1968_vm10, %v12881_v37  ;;  %v2933_v63 = vadd.f32 %v13059_v59, %v2633_v26  ;;  %v2281_v29 = vadd.f32 %v14939_v2, %v14938_v40  ;;  %v14942_v34 = vld [vmem:[#allocation27_spill] sm:$0xff]  ;;  %v14957_v2 = vld [vmem:[#allocation36_spill] sm:$0xff] }
 0x27a   :  { %8947 = vmatprep.mubr.msk.bf16.mxu1 %vm1968_vm10, %v12883_v11  ;;  %3258 = vst.msk [vmem:[#allocation3 + $0x8] sm:$0xff] %vm3256_vm11, %v3225_v57  ;;  %v2934_v52 = vadd.f32 %v13033_v45, %v2634_v49  ;;  %v14941_v57 = vld [vmem:[#allocation25_spill] sm:$0xff]  ;;  %v2938_v59 = vadd.f32 %v14942_v34, %v2638_v55  ;;  %v14945_v49 = vld [vmem:[#allocation8_spill] sm:$0xff]  ;;  %v14953_v55 = vld [vmem:[#allocation10_spill] sm:$0xff] }
 0x27b   :  { %v13196_v38 = vpop.f32.mrf.mxu1 }
 0x27c   :  { %v8759_v12 = vpop.f32.mrf.mxu0 }
 0x27d   :  { %v3230_v20 = vadd.f32 %v8759_v12, %v2930_v21  ;;  %v13203_v17 = vpop.f32.mrf.mxu1  ;;  %v2639_v21 = vadd.f32 %v14941_v57, %v14940_v56  ;;  %v14958_v57 = vld [vmem:[#allocation13_spill] sm:$0xff] }
 0x27e   :  { %v3113_v60 = vpop.f32.mrf.mxu0 }
 0x27f   :  { %3263 = vst.msk [vmem:[#allocation3 + $0x30] sm:$0xff] %vm3256_vm11, %v3230_v20  ;;  %v3228_v44 = vadd.f32 %v3113_v60, %v2928_v48  ;;  %v13209_v1 = vpop.f32.mrf.mxu1  ;;  %8910 = vmatmul.mubr.msk.bf16.gmra.mxu0 %vm1968_vm10, %v6254_v31  ;;  %v2637_v20 = vadd.f32 %v14943_v6, %v2281_v29  ;;  %v14944_v60 = vld [vmem:[#allocation28_spill] sm:$0xff] }
 0x280   :  { %v8760_v58 = vpop.f32.mrf.mxu0  ;;  %8913 = vmatprep.mubr.msk.bf16.mxu0 %vm1968_vm10, %v12881_v37  ;;  %v2936_v7 = vadd.f32 %v14944_v60, %v2636_v46  ;;  %v14962_v60 = vld [vmem:[#allocation39_spill] sm:$0xff] }
 0x281   :  { %3261 = vst.msk [vmem:[#allocation3 + $0x20] sm:$0xff] %vm3256_vm11, %v3228_v44  ;;  %v3231_v15 = vadd.f32 %v8760_v58, %v2931_v36  ;;  %v13216_v47 = vpop.f32.mrf.mxu1  ;;  %8948 = vmatmul.mubr.msk.bf16.gmra.mxu1 %vm1968_vm10, %v13037_v25  ;;  %v14946_v44 = vld [vmem:[#allocation29_spill] sm:$0xff] }
 0x282   :  { %v3116_v61 = vpop.f32.mrf.mxu0  ;;  %8951 = vmatprep.mubr.msk.bf16.mxu1 %vm1968_vm10, %v6258_v22  ;;  %v2642_v36 = vadd.f32 %v14946_v44, %v14945_v49  ;;  %v14963_v49 = vld [vmem:[#allocation40_spill] sm:$0xff] }
 0x283   :  { %3264 = vst.msk [vmem:[#allocation3 + $0x38] sm:$0xff] %vm3256_vm11, %v3231_v15  ;;  %v3229_v62 = vadd.f32 %v3116_v61, %v2929_v51  ;;  %v13228_v13 = vpop.f32.mrf.mxu1  ;;  %v2939_v15 = vadd.f32 %v14947_v9, %v2639_v21  ;;  %v14959_v21 = vld [vmem:[#allocation37_spill] sm:$0xff]  ;;  %v14965_v9 = vld [vmem:[#allocation16_spill] sm:$0xff] }
 0x284   :  { %v8763_v31 = vpop.f32.mrf.mxu0 }
 0x285   :  { %3262 = vst.msk [vmem:[#allocation3 + $0x28] sm:$0xff] %vm3256_vm11, %v3229_v62  ;;  %v3234_v10 = vadd.f32 %v8763_v31, %v2934_v52  ;;  %v13234_v37 = vpop.f32.mrf.mxu1  ;;  %v2640_v62 = vadd.f32 %v14949_v28, %v14948_v16  ;;  %v14950_v31 = vld [vmem:[#allocation32_spill] sm:$0xff]  ;;  %v14967_v16 = vld [vmem:[#allocation41_spill] sm:$0xff] }
 0x286   :  { %v3129_v45 = vpop.f32.mrf.mxu0  ;;  %v2937_v26 = vadd.f32 %v14950_v31, %v2637_v20 }
 0x287   :  { %3267 = vst.msk [vmem:[#allocation3 + $0x50] sm:$0xff] %vm3256_vm11, %v3234_v10  ;;  %v3232_v23 = vadd.f32 %v3129_v45, %v2932_v5  ;;  %v13240_v41 = vpop.f32.mrf.mxu1  ;;  %8914 = vmatmul.mubr.msk.bf16.gmra.mxu0 %vm1968_vm10, %v12883_v11  ;;  %v14952_v5 = vld [vmem:[#allocation11_spill] sm:$0xff]  ;;  %v2940_v29 = vadd.f32 %v14957_v2, %v2640_v62 }
 0x288   :  { %v8764_v33 = vpop.f32.mrf.mxu0  ;;  %8917 = vmatprep.mubr.msk.bf16.mxu0 %vm1968_vm10, %v13037_v25  ;;  %v2297_v45 = vadd.f32 %v14952_v5, %v14951_v24  ;;  %v14969_v24 = vld [vmem:[#allocation43_spill] sm:$0xff] }
 0x289   :  { %3265 = vst.msk [vmem:[#allocation3 + $0x40] sm:$0xff] %vm3256_vm11, %v3232_v23  ;;  %v3235_v43 = vadd.f32 %v8764_v33, %v2935_v19  ;;  %v13248_v39 = vpop.f32.mrf.mxu1  ;;  %8952 = vmatmul.mubr.msk.bf16.gmra.mxu1 %vm1968_vm10, %v6259_v0  ;;  %v14954_v23 = vld [vmem:[#allocation33_spill] sm:$0xff]  ;;  %v14955_v33 = vld [vmem:[#allocation34_spill] sm:$0xff] }
 0x28a   :  { %v3132_v27 = vpop.f32.mrf.mxu0  ;;  %v2643_v19 = vadd.f32 %v14954_v23, %v14953_v55  ;;  %v2942_v46 = vadd.f32 %v14955_v33, %v2642_v36  ;;  %v14970_v55 = vld [vmem:[#allocation44_spill] sm:$0xff]  ;;  %v14972_v33 = vld [vmem:[#allocation45_spill] sm:$0xff] }
 0x28b   :  { %3268 = vst.msk [vmem:[#allocation3 + $0x58] sm:$0xff] %vm3256_vm11, %v3235_v43  ;;  %v3233_v53 = vadd.f32 %v3132_v27, %v2933_v63  ;;  %v13259_v11 = vpop.f32.mrf.mxu1  ;;  %v14956_v27 = vld [vmem:[#allocation35_spill] sm:$0xff] }
 0x28c   :  { %v8767_v12 = vpop.f32.mrf.mxu0  ;;  %v2641_v40 = vadd.f32 %v14956_v27, %v2297_v45  ;;  %v14973_v27 = vld [vmem:[#allocation46_spill] sm:$0xff] }
 0x28d   :  { %3266 = vst.msk [vmem:[#allocation3 + $0x48] sm:$0xff] %vm3256_vm11, %v3233_v53  ;;  %v3238_v48 = vadd.f32 %v8767_v12, %v2938_v59  ;;  %v13264_v8 = vpop.f32.mrf.mxu1  ;;  %v2646_v53 = vadd.f32 %v14959_v21, %v14958_v57  ;;  %v14960_v59 = vld [vmem:[#allocation38_spill] sm:$0xff] }
 0x28e   :  { %v3145_v25 = vpop.f32.mrf.mxu0  ;;  %v2943_v12 = vadd.f32 %v14960_v59, %v2643_v19  ;;  %v2941_v44 = vadd.f32 %v14963_v49, %v2641_v40 }
 0x28f   :  { %3271 = vst.msk [vmem:[#allocation3 + $0x70] sm:$0xff] %vm3256_vm11, %v3238_v48  ;;  %v3236_v58 = vadd.f32 %v3145_v25, %v2936_v7  ;;  %v13270_v51 = vpop.f32.mrf.mxu1  ;;  %8918 = vmatmul.mubr.msk.bf16.gmra.mxu0 %vm1968_vm10, %v6258_v22  ;;  %v14961_v48 = vld [vmem:[#allocation14_spill] sm:$0xff] }
 0x290   :  { %v8768_v61 = vpop.f32.mrf.mxu0  ;;  %v2644_v7 = vadd.f32 %v14962_v60, %v14961_v48  ;;  %v14979_v60 = vld [vmem:[#allocation20_spill] sm:$0xff] }
 0x291   :  { %3269 = vst.msk [vmem:[#allocation3 + $0x60] sm:$0xff] %vm3256_vm11, %v3236_v58  ;;  %v3239_v52 = vadd.f32 %v8768_v61, %v2939_v15  ;;  %v13277_v10 = vpop.f32.mrf.mxu1  ;;  %v14964_v58 = vld [vmem:[#allocation17_spill] sm:$0xff]  ;;  %v14966_v61 = vld [vmem:[#allocation15_spill] sm:$0xff] }
 0x292   :  { %v3148_v3 = vpop.f32.mrf.mxu0  ;;  %v2313_v15 = vadd.f32 %v14965_v9, %v14964_v58  ;;  %v2647_v28 = vadd.f32 %v14967_v16, %v14966_v61  ;;  %v2944_v23 = vadd.f32 %v14970_v55, %v2644_v7  ;;  %v14980_v7 = vld [vmem:[#allocation49_spill] sm:$0xff] }
 0x293   :  { %3272 = vst.msk [vmem:[#allocation3 + $0x78] sm:$0xff] %vm3256_vm11, %v3239_v52  ;;  %v3237_v0 = vadd.f32 %v3148_v3, %v2937_v26  ;;  %v13285_v43 = vpop.f32.mrf.mxu1  ;;  %v14968_v52 = vld [vmem:[#allocation42_spill] sm:$0xff] }
 0x294   :  { %v8771_v63 = vpop.f32.mrf.mxu0  ;;  %v2946_v31 = vadd.f32 %v14968_v52, %v2646_v53  ;;  %v2645_v5 = vadd.f32 %v14969_v24, %v2313_v15  ;;  %v2947_v40 = vadd.f32 %v14973_v27, %v2647_v28  ;;  %v14976_v53 = vld [vmem:[#allocation48_spill] sm:$0xff]  ;;  %v14983_v15 = vld [vmem:[#allocation51_spill] sm:$0xff] }
 0x295   :  { %3270 = vst.msk [vmem:[#allocation3 + $0x68] sm:$0xff] %vm3256_vm11, %v3237_v0  ;;  %v3242_v22 = vadd.f32 %v8771_v63, %v2942_v46  ;;  %v13294_v6 = vpop.f32.mrf.mxu1  ;;  %v14971_v0 = vld [vmem:[#allocation18_spill] sm:$0xff]  ;;  %v14984_v28 = vld [vmem:[#allocation52_spill] sm:$0xff] }
 0x296   :  { %v3161_v56 = vpop.f32.mrf.mxu0  ;;  %v2650_v46 = vadd.f32 %v14972_v33, %v14971_v0  ;;  %v6545_v33 = vld [vmem:[#allocation3 + $0x8] sm:$0xff] }
 0x297   :  { %3275 = vst.msk [vmem:[#allocation3 + $0x90] sm:$0xff] %vm3256_vm11, %v3242_v22  ;;  %v3240_v34 = vadd.f32 %v3161_v56, %v2940_v29  ;;  %v13306_v26 = vpop.f32.mrf.mxu1  ;;  %v14974_v29 = vld [vmem:[#allocation19_spill] sm:$0xff] }
 0x298   :  { %v8772_v20 = vpop.f32.mrf.mxu0  ;;  %v14975_v56 = vld [vmem:[#allocation47_spill] sm:$0xff] }
 0x299   :  { %3273 = vst.msk [vmem:[#allocation3 + $0x80] sm:$0xff] %vm3256_vm11, %v3240_v34  ;;  %v3243_v25 = vadd.f32 %v8772_v20, %v2943_v12  ;;  %v13315_v22 = vpop.f32.mrf.mxu1  ;;  %v2648_v57 = vadd.f32 %v14975_v56, %v14974_v29  ;;  %v2945_v34 = vadd.f32 %v14976_v53, %v2645_v5  ;;  %v14977_v12 = vld [vmem:[#allocation22_spill] sm:$0xff]  ;;  %v14978_v20 = vld [vmem:[#allocation21_spill] sm:$0xff] }
 0x29a   :  { %v3164_v36 = vpop.f32.mrf.mxu0  ;;  %v2329_v48 = vadd.f32 %v14978_v20, %v14977_v12 }
 0x29b   :  { %3276 = vst.msk [vmem:[#allocation3 + $0x98] sm:$0xff] %vm3256_vm11, %v3243_v25  ;;  %v3241_v62 = vadd.f32 %v3164_v36, %v2941_v44  ;;  %v2651_v25 = vadd.f32 %v14980_v7, %v14979_v60  ;;  %v14981_v44 = vld [vmem:[#allocation50_spill] sm:$0xff]  ;;  %v13327_v58 = vpop.f32.mrf.mxu1  ;;  %v13361_v7 = vld [vmem:[#allocation3 + $0x20] sm:$0xff] }
 0x29c   :  { %v8775_v3 = vpop.f32.mrf.mxu0  ;;  %v2950_v36 = vadd.f32 %v14981_v44, %v2650_v46  ;;  %14982 = vst [vmem:[#allocation7_spill] sm:$0xff] %v13327_v58  ;;  %v2649_v61 = vadd.f32 %v14983_v15, %v2329_v48  ;;  %v14994_v48 = vld [vmem:[#allocation53_spill] sm:$0xff]  ;;  %14995 = vst [vmem:[#allocation29_spill] sm:$0xff] %v13361_v7  ;;  %v14997_v15 = vld [vmem:[#allocation54_spill] sm:$0xff] }
 0x29d   :  { %3274 = vst.msk [vmem:[#allocation3 + $0x88] sm:$0xff] %vm3256_vm11, %v3241_v62  ;;  %v3246_v45 = vadd.f32 %v8775_v3, %v2946_v31  ;;  %v2948_v62 = vadd.f32 %v14984_v28, %v2648_v57  ;;  %v2951_v3 = vadd.f32 %v13141_v32, %v2651_v25  ;;  %v13334_v24 = vpop.f32.mrf.mxu1  ;;  %v6544_v32 = vld [vmem:[#allocation3] sm:$0xff]  ;;  %v13351_v57 = vld [vmem:[#allocation3 + $0x18] sm:$0xff]  ;;  %v2954_v60 = vadd.f32 %v13156_v14, %v14994_v48 }
 0x29e   :  { %v3177_v19 = vpop.f32.mrf.mxu0  ;;  %14985 = vst [vmem:[#allocation6_spill] sm:$0xff] %v13334_v24  ;;  %v2949_v55 = vadd.f32 %v13148_v50, %v2649_v61  ;;  %14990 = vst [vmem:[#allocation28_spill] sm:$0xff] %v13351_v57  ;;  %v6613_v20 = vsel %vm3256_vm11, %v13351_v57, 0.0  ;;  %v2952_v61 = vadd.f32 %v13167_v18, %v14997_v15 }
 0x29f   :  { %3279 = vst.msk [vmem:[#allocation3 + $0xb0] sm:$0xff] %vm3256_vm11, %v3246_v45  ;;  %v3244_v63 = vadd.f32 %v3177_v19, %v2944_v23  ;;  %v13339_v0 = vpop.f32.mrf.mxu1 }
 0x2a0   :  { %v8776_v2 = vpop.f32.mrf.mxu0  ;;  %14986 = vst [vmem:[#allocation5_spill] sm:$0xff] %v13339_v0 }
 0x2a1   :  { %3277 = vst.msk [vmem:[#allocation3 + $0xa0] sm:$0xff] %vm3256_vm11, %v3244_v63  ;;  %v3247_v21 = vadd.f32 %v8776_v2, %v2947_v40  ;;  %v13342_v46 = vpop.f32.mrf.mxu1  ;;  %v6609_v63 = vsel %vm3256_vm11, %v6545_v33, 0.0  ;;  %v6608_v40 = vsel %vm3256_vm11, %v6544_v32, 0.0  ;;  %v6546_v2 = vld [vmem:[#allocation3 + $0x10] sm:$0xff]  ;;  %v13389_v32 = vld [vmem:[#allocation3 + $0x38] sm:$0xff] }
 0x2a2   :  { %v3180_v59 = vpop.f32.mrf.mxu0  ;;  %14987 = vst [vmem:[#allocation25_spill] sm:$0xff] %v13342_v46  ;;  %v6610_v50 = vadd.f32 %v6609_v63, %v6608_v40  ;;  %v6611_v56 = vsel %vm3256_vm11, %v6546_v2, 0.0  ;;  %15002 = vst [vmem:[#allocation11_spill] sm:$0xff] %v13389_v32  ;;  %v6621_v2 = vsel %vm3256_vm11, %v13389_v32, 0.0 }
 0x2a3   :  { %3280 = vst.msk [vmem:[#allocation3 + $0xb8] sm:$0xff] %vm3256_vm11, %v3247_v21  ;;  %v3245_v49 = vadd.f32 %v3180_v59, %v2945_v34  ;;  %v13345_v27 = vpop.f32.mrf.mxu1  ;;  %v14992_v34 = vld [vmem:[#allocation23_spill] sm:$0xff]  ;;  %v14993_v59 = vld [vmem:[#allocation24_spill] sm:$0xff] }
 0x2a4   :  { %v8779_v9 = vpop.f32.mrf.mxu0  ;;  %14988 = vst [vmem:[#allocation27_spill] sm:$0xff] %v13345_v27  ;;  %v6612_v21 = vadd.f32 %v6611_v56, %v6610_v50  ;;  %v2345_v12 = vadd.f32 %v14993_v59, %v14992_v34  ;;  %v13397_v50 = vld [vmem:[#allocation3 + $0x40] sm:$0xff]  ;;  %v13401_v34 = vld [vmem:[#allocation3 + $0x48] sm:$0xff] }
 0x2a5   :  { %3278 = vst.msk [vmem:[#allocation3 + $0xa8] sm:$0xff] %vm3256_vm11, %v3245_v49  ;;  %v3250_v16 = vadd.f32 %v8779_v9, %v2950_v36  ;;  %v13348_v29 = vpop.f32.mrf.mxu1  ;;  %15005 = vst [vmem:[#allocation34_spill] sm:$0xff] %v13397_v50 }
 0x2a6   :  { %v3193_v52 = vpop.f32.mrf.mxu0  ;;  %14989 = vst [vmem:[#allocation26_spill] sm:$0xff] %v13348_v29  ;;  %v6614_v25 = vadd.f32 %v6613_v20, %v6612_v21  ;;  %v2653_v36 = vadd.f32 %v13158_v42, %v2345_v12  ;;  %15007 = vst [vmem:[#allocation36_spill] sm:$0xff] %v13401_v34  ;;  %v6623_v12 = vsel %vm3256_vm11, %v13397_v50, 0.0  ;;  %v13517_v29 = vld [vmem:[#allocation3 + $0x98] sm:$0xff] }
 0x2a7   :  { %3283 = vst.msk [vmem:[#allocation3 + $0xd0] sm:$0xff] %vm3256_vm11, %v3250_v16  ;;  %v3248_v31 = vadd.f32 %v3193_v52, %v2948_v62  ;;  %v13353_v53 = vpop.f32.mrf.mxu1  ;;  %v13368_v16 = vld [vmem:[#allocation3 + $0x28] sm:$0xff]  ;;  %v6615_v62 = vsel %vm3256_vm11, %v13361_v7, 0.0  ;;  %v2955_v52 = vadd.f32 %v13172_v35, %v13153_v54  ;;  %15024 = vst [vmem:[#allocation19_spill] sm:$0xff] %v13517_v29 }
 0x2a8   :  { %v8780_v5 = vpop.f32.mrf.mxu0  ;;  %14991 = vst [vmem:[#allocation8_spill] sm:$0xff] %v13353_v53  ;;  %14998 = vst [vmem:[#allocation9_spill] sm:$0xff] %v13368_v16 }
 0x2a9   :  { %3281 = vst.msk [vmem:[#allocation3 + $0xc0] sm:$0xff] %vm3256_vm11, %v3248_v31  ;;  %v3251_v45 = vadd.f32 %v8780_v5, %v2951_v3  ;;  %v13363_v49 = vpop.f32.mrf.mxu1  ;;  %v6616_v31 = vadd.f32 %v6615_v62, %v6614_v25  ;;  %v6617_v5 = vsel %vm3256_vm11, %v13368_v16, 0.0  ;;  %v13481_v16 = vld [vmem:[#allocation3 + $0x80] sm:$0xff] }
 0x2aa   :  { %v3196_v23 = vpop.f32.mrf.mxu0  ;;  %14996 = vst [vmem:[#allocation30_spill] sm:$0xff] %v13363_v49  ;;  %15016 = vst [vmem:[#allocation15_spill] sm:$0xff] %v13481_v16 }
 0x2ab   :  { %3284 = vst.msk [vmem:[#allocation3 + $0xd8] sm:$0xff] %vm3256_vm11, %v3251_v45  ;;  %v3249_v19 = vadd.f32 %v3196_v23, %v2949_v55  ;;  %v13375_v3 = vpop.f32.mrf.mxu1  ;;  %v2953_v45 = vadd.f32 %v13178_v30, %v2653_v36  ;;  %v6618_v33 = vadd.f32 %v6617_v5, %v6616_v31 }
 0x2ac   :  { %14999 = vst [vmem:[#allocation31_spill] sm:$0xff] %v13375_v3 }
 0x2ad   :  { %3282 = vst.msk [vmem:[#allocation3 + $0xc8] sm:$0xff] %vm3256_vm11, %v3249_v19  ;;  %v13382_v19 = vld [vmem:[#allocation3 + $0x30] sm:$0xff]  ;;  %v13384_v54 = vpop.f32.mrf.mxu1 }
 0x2ae   :  { %15000 = vst [vmem:[#allocation32_spill] sm:$0xff] %v13382_v19  ;;  %15001 = vst [vmem:[#allocation12_spill] sm:$0xff] %v13384_v54  ;;  %v6619_v35 = vsel %vm3256_vm11, %v13382_v19, 0.0  ;;  %v13505_v54 = vld [vmem:[#allocation3 + $0x90] sm:$0xff] }
 0x2af   :  { %v6620_v63 = vadd.f32 %v6619_v35, %v6618_v33  ;;  %v13391_v40 = vpop.f32.mrf.mxu1  ;;  %v13439_v33 = vld [vmem:[#allocation3 + $0x68] sm:$0xff]  ;;  %15021 = vst [vmem:[#allocation18_spill] sm:$0xff] %v13505_v54 }
 0x2b0   :  { %15003 = vst [vmem:[#allocation10_spill] sm:$0xff] %v13391_v40  ;;  %15013 = vst [vmem:[#allocation40_spill] sm:$0xff] %v13439_v33 }
 0x2b1   :  { %v6622_v56 = vadd.f32 %v6621_v2, %v6620_v63 }
 0x2b3   :  { %v6624_v20 = vadd.f32 %v6623_v12, %v6622_v56 }
 0x2bb   :  { %v8783_v44 = vpop.f32.mrf.mxu0 }
 0x2bc   :  { %v3254_v9 = vadd.f32 %v8783_v44, %v2954_v60  ;;  %v6625_v60 = vsel %vm3256_vm11, %v13401_v34, 0.0  ;;  %v13413_v44 = vld [vmem:[#allocation3 + $0x50] sm:$0xff]  ;;  %v13469_v34 = vld [vmem:[#allocation3 + $0x78] sm:$0xff] }
 0x2bd   :  { %v3209_v28 = vpop.f32.mrf.mxu0  ;;  %15010 = vst [vmem:[#allocation38_spill] sm:$0xff] %v13413_v44  ;;  %v6626_v36 = vadd.f32 %v6625_v60, %v6624_v20  ;;  %v6633_v60 = vsel %vm3256_vm11, %v13439_v33, 0.0  ;;  %15015 = vst [vmem:[#allocation16_spill] sm:$0xff] %v13469_v34 }
 0x2be   :  { %3287 = vst.msk [vmem:[#allocation3 + $0xf0] sm:$0xff] %vm3256_vm11, %v3254_v9  ;;  %v3252_v14 = vadd.f32 %v3209_v28, %v2952_v61  ;;  %v6627_v61 = vsel %vm3256_vm11, %v13413_v44, 0.0  ;;  %v13421_v28 = vld [vmem:[#allocation3 + $0x58] sm:$0xff] }
 0x2bf   :  { %v8784_v42 = vpop.f32.mrf.mxu0  ;;  %15011 = vst [vmem:[#allocation14_spill] sm:$0xff] %v13421_v28  ;;  %v6628_v62 = vadd.f32 %v6627_v61, %v6626_v36  ;;  %v6629_v5 = vsel %vm3256_vm11, %v13421_v28, 0.0 }
 0x2c0   :  { %3285 = vst.msk [vmem:[#allocation3 + $0xe0] sm:$0xff] %vm3256_vm11, %v3252_v14  ;;  %v3255_v18 = vadd.f32 %v8784_v42, %v2955_v52 }
 0x2c1   :  { %v3212_v55 = vpop.f32.mrf.mxu0 }
 0x2c2   :  { %3288 = vst.msk [vmem:[#allocation3 + $0xf8] sm:$0xff] %vm3256_vm11, %v3255_v18  ;;  %v3253_v23 = vadd.f32 %v3212_v55, %v2953_v45  ;;  %v13433_v18 = vld [vmem:[#allocation3 + $0x60] sm:$0xff]  ;;  %v6630_v45 = vadd.f32 %v6629_v5, %v6628_v62  ;;  %v13457_v62 = vld [vmem:[#allocation3 + $0x70] sm:$0xff] }
 0x2c3   :  { %15012 = vst [vmem:[#allocation39_spill] sm:$0xff] %v13433_v18  ;;  %v6631_v2 = vsel %vm3256_vm11, %v13433_v18, 0.0  ;;  %15014 = vst [vmem:[#allocation17_spill] sm:$0xff] %v13457_v62 }
 0x2c4   :  { %3286 = vst.msk [vmem:[#allocation3 + $0xe8] sm:$0xff] %vm3256_vm11, %v3253_v23  ;;  %v6632_v56 = vadd.f32 %v6631_v2, %v6630_v45  ;;  %v6635_v2 = vsel %vm3256_vm11, %v13457_v62, 0.0 }
 0x2c6   :  { %v6634_v5 = vadd.f32 %v6633_v60, %v6632_v56  ;;  %v6637_v60 = vsel %vm3256_vm11, %v13469_v34, 0.0 }
 0x2c8   :  { %v6636_v33 = vadd.f32 %v6635_v2, %v6634_v5 }
 0x2c9   :  { %v13393_v30 = vpop.f32.mrf.mxu1 }
 0x2ca   :  { %15004 = vst [vmem:[#allocation33_spill] sm:$0xff] %v13393_v30  ;;  %v6638_v7 = vadd.f32 %v6637_v60, %v6636_v33 }
 0x2cb   :  { %v13399_v21 = vpop.f32.mrf.mxu1  ;;  %v13618_v58 = vld [vmem:[#allocation3 + $0xe8] sm:$0xff] }
 0x2cc   :  { %15006 = vst [vmem:[#allocation35_spill] sm:$0xff] %v13399_v21 }
 0x2cd   :  { %v13403_v59 = vpop.f32.mrf.mxu1 }
 0x2ce   :  { %15008 = vst [vmem:[#allocation13_spill] sm:$0xff] %v13403_v59  ;;  %v6639_v59 = vsel %vm3256_vm11, %v13481_v16, 0.0 }
 0x2cf   :  { %v13407_v48 = vpop.f32.mrf.mxu1  ;;  %v6640_v21 = vadd.f32 %v6639_v59, %v6638_v7  ;;  %v6643_v59 = vsel %vm3256_vm11, %v13505_v54, 0.0 }
 0x2d0   :  { %15009 = vst [vmem:[#allocation37_spill] sm:$0xff] %v13407_v48  ;;  %v13487_v48 = vld [vmem:[#allocation3 + $0x88] sm:$0xff] }
 0x2d1   :  { %v13411_v25 = vpop.f32.mrf.mxu1  ;;  %15017 = vst [vmem:[#allocation41_spill] sm:$0xff] %v13487_v48  ;;  %v6641_v33 = vsel %vm3256_vm11, %v13487_v48, 0.0 }
 0x2d2   :  { %v6642_v3 = vadd.f32 %v6641_v33, %v6640_v21  ;;  %v6645_v33 = vsel %vm3256_vm11, %v13517_v29, 0.0 }
 0x2d3   :  { %v13415_v9 = vpop.f32.mrf.mxu1 }
 0x2d4   :  { %v6644_v48 = vadd.f32 %v6643_v59, %v6642_v3 }
 0x2d5   :  { %v13417_v15 = vpop.f32.mrf.mxu1 }
 0x2d7   :  { %v13423_v14 = vpop.f32.mrf.mxu0  ;;  %v13425_v52 = vpop.f32.mrf.mxu1 }
 0x2d9   :  { %v13427_v31 = vpop.f32.mrf.mxu0  ;;  %v13429_v42 = vpop.f32.mrf.mxu1 }
 0x2db   :  { %v13435_v55 = vpop.f32.mrf.mxu0  ;;  %v13437_v23 = vpop.f32.mrf.mxu1 }
 0x2dd   :  { %v13441_v35 = vpop.f32.mrf.mxu0  ;;  %v13443_v63 = vpop.f32.mrf.mxu1 }
 0x2df   :  { %v13447_v12 = vpop.f32.mrf.mxu0  ;;  %v13449_v20 = vpop.f32.mrf.mxu1 }
 0x2e1   :  { %v13453_v36 = vpop.f32.mrf.mxu0  ;;  %v13455_v61 = vpop.f32.mrf.mxu1 }
 0x2e3   :  { %v13459_v28 = vpop.f32.mrf.mxu0  ;;  %v13461_v44 = vpop.f32.mrf.mxu1 }
 0x2e5   :  { %v13463_v18 = vpop.f32.mrf.mxu0  ;;  %v13465_v45 = vpop.f32.mrf.mxu1 }
 0x2e7   :  { %v13471_v50 = vpop.f32.mrf.mxu0  ;;  %v13473_v32 = vpop.f32.mrf.mxu1 }
 0x2e9   :  { %v13475_v19 = vpop.f32.mrf.mxu0  ;;  %v13477_v56 = vpop.f32.mrf.mxu1 }
 0x2eb   :  { %v13483_v57 = vpop.f32.mrf.mxu0  ;;  %v13485_v62 = vpop.f32.mrf.mxu1 }
 0x2ed   :  { %v13489_v5 = vpop.f32.mrf.mxu0  ;;  %v13491_v2 = vpop.f32.mrf.mxu1 }
 0x2ee   :  { %15018 = vst [vmem:[#allocation42_spill] sm:$0xff] %v13491_v2 }
 0x2ef   :  { %v13495_v30 = vpop.f32.mrf.mxu0  ;;  %v13497_v34 = vpop.f32.mrf.mxu1 }
 0x2f0   :  { %15019 = vst [vmem:[#allocation43_spill] sm:$0xff] %v13497_v34 }
 0x2f1   :  { %v13501_v60 = vpop.f32.mrf.mxu0  ;;  %v13503_v40 = vpop.f32.mrf.mxu1 }
 0x2f2   :  { %15020 = vst [vmem:[#allocation44_spill] sm:$0xff] %v13503_v40  ;;  %v13535_v40 = vld [vmem:[#allocation3 + $0xa8] sm:$0xff] }
 0x2f3   :  { %v13507_v49 = vpop.f32.mrf.mxu0  ;;  %v13509_v53 = vpop.f32.mrf.mxu1  ;;  %15032 = vst [vmem:[#allocation51_spill] sm:$0xff] %v13535_v40 }
 0x2f4   :  { %15022 = vst [vmem:[#allocation45_spill] sm:$0xff] %v13509_v53  ;;  %v13529_v53 = vld [vmem:[#allocation3 + $0xa0] sm:$0xff] }
 0x2f5   :  { %v13511_v16 = vpop.f32.mrf.mxu0  ;;  %v13513_v7 = vpop.f32.mrf.mxu1  ;;  %15029 = vst [vmem:[#allocation20_spill] sm:$0xff] %v13529_v53 }
 0x2f6   :  { %15023 = vst [vmem:[#allocation46_spill] sm:$0xff] %v13513_v7  ;;  %v6646_v7 = vadd.f32 %v6645_v33, %v6644_v48  ;;  %v6649_v48 = vsel %vm3256_vm11, %v13535_v40, 0.0 }
 0x2f7   :  { %v13519_v27 = vpop.f32.mrf.mxu0  ;;  %v13521_v46 = vpop.f32.mrf.mxu1 }
 0x2f8   :  { %15025 = vst [vmem:[#allocation47_spill] sm:$0xff] %v13519_v27  ;;  %15026 = vst [vmem:[#allocation48_spill] sm:$0xff] %v13521_v46  ;;  %v6647_v46 = vsel %vm3256_vm11, %v13529_v53, 0.0 }
 0x2f9   :  { %v13523_v0 = vpop.f32.mrf.mxu0  ;;  %v13525_v21 = vpop.f32.mrf.mxu1 }
 0x2fa   :  { %15027 = vst [vmem:[#allocation22_spill] sm:$0xff] %v13523_v0  ;;  %15028 = vst [vmem:[#allocation21_spill] sm:$0xff] %v13525_v21  ;;  %v6648_v21 = vadd.f32 %v6647_v46, %v6646_v7 }
 0x2fb   :  { %v13531_v24 = vpop.f32.mrf.mxu0  ;;  %v13533_v54 = vpop.f32.mrf.mxu1 }
 0x2fc   :  { %15030 = vst [vmem:[#allocation49_spill] sm:$0xff] %v13531_v24  ;;  %15031 = vst [vmem:[#allocation50_spill] sm:$0xff] %v13533_v54  ;;  %v13553_v24 = vld [vmem:[#allocation3 + $0xb0] sm:$0xff] }
 0x2fd   :  { %v13537_v3 = vpop.f32.mrf.mxu0  ;;  %v13539_v59 = vpop.f32.mrf.mxu1  ;;  %15039 = vst [vmem:[#allocation56_spill] sm:$0xff] %v13553_v24  ;;  %v6651_v7 = vsel %vm3256_vm11, %v13553_v24, 0.0 }
 0x2fe   :  { %15033 = vst [vmem:[#allocation52_spill] sm:$0xff] %v13537_v3  ;;  %15034 = vst [vmem:[#allocation23_spill] sm:$0xff] %v13539_v59  ;;  %v6650_v3 = vadd.f32 %v6649_v48, %v6648_v21 }
 0x2ff   :  { %v13543_v34 = vpop.f32.mrf.mxu0  ;;  %v13545_v29 = vpop.f32.mrf.mxu1 }
 0x300   :  { %15035 = vst [vmem:[#allocation24_spill] sm:$0xff] %v13543_v34  ;;  %15036 = vst [vmem:[#allocation53_spill] sm:$0xff] %v13545_v29  ;;  %v13565_v29 = vld [vmem:[#allocation3 + $0xb8] sm:$0xff]  ;;  %v6652_v40 = vadd.f32 %v6651_v7, %v6650_v3 }
 0x301   :  { %v13549_v33 = vpop.f32.mrf.mxu0  ;;  %v13551_v54 = vpop.f32.mrf.mxu1  ;;  %15044 = vst [vmem:[#allocation61_spill] sm:$0xff] %v13565_v29  ;;  %v6653_v48 = vsel %vm3256_vm11, %v13565_v29, 0.0 }
 0x302   :  { %15037 = vst [vmem:[#allocation54_spill] sm:$0xff] %v13549_v33  ;;  %15038 = vst [vmem:[#allocation55_spill] sm:$0xff] %v13551_v54 }
 0x303   :  { %v13555_v0 = vpop.f32.mrf.mxu0  ;;  %v13557_v59 = vpop.f32.mrf.mxu1 }
 0x304   :  { %15040 = vst [vmem:[#allocation57_spill] sm:$0xff] %v13555_v0  ;;  %15041 = vst [vmem:[#allocation58_spill] sm:$0xff] %v13557_v59  ;;  %v13577_v59 = vld [vmem:[#allocation3 + $0xc0] sm:$0xff]  ;;  %v13583_v0 = vld [vmem:[#allocation3 + $0xc8] sm:$0xff] }
 0x305   :  { %v13559_v53 = vpop.f32.mrf.mxu0  ;;  %v13561_v46 = vpop.f32.mrf.mxu1  ;;  %15049 = vst [vmem:[#allocation66_spill] sm:$0xff] %v13577_v59  ;;  %15052 = vst [vmem:[#allocation69_spill] sm:$0xff] %v13583_v0 }
 0x306   :  { %15042 = vst [vmem:[#allocation59_spill] sm:$0xff] %v13559_v53  ;;  %15043 = vst [vmem:[#allocation60_spill] sm:$0xff] %v13561_v46  ;;  %v6654_v46 = vadd.f32 %v6653_v48, %v6652_v40  ;;  %v6657_v40 = vsel %vm3256_vm11, %v13583_v0, 0.0 }
 0x307   :  { %v13567_v33 = vpop.f32.mrf.mxu0  ;;  %v13569_v54 = vpop.f32.mrf.mxu1 }
 0x308   :  { %15045 = vst [vmem:[#allocation62_spill] sm:$0xff] %v13567_v33  ;;  %15046 = vst [vmem:[#allocation63_spill] sm:$0xff] %v13569_v54  ;;  %v6655_v54 = vsel %vm3256_vm11, %v13577_v59, 0.0 }
 0x309   :  { %v13571_v34 = vpop.f32.mrf.mxu0  ;;  %v13573_v21 = vpop.f32.mrf.mxu1 }
 0x30a   :  { %15047 = vst [vmem:[#allocation64_spill] sm:$0xff] %v13571_v34  ;;  %15048 = vst [vmem:[#allocation65_spill] sm:$0xff] %v13573_v21  ;;  %v6656_v21 = vadd.f32 %v6655_v54, %v6654_v46  ;;  %v5488_v54 = vadd.f32 %v13427_v31, %v13196_v38  ;;  %v5491_v38 = vadd.f32 %v13441_v35, %v13209_v1  ;;  %v6665_v1 = vsel %vm3256_vm11, %v13618_v58, 0.0 }
 0x30b   :  { %v13579_v53 = vpop.f32.mrf.mxu0  ;;  %v13581_v24 = vpop.f32.mrf.mxu1 }
 0x30c   :  { %15050 = vst [vmem:[#allocation67_spill] sm:$0xff] %v13579_v53  ;;  %15051 = vst [vmem:[#allocation68_spill] sm:$0xff] %v13581_v24  ;;  %v5496_v53 = vadd.f32 %v13423_v14, %v13185_v4  ;;  %v5499_v4 = vadd.f32 %v13435_v55, %v13203_v17 }
 0x30d   :  { %v13585_v3 = vpop.f32.mrf.mxu0  ;;  %v13587_v7 = vpop.f32.mrf.mxu1 }
 0x30e   :  { %15053 = vst [vmem:[#allocation70_spill] sm:$0xff] %v13585_v3  ;;  %15054 = vst [vmem:[#allocation71_spill] sm:$0xff] %v13587_v7  ;;  %v13601_v3 = vld [vmem:[#allocation3 + $0xd0] sm:$0xff]  ;;  %v6658_v7 = vadd.f32 %v6657_v40, %v6656_v21  ;;  %v5883_v14 = vadd.f32 %v13411_v25, %v5496_v53 }
 0x30f   :  { %v13591_v34 = vpop.f32.mrf.mxu0  ;;  %v13593_v29 = vpop.f32.mrf.mxu1  ;;  %15058 = vst [vmem:[#allocation75_spill] sm:$0xff] %v13601_v3  ;;  %v6659_v0 = vsel %vm3256_vm11, %v13601_v3, 0.0  ;;  %v5881_v3 = vadd.f32 %v13415_v9, %v5488_v54  ;;  %v5504_v54 = vadd.f32 %v13453_v36, %v13228_v13 }
 0x310   :  { %15055 = vst [vmem:[#allocation72_spill] sm:$0xff] %v13591_v34  ;;  %15056 = vst [vmem:[#allocation73_spill] sm:$0xff] %v13593_v29  ;;  %v13613_v34 = vld [vmem:[#allocation3 + $0xe0] sm:$0xff]  ;;  %v6660_v21 = vadd.f32 %v6659_v0, %v6658_v7  ;;  %v5512_v0 = vadd.f32 %v13447_v12, %v13216_v47  ;;  %v5884_v7 = vadd.f32 %v13417_v15, %v5499_v4 }
 0x311   :  { %v13597_v48 = vpop.f32.mrf.mxu0  ;;  %v8925_v24 = vpop.f32.mrf.mxu1  ;;  %15061 = vst [vmem:[#allocation78_spill] sm:$0xff] %v13613_v34  ;;  %v6663_v2 = vsel %vm3256_vm11, %v13613_v34, 0.0  ;;  %v5882_v34 = vadd.f32 %v13425_v52, %v5491_v38  ;;  %v5515_v15 = vadd.f32 %v13459_v28, %v13234_v37  ;;  %v5507_v52 = vadd.f32 %v13463_v18, %v13240_v41  ;;  %v13650_v38 = vld [vmem:[#allocation3 + $0xf8] sm:$0xff] }
 0x312   :  { %15057 = vst [vmem:[#allocation74_spill] sm:$0xff] %v13597_v48  ;;  %v13611_v48 = vld [vmem:[#allocation3 + $0xd8] sm:$0xff]  ;;  %v5887_v4 = vadd.f32 %v13429_v42, %v5512_v0  ;;  %v5885_v37 = vadd.f32 %v13437_v23, %v5504_v54  ;;  %v5520_v23 = vadd.f32 %v13475_v19, %v13259_v11 }
 0x313   :  { %v13603_v33 = vpop.f32.mrf.mxu0  ;;  %v6352_v59 = vpop.f32.mrf.mxu1  ;;  %v5888_v18 = vadd.f32 %v13443_v63, %v5515_v15 }
 0x314   :  { %15059 = vst [vmem:[#allocation76_spill] sm:$0xff] %v13603_v33 }
 0x315   :  { %v13607_v46 = vpop.f32.mrf.mxu0  ;;  %v8926_v29 = vpop.f32.mrf.mxu1 }
 0x316   :  { %15060 = vst [vmem:[#allocation77_spill] sm:$0xff] %v13607_v46  ;;  %v6661_v46 = vsel %vm3256_vm11, %v13611_v48, 0.0 }
 0x317   :  { %v8891_v40 = vpop.f32.mrf.mxu0  ;;  %v6355_v33 = vpop.f32.mrf.mxu1  ;;  %v6662_v27 = vadd.f32 %v6661_v46, %v6660_v21  ;;  %v13640_v21 = vld [vmem:[#allocation3 + $0xf0] sm:$0xff] }
 0x318   :  { %v6182_v31 = vadd.f32 %v8891_v40, %v5883_v14  ;;  %v6667_v42 = vsel %vm3256_vm11, %v13640_v21, 0.0 }
 0x319   :  { %v6053_v17 = vpop.f32.mrf.mxu0  ;;  %v8929_v55 = vpop.f32.mrf.mxu1  ;;  %v6664_v47 = vadd.f32 %v6663_v2, %v6662_v27 }
 0x31a   :  { %v6481_v53 = vadd.f32 %v8925_v24, %v6182_v31  ;;  %v6180_v25 = vadd.f32 %v6053_v17, %v5881_v3 }
 0x31b   :  { %v8892_v9 = vpop.f32.mrf.mxu0  ;;  %v6368_v35 = vpop.f32.mrf.mxu1  ;;  %v6666_v13 = vadd.f32 %v6665_v1, %v6664_v47 }
 0x31c   :  { %6514 = vst.msk [vmem:[#allocation3 + $0x110] sm:$0xff] %vm3256_vm11, %v6481_v53  ;;  %v6479_v14 = vadd.f32 %v6352_v59, %v6180_v25  ;;  %v6183_v40 = vadd.f32 %v8892_v9, %v5884_v7  ;;  %v5886_v53 = vadd.f32 %v13449_v20, %v5507_v52  ;;  %v6669_v25 = vsel %vm3256_vm11, %v13650_v38, 0.0 }
 0x31d   :  { %v6056_v24 = vpop.f32.mrf.mxu0  ;;  %v8930_v12 = vpop.f32.mrf.mxu1  ;;  %v5531_v9 = vadd.f32 %v13483_v57, %v13264_v8  ;;  %v5544_v8 = vadd.f32 %v13495_v30, %v13277_v10 }
 0x31e   :  { %6512 = vst.msk [vmem:[#allocation3 + $0x100] sm:$0xff] %vm3256_vm11, %v6479_v14  ;;  %v6482_v3 = vadd.f32 %v8926_v29, %v6183_v40  ;;  %v6181_v46 = vadd.f32 %v6056_v24, %v5882_v34  ;;  %v5528_v29 = vadd.f32 %v13471_v50, %v13248_v39  ;;  %v5523_v40 = vadd.f32 %v13489_v5, %v13270_v51 }
 0x31f   :  { %v8895_v36 = vpop.f32.mrf.mxu0  ;;  %v6371_v59 = vpop.f32.mrf.mxu1  ;;  %v5889_v24 = vadd.f32 %v13461_v44, %v5520_v23  ;;  %v5536_v44 = vadd.f32 %v13501_v60, %v13285_v43  ;;  %v5895_v43 = vadd.f32 %v13477_v56, %v5544_v8  ;;  %v15062_v23 = vld [vmem:[#allocation47_spill] sm:$0xff] }
 0x320   :  { %6515 = vst.msk [vmem:[#allocation3 + $0x118] sm:$0xff] %vm3256_vm11, %v6482_v3  ;;  %v6480_v27 = vadd.f32 %v6355_v33, %v6181_v46  ;;  %v6186_v2 = vadd.f32 %v8895_v36, %v5887_v4  ;;  %v6668_v33 = vadd.f32 %v6667_v42, %v6666_v13  ;;  %v5891_v63 = vadd.f32 %v13455_v61, %v5528_v29 }
 0x321   :  { %v6069_v34 = vpop.f32.mrf.mxu0  ;;  %v8933_v28 = vpop.f32.mrf.mxu1  ;;  %v5892_v13 = vadd.f32 %v13465_v45, %v5531_v9 }
 0x322   :  { %6513 = vst.msk [vmem:[#allocation3 + $0x108] sm:$0xff] %vm3256_vm11, %v6480_v27  ;;  %v6485_v31 = vadd.f32 %v8929_v55, %v6186_v2  ;;  %v6184_v41 = vadd.f32 %v6069_v34, %v5885_v37  ;;  %v6670_v20 = vadd.f32 %v6669_v25, %v6668_v33  ;;  %v5890_v37 = vadd.f32 %v13473_v32, %v5523_v40 }
 0x323   :  { %v8896_v17 = vpop.f32.mrf.mxu0  ;;  %v6384_v0 = vpop.f32.mrf.mxu1  ;;  %v13674_v57 = vld [vmem:[#allocation3 + $0x110] sm:$0xff]  ;;  %v5893_v32 = vadd.f32 %v13485_v62, %v5536_v44  ;;  %v15069_v44 = vld [vmem:[#allocation49_spill] sm:$0xff] }
 0x324   :  { %6518 = vst.msk [vmem:[#allocation3 + $0x130] sm:$0xff] %vm3256_vm11, %v6485_v31  ;;  %v6483_v39 = vadd.f32 %v6368_v35, %v6184_v41  ;;  %v6187_v50 = vadd.f32 %v8896_v17, %v5888_v18  ;;  %v6675_v52 = vsel %vm3256_vm11, %v13674_v57, 0.0 }
 0x325   :  { %v13660_v7 = vld [vmem:[#allocation3 + $0x100] sm:$0xff]  ;;  %v6072_v55 = vpop.f32.mrf.mxu0  ;;  %v8934_v1 = vpop.f32.mrf.mxu1 }
 0x326   :  { %v6671_v11 = vsel %vm3256_vm11, %v13660_v7, 0.0  ;;  %6516 = vst.msk [vmem:[#allocation3 + $0x120] sm:$0xff] %vm3256_vm11, %v6483_v39  ;;  %v6486_v19 = vadd.f32 %v8930_v12, %v6187_v50  ;;  %v6185_v35 = vadd.f32 %v6072_v55, %v5886_v53  ;;  %v5560_v39 = vadd.f32 %v15062_v23, %v13315_v22 }
 0x327   :  { %v8899_v54 = vpop.f32.mrf.mxu0  ;;  %v6387_v14 = vpop.f32.mrf.mxu1  ;;  %v6672_v15 = vadd.f32 %v6671_v11, %v6670_v20  ;;  %v13684_v10 = vld [vmem:[#allocation3 + $0x118] sm:$0xff]  ;;  %v15064_v11 = vld [vmem:[#allocation7_spill] sm:$0xff] }
 0x328   :  { %6519 = vst.msk [vmem:[#allocation3 + $0x138] sm:$0xff] %vm3256_vm11, %v6486_v19  ;;  %v6484_v61 = vadd.f32 %v6371_v59, %v6185_v35  ;;  %v6190_v47 = vadd.f32 %v8899_v54, %v5891_v63  ;;  %v6677_v42 = vsel %vm3256_vm11, %v13684_v10, 0.0  ;;  %v15065_v19 = vld [vmem:[#allocation22_spill] sm:$0xff] }
 0x329   :  { %v13676_v12 = vld [vmem:[#allocation3 + $0x108] sm:$0xff]  ;;  %v6085_v3 = vpop.f32.mrf.mxu0  ;;  %v8937_v46 = vpop.f32.mrf.mxu1  ;;  %v5552_v35 = vadd.f32 %v15065_v19, %v15064_v11 }
 0x32a   :  { %v6673_v4 = vsel %vm3256_vm11, %v13676_v12, 0.0  ;;  %6517 = vst.msk [vmem:[#allocation3 + $0x128] sm:$0xff] %vm3256_vm11, %v6484_v61  ;;  %v6489_v51 = vadd.f32 %v8933_v28, %v6190_v47  ;;  %v6188_v5 = vadd.f32 %v6085_v3, %v5889_v24  ;;  %v5547_v28 = vadd.f32 %v13507_v49, %v13294_v6  ;;  %v15066_v24 = vld [vmem:[#allocation43_spill] sm:$0xff] }
 0x32b   :  { %v6674_v30 = vadd.f32 %v6673_v4, %v6672_v15  ;;  %v8900_v36 = vpop.f32.mrf.mxu0  ;;  %v6400_v59 = vpop.f32.mrf.mxu1  ;;  %v13706_v50 = vld [vmem:[#allocation3 + $0x130] sm:$0xff]  ;;  %v15067_v4 = vld [vmem:[#allocation44_spill] sm:$0xff] }
 0x32c   :  { %6522 = vst.msk [vmem:[#allocation3 + $0x150] sm:$0xff] %vm3256_vm11, %v6489_v51  ;;  %v6487_v27 = vadd.f32 %v6384_v0, %v6188_v5  ;;  %v6191_v2 = vadd.f32 %v8900_v36, %v5892_v13  ;;  %v5539_v0 = vadd.f32 %v13511_v16, %v13306_v26  ;;  %v6683_v40 = vsel %vm3256_vm11, %v13706_v50, 0.0  ;;  %v15068_v13 = vld [vmem:[#allocation6_spill] sm:$0xff] }
 0x32d   :  { %v6676_v29 = vadd.f32 %v6675_v52, %v6674_v30  ;;  %v13690_v34 = vld [vmem:[#allocation3 + $0x120] sm:$0xff]  ;;  %v6088_v45 = vpop.f32.mrf.mxu0  ;;  %v8938_v60 = vpop.f32.mrf.mxu1  ;;  %v5899_v51 = vadd.f32 %v15067_v4, %v5560_v39  ;;  %v5563_v30 = vadd.f32 %v15069_v44, %v15068_v13 }
 0x32e   :  { %6520 = vst.msk [vmem:[#allocation3 + $0x140] sm:$0xff] %vm3256_vm11, %v6487_v27  ;;  %v6490_v31 = vadd.f32 %v8934_v1, %v6191_v2  ;;  %v6189_v41 = vadd.f32 %v6088_v45, %v5890_v37  ;;  %v6679_v56 = vsel %vm3256_vm11, %v13690_v34, 0.0  ;;  %v15063_v1 = vld [vmem:[#allocation42_spill] sm:$0xff]  ;;  %v5894_v8 = vadd.f32 %v15066_v24, %v5539_v0  ;;  %v15070_v37 = vld [vmem:[#allocation45_spill] sm:$0xff] }
 0x32f   :  { %v6678_v18 = vadd.f32 %v6677_v42, %v6676_v29  ;;  %v8903_v33 = vpop.f32.mrf.mxu0  ;;  %v6403_v17 = vpop.f32.mrf.mxu1  ;;  %v5896_v9 = vadd.f32 %v15063_v1, %v5547_v28  ;;  %v13716_v22 = vld [vmem:[#allocation3 + $0x138] sm:$0xff]  ;;  %v5897_v29 = vadd.f32 %v15070_v37, %v5552_v35  ;;  %v15081_v13 = vld [vmem:[#allocation57_spill] sm:$0xff] }
 0x330   :  { %6523 = vst.msk [vmem:[#allocation3 + $0x158] sm:$0xff] %vm3256_vm11, %v6490_v31  ;;  %v6488_v6 = vadd.f32 %v6387_v14, %v6189_v41  ;;  %v6194_v49 = vadd.f32 %v8903_v33, %v5895_v43  ;;  %v6685_v36 = vsel %vm3256_vm11, %v13716_v22, 0.0  ;;  %v15071_v43 = vld [vmem:[#allocation5_spill] sm:$0xff]  ;;  %v15072_v28 = vld [vmem:[#allocation52_spill] sm:$0xff] }
 0x331   :  { %v6680_v53 = vadd.f32 %v6679_v56, %v6678_v18  ;;  %v13708_v25 = vld [vmem:[#allocation3 + $0x128] sm:$0xff]  ;;  %v6101_v62 = vpop.f32.mrf.mxu0  ;;  %v8941_v55 = vpop.f32.mrf.mxu1  ;;  %v5555_v42 = vadd.f32 %v15072_v28, %v15071_v43  ;;  %v15073_v33 = vld [vmem:[#allocation25_spill] sm:$0xff]  ;;  %v15084_v43 = vld [vmem:[#allocation59_spill] sm:$0xff] }
 0x332   :  { %v6681_v26 = vsel %vm3256_vm11, %v13708_v25, 0.0  ;;  %6521 = vst.msk [vmem:[#allocation3 + $0x148] sm:$0xff] %vm3256_vm11, %v6488_v6  ;;  %v6493_v16 = vadd.f32 %v8937_v46, %v6194_v49  ;;  %v6192_v63 = vadd.f32 %v6101_v62, %v5893_v32  ;;  %v15074_v32 = vld [vmem:[#allocation24_spill] sm:$0xff] }
 0x333   :  { %v6682_v20 = vadd.f32 %v6681_v26, %v6680_v53  ;;  %v8904_v54 = vpop.f32.mrf.mxu0  ;;  %v6416_v14 = vpop.f32.mrf.mxu1  ;;  %v5576_v0 = vadd.f32 %v15074_v32, %v15073_v33  ;;  %v15075_v26 = vld [vmem:[#allocation46_spill] sm:$0xff] }
 0x334   :  { %6526 = vst.msk [vmem:[#allocation3 + $0x170] sm:$0xff] %vm3256_vm11, %v6493_v16  ;;  %v6491_v61 = vadd.f32 %v6400_v59, %v6192_v63  ;;  %v6195_v47 = vadd.f32 %v8904_v54, %v5896_v9  ;;  %v15076_v16 = vld [vmem:[#allocation27_spill] sm:$0xff]  ;;  %v15077_v63 = vld [vmem:[#allocation54_spill] sm:$0xff] }
 0x335   :  { %v6684_v15 = vadd.f32 %v6683_v40, %v6682_v20  ;;  %v13722_v3 = vld [vmem:[#allocation3 + $0x140] sm:$0xff]  ;;  %v6104_v46 = vpop.f32.mrf.mxu0  ;;  %v8942_v5 = vpop.f32.mrf.mxu1  ;;  %v5568_v1 = vadd.f32 %v15077_v63, %v15076_v16  ;;  %v15086_v33 = vld [vmem:[#allocation62_spill] sm:$0xff]  ;;  %v15088_v16 = vld [vmem:[#allocation31_spill] sm:$0xff] }
 0x336   :  { %6524 = vst.msk [vmem:[#allocation3 + $0x160] sm:$0xff] %vm3256_vm11, %v6491_v61  ;;  %v6494_v52 = vadd.f32 %v8938_v60, %v6195_v47  ;;  %v6193_v59 = vadd.f32 %v6104_v46, %v5894_v8  ;;  %v6687_v31 = vsel %vm3256_vm11, %v13722_v3, 0.0  ;;  %v13738_v60 = vld [vmem:[#allocation3 + $0x150] sm:$0xff]  ;;  %v15078_v61 = vld [vmem:[#allocation48_spill] sm:$0xff] }
 0x337   :  { %v6686_v27 = vadd.f32 %v6685_v36, %v6684_v15  ;;  %v8907_v2 = vpop.f32.mrf.mxu0  ;;  %v6419_v45 = vpop.f32.mrf.mxu1  ;;  %v13748_v9 = vld [vmem:[#allocation3 + $0x158] sm:$0xff]  ;;  %v6691_v20 = vsel %vm3256_vm11, %v13738_v60, 0.0  ;;  %v15079_v15 = vld [vmem:[#allocation21_spill] sm:$0xff] }
 0x338   :  { %6527 = vst.msk [vmem:[#allocation3 + $0x178] sm:$0xff] %vm3256_vm11, %v6494_v52  ;;  %v6492_v41 = vadd.f32 %v6403_v17, %v6193_v59  ;;  %v6198_v18 = vadd.f32 %v8907_v2, %v5899_v51  ;;  %v5900_v17 = vadd.f32 %v15075_v26, %v5563_v30  ;;  %v5903_v46 = vadd.f32 %v15079_v15, %v5576_v0  ;;  %v15080_v51 = vld [vmem:[#allocation26_spill] sm:$0xff]  ;;  %v15089_v63 = vld [vmem:[#allocation64_spill] sm:$0xff] }
 0x339   :  { %v6688_v56 = vadd.f32 %v6687_v31, %v6686_v27  ;;  %v13740_v6 = vld [vmem:[#allocation3 + $0x148] sm:$0xff]  ;;  %v6117_v49 = vpop.f32.mrf.mxu0  ;;  %v8945_v23 = vpop.f32.mrf.mxu1  ;;  %v5579_v44 = vadd.f32 %v15081_v13, %v15080_v51  ;;  %v6693_v30 = vsel %vm3256_vm11, %v13748_v9, 0.0  ;;  %v15091_v51 = vld [vmem:[#allocation55_spill] sm:$0xff] }
 0x33a   :  { %v6689_v39 = vsel %vm3256_vm11, %v13740_v6, 0.0  ;;  %6525 = vst.msk [vmem:[#allocation3 + $0x168] sm:$0xff] %vm3256_vm11, %v6492_v41  ;;  %v6497_v53 = vadd.f32 %v8941_v55, %v6198_v18  ;;  %v6196_v62 = vadd.f32 %v6117_v49, %v5897_v29  ;;  %v5898_v55 = vadd.f32 %v15078_v61, %v5555_v42  ;;  %v15082_v27 = vld [vmem:[#allocation50_spill] sm:$0xff]  ;;  %v15083_v29 = vld [vmem:[#allocation8_spill] sm:$0xff] }
 0x33b   :  { %v6690_v11 = vadd.f32 %v6689_v39, %v6688_v56  ;;  %v8908_v19 = vpop.f32.mrf.mxu0  ;;  %v6432_v35 = vpop.f32.mrf.mxu1  ;;  %v5901_v2 = vadd.f32 %v15082_v27, %v5568_v1  ;;  %v5571_v28 = vadd.f32 %v15084_v43, %v15083_v29  ;;  %v15085_v18 = vld [vmem:[#allocation30_spill] sm:$0xff]  ;;  %v5584_v1 = vadd.f32 %v15089_v63, %v15088_v16 }
 0x33c   :  { %6530 = vst.msk [vmem:[#allocation3 + $0x190] sm:$0xff] %vm3256_vm11, %v6497_v53  ;;  %v6495_v54 = vadd.f32 %v6416_v14, %v6196_v62  ;;  %v6199_v40 = vadd.f32 %v8908_v19, %v5900_v17  ;;  %v5592_v32 = vadd.f32 %v15086_v33, %v15085_v18  ;;  %v15087_v17 = vld [vmem:[#allocation23_spill] sm:$0xff]  ;;  %v15094_v29 = vld [vmem:[#allocation58_spill] sm:$0xff] }
 0x33d   :  { %v6692_v47 = vadd.f32 %v6691_v20, %v6690_v11  ;;  %v13754_v24 = vld [vmem:[#allocation3 + $0x160] sm:$0xff]  ;;  %v6120_v8 = vpop.f32.mrf.mxu0  ;;  %v8946_v4 = vpop.f32.mrf.mxu1  ;;  %v5905_v43 = vadd.f32 %v15094_v29, %v5584_v1  ;;  %v15099_v1 = vld [vmem:[#allocation60_spill] sm:$0xff] }
 0x33e   :  { %6528 = vst.msk [vmem:[#allocation3 + $0x180] sm:$0xff] %vm3256_vm11, %v6495_v54  ;;  %v6498_v36 = vadd.f32 %v8942_v5, %v6199_v40  ;;  %v6197_v14 = vadd.f32 %v6120_v8, %v5898_v55  ;;  %v6695_v42 = vsel %vm3256_vm11, %v13754_v24, 0.0  ;;  %v13770_v5 = vld [vmem:[#allocation3 + $0x170] sm:$0xff]  ;;  %v5907_v13 = vadd.f32 %v15091_v51, %v5592_v32 }
 0x33f   :  { %v6694_v52 = vadd.f32 %v6693_v30, %v6692_v47  ;;  %v8911_v59 = vpop.f32.mrf.mxu0  ;;  %v6435_v37 = vpop.f32.mrf.mxu1  ;;  %v13780_v11 = vld [vmem:[#allocation3 + $0x178] sm:$0xff]  ;;  %v6699_v40 = vsel %vm3256_vm11, %v13770_v5, 0.0  ;;  %v15090_v47 = vld [vmem:[#allocation53_spill] sm:$0xff] }
 0x340   :  { %6531 = vst.msk [vmem:[#allocation3 + $0x198] sm:$0xff] %vm3256_vm11, %v6498_v36  ;;  %v6496_v31 = vadd.f32 %v6419_v45, %v6197_v14  ;;  %v6202_v41 = vadd.f32 %v8911_v59, %v5903_v46  ;;  %v5904_v45 = vadd.f32 %v15087_v17, %v5579_v44  ;;  %v15092_v30 = vld [vmem:[#allocation12_spill] sm:$0xff]  ;;  %v15093_v36 = vld [vmem:[#allocation67_spill] sm:$0xff] }
 0x341   :  { %v6696_v0 = vadd.f32 %v6695_v42, %v6694_v52  ;;  %v13772_v56 = vld [vmem:[#allocation3 + $0x168] sm:$0xff]  ;;  %v6133_v49 = vpop.f32.mrf.mxu0  ;;  %v8949_v39 = vpop.f32.mrf.mxu1  ;;  %v5595_v14 = vadd.f32 %v15093_v36, %v15092_v30  ;;  %v6701_v52 = vsel %vm3256_vm11, %v13780_v11, 0.0 }
 0x342   :  { %v6697_v53 = vsel %vm3256_vm11, %v13772_v56, 0.0  ;;  %6529 = vst.msk [vmem:[#allocation3 + $0x188] sm:$0xff] %vm3256_vm11, %v6496_v31  ;;  %v6501_v62 = vadd.f32 %v8945_v23, %v6202_v41  ;;  %v6200_v26 = vadd.f32 %v6133_v49, %v5901_v2  ;;  %v5902_v23 = vadd.f32 %v15090_v47, %v5571_v28  ;;  %v15095_v42 = vld [vmem:[#allocation10_spill] sm:$0xff]  ;;  %v15098_v49 = vld [vmem:[#allocation72_spill] sm:$0xff] }
 0x343   :  { %v6698_v19 = vadd.f32 %v6697_v53, %v6696_v0  ;;  %v8912_v20 = vpop.f32.mrf.mxu0  ;;  %v6448_v54 = vpop.f32.mrf.mxu1  ;;  %v15096_v31 = vld [vmem:[#allocation70_spill] sm:$0xff]  ;;  %v15097_v0 = vld [vmem:[#allocation33_spill] sm:$0xff] }
 0x344   :  { %6534 = vst.msk [vmem:[#allocation3 + $0x1b0] sm:$0xff] %vm3256_vm11, %v6501_v62  ;;  %v6499_v61 = vadd.f32 %v6432_v35, %v6200_v26  ;;  %v6203_v55 = vadd.f32 %v8912_v20, %v5904_v45  ;;  %v5587_v41 = vadd.f32 %v15096_v31, %v15095_v42  ;;  %v5608_v53 = vadd.f32 %v15098_v49, %v15097_v0  ;;  %v15101_v20 = vld [vmem:[#allocation74_spill] sm:$0xff]  ;;  %v15108_v0 = vld [vmem:[#allocation77_spill] sm:$0xff] }
 0x345   :  { %v6700_v8 = vadd.f32 %v6699_v40, %v6698_v19  ;;  %v13786_v15 = vld [vmem:[#allocation3 + $0x180] sm:$0xff]  ;;  %v6136_v46 = vpop.f32.mrf.mxu0  ;;  %v8950_v44 = vpop.f32.mrf.mxu1  ;;  %v5908_v19 = vadd.f32 %v15099_v1, %v5595_v14 }
 0x346   :  { %6532 = vst.msk [vmem:[#allocation3 + $0x1a0] sm:$0xff] %vm3256_vm11, %v6499_v61  ;;  %v6502_v59 = vadd.f32 %v8946_v4, %v6203_v55  ;;  %v6201_v35 = vadd.f32 %v6136_v46, %v5902_v23  ;;  %v6703_v18 = vsel %vm3256_vm11, %v13786_v15, 0.0  ;;  %v13802_v4 = vld [vmem:[#allocation3 + $0x190] sm:$0xff] }
 0x347   :  { %v6702_v27 = vadd.f32 %v6701_v52, %v6700_v8  ;;  %v8915_v2 = vpop.f32.mrf.mxu0  ;;  %v6451_v28 = vpop.f32.mrf.mxu1  ;;  %v13812_v61 = vld [vmem:[#allocation3 + $0x198] sm:$0xff]  ;;  %v6707_v8 = vsel %vm3256_vm11, %v13802_v4, 0.0  ;;  %v15103_v52 = vld [vmem:[#allocation65_spill] sm:$0xff] }
 0x348   :  { %6535 = vst.msk [vmem:[#allocation3 + $0x1b8] sm:$0xff] %vm3256_vm11, %v6502_v59  ;;  %v6500_v33 = vadd.f32 %v6435_v37, %v6201_v35  ;;  %v6206_v32 = vadd.f32 %v8915_v2, %v5907_v13  ;;  %v15100_v37 = vld [vmem:[#allocation35_spill] sm:$0xff]  ;;  %v5911_v59 = vadd.f32 %v15103_v52, %v5608_v53  ;;  %v15104_v35 = vld [vmem:[#allocation13_spill] sm:$0xff]  ;;  %v6709_v29 = vsel %vm3256_vm11, %v13812_v61, 0.0 }
 0x349   :  { %v6704_v62 = vadd.f32 %v6703_v18, %v6702_v27  ;;  %v13804_v26 = vld [vmem:[#allocation3 + $0x188] sm:$0xff]  ;;  %v6149_v17 = vpop.f32.mrf.mxu0  ;;  %v5600_v40 = vadd.f32 %v15101_v20, %v15100_v37  ;;  %v8953_v23 = vpop.f32.mrf.mxu1  ;;  %v15102_v13 = vld [vmem:[#allocation63_spill] sm:$0xff]  ;;  %v15105_v27 = vld [vmem:[#allocation76_spill] sm:$0xff] }
 0x34a   :  { %v6705_v45 = vsel %vm3256_vm11, %v13804_v26, 0.0  ;;  %6533 = vst.msk [vmem:[#allocation3 + $0x1a8] sm:$0xff] %vm3256_vm11, %v6500_v33  ;;  %v6505_v16 = vadd.f32 %v8949_v39, %v6206_v32  ;;  %v6204_v63 = vadd.f32 %v6149_v17, %v5905_v43  ;;  %v5906_v39 = vadd.f32 %v15102_v13, %v5587_v41  ;;  %v15106_v41 = vld [vmem:[#allocation68_spill] sm:$0xff]  ;;  %v15107_v32 = vld [vmem:[#allocation37_spill] sm:$0xff]  ;;  %v15109_v20 = vld [vmem:[#allocation71_spill] sm:$0xff] }
 0x34b   :  { %v6706_v55 = vadd.f32 %v6705_v45, %v6704_v62  ;;  %v8916_v47 = vpop.f32.mrf.mxu0  ;;  %v5611_v2 = vadd.f32 %v15105_v27, %v15104_v35  ;;  %v6464_v18 = vpop.f32.mrf.mxu1  ;;  %v5909_v33 = vadd.f32 %v15106_v41, %v5600_v40  ;;  %v5603_v49 = vadd.f32 %v15108_v0, %v15107_v32  ;;  %v13832_v45 = vld [vmem:[#allocation3 + $0x1b0] sm:$0xff] }
 0x34c   :  { %6538 = vst.msk [vmem:[#allocation3 + $0x1d0] sm:$0xff] %vm3256_vm11, %v6505_v16  ;;  %v6503_v46 = vadd.f32 %v6448_v54, %v6204_v63  ;;  %v6207_v51 = vadd.f32 %v8916_v47, %v5908_v19 }
 0x34d   :  { %v6708_v30 = vadd.f32 %v6707_v8, %v6706_v55  ;;  %v13818_v36 = vld [vmem:[#allocation3 + $0x1a0] sm:$0xff]  ;;  %v6152_v14 = vpop.f32.mrf.mxu0  ;;  %v5912_v40 = vadd.f32 %v15109_v20, %v5611_v2 }
 0x34e   :  { %6536 = vst.msk [vmem:[#allocation3 + $0x1c0] sm:$0xff] %vm3256_vm11, %v6503_v46  ;;  %v6506_v43 = vadd.f32 %v8950_v44, %v6207_v51  ;;  %v6205_v42 = vadd.f32 %v6152_v14, %v5906_v39  ;;  %v6711_v53 = vsel %vm3256_vm11, %v13818_v36, 0.0  ;;  %v6715_v46 = vsel %vm3256_vm11, %v13832_v45, 0.0  ;;  %v15110_v39 = vld [vmem:[#allocation73_spill] sm:$0xff] }
 0x34f   :  { %v6710_v54 = vadd.f32 %v6709_v29, %v6708_v30  ;;  %v8919_v31 = vpop.f32.mrf.mxu0  ;;  %v13840_v55 = vld [vmem:[#allocation3 + $0x1b8] sm:$0xff]  ;;  %v5910_v30 = vadd.f32 %v15110_v39, %v5603_v49 }
 0x350   :  { %6539 = vst.msk [vmem:[#allocation3 + $0x1d8] sm:$0xff] %vm3256_vm11, %v6506_v43  ;;  %v6504_v62 = vadd.f32 %v6451_v28, %v6205_v42  ;;  %v6210_v17 = vadd.f32 %v8919_v31, %v5911_v59  ;;  %v8954_v28 = vpop.f32.mrf.mxu1  ;;  %v6717_v59 = vsel %vm3256_vm11, %v13840_v55, 0.0 }
 0x351   :  { %v6712_v16 = vadd.f32 %v6711_v53, %v6710_v54  ;;  %v13834_v44 = vld [vmem:[#allocation3 + $0x1a8] sm:$0xff]  ;;  %v6165_v63 = vpop.f32.mrf.mxu0 }
 0x352   :  { %v6713_v1 = vsel %vm3256_vm11, %v13834_v44, 0.0  ;;  %6537 = vst.msk [vmem:[#allocation3 + $0x1c8] sm:$0xff] %vm3256_vm11, %v6504_v62  ;;  %v6509_v19 = vadd.f32 %v8953_v23, %v6210_v17  ;;  %v6208_v37 = vadd.f32 %v6165_v63, %v5909_v33  ;;  %v6467_v29 = vpop.f32.mrf.mxu1 }
 0x353   :  { %v6714_v47 = vadd.f32 %v6713_v1, %v6712_v16  ;;  %v8920_v8 = vpop.f32.mrf.mxu0  ;;  %v13854_v54 = vld [vmem:[#allocation3 + $0x1d0] sm:$0xff] }
 0x354   :  { %6542 = vst.msk [vmem:[#allocation3 + $0x1f0] sm:$0xff] %vm3256_vm11, %v6509_v19  ;;  %v6507_v51 = vadd.f32 %v6464_v18, %v6208_v37  ;;  %v6211_v13 = vadd.f32 %v8920_v8, %v5912_v40  ;;  %v6723_v0 = vsel %vm3256_vm11, %v13854_v54, 0.0 }
 0x355   :  { %v6716_v14 = vadd.f32 %v6715_v46, %v6714_v47  ;;  %v13846_v52 = vld [vmem:[#allocation3 + $0x1c0] sm:$0xff]  ;;  %v6168_v23 = vpop.f32.mrf.mxu0 }
 0x356   :  { %6540 = vst.msk [vmem:[#allocation3 + $0x1e0] sm:$0xff] %vm3256_vm11, %v6507_v51  ;;  %v6510_v35 = vadd.f32 %v8954_v28, %v6211_v13  ;;  %v6209_v27 = vadd.f32 %v6168_v23, %v5910_v30  ;;  %v6719_v43 = vsel %vm3256_vm11, %v13846_v52, 0.0 }
 0x357   :  { %v6718_v2 = vadd.f32 %v6717_v59, %v6716_v14  ;;  %v13861_v33 = vld [vmem:[#allocation3 + $0x1d8] sm:$0xff] }
 0x358   :  { %6543 = vst.msk [vmem:[#allocation3 + $0x1f8] sm:$0xff] %vm3256_vm11, %v6510_v35  ;;  %v6508_v42 = vadd.f32 %v6467_v29, %v6209_v27  ;;  %v6725_v53 = vsel %vm3256_vm11, %v13861_v33, 0.0  ;;  %v13885_v35 = vld [vmem:[#allocation3] sm:$0xff] }
 0x359   :  { %v6720_v31 = vadd.f32 %v6719_v43, %v6718_v2  ;;  %v13856_v18 = vld [vmem:[#allocation3 + $0x1c8] sm:$0xff]  ;;  %v13893_v43 = vld [vmem:[#allocation3 + $0x10] sm:$0xff] }
 0x35a   :  { %v6721_v41 = vsel %vm3256_vm11, %v13856_v18, 0.0  ;;  %6541 = vst.msk [vmem:[#allocation3 + $0x1e8] sm:$0xff] %vm3256_vm11, %v6508_v42  ;;  %v13889_v2 = vld [vmem:[#allocation3 + $0x8] sm:$0xff] }
 0x35b   :  { %v6722_v32 = vadd.f32 %v6721_v41, %v6720_v31  ;;  %v13875_v37 = vld [vmem:[#allocation3 + $0x1f0] sm:$0xff]  ;;  %v15111_v31 = vld [vmem:[#allocation28_spill] sm:$0xff] }
 0x35c   :  { %v6731_v40 = vsel %vm3256_vm11, %v13875_v37, 0.0 }
 0x35d   :  { %v6724_v49 = vadd.f32 %v6723_v0, %v6722_v32  ;;  %v13867_v62 = vld [vmem:[#allocation3 + $0x1e0] sm:$0xff] }
 0x35e   :  { %v6727_v63 = vsel %vm3256_vm11, %v13867_v62, 0.0 }
 0x35f   :  { %v6726_v17 = vadd.f32 %v6725_v53, %v6724_v49  ;;  %v13879_v47 = vld [vmem:[#allocation3 + $0x1f8] sm:$0xff]  ;;  %v15112_v49 = vld [vmem:[#allocation29_spill] sm:$0xff] }
 0x360   :  { %v6733_v8 = vsel %vm3256_vm11, %v13879_v47, 0.0 }
 0x361   :  { %v13869_v16 = vld [vmem:[#allocation3 + $0x1e8] sm:$0xff]  ;;  %v6728_v1 = vadd.f32 %v6727_v63, %v6726_v17  ;;  %v15113_v63 = vld [vmem:[#allocation9_spill] sm:$0xff] }
 0x362   :  { %v6729_v19 = vsel %vm3256_vm11, %v13869_v16, 0.0 }
 0x363   :  { %v6730_v20 = vadd.f32 %v6729_v19, %v6728_v1 }
 0x365   :  { %v6732_v28 = vadd.f32 %v6731_v40, %v6730_v20 }
 0x367   :  { %v6734_v46 = vadd.f32 %v6733_v8, %v6732_v28  ;;  %v15114_v8 = vld [vmem:[#allocation32_spill] sm:$0xff] }
 0x369   :  { %v6735_v51 = vrot.slane %v6734_v46, 4 }
 0x36b   :  { %v6736_v13 = vadd.f32 %v6735_v51, %v6734_v46 }
 0x36d   :  { %v6737_v39 = vrot.slane %v6736_v13, 2 }
 0x36f   :  { %v6738_v30 = vadd.f32 %v6737_v39, %v6736_v13 }
 0x371   :  { %v6739_v14 = vrot.slane %v6738_v30, 1 }
 0x373   :  { %v6740_v23 = vadd.f32 %v6739_v14, %v6738_v30  ;;  %v15115_v30 = vld [vmem:[#allocation11_spill] sm:$0xff] }
 0x375   :  { %v13883_v59 = vmul.f32 0.001953125, %v6740_v23 }
 0x377   :  { %v6742_v27 = vsub.f32 %v13885_v35, %v13883_v59  ;;  %v6743_v29 = vsub.f32 %v13889_v2, %v13883_v59  ;;  %v6744_v42 = vsub.f32 %v13893_v43, %v13883_v59  ;;  %v6745_v41 = vsub.f32 %v15111_v31, %v13883_v59 }
 0x378   :  { %v6746_v53 = vsub.f32 %v15112_v49, %v13883_v59  ;;  %v6747_v1 = vsub.f32 %v15113_v63, %v13883_v59  ;;  %v6748_v46 = vsub.f32 %v15114_v8, %v13883_v59  ;;  %v6749_v14 = vsub.f32 %v15115_v30, %v13883_v59  ;;  %v15117_v49 = vld [vmem:[#allocation36_spill] sm:$0xff] }
 0x379   :  { %v6806_v32 = vmul.f32 %v6742_v27, %v6742_v27  ;;  %v6807_v0 = vmul.f32 %v6743_v29, %v6743_v29  ;;  %v6808_v17 = vmul.f32 %v6744_v42, %v6744_v42  ;;  %v6809_v19 = vmul.f32 %v6745_v41, %v6745_v41  ;;  %v15116_v42 = vld [vmem:[#allocation34_spill] sm:$0xff] }
 0x37a   :  { %v6810_v51 = vmul.f32 %v6746_v53, %v6746_v53  ;;  %v6811_v23 = vmul.f32 %v6747_v1, %v6747_v1  ;;  %v6750_v31 = vsub.f32 %v15116_v42, %v13883_v59  ;;  %v6812_v41 = vmul.f32 %v6748_v46, %v6748_v46 }
 0x37b   :  { %v6870_v20 = vsel %vm3256_vm11, %v6806_v32, 0.0  ;;  %v6871_v40 = vsel %vm3256_vm11, %v6807_v0, 0.0  ;;  %v6873_v13 = vsel %vm3256_vm11, %v6808_v17, 0.0  ;;  %v6875_v27 = vsel %vm3256_vm11, %v6809_v19, 0.0 }
 0x37c   :  { %v6872_v28 = vadd.f32 %v6871_v40, %v6870_v20  ;;  %v6877_v32 = vsel %vm3256_vm11, %v6810_v51, 0.0  ;;  %v6751_v53 = vsub.f32 %v15117_v49, %v13883_v59  ;;  %v6813_v63 = vmul.f32 %v6749_v14, %v6749_v14  ;;  %v15118_v40 = vld [vmem:[#allocation38_spill] sm:$0xff] }
 0x37d   :  { %v6879_v17 = vsel %vm3256_vm11, %v6811_v23, 0.0  ;;  %v6752_v1 = vsub.f32 %v15118_v40, %v13883_v59  ;;  %v6881_v19 = vsel %vm3256_vm11, %v6812_v41, 0.0 }
 0x37e   :  { %v6874_v39 = vadd.f32 %v6873_v13, %v6872_v28  ;;  %v6814_v28 = vmul.f32 %v6750_v31, %v6750_v31  ;;  %v15119_v13 = vld [vmem:[#allocation14_spill] sm:$0xff]  ;;  %v6883_v51 = vsel %vm3256_vm11, %v6813_v63, 0.0 }
 0x37f   :  { %v6753_v46 = vsub.f32 %v15119_v13, %v13883_v59 }
 0x380   :  { %v6876_v29 = vadd.f32 %v6875_v27, %v6874_v39  ;;  %v6815_v39 = vmul.f32 %v6751_v53, %v6751_v53  ;;  %v15120_v27 = vld [vmem:[#allocation39_spill] sm:$0xff]  ;;  %v6885_v23 = vsel %vm3256_vm11, %v6814_v28, 0.0 }
 0x381   :  { %v6754_v14 = vsub.f32 %v15120_v27, %v13883_v59 }
 0x382   :  { %v6878_v0 = vadd.f32 %v6877_v32, %v6876_v29  ;;  %v6816_v29 = vmul.f32 %v6752_v1, %v6752_v1  ;;  %v15121_v32 = vld [vmem:[#allocation40_spill] sm:$0xff]  ;;  %v6887_v41 = vsel %vm3256_vm11, %v6815_v39, 0.0 }
 0x383   :  { %v6755_v31 = vsub.f32 %v15121_v32, %v13883_v59 }
 0x384   :  { %v6880_v20 = vadd.f32 %v6879_v17, %v6878_v0  ;;  %v6817_v0 = vmul.f32 %v6753_v46, %v6753_v46  ;;  %v15122_v17 = vld [vmem:[#allocation17_spill] sm:$0xff]  ;;  %v6889_v63 = vsel %vm3256_vm11, %v6816_v29, 0.0 }
 0x385   :  { %v6756_v53 = vsub.f32 %v15122_v17, %v13883_v59 }
 0x386   :  { %v6882_v8 = vadd.f32 %v6881_v19, %v6880_v20  ;;  %v6818_v20 = vmul.f32 %v6754_v14, %v6754_v14  ;;  %v15123_v19 = vld [vmem:[#allocation16_spill] sm:$0xff]  ;;  %v6891_v28 = vsel %vm3256_vm11, %v6817_v0, 0.0 }
 0x387   :  { %v6757_v1 = vsub.f32 %v15123_v19, %v13883_v59 }
 0x388   :  { %v6884_v30 = vadd.f32 %v6883_v51, %v6882_v8  ;;  %v6819_v8 = vmul.f32 %v6755_v31, %v6755_v31  ;;  %v15124_v51 = vld [vmem:[#allocation15_spill] sm:$0xff]  ;;  %v6893_v39 = vsel %vm3256_vm11, %v6818_v20, 0.0 }
 0x389   :  { %v6758_v46 = vsub.f32 %v15124_v51, %v13883_v59 }
 0x38a   :  { %v6886_v42 = vadd.f32 %v6885_v23, %v6884_v30  ;;  %v6820_v30 = vmul.f32 %v6756_v53, %v6756_v53  ;;  %v15125_v23 = vld [vmem:[#allocation41_spill] sm:$0xff]  ;;  %v6895_v29 = vsel %vm3256_vm11, %v6819_v8, 0.0 }
 0x38b   :  { %v6759_v14 = vsub.f32 %v15125_v23, %v13883_v59 }
 0x38c   :  { %v6888_v49 = vadd.f32 %v6887_v41, %v6886_v42  ;;  %v6821_v42 = vmul.f32 %v6757_v1, %v6757_v1  ;;  %v15126_v41 = vld [vmem:[#allocation18_spill] sm:$0xff]  ;;  %v6897_v0 = vsel %vm3256_vm11, %v6820_v30, 0.0 }
 0x38d   :  { %v6760_v31 = vsub.f32 %v15126_v41, %v13883_v59 }
 0x38e   :  { %v6890_v40 = vadd.f32 %v6889_v63, %v6888_v49  ;;  %v6822_v49 = vmul.f32 %v6758_v46, %v6758_v46  ;;  %v15127_v63 = vld [vmem:[#allocation19_spill] sm:$0xff]  ;;  %v6899_v20 = vsel %vm3256_vm11, %v6821_v42, 0.0 }
 0x38f   :  { %v6761_v53 = vsub.f32 %v15127_v63, %v13883_v59 }
 0x390   :  { %v6892_v13 = vadd.f32 %v6891_v28, %v6890_v40  ;;  %v6823_v40 = vmul.f32 %v6759_v14, %v6759_v14  ;;  %v15128_v28 = vld [vmem:[#allocation20_spill] sm:$0xff]  ;;  %v6901_v8 = vsel %vm3256_vm11, %v6822_v49, 0.0 }
 0x391   :  { %v6762_v1 = vsub.f32 %v15128_v28, %v13883_v59 }
 0x392   :  { %v6894_v27 = vadd.f32 %v6893_v39, %v6892_v13  ;;  %v6824_v13 = vmul.f32 %v6760_v31, %v6760_v31  ;;  %v15129_v39 = vld [vmem:[#allocation51_spill] sm:$0xff]  ;;  %v6903_v30 = vsel %vm3256_vm11, %v6823_v40, 0.0 }
 0x393   :  { %v6763_v46 = vsub.f32 %v15129_v39, %v13883_v59 }
 0x394   :  { %v6896_v32 = vadd.f32 %v6895_v29, %v6894_v27  ;;  %v6825_v27 = vmul.f32 %v6761_v53, %v6761_v53  ;;  %v15130_v29 = vld [vmem:[#allocation56_spill] sm:$0xff]  ;;  %v6905_v42 = vsel %vm3256_vm11, %v6824_v13, 0.0 }
 0x395   :  { %v6764_v14 = vsub.f32 %v15130_v29, %v13883_v59 }
 0x396   :  { %v6898_v17 = vadd.f32 %v6897_v0, %v6896_v32  ;;  %v6826_v32 = vmul.f32 %v6762_v1, %v6762_v1  ;;  %v15131_v0 = vld [vmem:[#allocation61_spill] sm:$0xff]  ;;  %v6907_v49 = vsel %vm3256_vm11, %v6825_v27, 0.0 }
 0x397   :  { %v6765_v31 = vsub.f32 %v15131_v0, %v13883_v59  ;;  %v15135_v0 = vld [vmem:[#allocation78_spill] sm:$0xff] }
 0x398   :  { %v6900_v19 = vadd.f32 %v6899_v20, %v6898_v17  ;;  %v6827_v17 = vmul.f32 %v6763_v46, %v6763_v46  ;;  %v15132_v20 = vld [vmem:[#allocation66_spill] sm:$0xff]  ;;  %v6909_v40 = vsel %vm3256_vm11, %v6826_v32, 0.0 }
 0x399   :  { %v6766_v53 = vsub.f32 %v15132_v20, %v13883_v59  ;;  %v6771_v20 = vsub.f32 %v13618_v58, %v13883_v59  ;;  %v6774_v58 = vsub.f32 %v13660_v7, %v13883_v59  ;;  %v6777_v7 = vsub.f32 %v13684_v10, %v13883_v59 }
 0x39a   :  { %v6902_v51 = vadd.f32 %v6901_v8, %v6900_v19  ;;  %v6828_v19 = vmul.f32 %v6764_v14, %v6764_v14  ;;  %v15133_v8 = vld [vmem:[#allocation69_spill] sm:$0xff]  ;;  %v6911_v13 = vsel %vm3256_vm11, %v6827_v17, 0.0  ;;  %v6769_v14 = vsub.f32 %v13611_v48, %v13883_v59 }
 0x39b   :  { %v6767_v1 = vsub.f32 %v15133_v8, %v13883_v59  ;;  %v6772_v48 = vsub.f32 %v13640_v21, %v13883_v59  ;;  %v6775_v21 = vsub.f32 %v13676_v12, %v13883_v59  ;;  %v6778_v12 = vsub.f32 %v13690_v34, %v13883_v59 }
 0x39c   :  { %v6904_v23 = vadd.f32 %v6903_v30, %v6902_v51  ;;  %v6829_v51 = vmul.f32 %v6765_v31, %v6765_v31  ;;  %v15134_v30 = vld [vmem:[#allocation75_spill] sm:$0xff]  ;;  %v6913_v27 = vsel %vm3256_vm11, %v6828_v19, 0.0  ;;  %v6770_v31 = vsub.f32 %v15135_v0, %v13883_v59 }
 0x39d   :  { %v6768_v46 = vsub.f32 %v15134_v30, %v13883_v59  ;;  %v6780_v10 = vsub.f32 %v13706_v50, %v13883_v59  ;;  %v6781_v34 = vsub.f32 %v13716_v22, %v13883_v59  ;;  %v6783_v50 = vsub.f32 %v13740_v6, %v13883_v59 }
 0x39e   :  { %v6906_v41 = vadd.f32 %v6905_v42, %v6904_v23  ;;  %v6830_v23 = vmul.f32 %v6766_v53, %v6766_v53  ;;  %v6831_v42 = vmul.f32 %v6767_v1, %v6767_v1  ;;  %v6915_v32 = vsel %vm3256_vm11, %v6829_v51, 0.0 }
 0x39f   :  { %v6833_v53 = vmul.f32 %v6769_v14, %v6769_v14  ;;  %v6773_v51 = vsub.f32 %v13650_v38, %v13883_v59  ;;  %v6776_v38 = vsub.f32 %v13674_v57, %v13883_v59  ;;  %v6779_v57 = vsub.f32 %v13708_v25, %v13883_v59 }
 0x3a0   :  { %v6908_v63 = vadd.f32 %v6907_v49, %v6906_v41  ;;  %v6832_v49 = vmul.f32 %v6768_v46, %v6768_v46  ;;  %v6917_v17 = vsel %vm3256_vm11, %v6830_v23, 0.0  ;;  %v6919_v19 = vsel %vm3256_vm11, %v6831_v42, 0.0 }
 0x3a1   :  { %v6836_v46 = vmul.f32 %v6772_v48, %v6772_v48  ;;  %v6782_v25 = vsub.f32 %v13722_v3, %v13883_v59  ;;  %v6784_v22 = vsub.f32 %v13738_v60, %v13883_v59  ;;  %v6785_v3 = vsub.f32 %v13748_v9, %v13883_v59 }
 0x3a2   :  { %v6910_v28 = vadd.f32 %v6909_v40, %v6908_v63  ;;  %v6921_v8 = vsel %vm3256_vm11, %v6832_v49, 0.0  ;;  %v6786_v6 = vsub.f32 %v13754_v24, %v13883_v59  ;;  %v6787_v60 = vsub.f32 %v13772_v56, %v13883_v59 }
 0x3a3   :  { %v6788_v9 = vsub.f32 %v13770_v5, %v13883_v59  ;;  %v6789_v24 = vsub.f32 %v13780_v11, %v13883_v59  ;;  %v6790_v56 = vsub.f32 %v13786_v15, %v13883_v59  ;;  %v6791_v5 = vsub.f32 %v13804_v26, %v13883_v59 }
 0x3a4   :  { %v6912_v39 = vadd.f32 %v6911_v13, %v6910_v28  ;;  %v6834_v28 = vmul.f32 %v6770_v31, %v6770_v31  ;;  %v6835_v13 = vmul.f32 %v6771_v20, %v6771_v20  ;;  %v6839_v31 = vmul.f32 %v6775_v21, %v6775_v21 }
 0x3a5   :  { %v6792_v11 = vsub.f32 %v13802_v4, %v13883_v59  ;;  %v6793_v15 = vsub.f32 %v13812_v61, %v13883_v59  ;;  %v6794_v26 = vsub.f32 %v13818_v36, %v13883_v59  ;;  %v6795_v4 = vsub.f32 %v13834_v44, %v13883_v59 }
 0x3a6   :  { %v6914_v29 = vadd.f32 %v6913_v27, %v6912_v39  ;;  %v6923_v39 = vsel %vm3256_vm11, %v6833_v53, 0.0  ;;  %v6925_v23 = vsel %vm3256_vm11, %v6834_v28, 0.0  ;;  %v6927_v14 = vsel %vm3256_vm11, %v6835_v13, 0.0 }
 0x3a7   :  { %v6842_v28 = vmul.f32 %v6778_v12, %v6778_v12  ;;  %v6796_v61 = vsub.f32 %v13832_v45, %v13883_v59  ;;  %v6797_v36 = vsub.f32 %v13840_v55, %v13883_v59  ;;  %v6798_v44 = vsub.f32 %v13846_v52, %v13883_v59 }
 0x3a8   :  { %v6916_v41 = vadd.f32 %v6915_v32, %v6914_v29  ;;  %v6837_v29 = vmul.f32 %v6773_v51, %v6773_v51  ;;  %v6838_v32 = vmul.f32 %v6774_v58, %v6774_v58  ;;  %v6843_v51 = vmul.f32 %v6779_v57, %v6779_v57 }
 0x3a9   :  { %v6941_v58 = vsel %vm3256_vm11, %v6842_v28, 0.0  ;;  %v6851_v57 = vmul.f32 %v6787_v60, %v6787_v60  ;;  %v6799_v45 = vsub.f32 %v13856_v18, %v13883_v59  ;;  %v6800_v55 = vsub.f32 %v13854_v54, %v13883_v59 }
 0x3aa   :  { %v6918_v63 = vadd.f32 %v6917_v17, %v6916_v41  ;;  %v6929_v41 = vsel %vm3256_vm11, %v6836_v46, 0.0  ;;  %v6931_v49 = vsel %vm3256_vm11, %v6837_v29, 0.0  ;;  %v6933_v20 = vsel %vm3256_vm11, %v6838_v32, 0.0 }
 0x3ab   :  { %v6846_v29 = vmul.f32 %v6782_v25, %v6782_v25  ;;  %v6855_v25 = vmul.f32 %v6791_v5, %v6791_v5  ;;  %v6801_v52 = vsub.f32 %v13861_v33, %v13883_v59  ;;  %v6802_v18 = vsub.f32 %v13867_v62, %v13883_v59 }
 0x3ac   :  { %v6920_v40 = vadd.f32 %v6919_v19, %v6918_v63  ;;  %v6840_v63 = vmul.f32 %v6776_v38, %v6776_v38  ;;  %v6841_v19 = vmul.f32 %v6777_v7, %v6777_v7  ;;  %v6847_v38 = vmul.f32 %v6783_v50, %v6783_v50 }
 0x3ad   :  { %v6949_v7 = vsel %vm3256_vm11, %v6846_v29, 0.0  ;;  %v6858_v29 = vmul.f32 %v6794_v26, %v6794_v26  ;;  %v6803_v54 = vsub.f32 %v13869_v16, %v13883_v59  ;;  %v6804_v33 = vsub.f32 %v13875_v37, %v13883_v59 }
 0x3ae   :  { %v6922_v1 = vadd.f32 %v6921_v8, %v6920_v40  ;;  %v6935_v40 = vsel %vm3256_vm11, %v6839_v31, 0.0  ;;  %v6937_v8 = vsel %vm3256_vm11, %v6840_v63, 0.0  ;;  %v6939_v13 = vsel %vm3256_vm11, %v6841_v19, 0.0 }
 0x3af   :  { %v6850_v63 = vmul.f32 %v6786_v6, %v6786_v6  ;;  %v6973_v6 = vsel %vm3256_vm11, %v6858_v29, 0.0  ;;  %v6805_v62 = vsub.f32 %v13879_v47, %v13883_v59  ;;  %v6867_v5 = vmul.f32 %v6803_v54, %v6803_v54 }
 0x3b0   :  { %v6924_v30 = vadd.f32 %v6923_v39, %v6922_v1 }
 0x3b2   :  { %v6926_v27 = vadd.f32 %v6925_v23, %v6924_v30  ;;  %v6844_v30 = vmul.f32 %v6780_v10, %v6780_v10  ;;  %v6845_v23 = vmul.f32 %v6781_v34, %v6781_v34  ;;  %v6957_v10 = vsel %vm3256_vm11, %v6850_v63, 0.0 }
 0x3b4   :  { %v6928_v42 = vadd.f32 %v6927_v14, %v6926_v27  ;;  %v6943_v27 = vsel %vm3256_vm11, %v6843_v51, 0.0  ;;  %v6945_v14 = vsel %vm3256_vm11, %v6844_v30, 0.0  ;;  %v6947_v32 = vsel %vm3256_vm11, %v6845_v23, 0.0 }
 0x3b5   :  { %v6854_v51 = vmul.f32 %v6790_v56, %v6790_v56 }
 0x3b6   :  { %v6930_v0 = vadd.f32 %v6929_v41, %v6928_v42 }
 0x3b7   :  { %v6965_v50 = vsel %vm3256_vm11, %v6854_v51, 0.0  ;;  %v6869_v51 = vmul.f32 %v6805_v62, %v6805_v62 }
 0x3b8   :  { %v6932_v17 = vadd.f32 %v6931_v49, %v6930_v0  ;;  %v6848_v0 = vmul.f32 %v6784_v22, %v6784_v22  ;;  %v6849_v49 = vmul.f32 %v6785_v3, %v6785_v3  ;;  %v6859_v3 = vmul.f32 %v6795_v4, %v6795_v4 }
 0x3ba   :  { %v6934_v53 = vadd.f32 %v6933_v20, %v6932_v17  ;;  %v6951_v17 = vsel %vm3256_vm11, %v6847_v38, 0.0  ;;  %v6953_v20 = vsel %vm3256_vm11, %v6848_v0, 0.0  ;;  %v6955_v19 = vsel %vm3256_vm11, %v6849_v49, 0.0 }
 0x3bb   :  { %v6862_v49 = vmul.f32 %v6798_v44, %v6798_v44 }
 0x3bc   :  { %v6936_v48 = vadd.f32 %v6935_v40, %v6934_v53 }
 0x3be   :  { %v6938_v1 = vadd.f32 %v6937_v8, %v6936_v48  ;;  %v6852_v48 = vmul.f32 %v6788_v9, %v6788_v9  ;;  %v6853_v8 = vmul.f32 %v6789_v24, %v6789_v24  ;;  %v6863_v9 = vmul.f32 %v6799_v45, %v6799_v45  ;;  %v9776_v45 = vld [vmem:[#allocation3 + $0x20] sm:$0xff] }
 0x3bf   :  { %v6981_v24 = vsel %vm3256_vm11, %v6862_v49, 0.0  ;;  %v9780_v49 = vld [vmem:[#allocation3 + $0x40] sm:$0xff] }
 0x3c0   :  { %v6940_v39 = vadd.f32 %v6939_v13, %v6938_v1  ;;  %v6959_v1 = vsel %vm3256_vm11, %v6851_v57, 0.0  ;;  %v6961_v13 = vsel %vm3256_vm11, %v6852_v48, 0.0  ;;  %v6963_v30 = vsel %vm3256_vm11, %v6853_v8, 0.0 }
 0x3c1   :  { %v6866_v48 = vmul.f32 %v6802_v18, %v6802_v18 }
 0x3c2   :  { %v6942_v46 = vadd.f32 %v6941_v58, %v6940_v39 }
 0x3c3   :  { %v6989_v16 = vsel %vm3256_vm11, %v6866_v48, 0.0  ;;  %v9788_v48 = vld [vmem:[#allocation3 + $0x80] sm:$0xff] }
 0x3c4   :  { %v6944_v21 = vadd.f32 %v6943_v27, %v6942_v46  ;;  %v6856_v46 = vmul.f32 %v6792_v11, %v6792_v11  ;;  %v6857_v27 = vmul.f32 %v6793_v15, %v6793_v15 }
 0x3c6   :  { %v6946_v42 = vadd.f32 %v6945_v14, %v6944_v21  ;;  %v6967_v21 = vsel %vm3256_vm11, %v6855_v25, 0.0  ;;  %v6969_v14 = vsel %vm3256_vm11, %v6856_v46, 0.0  ;;  %v6971_v38 = vsel %vm3256_vm11, %v6857_v27, 0.0 }
 0x3c7   :  { %v6995_v25 = vsel %vm3256_vm11, %v6869_v51, 0.0  ;;  %v9793_v51 = vld [vmem:[#allocation3 + $0xa8] sm:$0xff] }
 0x3c8   :  { %v6948_v41 = vadd.f32 %v6947_v32, %v6946_v42 }
 0x3ca   :  { %v6950_v31 = vadd.f32 %v6949_v7, %v6948_v41  ;;  %v6860_v41 = vmul.f32 %v6796_v61, %v6796_v61  ;;  %v6861_v7 = vmul.f32 %v6797_v36, %v6797_v36  ;;  %v7006_v61 = vld [vmem:[%s14860_s2] sm:$0x1] }
 0x3cb   :  { %v14092_v36 = vld [vmem:[%s14861_s3] sm:$0x1] }
 0x3cc   :  { %v6952_v12 = vadd.f32 %v6951_v17, %v6950_v31  ;;  %v6975_v31 = vsel %vm3256_vm11, %v6859_v3, 0.0  ;;  %v6977_v17 = vsel %vm3256_vm11, %v6860_v41, 0.0  ;;  %v6979_v63 = vsel %vm3256_vm11, %v6861_v7, 0.0 }
 0x3ce   :  { %v6954_v53 = vadd.f32 %v6953_v20, %v6952_v12 }
 0x3d0   :  { %v6956_v40 = vadd.f32 %v6955_v19, %v6954_v53  ;;  %v6864_v53 = vmul.f32 %v6800_v55, %v6800_v55  ;;  %v6865_v19 = vmul.f32 %v6801_v52, %v6801_v52  ;;  %v9779_v55 = vld [vmem:[#allocation3 + $0x38] sm:$0xff] }
 0x3d2   :  { %v6958_v28 = vadd.f32 %v6957_v10, %v6956_v40  ;;  %v6983_v40 = vsel %vm3256_vm11, %v6863_v9, 0.0  ;;  %v6985_v10 = vsel %vm3256_vm11, %v6864_v53, 0.0  ;;  %v6987_v8 = vsel %vm3256_vm11, %v6865_v19, 0.0  ;;  %v9782_v9 = vld [vmem:[#allocation3 + $0x50] sm:$0xff]  ;;  %v9784_v53 = vld [vmem:[#allocation3 + $0x60] sm:$0xff] }
 0x3d3   :  { %v9786_v19 = vld [vmem:[#allocation3 + $0x70] sm:$0xff] }
 0x3d4   :  { %v6960_v34 = vadd.f32 %v6959_v1, %v6958_v28 }
 0x3d6   :  { %v6962_v39 = vadd.f32 %v6961_v13, %v6960_v34  ;;  %v6868_v34 = vmul.f32 %v6804_v33, %v6804_v33  ;;  %v6991_v13 = vsel %vm3256_vm11, %v6867_v5, 0.0  ;;  %v9790_v5 = vld [vmem:[#allocation3 + $0x90] sm:$0xff] }
 0x3d8   :  { %v6964_v58 = vadd.f32 %v6963_v30, %v6962_v39  ;;  %v6993_v37 = vsel %vm3256_vm11, %v6868_v34, 0.0 }
 0x3da   :  { %v6966_v23 = vadd.f32 %v6965_v50, %v6964_v58 }
 0x3dc   :  { %v6968_v22 = vadd.f32 %v6967_v21, %v6966_v23  ;;  %v7012_v21 = vlaneseq }
 0x3de   :  { %v6970_v42 = vadd.f32 %v6969_v14, %v6968_v22  ;;  %v14083_v22 = vshrl.u32 %v7012_v21, 7 }
 0x3e0   :  { %v6972_v32 = vadd.f32 %v6971_v38, %v6970_v42  ;;  %v7014_v29 = vsub.s32 0, %v14083_v22 }
 0x3e2   :  { %v6974_v0 = vadd.f32 %v6973_v6, %v6972_v32 }
 0x3e4   :  { %v6976_v60 = vadd.f32 %v6975_v31, %v6974_v0  ;;  %v9777_v31 = vld [vmem:[#allocation3 + $0x28] sm:$0xff] }
 0x3e6   :  { %v6978_v12 = vadd.f32 %v6977_v17, %v6976_v60  ;;  %v9778_v60 = vld [vmem:[#allocation3 + $0x30] sm:$0xff] }
 0x3e8   :  { %v6980_v20 = vadd.f32 %v6979_v63, %v6978_v12  ;;  %v9781_v12 = vld [vmem:[#allocation3 + $0x48] sm:$0xff] }
 0x3ea   :  { %v6982_v57 = vadd.f32 %v6981_v24, %v6980_v20  ;;  %v9783_v20 = vld [vmem:[#allocation3 + $0x58] sm:$0xff] }
 0x3ec   :  { %v6984_v56 = vadd.f32 %v6983_v40, %v6982_v57  ;;  %v9785_v57 = vld [vmem:[#allocation3 + $0x68] sm:$0xff] }
 0x3ee   :  { %v6986_v28 = vadd.f32 %v6985_v10, %v6984_v56  ;;  %v9787_v56 = vld [vmem:[#allocation3 + $0x78] sm:$0xff] }
 0x3f0   :  { %v6988_v1 = vadd.f32 %v6987_v8, %v6986_v28  ;;  %v9789_v28 = vld [vmem:[#allocation3 + $0x88] sm:$0xff] }
 0x3f2   :  { %v6990_v11 = vadd.f32 %v6989_v16, %v6988_v1  ;;  %v9791_v1 = vld [vmem:[#allocation3 + $0x98] sm:$0xff]  ;;  %v9792_v16 = vld [vmem:[#allocation3 + $0xa0] sm:$0xff] }
 0x3f4   :  { %v6992_v39 = vadd.f32 %v6991_v13, %v6990_v11 }
 0x3f6   :  { %v6994_v15 = vadd.f32 %v6993_v37, %v6992_v39  ;;  %v9794_v39 = vld [vmem:[#allocation3 + $0xb0] sm:$0xff] }
 0x3f8   :  { %v6996_v30 = vadd.f32 %v6995_v25, %v6994_v15  ;;  %v9795_v15 = vld [vmem:[#allocation3 + $0xb8] sm:$0xff] }
 0x3fa   :  { %v6997_v58 = vrot.slane %v6996_v30, 4 }
 0x3fc   :  { %v6998_v47 = vadd.f32 %v6997_v58, %v6996_v30  ;;  %v9796_v30 = vld [vmem:[#allocation3 + $0xc0] sm:$0xff] }
 0x3fe   :  { %v6999_v26 = vrot.slane %v6998_v47, 2 }
 0x400   :  { %v7000_v46 = vadd.f32 %v6999_v26, %v6998_v47  ;;  %v9797_v47 = vld [vmem:[#allocation3 + $0xc8] sm:$0xff] }
 0x402   :  { %v7001_v50 = vrot.slane %v7000_v46, 1 }
 0x404   :  { %v7002_v23 = vadd.f32 %v7001_v50, %v7000_v46  ;;  %v9798_v46 = vld [vmem:[#allocation3 + $0xd0] sm:$0xff] }
 0x406   :  { %v7003_v4 = vmul.f32 0.001953125, %v7002_v23  ;;  %v9799_v23 = vld [vmem:[#allocation3 + $0xd8] sm:$0xff] }
 0x408   :  { %v7004_v27 = vadd.f32 1e-05, %v7003_v4 }
 0x40a   :  { %9770 = vrsqrt.f32 %v7004_v27  ;;  %v9800_v27 = vld [vmem:[#allocation3 + $0xe0] sm:$0xff] }
 0x417   :  { %v9771_v14 = vpop.eup %9770 }
 0x418   :  { %v7007_v42 = vmul.f32 %v9771_v14, %v7006_v61  ;;  %v9801_v61 = vld [vmem:[#allocation3 + $0xe8] sm:$0xff] }
 0x41a   :  { %v14095_v3 = vmul.f32 %v7007_v42, %v13883_v59  ;;  %v14099_v38 = vrot.slane %v7007_v42, %v7014_v29  ;;  %v9775_v59 = vld [vmem:[#allocation3 + $0x18] sm:$0xff]  ;;  %v9802_v42 = vld [vmem:[#allocation3 + $0xf0] sm:$0xff] }
 0x41c   :  { %v7010_v32 = vsub.f32 %v14092_v36, %v14095_v3  ;;  %v14105_v44 = vmul.f32 %v13885_v35, %v14099_v38  ;;  %v14109_v41 = vmul.f32 %v13889_v2, %v14099_v38  ;;  %v14113_v6 = vmul.f32 %v13893_v43, %v14099_v38  ;;  %v9803_v3 = vld [vmem:[#allocation3 + $0xf8] sm:$0xff] }
 0x41d   :  { %v14116_v0 = vmul.f32 %v9775_v59, %v14099_v38  ;;  %v14119_v7 = vmul.f32 %v9776_v45, %v14099_v38  ;;  %v14122_v35 = vmul.f32 %v9777_v31, %v14099_v38  ;;  %v14125_v2 = vmul.f32 %v9778_v60, %v14099_v38  ;;  %v9804_v31 = vld [vmem:[#allocation3 + $0x100] sm:$0xff] }
 0x41e   :  { %v14128_v43 = vmul.f32 %v9779_v55, %v14099_v38  ;;  %v14131_v17 = vmul.f32 %v9780_v49, %v14099_v38  ;;  %v14134_v52 = vmul.f32 %v9781_v12, %v14099_v38  ;;  %v14137_v63 = vmul.f32 %v9782_v9, %v14099_v38  ;;  %v9805_v55 = vld [vmem:[#allocation3 + $0x108] sm:$0xff]  ;;  %v9806_v12 = vld [vmem:[#allocation3 + $0x110] sm:$0xff] }
 0x41f   :  { %v14140_v18 = vmul.f32 %v9783_v20, %v14099_v38  ;;  %v14143_v24 = vmul.f32 %v9784_v53, %v14099_v38  ;;  %v14146_v54 = vmul.f32 %v9785_v57, %v14099_v38  ;;  %v7031_v40 = vmul.f32 %v9786_v19, %v14099_v38  ;;  %v9807_v20 = vld [vmem:[#allocation3 + $0x118] sm:$0xff]  ;;  %v9808_v57 = vld [vmem:[#allocation3 + $0x120] sm:$0xff] }
 0x420   :  { %v7032_v33 = vmul.f32 %v9787_v56, %v14099_v38  ;;  %v7033_v10 = vmul.f32 %v9788_v48, %v14099_v38  ;;  %v7034_v62 = vmul.f32 %v9789_v28, %v14099_v38  ;;  %v7035_v8 = vmul.f32 %v9790_v5, %v14099_v38 }
 0x421   :  { %v7036_v34 = vmul.f32 %v9791_v1, %v14099_v38  ;;  %v7037_v11 = vmul.f32 %v9792_v16, %v14099_v38  ;;  %v7038_v13 = vmul.f32 %v9793_v51, %v14099_v38  ;;  %v7039_v37 = vmul.f32 %v9794_v39, %v14099_v38 }
 0x422   :  { %v7040_v25 = vmul.f32 %v9795_v15, %v14099_v38  ;;  %v7041_v58 = vmul.f32 %v9796_v30, %v14099_v38  ;;  %v7042_v26 = vmul.f32 %v9797_v47, %v14099_v38  ;;  %v7043_v50 = vmul.f32 %v9798_v46, %v14099_v38 }
 0x423   :  { %v7044_v4 = vmul.f32 %v9799_v23, %v14099_v38  ;;  %v7045_v21 = vmul.f32 %v9800_v27, %v14099_v38  ;;  %v7046_v14 = vmul.f32 %v9801_v61, %v14099_v38  ;;  %v7047_v36 = vmul.f32 %v9802_v42, %v14099_v38 }
 0x424   :  { %v7048_v59 = vmul.f32 %v9803_v3, %v14099_v38  ;;  %v14168_v45 = vrot.slane %v7010_v32, %v7014_v29  ;;  %v14171_v60 = vmul.f32 %v9804_v31, %v14099_v38  ;;  %v14174_v49 = vmul.f32 %v9805_v55, %v14099_v38  ;;  %v9809_v29 = vld [vmem:[#allocation3 + $0x128] sm:$0xff] }
 0x425   :  { %v14177_v9 = vmul.f32 %v9806_v12, %v14099_v38  ;;  %v14180_v53 = vmul.f32 %v9807_v20, %v14099_v38  ;;  %v14183_v22 = vmul.f32 %v9808_v57, %v14099_v38  ;;  %v14186_v32 = vmul.f32 %v9809_v29, %v14099_v38 }
 0x426   :  { %v14190_v19 = vadd.f32 %v14168_v45, %v14105_v44  ;;  %v14194_v56 = vadd.f32 %v14168_v45, %v14109_v41  ;;  %v14198_v48 = vadd.f32 %v14168_v45, %v14113_v6  ;;  %v14202_v28 = vadd.f32 %v14168_v45, %v14116_v0 }
 0x427   :  { %15136 = vst [vmem:[#allocation47_spill] sm:$0xff] %v14183_v22  ;;  %15137 = vst [vmem:[#allocation42_spill] sm:$0xff] %v14186_v32  ;;  %v14206_v5 = vadd.f32 %v14168_v45, %v14119_v7  ;;  %v14210_v44 = vadd.f32 %v14168_v45, %v14122_v35  ;;  %v14214_v41 = vadd.f32 %v14168_v45, %v14125_v2 }
 0x428   :  { %v14218_v6 = vadd.f32 %v14168_v45, %v14128_v43  ;;  %v7063_v0 = vadd.f32 %v14168_v45, %v14131_v17  ;;  %v7064_v1 = vadd.f32 %v14168_v45, %v14134_v52  ;;  %v14226_v7 = vadd.f32 %v14168_v45, %v14137_v63 }
 0x429   :  { %v14230_v35 = vadd.f32 %v14168_v45, %v14140_v18  ;;  %v7067_v2 = vadd.f32 %v14168_v45, %v14143_v24  ;;  %v7068_v43 = vadd.f32 %v14168_v45, %v14146_v54  ;;  %v14237_v16 = vadd.f32 %v14168_v45, %v7031_v40 }
 0x42a   :  { %v14240_v17 = vadd.f32 %v14168_v45, %v7032_v33  ;;  %v7071_v52 = vadd.f32 %v14168_v45, %v7033_v10  ;;  %v7072_v63 = vadd.f32 %v14168_v45, %v7034_v62  ;;  %v14245_v51 = vadd.f32 %v14168_v45, %v7035_v8 }
 0x42b   :  { %v14248_v18 = vadd.f32 %v14168_v45, %v7036_v34  ;;  %v7075_v24 = vadd.f32 %v14168_v45, %v7037_v11  ;;  %v7076_v54 = vadd.f32 %v14168_v45, %v7038_v13  ;;  %v14253_v40 = vadd.f32 %v14168_v45, %v7039_v37 }
 0x42c   :  { %v14256_v33 = vadd.f32 %v14168_v45, %v7040_v25  ;;  %v7079_v10 = vadd.f32 %v14168_v45, %v7041_v58  ;;  %v7080_v62 = vadd.f32 %v14168_v45, %v7042_v26  ;;  %v14261_v8 = vadd.f32 %v14168_v45, %v7043_v50 }
 0x42d   :  { %v14264_v34 = vadd.f32 %v14168_v45, %v7044_v4  ;;  %v7083_v11 = vadd.f32 %v14168_v45, %v7045_v21  ;;  %v7084_v13 = vadd.f32 %v14168_v45, %v7046_v14  ;;  %v7085_v39 = vadd.f32 %v14168_v45, %v7047_v36 }
 0x42e   :  { %v7086_v37 = vadd.f32 %v14168_v45, %v7048_v59  ;;  %v7087_v15 = vmax.f32 %v14190_v19, 0.0  ;;  %v7088_v25 = vmax.f32 %v14194_v56, 0.0  ;;  %v7089_v30 = vmax.f32 %v14198_v48, 0.0 }
 0x42f   :  { %v7090_v58 = vmax.f32 %v14202_v28, 0.0  ;;  %v7091_v47 = vmax.f32 %v14206_v5, 0.0  ;;  %v7092_v26 = vmax.f32 %v14210_v44, 0.0  ;;  %v7093_v46 = vmax.f32 %v14214_v41, 0.0 }
 0x430   :  { %v7094_v50 = vmax.f32 %v14218_v6, 0.0  ;;  %v7095_v23 = vmax.f32 %v7063_v0, 0.0  ;;  %v7096_v4 = vmax.f32 %v7064_v1, 0.0  ;;  %v7097_v27 = vmax.f32 %v14226_v7, 0.0 }
 0x431   :  { %v7098_v21 = vmax.f32 %v14230_v35, 0.0  ;;  %v7099_v61 = vmax.f32 %v7067_v2, 0.0  ;;  %v7100_v14 = vmax.f32 %v7068_v43, 0.0  ;;  %v7101_v42 = vmax.f32 %v14237_v16, 0.0 }
 0x432   :  { %v7102_v36 = vmax.f32 %v14240_v17, 0.0  ;;  %v7103_v3 = vmax.f32 %v7071_v52, 0.0  ;;  %v7104_v59 = vmax.f32 %v7072_v63, 0.0  ;;  %v7105_v31 = vmax.f32 %v14245_v51, 0.0 }
 0x433   :  { %v7106_v55 = vmax.f32 %v14248_v18, 0.0  ;;  %v7107_v12 = vmax.f32 %v7075_v24, 0.0  ;;  %v7108_v20 = vmax.f32 %v7076_v54, 0.0  ;;  %v7109_v57 = vmax.f32 %v14253_v40, 0.0 }
 0x434   :  { %v7110_v29 = vmax.f32 %v14256_v33, 0.0  ;;  %v7111_v19 = vmax.f32 %v7079_v10, 0.0  ;;  %v7112_v56 = vmax.f32 %v7080_v62, 0.0  ;;  %v7113_v48 = vmax.f32 %v14261_v8, 0.0 }
 0x435   :  { %v7114_v28 = vmax.f32 %v14264_v34, 0.0  ;;  %v7115_v5 = vmax.f32 %v7083_v11, 0.0  ;;  %v7116_v44 = vmax.f32 %v7084_v13, 0.0  ;;  %v7117_v41 = vmax.f32 %v7085_v39, 0.0 }
 0x436   :  { %v7118_v6 = vmax.f32 %v7086_v37, 0.0  ;;  %v7119_v0 = vmax.f32 %v7087_v15, %v7089_v30  ;;  %v7120_v1 = vmax.f32 %v7088_v25, %v7090_v58  ;;  %v7121_v7 = vmax.f32 %v7091_v47, %v7093_v46 }
 0x437   :  { %v7122_v35 = vmax.f32 %v7092_v26, %v7094_v50  ;;  %v7123_v2 = vmax.f32 %v7095_v23, %v7097_v27  ;;  %v7124_v43 = vmax.f32 %v7096_v4, %v7098_v21  ;;  %v7125_v16 = vmax.f32 %v7099_v61, %v7101_v42 }
 0x438   :  { %v7126_v17 = vmax.f32 %v7100_v14, %v7102_v36  ;;  %v7127_v52 = vmax.f32 %v7103_v3, %v7105_v31  ;;  %v7128_v63 = vmax.f32 %v7104_v59, %v7106_v55  ;;  %v7129_v51 = vmax.f32 %v7107_v12, %v7109_v57 }
 0x439   :  { %v7130_v18 = vmax.f32 %v7108_v20, %v7110_v29  ;;  %v7131_v24 = vmax.f32 %v7111_v19, %v7113_v48  ;;  %v7132_v54 = vmax.f32 %v7112_v56, %v7114_v28  ;;  %v7133_v40 = vmax.f32 %v7115_v5, %v7117_v41 }
 0x43a   :  { %v7134_v33 = vmax.f32 %v7116_v44, %v7118_v6  ;;  %v14288_v10 = vmax.f32 %v7119_v0, 0.0  ;;  %v14290_v62 = vmax.f32 %v7120_v1, 0.0  ;;  %v14292_v8 = vmax.f32 %v7121_v7, %v7089_v30 }
 0x43b   :  { %v14294_v34 = vmax.f32 %v7122_v35, %v7090_v58  ;;  %v14296_v11 = vmax.f32 %v7123_v2, %v7093_v46  ;;  %v14298_v13 = vmax.f32 %v7124_v43, %v7094_v50  ;;  %v14300_v39 = vmax.f32 %v7125_v16, %v7097_v27 }
 0x43c   :  { %v14302_v37 = vmax.f32 %v7126_v17, %v7098_v21  ;;  %v14304_v15 = vmax.f32 %v7127_v52, %v7101_v42  ;;  %v14306_v25 = vmax.f32 %v7128_v63, %v7102_v36  ;;  %v14308_v47 = vmax.f32 %v7129_v51, %v7105_v31 }
 0x43d   :  { %v14310_v26 = vmax.f32 %v7130_v18, %v7106_v55  ;;  %v14312_v30 = vmax.f32 %v7131_v24, %v7109_v57  ;;  %v14314_v58 = vmax.f32 %v7132_v54, %v7110_v29  ;;  %v14316_v46 = vmax.f32 %v7133_v40, %v7113_v48 }
 0x43e   :  { %v14318_v50 = vmax.f32 %v7134_v33, %v7114_v28  ;;  %v7168_v23 = vrot.slane %v14288_v10, 7  ;;  %v7169_v4 = vrot.slane %v14290_v62, 7  ;;  %v7171_v27 = vrot.slane %v14292_v8, 7 }
 0x43f   :  { %v7172_v21 = vrot.slane %v14294_v34, 7  ;;  %v7174_v61 = vrot.slane %v14296_v11, 7  ;;  %v7175_v14 = vrot.slane %v14298_v13, 7  ;;  %v7177_v42 = vrot.slane %v14300_v39, 7 }
 0x440   :  { %v7178_v36 = vrot.slane %v14302_v37, 7  ;;  %v14329_v3 = vsel %vm7167_vm12, %v7168_v23, %v7169_v4  ;;  %v7180_v31 = vrot.slane %v14304_v15, 7  ;;  %v7181_v55 = vrot.slane %v14306_v25, 7 }
 0x441   :  { %v14332_v59 = vsel %vm7167_vm12, %v7171_v27, %v7172_v21  ;;  %v14337_v12 = vsel %vm7167_vm12, %v7174_v61, %v7175_v14  ;;  %v7183_v57 = vrot.slane %v14308_v47, 7  ;;  %v7184_v29 = vrot.slane %v14310_v26, 7 }
 0x442   :  { %v14340_v20 = vsel %vm7167_vm12, %v7177_v42, %v7178_v36  ;;  %v14345_v19 = vsel %vm7167_vm12, %v7180_v31, %v7181_v55  ;;  %v7186_v56 = vrot.slane %v14312_v30, 7  ;;  %v7187_v48 = vrot.slane %v14314_v58, 7 }
 0x443   :  { %v7189_v28 = vrot.slane %v14316_v46, 7  ;;  %v14351_v5 = vsel %vm7167_vm12, %v7183_v57, %v7184_v29  ;;  %v7190_v44 = vrot.slane %v14318_v50, 7  ;;  %v7208_v41 = vsel %vm7167_vm12, 0.0, %v7168_v23 }
 0x444   :  { %v7209_v6 = vsel %vm7167_vm12, 0.0, %v7171_v27  ;;  %v14357_v0 = vsel %vm7167_vm12, %v7186_v56, %v7187_v48  ;;  %v7210_v1 = vsel %vm7167_vm12, 0.0, %v7174_v61  ;;  %v7211_v7 = vsel %vm7167_vm12, 0.0, %v7177_v42 }
 0x445   :  { %v14362_v35 = vsel %vm7167_vm12, 0.0, %v7180_v31  ;;  %v14365_v2 = vsel %vm7167_vm12, %v7189_v28, %v7190_v44  ;;  %v14368_v43 = vsel %vm7167_vm12, 0.0, %v7183_v57  ;;  %v14371_v16 = vsel %vm7167_vm12, 0.0, %v7186_v56 }
 0x446   :  { %v14374_v17 = vsel %vm7167_vm12, 0.0, %v7189_v28  ;;  %v7216_v52 = vrot.slane %v14288_v10, 1  ;;  %v7217_v63 = vrot.slane %v14290_v62, 1  ;;  %v7219_v51 = vrot.slane %v14292_v8, 1 }
 0x447   :  { %v7220_v18 = vrot.slane %v14294_v34, 1  ;;  %v7222_v24 = vrot.slane %v14296_v11, 1  ;;  %v7223_v54 = vrot.slane %v14298_v13, 1  ;;  %v7225_v40 = vrot.slane %v14300_v39, 1 }
 0x448   :  { %v7226_v33 = vrot.slane %v14302_v37, 1  ;;  %v7218_v23 = vsel %vm319_vm1, %v7216_v52, %v7217_v63  ;;  %v7228_v27 = vrot.slane %v14304_v15, 1  ;;  %v7229_v21 = vrot.slane %v14306_v25, 1 }
 0x449   :  { %v7221_v4 = vsel %vm319_vm1, %v7219_v51, %v7220_v18  ;;  %v7224_v61 = vsel %vm319_vm1, %v7222_v24, %v7223_v54  ;;  %v7231_v42 = vrot.slane %v14308_v47, 1  ;;  %v7232_v36 = vrot.slane %v14310_v26, 1 }
 0x44a   :  { %v7227_v14 = vsel %vm319_vm1, %v7225_v40, %v7226_v33  ;;  %v7230_v31 = vsel %vm319_vm1, %v7228_v27, %v7229_v21  ;;  %v7234_v55 = vrot.slane %v14312_v30, 1  ;;  %v7235_v57 = vrot.slane %v14314_v58, 1 }
 0x44b   :  { %v7237_v29 = vrot.slane %v14316_v46, 1  ;;  %v7233_v56 = vsel %vm319_vm1, %v7231_v42, %v7232_v36  ;;  %v7238_v48 = vrot.slane %v14318_v50, 1  ;;  %v7256_v28 = vsel %vm319_vm1, %v7217_v63, 0.0 }
 0x44c   :  { %v7257_v44 = vsel %vm319_vm1, %v7220_v18, 0.0  ;;  %v7236_v52 = vsel %vm319_vm1, %v7234_v55, %v7235_v57  ;;  %v7258_v51 = vsel %vm319_vm1, %v7223_v54, 0.0  ;;  %v7259_v24 = vsel %vm319_vm1, %v7226_v33, 0.0 }
 0x44d   :  { %v7260_v40 = vsel %vm319_vm1, %v7229_v21, 0.0  ;;  %v7239_v27 = vsel %vm319_vm1, %v7237_v29, %v7238_v48  ;;  %v7261_v32 = vsel %vm319_vm1, %v7232_v36, 0.0  ;;  %v7262_v42 = vsel %vm319_vm1, %v7235_v57, 0.0 }
 0x44e   :  { %v7263_v22 = vsel %vm319_vm1, %v7238_v48, 0.0  ;;  %v7264_v63 = vmax.f32 %v14288_v10, %v7208_v41  ;;  %v7265_v18 = vmax.f32 %v14290_v62, %v14329_v3  ;;  %v7266_v55 = vmax.f32 %v14292_v8, %v7209_v6 }
 0x44f   :  { %v7267_v54 = vmax.f32 %v14294_v34, %v14332_v59  ;;  %v7268_v33 = vmax.f32 %v14296_v11, %v7210_v1  ;;  %v7269_v21 = vmax.f32 %v14298_v13, %v14337_v12  ;;  %v7270_v36 = vmax.f32 %v14300_v39, %v7211_v7  ;;  %v9812_v7 = vld [vmem:[#allocation3 + $0x140] sm:$0xff] }
 0x450   :  { %v7271_v57 = vmax.f32 %v14302_v37, %v14340_v20  ;;  %v7272_v10 = vmax.f32 %v14304_v15, %v14362_v35  ;;  %v7273_v62 = vmax.f32 %v14306_v25, %v14345_v19  ;;  %v7274_v8 = vmax.f32 %v14308_v47, %v14368_v43 }
 0x451   :  { %v7275_v34 = vmax.f32 %v14310_v26, %v14351_v5  ;;  %v7276_v11 = vmax.f32 %v14312_v30, %v14371_v16  ;;  %v7277_v13 = vmax.f32 %v14314_v58, %v14357_v0  ;;  %v7278_v39 = vmax.f32 %v14316_v46, %v14374_v17  ;;  %v9814_v16 = vld [vmem:[#allocation3 + $0x150] sm:$0xff] }
 0x452   :  { %v7279_v37 = vmax.f32 %v14318_v50, %v14365_v2  ;;  %v7280_v15 = vmax.f32 %v7264_v63, %v7218_v23  ;;  %v7281_v25 = vmax.f32 %v7265_v18, %v7256_v28  ;;  %v7282_v3 = vmax.f32 %v7266_v55, %v7221_v4  ;;  %v9813_v2 = vld [vmem:[#allocation3 + $0x148] sm:$0xff]  ;;  %v9815_v23 = vld [vmem:[#allocation3 + $0x158] sm:$0xff]  ;;  %v9824_v55 = vld [vmem:[#allocation3 + $0x1a0] sm:$0xff] }
 0x453   :  { %v7283_v59 = vmax.f32 %v7267_v54, %v7257_v44  ;;  %v7284_v47 = vmax.f32 %v7268_v33, %v7224_v61  ;;  %v7285_v12 = vmax.f32 %v7269_v21, %v7258_v51  ;;  %v7286_v20 = vmax.f32 %v7270_v36, %v7227_v14  ;;  %v9816_v61 = vld [vmem:[#allocation3 + $0x160] sm:$0xff]  ;;  %v9819_v28 = vld [vmem:[#allocation3 + $0x178] sm:$0xff]  ;;  %v9825_v33 = vld [vmem:[#allocation3 + $0x1a8] sm:$0xff] }
 0x454   :  { %v7287_v26 = vmax.f32 %v7271_v57, %v7259_v24  ;;  %v7288_v19 = vmax.f32 %v7272_v10, %v7230_v31  ;;  %v7289_v30 = vmax.f32 %v7273_v62, %v7260_v40  ;;  %v7290_v5 = vmax.f32 %v7274_v8, %v7233_v56  ;;  %7296 = vst.msk [vmem:[#allocation4] sm:$0xff] %vm3256_vm11, %v7280_v15  ;;  %v9817_v31 = vld [vmem:[#allocation3 + $0x168] sm:$0xff]  ;;  %v9818_v56 = vld [vmem:[#allocation3 + $0x170] sm:$0xff]  ;;  %v9823_v63 = vld [vmem:[#allocation3 + $0x198] sm:$0xff] }
 0x455   :  { %v7291_v41 = vmax.f32 %v7275_v34, %v7261_v32  ;;  %7297 = vst.msk [vmem:[#allocation4 + $0x8] sm:$0xff] %vm3256_vm11, %v7281_v25  ;;  %7298 = vst.msk [vmem:[#allocation4 + $0x10] sm:$0xff] %vm3256_vm11, %v7282_v3  ;;  %v7292_v58 = vmax.f32 %v7276_v11, %v7236_v52  ;;  %v7293_v46 = vmax.f32 %v7277_v13, %v7262_v42  ;;  %v9810_v32 = vld [vmem:[#allocation3 + $0x130] sm:$0xff]  ;;  %v9820_v52 = vld [vmem:[#allocation3 + $0x180] sm:$0xff] }
 0x456   :  { %7299 = vst.msk [vmem:[#allocation4 + $0x18] sm:$0xff] %vm3256_vm11, %v7283_v59  ;;  %v7294_v50 = vmax.f32 %v7278_v39, %v7239_v27  ;;  %v7295_v6 = vmax.f32 %v7279_v37, %v7263_v22  ;;  %7300 = vst.msk [vmem:[#allocation4 + $0x20] sm:$0xff] %vm3256_vm11, %v7284_v47  ;;  %v14449_v0 = vmul.f32 %v9810_v32, %v14099_v38  ;;  %v9811_v22 = vld [vmem:[#allocation3 + $0x138] sm:$0xff]  ;;  %v9821_v24 = vld [vmem:[#allocation3 + $0x188] sm:$0xff] }
 0x457   :  { %7301 = vst.msk [vmem:[#allocation4 + $0x28] sm:$0xff] %vm3256_vm11, %v7285_v12  ;;  %7302 = vst.msk [vmem:[#allocation4 + $0x30] sm:$0xff] %vm3256_vm11, %v7286_v20  ;;  %v14452_v1 = vmul.f32 %v9811_v22, %v14099_v38  ;;  %v14455_v35 = vmul.f32 %v9812_v7, %v14099_v38  ;;  %v14458_v43 = vmul.f32 %v9813_v2, %v14099_v38  ;;  %v9822_v27 = vld [vmem:[#allocation3 + $0x190] sm:$0xff]  ;;  %v7397_v36 = vld [vmem:[#allocation3 + $0x1e8] sm:$0xff] }
 0x458   :  { %7303 = vst.msk [vmem:[#allocation4 + $0x38] sm:$0xff] %vm3256_vm11, %v7287_v26  ;;  %7304 = vst.msk [vmem:[#allocation4 + $0x40] sm:$0xff] %vm3256_vm11, %v7288_v19  ;;  %v14465_v17 = vmul.f32 %v9814_v16, %v14099_v38  ;;  %v14468_v4 = vmul.f32 %v9815_v23, %v14099_v38  ;;  %v14471_v14 = vmul.f32 %v9816_v61, %v14099_v38  ;;  %v9826_v57 = vld [vmem:[#allocation3 + $0x1b0] sm:$0xff]  ;;  %v9827_v62 = vld [vmem:[#allocation3 + $0x1b8] sm:$0xff] }
 0x459   :  { %7305 = vst.msk [vmem:[#allocation4 + $0x48] sm:$0xff] %vm3256_vm11, %v7289_v30  ;;  %7306 = vst.msk [vmem:[#allocation4 + $0x50] sm:$0xff] %vm3256_vm11, %v7290_v5  ;;  %v14474_v29 = vmul.f32 %v9817_v31, %v14099_v38  ;;  %v14477_v48 = vmul.f32 %v9818_v56, %v14099_v38  ;;  %v14480_v44 = vmul.f32 %v9819_v28, %v14099_v38  ;;  %v9828_v34 = vld [vmem:[#allocation3 + $0x1c0] sm:$0xff]  ;;  %v9829_v13 = vld [vmem:[#allocation3 + $0x1c8] sm:$0xff] }
 0x45a   :  { %7307 = vst.msk [vmem:[#allocation4 + $0x58] sm:$0xff] %vm3256_vm11, %v7291_v41  ;;  %7308 = vst.msk [vmem:[#allocation4 + $0x60] sm:$0xff] %vm3256_vm11, %v7292_v58  ;;  %v14483_v51 = vmul.f32 %v9820_v52, %v14099_v38  ;;  %v14486_v40 = vmul.f32 %v9821_v24, %v14099_v38  ;;  %v14489_v42 = vmul.f32 %v9822_v27, %v14099_v38  ;;  %v9830_v25 = vld [vmem:[#allocation3 + $0x1d0] sm:$0xff]  ;;  %v9831_v59 = vld [vmem:[#allocation3 + $0x1d8] sm:$0xff] }
 0x45b   :  { %7309 = vst.msk [vmem:[#allocation4 + $0x68] sm:$0xff] %vm3256_vm11, %v7293_v46  ;;  %7310 = vst.msk [vmem:[#allocation4 + $0x70] sm:$0xff] %vm3256_vm11, %v7294_v50  ;;  %v14492_v18 = vmul.f32 %v9823_v63, %v14099_v38  ;;  %v14495_v54 = vmul.f32 %v9824_v55, %v14099_v38  ;;  %v14498_v21 = vmul.f32 %v9825_v33, %v14099_v38  ;;  %v9832_v12 = vld [vmem:[#allocation3 + $0x1e0] sm:$0xff]  ;;  %v9833_v58 = vld [vmem:[#allocation3 + $0x1f0] sm:$0xff] }
 0x45c   :  { %7311 = vst.msk [vmem:[#allocation4 + $0x78] sm:$0xff] %vm3256_vm11, %v7295_v6  ;;  %v14501_v10 = vmul.f32 %v9826_v57, %v14099_v38  ;;  %v14504_v8 = vmul.f32 %v9827_v62, %v14099_v38  ;;  %v14507_v11 = vmul.f32 %v9828_v34, %v14099_v38  ;;  %v7425_v39 = vmul.f32 %v9829_v13, %v14099_v38  ;;  %v7312_v37 = vld [vmem:[#allocation4] ss:$2 sm:$0xff]  ;;  %v9834_v50 = vld [vmem:[#allocation3 + $0x1f8] sm:$0xff]  ;;  %v15138_v24 = vld [vmem:[#allocation47_spill] sm:$0xff] }
 0x45d   :  { %v7314_v15 = vld [vmem:[#allocation4 + $0x10] ss:$2 sm:$0xff]  ;;  %v7426_v3 = vmul.f32 %v9830_v25, %v14099_v38  ;;  %v7427_v47 = vmul.f32 %v9831_v59, %v14099_v38  ;;  %v7428_v20 = vmul.f32 %v9832_v12, %v14099_v38  ;;  %v7429_v26 = vmul.f32 %v7397_v36, %v14099_v38  ;;  %v15139_v27 = vld [vmem:[#allocation42_spill] sm:$0xff] }
 0x45e   :  { %v7316_v19 = vld [vmem:[#allocation4 + $0x20] ss:$2 sm:$0xff]  ;;  %v8231_v5 = vpack.c.bf16 %v7312_v37, %v7312_v37  ;;  %v8232_v41 = vpack.c.bf16 %v7314_v15, %v7314_v15  ;;  %v7430_v46 = vmul.f32 %v9833_v58, %v14099_v38  ;;  %v7431_v6 = vmul.f32 %v9834_v50, %v14099_v38 }
 0x45f   :  { %v7318_v30 = vld [vmem:[#allocation4 + $0x30] ss:$2 sm:$0xff]  ;;  %v8233_v7 = vpack.c.bf16 %v7316_v19, %v7316_v19  ;;  %v14518_v16 = vadd.f32 %v14171_v60, %v14168_v45  ;;  %v14522_v23 = vadd.f32 %v14174_v49, %v14168_v45  ;;  %v14534_v38 = vadd.f32 %v14177_v9, %v14168_v45 }
 0x460   :  { %v7320_v32 = vld [vmem:[#allocation4 + $0x40] ss:$2 sm:$0xff]  ;;  %v8234_v2 = vpack.c.bf16 %v7318_v30, %v7318_v30  ;;  %7360 = vst.msk [vmem:[%s14862_s4] sm:$0xf] %vm7359_vm13, %v8231_v5  ;;  %7361 = vst.msk [vmem:[%s14862_s4 + $0x4] sm:$0xf] %vm7359_vm13, %v8232_v41  ;;  %v14538_v60 = vadd.f32 %v14180_v53, %v14168_v45  ;;  %v14550_v9 = vadd.f32 %v15138_v24, %v14168_v45 }
 0x461   :  { %v7322_v22 = vld [vmem:[#allocation4 + $0x50] ss:$2 sm:$0xff]  ;;  %v8235_v56 = vpack.c.bf16 %v7320_v32, %v7320_v32  ;;  %7362 = vst.msk [vmem:[%s14862_s4 + $0x8] sm:$0xf] %vm7359_vm13, %v8233_v7  ;;  %v14554_v53 = vadd.f32 %v15139_v27, %v14168_v45  ;;  %v14566_v63 = vadd.f32 %v14449_v0, %v14168_v45  ;;  %v14570_v55 = vadd.f32 %v14452_v1, %v14168_v45 }
 0x462   :  { %v7324_v61 = vld [vmem:[#allocation4 + $0x60] ss:$2 sm:$0xff]  ;;  %v8236_v28 = vpack.c.bf16 %v7322_v22, %v7322_v22  ;;  %7363 = vst.msk [vmem:[%s14862_s4 + $0xc] sm:$0xf] %vm7359_vm13, %v8234_v2  ;;  %v14574_v33 = vadd.f32 %v14455_v35, %v14168_v45  ;;  %v14578_v36 = vadd.f32 %v14458_v43, %v14168_v45  ;;  %v14590_v0 = vadd.f32 %v14465_v17, %v14168_v45 }
 0x463   :  { %v7326_v31 = vld [vmem:[#allocation4 + $0x70] ss:$2 sm:$0xff]  ;;  %v8237_v49 = vpack.c.bf16 %v7324_v61, %v7324_v61  ;;  %7364 = vst.msk [vmem:[%s14862_s4 + $0x10] sm:$0xf] %vm7359_vm13, %v8235_v56  ;;  %v14594_v1 = vadd.f32 %v14468_v4, %v14168_v45  ;;  %v7444_v35 = vadd.f32 %v14471_v14, %v14168_v45  ;;  %v7445_v43 = vadd.f32 %v14474_v29, %v14168_v45 }
 0x464   :  { %v8238_v52 = vpack.c.bf16 %v7326_v31, %v7326_v31  ;;  %7365 = vst.msk [vmem:[%s14862_s4 + $0x14] sm:$0xf] %vm7359_vm13, %v8236_v28  ;;  %v14602_v57 = vadd.f32 %v14477_v48, %v14168_v45  ;;  %v14606_v62 = vadd.f32 %v14480_v44, %v14168_v45  ;;  %v7448_v17 = vadd.f32 %v14483_v51, %v14168_v45 }
 0x465   :  { %7366 = vst.msk [vmem:[%s14862_s4 + $0x18] sm:$0xf] %vm7359_vm13, %v8237_v49  ;;  %v7449_v4 = vadd.f32 %v14486_v40, %v14168_v45  ;;  %v14614_v14 = vadd.f32 %v14489_v42, %v14168_v45  ;;  %v14618_v29 = vadd.f32 %v14492_v18, %v14168_v45  ;;  %v7452_v48 = vadd.f32 %v14495_v54, %v14168_v45 }
 0x466   :  { %7367 = vst.msk [vmem:[%s14862_s4 + $0x1c] sm:$0xf] %vm7359_vm13, %v8238_v52  ;;  %v7453_v44 = vadd.f32 %v14498_v21, %v14168_v45  ;;  %v14626_v51 = vadd.f32 %v14501_v10, %v14168_v45  ;;  %v14630_v40 = vadd.f32 %v14504_v8, %v14168_v45  ;;  %v7456_v42 = vadd.f32 %v14507_v11, %v14168_v45 }
 0x467   :  { %v7457_v18 = vadd.f32 %v7425_v39, %v14168_v45  ;;  %v14636_v34 = vadd.f32 %v7426_v3, %v14168_v45  ;;  %v14639_v54 = vadd.f32 %v7427_v47, %v14168_v45  ;;  %v7460_v21 = vadd.f32 %v7428_v20, %v14168_v45 }
 0x468   :  { %v7461_v10 = vadd.f32 %v7429_v26, %v14168_v45  ;;  %v7462_v13 = vadd.f32 %v7430_v46, %v14168_v45  ;;  %v7463_v8 = vadd.f32 %v7431_v6, %v14168_v45  ;;  %v7464_v37 = vmax.f32 %v14518_v16, 0.0 }
 0x469   :  { %v7465_v11 = vmax.f32 %v14522_v23, 0.0  ;;  %v7466_v39 = vmax.f32 %v14534_v38, 0.0  ;;  %v7467_v15 = vmax.f32 %v14538_v60, 0.0  ;;  %v7468_v25 = vmax.f32 %v14550_v9, 0.0 }
 0x46a   :  { %v7469_v3 = vmax.f32 %v14554_v53, 0.0  ;;  %v7470_v59 = vmax.f32 %v14566_v63, 0.0  ;;  %v7471_v47 = vmax.f32 %v14570_v55, 0.0  ;;  %v7472_v12 = vmax.f32 %v14574_v33, 0.0 }
 0x46b   :  { %v7473_v45 = vmax.f32 %v14578_v36, 0.0  ;;  %v7474_v20 = vmax.f32 %v14590_v0, 0.0  ;;  %v7475_v26 = vmax.f32 %v14594_v1, 0.0  ;;  %v7476_v19 = vmax.f32 %v7444_v35, 0.0 }
 0x46c   :  { %v7477_v30 = vmax.f32 %v7445_v43, 0.0  ;;  %v7478_v5 = vmax.f32 %v14602_v57, 0.0  ;;  %v7479_v41 = vmax.f32 %v14606_v62, 0.0  ;;  %v7480_v58 = vmax.f32 %v7448_v17, 0.0 }
 0x46d   :  { %v7481_v46 = vmax.f32 %v7449_v4, 0.0  ;;  %v7482_v50 = vmax.f32 %v14614_v14, 0.0  ;;  %v7483_v6 = vmax.f32 %v14618_v29, 0.0  ;;  %v7484_v32 = vmax.f32 %v7452_v48, 0.0 }
 0x46e   :  { %v7485_v22 = vmax.f32 %v7453_v44, 0.0  ;;  %v7486_v7 = vmax.f32 %v14626_v51, 0.0  ;;  %v7487_v2 = vmax.f32 %v14630_v40, 0.0  ;;  %v7488_v16 = vmax.f32 %v7456_v42, 0.0 }
 0x46f   :  { %v7489_v23 = vmax.f32 %v7457_v18, 0.0  ;;  %v7490_v61 = vmax.f32 %v14636_v34, 0.0  ;;  %v7491_v31 = vmax.f32 %v14639_v54, 0.0  ;;  %v7492_v56 = vmax.f32 %v7460_v21, 0.0 }
 0x470   :  { %v7493_v28 = vmax.f32 %v7461_v10, 0.0  ;;  %v7494_v38 = vmax.f32 %v7462_v13, 0.0  ;;  %v7495_v60 = vmax.f32 %v7463_v8, 0.0  ;;  %v7496_v49 = vmax.f32 %v7464_v37, %v7466_v39 }
 0x471   :  { %v7497_v52 = vmax.f32 %v7465_v11, %v7467_v15  ;;  %v7498_v24 = vmax.f32 %v7468_v25, %v7470_v59  ;;  %v7499_v9 = vmax.f32 %v7469_v3, %v7471_v47  ;;  %v7500_v27 = vmax.f32 %v7472_v12, %v7474_v20 }
 0x472   :  { %v7501_v53 = vmax.f32 %v7473_v45, %v7475_v26  ;;  %v7502_v63 = vmax.f32 %v7476_v19, %v7478_v5  ;;  %v7503_v55 = vmax.f32 %v7477_v30, %v7479_v41  ;;  %v7504_v33 = vmax.f32 %v7480_v58, %v7482_v50 }
 0x473   :  { %v7505_v36 = vmax.f32 %v7481_v46, %v7483_v6  ;;  %v7506_v0 = vmax.f32 %v7484_v32, %v7486_v7  ;;  %v7507_v1 = vmax.f32 %v7485_v22, %v7487_v2  ;;  %v7508_v35 = vmax.f32 %v7488_v16, %v7490_v61 }
 0x474   :  { %v7509_v43 = vmax.f32 %v7489_v23, %v7491_v31  ;;  %v7510_v57 = vmax.f32 %v7492_v56, %v7494_v38  ;;  %v7511_v62 = vmax.f32 %v7493_v28, %v7495_v60  ;;  %v14665_v17 = vmax.f32 %v7496_v49, 0.0 }
 0x475   :  { %v14667_v4 = vmax.f32 %v7497_v52, 0.0  ;;  %v14669_v14 = vmax.f32 %v7498_v24, %v7466_v39  ;;  %v14671_v29 = vmax.f32 %v7499_v9, %v7467_v15  ;;  %v14673_v48 = vmax.f32 %v7500_v27, %v7470_v59 }
 0x476   :  { %v14675_v44 = vmax.f32 %v7501_v53, %v7471_v47  ;;  %v14677_v51 = vmax.f32 %v7502_v63, %v7474_v20  ;;  %v14679_v40 = vmax.f32 %v7503_v55, %v7475_v26  ;;  %v14681_v42 = vmax.f32 %v7504_v33, %v7478_v5 }
 0x477   :  { %v14683_v18 = vmax.f32 %v7505_v36, %v7479_v41  ;;  %v14685_v34 = vmax.f32 %v7506_v0, %v7482_v50  ;;  %v14687_v54 = vmax.f32 %v7507_v1, %v7483_v6  ;;  %v14689_v21 = vmax.f32 %v7508_v35, %v7486_v7 }
 0x478   :  { %v14691_v10 = vmax.f32 %v7509_v43, %v7487_v2  ;;  %v14693_v13 = vmax.f32 %v7510_v57, %v7490_v61  ;;  %v14695_v8 = vmax.f32 %v7511_v62, %v7491_v31  ;;  %v7544_v37 = vrot.slane %v14665_v17, 7 }
 0x479   :  { %v7545_v11 = vrot.slane %v14667_v4, 7  ;;  %v7547_v39 = vrot.slane %v14669_v14, 7  ;;  %v7548_v15 = vrot.slane %v14671_v29, 7  ;;  %v7550_v25 = vrot.slane %v14673_v48, 7 }
 0x47a   :  { %v7551_v3 = vrot.slane %v14675_v44, 7  ;;  %v7553_v47 = vrot.slane %v14677_v51, 7  ;;  %v7554_v12 = vrot.slane %v14679_v40, 7  ;;  %v7556_v45 = vrot.slane %v14681_v42, 7 }
 0x47b   :  { %v14704_v59 = vsel %vm7167_vm12, %v7544_v37, %v7545_v11  ;;  %v14710_v20 = vsel %vm7167_vm12, %v7547_v39, %v7548_v15  ;;  %v7557_v19 = vrot.slane %v14683_v18, 7  ;;  %v7559_v30 = vrot.slane %v14685_v34, 7 }
 0x47c   :  { %v14713_v26 = vsel %vm7167_vm12, %v7550_v25, %v7551_v3  ;;  %v14718_v5 = vsel %vm7167_vm12, %v7553_v47, %v7554_v12  ;;  %v7560_v41 = vrot.slane %v14687_v54, 7  ;;  %v7562_v58 = vrot.slane %v14689_v21, 7 }
 0x47d   :  { %v7563_v46 = vrot.slane %v14691_v10, 7  ;;  %v14724_v50 = vsel %vm7167_vm12, %v7556_v45, %v7557_v19  ;;  %v7565_v6 = vrot.slane %v14693_v13, 7  ;;  %v7566_v32 = vrot.slane %v14695_v8, 7 }
 0x47e   :  { %v7584_v22 = vsel %vm7167_vm12, 0.0, %v7544_v37  ;;  %v14730_v7 = vsel %vm7167_vm12, %v7559_v30, %v7560_v41  ;;  %v7585_v16 = vsel %vm7167_vm12, 0.0, %v7547_v39  ;;  %v7586_v23 = vsel %vm7167_vm12, 0.0, %v7550_v25 }
 0x47f   :  { %v14733_v2 = vsel %vm7167_vm12, %v7562_v58, %v7563_v46  ;;  %v14738_v61 = vsel %vm7167_vm12, %v7565_v6, %v7566_v32  ;;  %v7587_v31 = vsel %vm7167_vm12, 0.0, %v7553_v47  ;;  %v7588_v56 = vsel %vm7167_vm12, 0.0, %v7556_v45 }
 0x480   :  { %v14743_v28 = vsel %vm7167_vm12, 0.0, %v7559_v30  ;;  %v14746_v38 = vsel %vm7167_vm12, 0.0, %v7562_v58  ;;  %v14749_v60 = vsel %vm7167_vm12, 0.0, %v7565_v6  ;;  %v7592_v49 = vrot.slane %v14665_v17, 1 }
 0x481   :  { %v7593_v52 = vrot.slane %v14667_v4, 1  ;;  %v7595_v24 = vrot.slane %v14669_v14, 1  ;;  %v7596_v9 = vrot.slane %v14671_v29, 1  ;;  %v7598_v27 = vrot.slane %v14673_v48, 1 }
 0x482   :  { %v7599_v53 = vrot.slane %v14675_v44, 1  ;;  %v7601_v55 = vrot.slane %v14677_v51, 1  ;;  %v7602_v33 = vrot.slane %v14679_v40, 1  ;;  %v7604_v36 = vrot.slane %v14681_v42, 1 }
 0x483   :  { %v7594_v63 = vsel %vm319_vm1, %v7592_v49, %v7593_v52  ;;  %v7597_v0 = vsel %vm319_vm1, %v7595_v24, %v7596_v9  ;;  %v7605_v35 = vrot.slane %v14683_v18, 1  ;;  %v7607_v43 = vrot.slane %v14685_v34, 1 }
 0x484   :  { %v7600_v1 = vsel %vm319_vm1, %v7598_v27, %v7599_v53  ;;  %v7603_v57 = vsel %vm319_vm1, %v7601_v55, %v7602_v33  ;;  %v7608_v62 = vrot.slane %v14687_v54, 1  ;;  %v7610_v37 = vrot.slane %v14689_v21, 1 }
 0x485   :  { %v7611_v11 = vrot.slane %v14691_v10, 1  ;;  %v7606_v39 = vsel %vm319_vm1, %v7604_v36, %v7605_v35  ;;  %v7613_v15 = vrot.slane %v14693_v13, 1  ;;  %v7614_v25 = vrot.slane %v14695_v8, 1 }
 0x486   :  { %v7632_v3 = vsel %vm319_vm1, %v7593_v52, 0.0  ;;  %v7609_v47 = vsel %vm319_vm1, %v7607_v43, %v7608_v62  ;;  %v7633_v45 = vsel %vm319_vm1, %v7596_v9, 0.0  ;;  %v7634_v19 = vsel %vm319_vm1, %v7599_v53, 0.0 }
 0x487   :  { %v7612_v12 = vsel %vm319_vm1, %v7610_v37, %v7611_v11  ;;  %v7615_v30 = vsel %vm319_vm1, %v7613_v15, %v7614_v25  ;;  %v7635_v41 = vsel %vm319_vm1, %v7602_v33, 0.0  ;;  %v7636_v58 = vsel %vm319_vm1, %v7605_v35, 0.0 }
 0x488   :  { %v7637_v46 = vsel %vm319_vm1, %v7608_v62, 0.0  ;;  %v7638_v6 = vsel %vm319_vm1, %v7611_v11, 0.0  ;;  %v7639_v32 = vsel %vm319_vm1, %v7614_v25, 0.0  ;;  %v7640_v49 = vmax.f32 %v14665_v17, %v7584_v22 }
 0x489   :  { %v7641_v52 = vmax.f32 %v14667_v4, %v14704_v59  ;;  %v7642_v24 = vmax.f32 %v14669_v14, %v7585_v16  ;;  %v7643_v9 = vmax.f32 %v14671_v29, %v14710_v20  ;;  %v7644_v27 = vmax.f32 %v14673_v48, %v7586_v23 }
 0x48a   :  { %v7645_v53 = vmax.f32 %v14675_v44, %v14713_v26  ;;  %v7646_v55 = vmax.f32 %v14677_v51, %v7587_v31  ;;  %v7647_v33 = vmax.f32 %v14679_v40, %v14718_v5  ;;  %v7648_v17 = vmax.f32 %v14681_v42, %v7588_v56 }
 0x48b   :  { %v7649_v4 = vmax.f32 %v14683_v18, %v14724_v50  ;;  %v7650_v14 = vmax.f32 %v14685_v34, %v14743_v28  ;;  %v7651_v29 = vmax.f32 %v14687_v54, %v14730_v7  ;;  %v7652_v48 = vmax.f32 %v14689_v21, %v14746_v38 }
 0x48c   :  { %v7653_v44 = vmax.f32 %v14691_v10, %v14733_v2  ;;  %v7654_v51 = vmax.f32 %v14693_v13, %v14749_v60  ;;  %v7655_v40 = vmax.f32 %v14695_v8, %v14738_v61  ;;  %v7656_v42 = vmax.f32 %v7640_v49, %v7594_v63 }
 0x48d   :  { %v7657_v18 = vmax.f32 %v7641_v52, %v7632_v3  ;;  %v7658_v59 = vmax.f32 %v7642_v24, %v7597_v0  ;;  %v7659_v20 = vmax.f32 %v7643_v9, %v7633_v45  ;;  %v7660_v34 = vmax.f32 %v7644_v27, %v7600_v1 }
 0x48e   :  { %v7661_v26 = vmax.f32 %v7645_v53, %v7634_v19  ;;  %v7662_v5 = vmax.f32 %v7646_v55, %v7603_v57  ;;  %v7663_v54 = vmax.f32 %v7647_v33, %v7635_v41  ;;  %v7664_v50 = vmax.f32 %v7648_v17, %v7606_v39  ;;  %7672 = vst.msk [vmem:[#allocation4] sm:$0xff] %vm3256_vm11, %v7656_v42 }
 0x48f   :  { %v7665_v22 = vmax.f32 %v7649_v4, %v7636_v58  ;;  %7673 = vst.msk [vmem:[#allocation4 + $0x8] sm:$0xff] %vm3256_vm11, %v7657_v18  ;;  %v7666_v21 = vmax.f32 %v7650_v14, %v7609_v47  ;;  %v7667_v10 = vmax.f32 %v7651_v29, %v7637_v46  ;;  %v7668_v13 = vmax.f32 %v7652_v48, %v7612_v12 }
 0x490   :  { %v7669_v7 = vmax.f32 %v7653_v44, %v7638_v6  ;;  %7674 = vst.msk [vmem:[#allocation4 + $0x10] sm:$0xff] %vm3256_vm11, %v7658_v59  ;;  %7675 = vst.msk [vmem:[#allocation4 + $0x18] sm:$0xff] %vm3256_vm11, %v7659_v20  ;;  %v7670_v8 = vmax.f32 %v7654_v51, %v7615_v30  ;;  %v7671_v2 = vmax.f32 %v7655_v40, %v7639_v32 }
 0x491   :  { %7676 = vst.msk [vmem:[#allocation4 + $0x20] sm:$0xff] %vm3256_vm11, %v7660_v34  ;;  %7677 = vst.msk [vmem:[#allocation4 + $0x28] sm:$0xff] %vm3256_vm11, %v7661_v26 }
 0x492   :  { %7678 = vst.msk [vmem:[#allocation4 + $0x30] sm:$0xff] %vm3256_vm11, %v7662_v5  ;;  %7679 = vst.msk [vmem:[#allocation4 + $0x38] sm:$0xff] %vm3256_vm11, %v7663_v54 }
 0x493   :  { %7680 = vst.msk [vmem:[#allocation4 + $0x40] sm:$0xff] %vm3256_vm11, %v7664_v50  ;;  %7681 = vst.msk [vmem:[#allocation4 + $0x48] sm:$0xff] %vm3256_vm11, %v7665_v22 }
 0x494   :  { %7682 = vst.msk [vmem:[#allocation4 + $0x50] sm:$0xff] %vm3256_vm11, %v7666_v21  ;;  %7683 = vst.msk [vmem:[#allocation4 + $0x58] sm:$0xff] %vm3256_vm11, %v7667_v10 }
 0x495   :  { %7684 = vst.msk [vmem:[#allocation4 + $0x60] sm:$0xff] %vm3256_vm11, %v7668_v13  ;;  %7685 = vst.msk [vmem:[#allocation4 + $0x68] sm:$0xff] %vm3256_vm11, %v7669_v7 }
 0x496   :  { %7686 = vst.msk [vmem:[#allocation4 + $0x70] sm:$0xff] %vm3256_vm11, %v7670_v8  ;;  %7687 = vst.msk [vmem:[#allocation4 + $0x78] sm:$0xff] %vm3256_vm11, %v7671_v2  ;;  %v7688_v16 = vld [vmem:[#allocation4] ss:$2 sm:$0xff] }
 0x497   :  { %v7689_v23 = vld [vmem:[#allocation4 + $0x10] ss:$2 sm:$0xff]  ;;  %v8239_v31 = vpack.c.bf16 %v7688_v16, %v7688_v16 }
 0x498   :  { %v7690_v61 = vld [vmem:[#allocation4 + $0x20] ss:$2 sm:$0xff]  ;;  %v8240_v38 = vpack.c.bf16 %v7689_v23, %v7689_v23 }
 0x499   :  { %v7691_v56 = vld [vmem:[#allocation4 + $0x30] ss:$2 sm:$0xff]  ;;  %v8241_v60 = vpack.c.bf16 %v7690_v61, %v7690_v61  ;;  %8223 = vst.msk [vmem:[%s14862_s4 + $0x20] sm:$0xf] %vm7359_vm13, %v8239_v31 }
 0x49a   :  { %v7692_v28 = vld [vmem:[#allocation4 + $0x40] ss:$2 sm:$0xff]  ;;  %v8242_v0 = vpack.c.bf16 %v7691_v56, %v7691_v56  ;;  %8224 = vst.msk [vmem:[%s14862_s4 + $0x24] sm:$0xf] %vm7359_vm13, %v8240_v38 }
 0x49b   :  { %v7693_v63 = vld [vmem:[#allocation4 + $0x50] ss:$2 sm:$0xff]  ;;  %v8243_v1 = vpack.c.bf16 %v7692_v28, %v7692_v28  ;;  %8225 = vst.msk [vmem:[%s14862_s4 + $0x28] sm:$0xf] %vm7359_vm13, %v8241_v60 }
 0x49c   :  { %v7694_v36 = vld [vmem:[#allocation4 + $0x60] ss:$2 sm:$0xff]  ;;  %v8244_v43 = vpack.c.bf16 %v7693_v63, %v7693_v63  ;;  %8226 = vst.msk [vmem:[%s14862_s4 + $0x2c] sm:$0xf] %vm7359_vm13, %v8242_v0 }
 0x49d   :  { %v7695_v35 = vld [vmem:[#allocation4 + $0x70] ss:$2 sm:$0xff]  ;;  %v8245_v57 = vpack.c.bf16 %v7694_v36, %v7694_v36  ;;  %8227 = vst.msk [vmem:[%s14862_s4 + $0x30] sm:$0xf] %vm7359_vm13, %v8243_v1 }
 0x49e   :  { %v8246_v62 = vpack.c.bf16 %v7695_v35, %v7695_v35  ;;  %8228 = vst.msk [vmem:[%s14862_s4 + $0x34] sm:$0xf] %vm7359_vm13, %v8244_v43 }
 0x49f   :  { %8229 = vst.msk [vmem:[%s14862_s4 + $0x38] sm:$0xf] %vm7359_vm13, %v8245_v57 }
 0x4a0   :  { %8230 = vst.msk [vmem:[%s14862_s4 + $0x3c] sm:$0xf] %vm7359_vm13, %v8246_v62 }

</bundles_post_ra>
